<compile_context>
chip_gen: v5e
topology: v5e:2x2
jax: 0.10.0
libtpu: 0.0.40
codegen_flags: <defaults>
</compile_context>

<pallas_src>
import functools

import jax
import jax.numpy as jnp
from jax import lax
from jax.experimental import pallas as pl
from jax.experimental.pallas import tpu as pltpu

LANE = 128


def _round_up(x, m):
    return (x + m - 1) // m * m


# ----------------------------------------------------------------------------
# Fused BasicBlock kernel: one grid step == one image of the batch.
# Layout: row-flattened halo-padded NHWC, i.e. refs are (rows, Cp) with
# rows = (padded_y * (w+2) + padded_x) on sublanes and channels on lanes.
# ----------------------------------------------------------------------------
def _basic_block_kernel(xflat_ref, w1_ref, t1_ref, w2_ref, t2_ref, out_ref,
                        hflat_ref, acc_ref, *, h, w, wp, mf):
    slab = h * wp                       # rows of the flat conv-output slab
    cp = acc_ref.shape[-1]
    rows_h = hflat_ref.shape[0]

    # Zero only the halo strips of the intermediate scratch (top halo lives in
    # [0, mf), bottom halo in [mf+slab, rows_h)).  The interior -- including
    # the halo-coincident seam columns -- is fully rewritten below each step,
    # so this is correct even when the batch axis is sharded across cores.
    hflat_ref[pl.ds(0, mf), :] = jnp.zeros((mf, cp), hflat_ref.dtype)
    tail = rows_h - (mf + slab)
    hflat_ref[pl.ds(mf + slab, tail), :] = jnp.zeros((tail, cp),
                                                     hflat_ref.dtype)

    def conv3x3(src_ref, w_ref, base):
        # 3x3 "same" conv over the row-flattened padded image: each tap is a
        # contiguous (slab, cp) row window -> one (slab,cp)@(cp,cp) MXU dot.
        # f32 accumulation lands in the VMEM scratch (bounded vreg pressure).
        for dy in range(3):
            part = None
            for dx in range(3):
                tap = src_ref[pl.ds(base + dy * wp + dx, slab), :]   # bf16
                d = jnp.dot(tap, w_ref[dy * 3 + dx],
                            preferred_element_type=jnp.float32)
                part = d if part is None else part + d
            if dy == 0:
                acc_ref[...] = part
            else:
                acc_ref[...] += part

    # ---- conv1 (BN1 scale folded into w1) -> +shift -> ReLU ----------------
    conv3x3(xflat_ref, w1_ref, 0)
    hact = jnp.maximum(acc_ref[...] + t1_ref[...], 0.0)

    # Seam columns (x >= w) of the slab land exactly on halo positions of
    # hflat when stored at offset mf; mask them to zero so conv2 reads a
    # clean zero halo every step.
    col = lax.broadcasted_iota(jnp.int32, (slab, 1), 0) % wp
    hact = jnp.where(col < w, hact, 0.0)
    hflat_ref[pl.ds(mf, slab), :] = hact.astype(hflat_ref.dtype)

    # ---- conv2 (BN2 scale folded into w2) -> +shift -> +identity -> ReLU ---
    conv3x3(hflat_ref, w2_ref, mf - (wp + 1))
    identity = xflat_ref[pl.ds(wp + 1, slab), :]         # == conv1 center tap
    y = acc_ref[...] + t2_ref[...] + identity.astype(jnp.float32)
    out_ref[...] = jnp.maximum(y, 0.0).astype(out_ref.dtype)


# ----------------------------------------------------------------------------
# Host-side wrapper
# ----------------------------------------------------------------------------
def basic_block_apply(x_nhwc, params):
    """x_nhwc: (N, H, W, C).  Returns (N, H, W, C) bf16 (stride-1 block)."""
    n, h, w, c = x_nhwc.shape
    cp = params["w1"].shape[-1]
    assert params["w1"].shape == (9, cp, cp) and cp % LANE == 0
    wp = w + 2
    slab = h * wp
    rows_in = _round_up((h + 2) * wp + 2, 16)   # +2 tap overrun, sublane pad
    mf = _round_up(wp + 1, 16)                  # aligned interior offset
    rows_h = _round_up(mf + slab + wp + 1, 16)

    # Single +1-pixel halo pad, channel pad to lane width, row-flatten (H, W).
    xpad = jnp.pad(x_nhwc.astype(jnp.bfloat16),
                   ((0, 0), (1, 1), (1, 1), (0, cp - c)))
    xflat = xpad.reshape(n, (h + 2) * wp, cp)
    xflat = jnp.pad(xflat, ((0, 0), (0, rows_in - (h + 2) * wp), (0, 0)))

    # Rough VMEM budget (double-buffered blocks + scratch) with headroom.
    est = (2 * rows_in * cp * 2 + 2 * slab * cp * 2
           + 2 * 2 * 9 * cp * cp * 2 + 2 * 2 * cp * 4
           + rows_h * cp * 2 + slab * cp * 4)
    vmem_limit = int(min(max(2 * est, 16 * 2**20), 64 * 2**20))

    kernel = functools.partial(_basic_block_kernel, h=h, w=w, wp=wp, mf=mf)
    out_flat = pl.pallas_call(
        kernel,
        out_shape=jax.ShapeDtypeStruct((n, slab, cp), jnp.bfloat16),
        grid=(n,),
        in_specs=[
            pl.BlockSpec((None, rows_in, cp), lambda b: (b, 0, 0)),
            # Constant index maps: weights/shifts are DMA'd into VMEM once per
            # core and reused across all grid steps.
            pl.BlockSpec((9, cp, cp), lambda b: (0, 0, 0)),
            pl.BlockSpec((1, cp), lambda b: (0, 0)),
            pl.BlockSpec((9, cp, cp), lambda b: (0, 0, 0)),
            pl.BlockSpec((1, cp), lambda b: (0, 0)),
        ],
        out_specs=pl.BlockSpec((None, slab, cp), lambda b: (b, 0, 0)),
        scratch_shapes=[pltpu.VMEM((rows_h, cp), jnp.bfloat16),   # intermediate
                        pltpu.VMEM((slab, cp), jnp.float32)],     # f32 acc
        compiler_params=pltpu.CompilerParams(
            dimension_semantics=("parallel",),
            vmem_limit_bytes=vmem_limit),
    )(xflat, params["w1"], params["t1"], params["w2"], params["t2"])

    # Flat slab -> (h, w+2); drop the 2 seam columns and the channel padding.
    return out_flat.reshape(n, h, wp, cp)[:, :, :w, :c]


def basic_block_forward(x_nchw, params):
    """NCHW in / NCHW out, matching the PyTorch module interface.
    (For stacked blocks, chain basic_block_apply on NHWC bf16 directly and
    convert layout/dtype only at the network boundary.)"""
    x_nhwc = jnp.transpose(x_nchw, (0, 2, 3, 1))
    y_nhwc = basic_block_apply(x_nhwc, params)
    return jnp.transpose(y_nhwc, (0, 3, 1, 2)).astype(jnp.float32)


# ----------------------------------------------------------------------------
# Parameters: PyTorch-default-like init, eval-mode BN folding, lane packing
# ----------------------------------------------------------------------------
def init_basic_block_params(key, in_channels, out_channels):
    k1, k2 = jax.random.split(key)

    def conv_init(k, kh, kw, cin, cout):
        kw_key, kb_key = jax.random.split(k)
        fan_in = kh * kw * cin
        bound = 1.0 / float(fan_in) ** 0.5
        wgt = jax.random.uniform(kw_key, (kh, kw, cin, cout), jnp.float32,
                                 -bound, bound)
        b = jax.random.uniform(kb_key, (cout,), jnp.float32, -bound, bound)
        return wgt, b

    def bn_init(c):
        return dict(gamma=jnp.ones((c,), jnp.float32),
                    beta=jnp.zeros((c,), jnp.float32),
                    mean=jnp.zeros((c,), jnp.float32),
                    var=jnp.ones((c,), jnp.float32))

    w1, b1 = conv_init(k1, 3, 3, in_channels, out_channels)
    w2, b2 = conv_init(k2, 3, 3, out_channels, out_channels)
    return dict(w1=w1, b1=b1, bn1=bn_init(out_channels),
                w2=w2, b2=b2, bn2=bn_init(out_channels))


def fold_conv_bn(w, b, bn, eps=1e-5):
    # Eval-mode BN folded into the conv: w' = w*scale (per out-channel),
    # shift = (b - mean)*scale + beta.  Epilogue is then just "+ shift".
    scale = bn["gamma"] / jnp.sqrt(bn["var"] + eps)
    return w * scale, (b - bn["mean"]) * scale + bn["beta"]


def pack_params(w1f, t1, w2f, t2):
    cout = w1f.shape[-1]
    cp = _round_up(max(cout, LANE), LANE)

    def pack_w(wf):
        kh, kw, cin, co = wf.shape
        wpad = jnp.pad(wf, ((0, 0), (0, 0), (0, cp - cin), (0, cp - co)))
        return wpad.reshape(kh * kw, cp, cp).astype(jnp.bfloat16)

    def pack_t(t):
        return jnp.pad(t, (0, cp - t.shape[0])).reshape(1, cp).astype(jnp.float32)

    return dict(w1=pack_w(w1f), t1=pack_t(t1), w2=pack_w(w2f), t2=pack_t(t2))


# ----------------------------------------------------------------------------
# Pure-JAX reference (mirrors the kernel's bf16-in / f32-accumulate numerics)
# ----------------------------------------------------------------------------
def reference_basic_block_nchw(x_nchw, w1f, t1, w2f, t2):
    x = jnp.transpose(x_nchw, (0, 2, 3, 1))
    xb = x.astype(jnp.bfloat16).astype(jnp.float32)
    dn = ("NHWC", "HWIO", "NHWC")

    def conv(v, wgt):
        return lax.conv_general_dilated(
            v, wgt.astype(jnp.bfloat16).astype(jnp.float32),
            window_strides=(1, 1), padding=((1, 1), (1, 1)),
            dimension_numbers=dn, precision=lax.Precision.HIGHEST)

    hmid = jnp.maximum(conv(xb, w1f) + t1, 0.0)
    hmid = hmid.astype(jnp.bfloat16).astype(jnp.float32)
    y = jnp.maximum(conv(hmid, w2f) + t2 + xb, 0.0)
    return jnp.transpose(y, (0, 3, 1, 2))


if __name__ == "__main__":
    batch, channels, spatial = 2, 4, 16

    key = jax.random.PRNGKey(0)
    kx, kp = jax.random.split(key)
    x_nchw = jax.random.normal(kx, (batch, channels, spatial, spatial),
                               jnp.float32)

    raw = init_basic_block_params(kp, channels, channels)
    w1f, t1 = fold_conv_bn(raw["w1"], raw["b1"], raw["bn1"])
    w2f, t2 = fold_conv_bn(raw["w2"], raw["b2"], raw["bn2"])
    packed = pack_params(w1f, t1, w2f, t2)

    fwd = jax.jit(basic_block_forward)
    out = jax.block_until_ready(fwd(x_nchw, packed))

    assert out.shape == (batch, channels, spatial, spatial), out.shape
    assert bool(jnp.all(jnp.isfinite(out)))

    ref = reference_basic_block_nchw(x_nchw, w1f, t1, w2f, t2)
    max_err = float(jnp.max(jnp.abs(out - ref)))
    assert bool(jnp.allclose(out, ref, atol=2e-2, rtol=2e-2)), max_err

    print("KERNEL_OK")
</pallas_src>

<mosaic_0001>
module attributes {stable_mosaic.version = 11 : i64} {
  func.func @_basic_block_kernel(%arg0: i32, %arg1: memref<1x336x128xbf16, #tpu.memory_space<vmem>>, %arg2: memref<9x128x128xbf16, #tpu.memory_space<vmem>>, %arg3: memref<1x128xf32, #tpu.memory_space<vmem>>, %arg4: memref<9x128x128xbf16, #tpu.memory_space<vmem>>, %arg5: memref<1x128xf32, #tpu.memory_space<vmem>>, %arg6: memref<1x288x128xbf16, #tpu.memory_space<vmem>>, %arg7: memref<352x128xbf16, #tpu.memory_space<vmem>>, %arg8: memref<288x128xf32, #tpu.memory_space<vmem>>) attributes {dimension_semantics = [#tpu.dimension_semantics<parallel>], iteration_bounds = array<i64: 2>, scalar_prefetch = 0 : i64, scratch_operands = 2 : i64, tpu.core_type = #tpu.core_type<tc>, window_params = [{transform_indices = @transform_0, window_bounds = array<i64: 1, 336, 128>}, {pipeline_mode = #tpu.pipeline_mode<synchronous>, transform_indices = @transform_1, window_bounds = array<i64: 9, 128, 128>}, {pipeline_mode = #tpu.pipeline_mode<synchronous>, transform_indices = @transform_2, window_bounds = array<i64: 1, 128>}, {pipeline_mode = #tpu.pipeline_mode<synchronous>, transform_indices = @transform_3, window_bounds = array<i64: 9, 128, 128>}, {pipeline_mode = #tpu.pipeline_mode<synchronous>, transform_indices = @transform_4, window_bounds = array<i64: 1, 128>}, {transform_indices = @transform_5, window_bounds = array<i64: 1, 288, 128>}]} {
    %cst = arith.constant 0.000000e+00 : bf16
    %0 = vector.broadcast %cst : bf16 to vector<32x128xbf16>
    %c0 = arith.constant 0 : index
    %c0_0 = arith.constant 0 : index
    %1 = vector.load %arg7[%c0, %c0_0] : memref<352x128xbf16, #tpu.memory_space<vmem>>, vector<32x128xbf16>
    tpu.vector_store %arg7[%c0, %c0_0], %0 {strides = array<i32>} : memref<352x128xbf16, #tpu.memory_space<vmem>>, vector<32x128xbf16>,
    %cst_1 = arith.constant 0.000000e+00 : bf16
    %2 = vector.broadcast %cst_1 : bf16 to vector<32x128xbf16>
    %c320 = arith.constant 320 : index
    %c0_2 = arith.constant 0 : index
    %3 = vector.load %arg7[%c320, %c0_2] : memref<352x128xbf16, #tpu.memory_space<vmem>>, vector<32x128xbf16>
    tpu.vector_store %arg7[%c320, %c0_2], %2 {strides = array<i32>} : memref<352x128xbf16, #tpu.memory_space<vmem>>, vector<32x128xbf16>,
    %c0_3 = arith.constant 0 : index
    %c0_4 = arith.constant 0 : index
    %c0_5 = arith.constant 0 : index
    %4 = vector.load %arg1[%c0_3, %c0_4, %c0_5] : memref<1x336x128xbf16, #tpu.memory_space<vmem>>, vector<1x288x128xbf16>
    %5 = vector.shape_cast %4 : vector<1x288x128xbf16> to vector<288x128xbf16>
    %c0_6 = arith.constant 0 : index
    %c0_7 = arith.constant 0 : index
    %c0_8 = arith.constant 0 : index
    %6 = vector.load %arg2[%c0_6, %c0_7, %c0_8] : memref<9x128x128xbf16, #tpu.memory_space<vmem>>, vector<1x128x128xbf16>
    %7 = vector.shape_cast %6 : vector<1x128x128xbf16> to vector<128x128xbf16>
    %cst_9 = arith.constant dense<0.000000e+00> : vector<288x128xf32>
    %8 = tpu.matmul %5, %7, %cst_9 {dimension_numbers = #tpu.dot_dimension_numbers<[1], [0], [0], [1], [0, 0, 1, 1], [], []>} : vector<288x128xbf16>, vector<128x128xbf16>, vector<288x128xf32> -> vector<288x128xf32>
    %c0_10 = arith.constant 0 : index
    %c1 = arith.constant 1 : index
    %c0_11 = arith.constant 0 : index
    %9 = vector.load %arg1[%c0_10, %c1, %c0_11] : memref<1x336x128xbf16, #tpu.memory_space<vmem>>, vector<1x288x128xbf16>
    %10 = vector.shape_cast %9 : vector<1x288x128xbf16> to vector<288x128xbf16>
    %c1_12 = arith.constant 1 : index
    %c0_13 = arith.constant 0 : index
    %c0_14 = arith.constant 0 : index
    %11 = vector.load %arg2[%c1_12, %c0_13, %c0_14] : memref<9x128x128xbf16, #tpu.memory_space<vmem>>, vector<1x128x128xbf16>
    %12 = vector.shape_cast %11 : vector<1x128x128xbf16> to vector<128x128xbf16>
    %cst_15 = arith.constant dense<0.000000e+00> : vector<288x128xf32>
    %13 = tpu.matmul %10, %12, %cst_15 {dimension_numbers = #tpu.dot_dimension_numbers<[1], [0], [0], [1], [0, 0, 1, 1], [], []>} : vector<288x128xbf16>, vector<128x128xbf16>, vector<288x128xf32> -> vector<288x128xf32>
    %14 = arith.addf %8, %13 : vector<288x128xf32>
    %c0_16 = arith.constant 0 : index
    %c2 = arith.constant 2 : index
    %c0_17 = arith.constant 0 : index
    %15 = vector.load %arg1[%c0_16, %c2, %c0_17] : memref<1x336x128xbf16, #tpu.memory_space<vmem>>, vector<1x288x128xbf16>
    %16 = vector.shape_cast %15 : vector<1x288x128xbf16> to vector<288x128xbf16>
    %c2_18 = arith.constant 2 : index
    %c0_19 = arith.constant 0 : index
    %c0_20 = arith.constant 0 : index
    %17 = vector.load %arg2[%c2_18, %c0_19, %c0_20] : memref<9x128x128xbf16, #tpu.memory_space<vmem>>, vector<1x128x128xbf16>
    %18 = vector.shape_cast %17 : vector<1x128x128xbf16> to vector<128x128xbf16>
    %cst_21 = arith.constant dense<0.000000e+00> : vector<288x128xf32>
    %19 = tpu.matmul %16, %18, %cst_21 {dimension_numbers = #tpu.dot_dimension_numbers<[1], [0], [0], [1], [0, 0, 1, 1], [], []>} : vector<288x128xbf16>, vector<128x128xbf16>, vector<288x128xf32> -> vector<288x128xf32>
    %20 = arith.addf %14, %19 : vector<288x128xf32>
    %c0_22 = arith.constant 0 : index
    %c0_23 = arith.constant 0 : index
    %21 = vector.load %arg8[%c0_22, %c0_23] : memref<288x128xf32, #tpu.memory_space<vmem>>, vector<288x128xf32>
    tpu.vector_store %arg8[%c0_22, %c0_23], %20 {strides = array<i32>} : memref<288x128xf32, #tpu.memory_space<vmem>>, vector<288x128xf32>,
    %c0_24 = arith.constant 0 : index
    %c18 = arith.constant 18 : index
    %c0_25 = arith.constant 0 : index
    %22 = vector.load %arg1[%c0_24, %c18, %c0_25] : memref<1x336x128xbf16, #tpu.memory_space<vmem>>, vector<1x288x128xbf16>
    %23 = vector.shape_cast %22 : vector<1x288x128xbf16> to vector<288x128xbf16>
    %c3 = arith.constant 3 : index
    %c0_26 = arith.constant 0 : index
    %c0_27 = arith.constant 0 : index
    %24 = vector.load %arg2[%c3, %c0_26, %c0_27] : memref<9x128x128xbf16, #tpu.memory_space<vmem>>, vector<1x128x128xbf16>
    %25 = vector.shape_cast %24 : vector<1x128x128xbf16> to vector<128x128xbf16>
    %cst_28 = arith.constant dense<0.000000e+00> : vector<288x128xf32>
    %26 = tpu.matmul %23, %25, %cst_28 {dimension_numbers = #tpu.dot_dimension_numbers<[1], [0], [0], [1], [0, 0, 1, 1], [], []>} : vector<288x128xbf16>, vector<128x128xbf16>, vector<288x128xf32> -> vector<288x128xf32>
    %c0_29 = arith.constant 0 : index
    %c19 = arith.constant 19 : index
    %c0_30 = arith.constant 0 : index
    %27 = vector.load %arg1[%c0_29, %c19, %c0_30] : memref<1x336x128xbf16, #tpu.memory_space<vmem>>, vector<1x288x128xbf16>
    %28 = vector.shape_cast %27 : vector<1x288x128xbf16> to vector<288x128xbf16>
    %c4 = arith.constant 4 : index
    %c0_31 = arith.constant 0 : index
    %c0_32 = arith.constant 0 : index
    %29 = vector.load %arg2[%c4, %c0_31, %c0_32] : memref<9x128x128xbf16, #tpu.memory_space<vmem>>, vector<1x128x128xbf16>
    %30 = vector.shape_cast %29 : vector<1x128x128xbf16> to vector<128x128xbf16>
    %cst_33 = arith.constant dense<0.000000e+00> : vector<288x128xf32>
    %31 = tpu.matmul %28, %30, %cst_33 {dimension_numbers = #tpu.dot_dimension_numbers<[1], [0], [0], [1], [0, 0, 1, 1], [], []>} : vector<288x128xbf16>, vector<128x128xbf16>, vector<288x128xf32> -> vector<288x128xf32>
    %32 = arith.addf %26, %31 : vector<288x128xf32>
    %c0_34 = arith.constant 0 : index
    %c20 = arith.constant 20 : index
    %c0_35 = arith.constant 0 : index
    %33 = vector.load %arg1[%c0_34, %c20, %c0_35] : memref<1x336x128xbf16, #tpu.memory_space<vmem>>, vector<1x288x128xbf16>
    %34 = vector.shape_cast %33 : vector<1x288x128xbf16> to vector<288x128xbf16>
    %c5 = arith.constant 5 : index
    %c0_36 = arith.constant 0 : index
    %c0_37 = arith.constant 0 : index
    %35 = vector.load %arg2[%c5, %c0_36, %c0_37] : memref<9x128x128xbf16, #tpu.memory_space<vmem>>, vector<1x128x128xbf16>
    %36 = vector.shape_cast %35 : vector<1x128x128xbf16> to vector<128x128xbf16>
    %cst_38 = arith.constant dense<0.000000e+00> : vector<288x128xf32>
    %37 = tpu.matmul %34, %36, %cst_38 {dimension_numbers = #tpu.dot_dimension_numbers<[1], [0], [0], [1], [0, 0, 1, 1], [], []>} : vector<288x128xbf16>, vector<128x128xbf16>, vector<288x128xf32> -> vector<288x128xf32>
    %38 = arith.addf %32, %37 : vector<288x128xf32>
    %c0_39 = arith.constant 0 : index
    %c0_40 = arith.constant 0 : index
    %39 = vector.load %arg8[%c0_39, %c0_40] : memref<288x128xf32, #tpu.memory_space<vmem>>, vector<288x128xf32>
    %40 = arith.addf %39, %38 : vector<288x128xf32>
    %c0_41 = arith.constant 0 : index
    %c0_42 = arith.constant 0 : index
    %41 = vector.load %arg8[%c0_41, %c0_42] : memref<288x128xf32, #tpu.memory_space<vmem>>, vector<288x128xf32>
    tpu.vector_store %arg8[%c0_41, %c0_42], %40 {strides = array<i32>} : memref<288x128xf32, #tpu.memory_space<vmem>>, vector<288x128xf32>,
    %c0_43 = arith.constant 0 : index
    %c36 = arith.constant 36 : index
    %c0_44 = arith.constant 0 : index
    %42 = vector.load %arg1[%c0_43, %c36, %c0_44] : memref<1x336x128xbf16, #tpu.memory_space<vmem>>, vector<1x288x128xbf16>
    %43 = vector.shape_cast %42 : vector<1x288x128xbf16> to vector<288x128xbf16>
    %c6 = arith.constant 6 : index
    %c0_45 = arith.constant 0 : index
    %c0_46 = arith.constant 0 : index
    %44 = vector.load %arg2[%c6, %c0_45, %c0_46] : memref<9x128x128xbf16, #tpu.memory_space<vmem>>, vector<1x128x128xbf16>
    %45 = vector.shape_cast %44 : vector<1x128x128xbf16> to vector<128x128xbf16>
    %cst_47 = arith.constant dense<0.000000e+00> : vector<288x128xf32>
    %46 = tpu.matmul %43, %45, %cst_47 {dimension_numbers = #tpu.dot_dimension_numbers<[1], [0], [0], [1], [0, 0, 1, 1], [], []>} : vector<288x128xbf16>, vector<128x128xbf16>, vector<288x128xf32> -> vector<288x128xf32>
    %c0_48 = arith.constant 0 : index
    %c37 = arith.constant 37 : index
    %c0_49 = arith.constant 0 : index
    %47 = vector.load %arg1[%c0_48, %c37, %c0_49] : memref<1x336x128xbf16, #tpu.memory_space<vmem>>, vector<1x288x128xbf16>
    %48 = vector.shape_cast %47 : vector<1x288x128xbf16> to vector<288x128xbf16>
    %c7 = arith.constant 7 : index
    %c0_50 = arith.constant 0 : index
    %c0_51 = arith.constant 0 : index
    %49 = vector.load %arg2[%c7, %c0_50, %c0_51] : memref<9x128x128xbf16, #tpu.memory_space<vmem>>, vector<1x128x128xbf16>
    %50 = vector.shape_cast %49 : vector<1x128x128xbf16> to vector<128x128xbf16>
    %cst_52 = arith.constant dense<0.000000e+00> : vector<288x128xf32>
    %51 = tpu.matmul %48, %50, %cst_52 {dimension_numbers = #tpu.dot_dimension_numbers<[1], [0], [0], [1], [0, 0, 1, 1], [], []>} : vector<288x128xbf16>, vector<128x128xbf16>, vector<288x128xf32> -> vector<288x128xf32>
    %52 = arith.addf %46, %51 : vector<288x128xf32>
    %c0_53 = arith.constant 0 : index
    %c38 = arith.constant 38 : index
    %c0_54 = arith.constant 0 : index
    %53 = vector.load %arg1[%c0_53, %c38, %c0_54] : memref<1x336x128xbf16, #tpu.memory_space<vmem>>, vector<1x288x128xbf16>
    %54 = vector.shape_cast %53 : vector<1x288x128xbf16> to vector<288x128xbf16>
    %c8 = arith.constant 8 : index
    %c0_55 = arith.constant 0 : index
    %c0_56 = arith.constant 0 : index
    %55 = vector.load %arg2[%c8, %c0_55, %c0_56] : memref<9x128x128xbf16, #tpu.memory_space<vmem>>, vector<1x128x128xbf16>
    %56 = vector.shape_cast %55 : vector<1x128x128xbf16> to vector<128x128xbf16>
    %cst_57 = arith.constant dense<0.000000e+00> : vector<288x128xf32>
    %57 = tpu.matmul %54, %56, %cst_57 {dimension_numbers = #tpu.dot_dimension_numbers<[1], [0], [0], [1], [0, 0, 1, 1], [], []>} : vector<288x128xbf16>, vector<128x128xbf16>, vector<288x128xf32> -> vector<288x128xf32>
    %58 = arith.addf %52, %57 : vector<288x128xf32>
    %c0_58 = arith.constant 0 : index
    %c0_59 = arith.constant 0 : index
    %59 = vector.load %arg8[%c0_58, %c0_59] : memref<288x128xf32, #tpu.memory_space<vmem>>, vector<288x128xf32>
    %60 = arith.addf %59, %58 : vector<288x128xf32>
    %c0_60 = arith.constant 0 : index
    %c0_61 = arith.constant 0 : index
    %61 = vector.load %arg8[%c0_60, %c0_61] : memref<288x128xf32, #tpu.memory_space<vmem>>, vector<288x128xf32>
    tpu.vector_store %arg8[%c0_60, %c0_61], %60 {strides = array<i32>} : memref<288x128xf32, #tpu.memory_space<vmem>>, vector<288x128xf32>,
    %c0_62 = arith.constant 0 : index
    %c0_63 = arith.constant 0 : index
    %62 = vector.load %arg8[%c0_62, %c0_63] : memref<288x128xf32, #tpu.memory_space<vmem>>, vector<288x128xf32>
    %c0_64 = arith.constant 0 : index
    %c0_65 = arith.constant 0 : index
    %63 = vector.load %arg3[%c0_64, %c0_65] : memref<1x128xf32, #tpu.memory_space<vmem>>, vector<1x128xf32>
    %64 = vector.broadcast %63 : vector<1x128xf32> to vector<288x128xf32>
    %65 = arith.addf %62, %64 : vector<288x128xf32>
    %cst_66 = arith.constant 0.000000e+00 : f32
    %66 = vector.broadcast %cst_66 : f32 to vector<288x128xf32>
    %67 = arith.maximumf %65, %66 : vector<288x128xf32>
    %68 = tpu.iota {dimensions = array<i32: 0>} : vector<288x1xi32>
    %c18_i32 = arith.constant 18 : i32
    %c0_i32 = arith.constant 0 : i32
    %69 = arith.cmpi eq, %c18_i32, %c0_i32 : i32
    %c1_i32 = arith.constant 1 : i32
    %70 = arith.select %69, %c1_i32, %c18_i32 : i32
    %71 = vector.broadcast %70 : i32 to vector<288x1xi32>
    %72 = arith.remsi %68, %71 : vector<288x1xi32>
    %c0_i32_67 = arith.constant 0 : i32
    %73 = vector.broadcast %c0_i32_67 : i32 to vector<288x1xi32>
    %74 = arith.cmpi ne, %72, %73 : vector<288x1xi32>
    %c0_i32_68 = arith.constant 0 : i32
    %75 = vector.broadcast %c0_i32_68 : i32 to vector<288x1xi32>
    %76 = arith.cmpi slt, %72, %75 : vector<288x1xi32>
    %c0_i32_69 = arith.constant 0 : i32
    %77 = arith.cmpi slt, %70, %c0_i32_69 : i32
    %78 = vector.broadcast %77 : i1 to vector<288x1xi1>
    %79 = vector.broadcast %78 : vector<288x1xi1> to vector<288x1xi1>
    %80 = arith.xori %76, %79 : vector<288x1xi1>
    %81 = arith.andi %80, %74 : vector<288x1xi1>
    %82 = vector.broadcast %70 : i32 to vector<288x1xi32>
    %83 = arith.addi %72, %82 : vector<288x1xi32>
    %84 = arith.select %81, %83, %72 : vector<288x1xi1>, vector<288x1xi32>
    %c16_i32 = arith.constant 16 : i32
    %85 = vector.broadcast %c16_i32 : i32 to vector<288x1xi32>
    %86 = arith.cmpi slt, %84, %85 : vector<288x1xi32>
    %cst_70 = arith.constant 0.000000e+00 : f32
    %87 = vector.shape_cast %86 : vector<288x1xi1> to vector<288x1xi1>
    %88 = vector.broadcast %87 : vector<288x1xi1> to vector<288x128xi1>
    %89 = vector.broadcast %cst_70 : f32 to vector<288x128xf32>
    %90 = arith.select %88, %67, %89 : vector<288x128xi1>, vector<288x128xf32>
    %91 = arith.truncf %90 : vector<288x128xf32> to vector<288x128xbf16>
    %c32 = arith.constant 32 : index
    %c0_71 = arith.constant 0 : index
    %92 = vector.load %arg7[%c32, %c0_71] : memref<352x128xbf16, #tpu.memory_space<vmem>>, vector<288x128xbf16>
    tpu.vector_store %arg7[%c32, %c0_71], %91 {strides = array<i32>} : memref<352x128xbf16, #tpu.memory_space<vmem>>, vector<288x128xbf16>,
    %c13 = arith.constant 13 : index
    %c0_72 = arith.constant 0 : index
    %93 = vector.load %arg7[%c13, %c0_72] : memref<352x128xbf16, #tpu.memory_space<vmem>>, vector<288x128xbf16>
    %c0_73 = arith.constant 0 : index
    %c0_74 = arith.constant 0 : index
    %c0_75 = arith.constant 0 : index
    %94 = vector.load %arg4[%c0_73, %c0_74, %c0_75] : memref<9x128x128xbf16, #tpu.memory_space<vmem>>, vector<1x128x128xbf16>
    %95 = vector.shape_cast %94 : vector<1x128x128xbf16> to vector<128x128xbf16>
    %cst_76 = arith.constant dense<0.000000e+00> : vector<288x128xf32>
    %96 = tpu.matmul %93, %95, %cst_76 {dimension_numbers = #tpu.dot_dimension_numbers<[1], [0], [0], [1], [0, 0, 1, 1], [], []>} : vector<288x128xbf16>, vector<128x128xbf16>, vector<288x128xf32> -> vector<288x128xf32>
    %c14 = arith.constant 14 : index
    %c0_77 = arith.constant 0 : index
    %97 = vector.load %arg7[%c14, %c0_77] : memref<352x128xbf16, #tpu.memory_space<vmem>>, vector<288x128xbf16>
    %c1_78 = arith.constant 1 : index
    %c0_79 = arith.constant 0 : index
    %c0_80 = arith.constant 0 : index
    %98 = vector.load %arg4[%c1_78, %c0_79, %c0_80] : memref<9x128x128xbf16, #tpu.memory_space<vmem>>, vector<1x128x128xbf16>
    %99 = vector.shape_cast %98 : vector<1x128x128xbf16> to vector<128x128xbf16>
    %cst_81 = arith.constant dense<0.000000e+00> : vector<288x128xf32>
    %100 = tpu.matmul %97, %99, %cst_81 {dimension_numbers = #tpu.dot_dimension_numbers<[1], [0], [0], [1], [0, 0, 1, 1], [], []>} : vector<288x128xbf16>, vector<128x128xbf16>, vector<288x128xf32> -> vector<288x128xf32>
    %101 = arith.addf %96, %100 : vector<288x128xf32>
    %c15 = arith.constant 15 : index
    %c0_82 = arith.constant 0 : index
    %102 = vector.load %arg7[%c15, %c0_82] : memref<352x128xbf16, #tpu.memory_space<vmem>>, vector<288x128xbf16>
    %c2_83 = arith.constant 2 : index
    %c0_84 = arith.constant 0 : index
    %c0_85 = arith.constant 0 : index
    %103 = vector.load %arg4[%c2_83, %c0_84, %c0_85] : memref<9x128x128xbf16, #tpu.memory_space<vmem>>, vector<1x128x128xbf16>
    %104 = vector.shape_cast %103 : vector<1x128x128xbf16> to vector<128x128xbf16>
    %cst_86 = arith.constant dense<0.000000e+00> : vector<288x128xf32>
    %105 = tpu.matmul %102, %104, %cst_86 {dimension_numbers = #tpu.dot_dimension_numbers<[1], [0], [0], [1], [0, 0, 1, 1], [], []>} : vector<288x128xbf16>, vector<128x128xbf16>, vector<288x128xf32> -> vector<288x128xf32>
    %106 = arith.addf %101, %105 : vector<288x128xf32>
    %c0_87 = arith.constant 0 : index
    %c0_88 = arith.constant 0 : index
    %107 = vector.load %arg8[%c0_87, %c0_88] : memref<288x128xf32, #tpu.memory_space<vmem>>, vector<288x128xf32>
    tpu.vector_store %arg8[%c0_87, %c0_88], %106 {strides = array<i32>} : memref<288x128xf32, #tpu.memory_space<vmem>>, vector<288x128xf32>,
    %c31 = arith.constant 31 : index
    %c0_89 = arith.constant 0 : index
    %108 = vector.load %arg7[%c31, %c0_89] : memref<352x128xbf16, #tpu.memory_space<vmem>>, vector<288x128xbf16>
    %c3_90 = arith.constant 3 : index
    %c0_91 = arith.constant 0 : index
    %c0_92 = arith.constant 0 : index
    %109 = vector.load %arg4[%c3_90, %c0_91, %c0_92] : memref<9x128x128xbf16, #tpu.memory_space<vmem>>, vector<1x128x128xbf16>
    %110 = vector.shape_cast %109 : vector<1x128x128xbf16> to vector<128x128xbf16>
    %cst_93 = arith.constant dense<0.000000e+00> : vector<288x128xf32>
    %111 = tpu.matmul %108, %110, %cst_93 {dimension_numbers = #tpu.dot_dimension_numbers<[1], [0], [0], [1], [0, 0, 1, 1], [], []>} : vector<288x128xbf16>, vector<128x128xbf16>, vector<288x128xf32> -> vector<288x128xf32>
    %c32_94 = arith.constant 32 : index
    %c0_95 = arith.constant 0 : index
    %112 = vector.load %arg7[%c32_94, %c0_95] : memref<352x128xbf16, #tpu.memory_space<vmem>>, vector<288x128xbf16>
    %c4_96 = arith.constant 4 : index
    %c0_97 = arith.constant 0 : index
    %c0_98 = arith.constant 0 : index
    %113 = vector.load %arg4[%c4_96, %c0_97, %c0_98] : memref<9x128x128xbf16, #tpu.memory_space<vmem>>, vector<1x128x128xbf16>
    %114 = vector.shape_cast %113 : vector<1x128x128xbf16> to vector<128x128xbf16>
    %cst_99 = arith.constant dense<0.000000e+00> : vector<288x128xf32>
    %115 = tpu.matmul %112, %114, %cst_99 {dimension_numbers = #tpu.dot_dimension_numbers<[1], [0], [0], [1], [0, 0, 1, 1], [], []>} : vector<288x128xbf16>, vector<128x128xbf16>, vector<288x128xf32> -> vector<288x128xf32>
    %116 = arith.addf %111, %115 : vector<288x128xf32>
    %c33 = arith.constant 33 : index
    %c0_100 = arith.constant 0 : index
    %117 = vector.load %arg7[%c33, %c0_100] : memref<352x128xbf16, #tpu.memory_space<vmem>>, vector<288x128xbf16>
    %c5_101 = arith.constant 5 : index
    %c0_102 = arith.constant 0 : index
    %c0_103 = arith.constant 0 : index
    %118 = vector.load %arg4[%c5_101, %c0_102, %c0_103] : memref<9x128x128xbf16, #tpu.memory_space<vmem>>, vector<1x128x128xbf16>
    %119 = vector.shape_cast %118 : vector<1x128x128xbf16> to vector<128x128xbf16>
    %cst_104 = arith.constant dense<0.000000e+00> : vector<288x128xf32>
    %120 = tpu.matmul %117, %119, %cst_104 {dimension_numbers = #tpu.dot_dimension_numbers<[1], [0], [0], [1], [0, 0, 1, 1], [], []>} : vector<288x128xbf16>, vector<128x128xbf16>, vector<288x128xf32> -> vector<288x128xf32>
    %121 = arith.addf %116, %120 : vector<288x128xf32>
    %c0_105 = arith.constant 0 : index
    %c0_106 = arith.constant 0 : index
    %122 = vector.load %arg8[%c0_105, %c0_106] : memref<288x128xf32, #tpu.memory_space<vmem>>, vector<288x128xf32>
    %123 = arith.addf %122, %121 : vector<288x128xf32>
    %c0_107 = arith.constant 0 : index
    %c0_108 = arith.constant 0 : index
    %124 = vector.load %arg8[%c0_107, %c0_108] : memref<288x128xf32, #tpu.memory_space<vmem>>, vector<288x128xf32>
    tpu.vector_store %arg8[%c0_107, %c0_108], %123 {strides = array<i32>} : memref<288x128xf32, #tpu.memory_space<vmem>>, vector<288x128xf32>,
    %c49 = arith.constant 49 : index
    %c0_109 = arith.constant 0 : index
    %125 = vector.load %arg7[%c49, %c0_109] : memref<352x128xbf16, #tpu.memory_space<vmem>>, vector<288x128xbf16>
    %c6_110 = arith.constant 6 : index
    %c0_111 = arith.constant 0 : index
    %c0_112 = arith.constant 0 : index
    %126 = vector.load %arg4[%c6_110, %c0_111, %c0_112] : memref<9x128x128xbf16, #tpu.memory_space<vmem>>, vector<1x128x128xbf16>
    %127 = vector.shape_cast %126 : vector<1x128x128xbf16> to vector<128x128xbf16>
    %cst_113 = arith.constant dense<0.000000e+00> : vector<288x128xf32>
    %128 = tpu.matmul %125, %127, %cst_113 {dimension_numbers = #tpu.dot_dimension_numbers<[1], [0], [0], [1], [0, 0, 1, 1], [], []>} : vector<288x128xbf16>, vector<128x128xbf16>, vector<288x128xf32> -> vector<288x128xf32>
    %c50 = arith.constant 50 : index
    %c0_114 = arith.constant 0 : index
    %129 = vector.load %arg7[%c50, %c0_114] : memref<352x128xbf16, #tpu.memory_space<vmem>>, vector<288x128xbf16>
    %c7_115 = arith.constant 7 : index
    %c0_116 = arith.constant 0 : index
    %c0_117 = arith.constant 0 : index
    %130 = vector.load %arg4[%c7_115, %c0_116, %c0_117] : memref<9x128x128xbf16, #tpu.memory_space<vmem>>, vector<1x128x128xbf16>
    %131 = vector.shape_cast %130 : vector<1x128x128xbf16> to vector<128x128xbf16>
    %cst_118 = arith.constant dense<0.000000e+00> : vector<288x128xf32>
    %132 = tpu.matmul %129, %131, %cst_118 {dimension_numbers = #tpu.dot_dimension_numbers<[1], [0], [0], [1], [0, 0, 1, 1], [], []>} : vector<288x128xbf16>, vector<128x128xbf16>, vector<288x128xf32> -> vector<288x128xf32>
    %133 = arith.addf %128, %132 : vector<288x128xf32>
    %c51 = arith.constant 51 : index
    %c0_119 = arith.constant 0 : index
    %134 = vector.load %arg7[%c51, %c0_119] : memref<352x128xbf16, #tpu.memory_space<vmem>>, vector<288x128xbf16>
    %c8_120 = arith.constant 8 : index
    %c0_121 = arith.constant 0 : index
    %c0_122 = arith.constant 0 : index
    %135 = vector.load %arg4[%c8_120, %c0_121, %c0_122] : memref<9x128x128xbf16, #tpu.memory_space<vmem>>, vector<1x128x128xbf16>
    %136 = vector.shape_cast %135 : vector<1x128x128xbf16> to vector<128x128xbf16>
    %cst_123 = arith.constant dense<0.000000e+00> : vector<288x128xf32>
    %137 = tpu.matmul %134, %136, %cst_123 {dimension_numbers = #tpu.dot_dimension_numbers<[1], [0], [0], [1], [0, 0, 1, 1], [], []>} : vector<288x128xbf16>, vector<128x128xbf16>, vector<288x128xf32> -> vector<288x128xf32>
    %138 = arith.addf %133, %137 : vector<288x128xf32>
    %c0_124 = arith.constant 0 : index
    %c0_125 = arith.constant 0 : index
    %139 = vector.load %arg8[%c0_124, %c0_125] : memref<288x128xf32, #tpu.memory_space<vmem>>, vector<288x128xf32>
    %140 = arith.addf %139, %138 : vector<288x128xf32>
    %c0_126 = arith.constant 0 : index
    %c0_127 = arith.constant 0 : index
    %141 = vector.load %arg8[%c0_126, %c0_127] : memref<288x128xf32, #tpu.memory_space<vmem>>, vector<288x128xf32>
    tpu.vector_store %arg8[%c0_126, %c0_127], %140 {strides = array<i32>} : memref<288x128xf32, #tpu.memory_space<vmem>>, vector<288x128xf32>,
    %c0_128 = arith.constant 0 : index
    %c19_129 = arith.constant 19 : index
    %c0_130 = arith.constant 0 : index
    %142 = vector.load %arg1[%c0_128, %c19_129, %c0_130] : memref<1x336x128xbf16, #tpu.memory_space<vmem>>, vector<1x288x128xbf16>
    %143 = vector.shape_cast %142 : vector<1x288x128xbf16> to vector<288x128xbf16>
    %c0_131 = arith.constant 0 : index
    %c0_132 = arith.constant 0 : index
    %144 = vector.load %arg8[%c0_131, %c0_132] : memref<288x128xf32, #tpu.memory_space<vmem>>, vector<288x128xf32>
    %c0_133 = arith.constant 0 : index
    %c0_134 = arith.constant 0 : index
    %145 = vector.load %arg5[%c0_133, %c0_134] : memref<1x128xf32, #tpu.memory_space<vmem>>, vector<1x128xf32>
    %146 = vector.broadcast %145 : vector<1x128xf32> to vector<288x128xf32>
    %147 = arith.addf %144, %146 : vector<288x128xf32>
    %148 = arith.extf %143 : vector<288x128xbf16> to vector<288x128xf32>
    %149 = arith.addf %147, %148 : vector<288x128xf32>
    %cst_135 = arith.constant 0.000000e+00 : f32
    %150 = vector.broadcast %cst_135 : f32 to vector<288x128xf32>
    %151 = arith.maximumf %149, %150 : vector<288x128xf32>
    %152 = arith.truncf %151 : vector<288x128xf32> to vector<288x128xbf16>
    %c0_136 = arith.constant 0 : index
    %c0_137 = arith.constant 0 : index
    %c0_138 = arith.constant 0 : index
    %153 = vector.load %arg6[%c0_136, %c0_137, %c0_138] : memref<1x288x128xbf16, #tpu.memory_space<vmem>>, vector<1x288x128xbf16>
    %154 = vector.shape_cast %153 : vector<1x288x128xbf16> to vector<288x128xbf16>
    %155 = vector.shape_cast %152 : vector<288x128xbf16> to vector<1x288x128xbf16>
    tpu.vector_store %arg6[%c0_136, %c0_137, %c0_138], %155 {strides = array<i32>} : memref<1x288x128xbf16, #tpu.memory_space<vmem>>, vector<1x288x128xbf16>,
    return
  }
  func.func @transform_0(%arg0: i32) -> (i32, i32, i32) {
    %c0_i32 = arith.constant 0 : i32
    %c0_i32_0 = arith.constant 0 : i32
    %c0_i32_1 = arith.constant 0 : i32
    return %arg0, %c0_i32, %c0_i32_0 : i32, i32, i32
  }
  func.func @transform_1(%arg0: i32) -> (i32, i32, i32) {
    %c0_i32 = arith.constant 0 : i32
    %c0_i32_0 = arith.constant 0 : i32
    %c0_i32_1 = arith.constant 0 : i32
    %c0_i32_2 = arith.constant 0 : i32
    return %c0_i32, %c0_i32_0, %c0_i32_1 : i32, i32, i32
  }
  func.func @transform_2(%arg0: i32) -> (i32, i32) {
    %c0_i32 = arith.constant 0 : i32
    %c0_i32_0 = arith.constant 0 : i32
    %c0_i32_1 = arith.constant 0 : i32
    return %c0_i32, %c0_i32_0 : i32, i32
  }
  func.func @transform_3(%arg0: i32) -> (i32, i32, i32) {
    %c0_i32 = arith.constant 0 : i32
    %c0_i32_0 = arith.constant 0 : i32
    %c0_i32_1 = arith.constant 0 : i32
    %c0_i32_2 = arith.constant 0 : i32
    return %c0_i32, %c0_i32_0, %c0_i32_1 : i32, i32, i32
  }
  func.func @transform_4(%arg0: i32) -> (i32, i32) {
    %c0_i32 = arith.constant 0 : i32
    %c0_i32_0 = arith.constant 0 : i32
    %c0_i32_1 = arith.constant 0 : i32
    return %c0_i32, %c0_i32_0 : i32, i32
  }
  func.func @transform_5(%arg0: i32) -> (i32, i32, i32) {
    %c0_i32 = arith.constant 0 : i32
    %c0_i32_0 = arith.constant 0 : i32
    %c0_i32_1 = arith.constant 0 : i32
    return %arg0, %c0_i32, %c0_i32_0 : i32, i32, i32
  }
}

</mosaic_0001>

<bundles_post_ra>
// kernel: basic_block_forward.1
= control target key start
LH: loop header
LB: loop body
LE: loop exit
PB: predicated region body
PF: predicated region fallthrough
CT: control target
= control target key end

     0   :  { %s10967_s18 = smov 0   ;;  %s14570_s0 = inlined_call_operand.vmem [shape: bf16[2,336,128], index: 0, kind: input, shape index: {}]   ;;  %s14571_s1 = inlined_call_operand.vmem [shape: bf16[9,128,128], index: 1, kind: input, shape index: {}]   ;;  %s14572_s2 = inlined_call_operand.vmem [shape: f32[1,128], index: 2, kind: input, shape index: {}]   ;;  %s14573_s3 = inlined_call_operand.vmem [shape: bf16[9,128,128], index: 3, kind: input, shape index: {}]   ;;  %s14574_s4 = inlined_call_operand.vmem [shape: f32[1,128], index: 4, kind: input, shape index: {}]   ;;  %s14575_s5 = inlined_call_operand.vmem [shape: bf16[2,288,128], index: 5, kind: output, shape index: {}]  }
   0x1 LB: > { %s8837_s19 = sadd.s32 4294967295, %s10934_s18   ;;  %p8841_p0 = scmp.ge.s32.totalorder %s10934_s18, 1  ;;  %s10934_s18 = sphi %s10967_s18, %s15_s18  }
   0x2   : > { %p187_p1 = scmp.lt.s32.totalorder %s10934_s18, 3 }
   0x4   : > { %p188_p2 = pnand %p8841_p0, %p187_p1 }
   0x6   : > { %191 = sbr.rel (%p188_p2) target bundleno = 1688 (0x698), region = 40 }
   0xb   : > { %v10122_v0 = vld [vmem:[%s14571_s1 + $0x78] sm:$0xff]  ;;  %p215_p3 = scmp.lt.s32.totalorder %s8837_s19, 1  ;;  %v10121_v2 = vld [vmem:[%s14571_s1 + $0x70] sm:$0xff]  ;;  %v10120_v4 = vld [vmem:[%s14571_s1 + $0x68] sm:$0xff]  ;;  %vm397_vm0 = vsmask.f32 7424 }
   0xc   : > { %v10114_v1 = vld [vmem:[%s14571_s1 + $0x38] sm:$0xff]  ;;  %612 = vmatpush.bf16.msra.mxu0 %v10122_v0  ;;  %10866 = vmatpush.bf16.msra.mxu2 %v10122_v0  ;;  %v10113_v3 = vld [vmem:[%s14571_s1 + $0x30] sm:$0xff]  ;;  %v10112_v5 = vld [vmem:[%s14571_s1 + $0x28] sm:$0xff]  ;;  %vm897_vm1 = vcmask 1046528   ;;  %vm1337_vm2 = vsmask.f32 6400 }
   0xd   : > { %777 = vmatpush.bf16.msra.mxu1 %v10114_v1  ;;  %10874 = vmatpush.bf16.msra.mxu3 %v10114_v1  ;;  %s14966_s19 = smov (!%p215_p3, %s8837_s19), 1  ;;  %v10119_v6 = vld [vmem:[%s14571_s1 + $0x60] sm:$0xff]  ;;  %v10118_v8 = vld [vmem:[%s14571_s1 + $0x58] sm:$0xff]  ;;  %v10117_v13 = vld [vmem:[%s14571_s1 + $0x50] sm:$0xff]  ;;  %vm1899_vm3 = vcmask 1045504   ;;  %vm2973_vm5 = vcmask 1044480  }
   0xe   : > { %s10882_s7 = smul.u32 168, %s14966_s19  ;;  %v10111_v7 = vld [vmem:[%s14571_s1 + $0x20] sm:$0xff]  ;;  %v10110_v10 = vld [vmem:[%s14571_s1 + $0x18] sm:$0xff]  ;;  %v10109_v17 = vld [vmem:[%s14571_s1 + $0x10] sm:$0xff]  ;;  %vm2411_vm4 = vsmask.f32 5376 }
   0xf   : > { %v10116_v20 = vld [vmem:[%s14571_s1 + $0x48] sm:$0xff]  ;;  %v10115_v26 = vld [vmem:[%s14571_s1 + $0x40] sm:$0xff]  ;;  %v10130_v32 = vld [vmem:[%s14571_s1 + $0xb8] sm:$0xff]  ;;  %s10883_s10 = smul.u32 144, %s14966_s19 }
  0x10   : > { %613 = vmatpush.bf16.msra.mxu0 %v10121_v2  ;;  %10867 = vmatpush.bf16.msra.mxu2 %v10121_v2  ;;  %s11005_s14 = scalar_lea.vmem %s14570_s0, %s10882_s7  ;;  %v10108_v25 = vld [vmem:[%s14571_s1 + $0x8] sm:$0xff]  ;;  %v10107_v31 = vld [vmem:[%s14571_s1] sm:$0xff]  ;;  %v10163_v33 = vld [vmem:[%s14571_s1 + $0x138] sm:$0xff] }
  0x11   : > { %778 = vmatpush.bf16.msra.mxu1 %v10113_v3  ;;  %10875 = vmatpush.bf16.msra.mxu3 %v10113_v3  ;;  %v10098_v9 = vld [vmem:[%s11005_s14 + $0x48] sm:$0xff]  ;;  %v10338_v11 = vld [vmem:[%s11005_s14] sm:$0xff]   ;;  %v11022_v15 = vld [vmem:[%s11005_s14 + $0x50] sm:$0xff]  ;;  %s14266_s13 = scalar_lea.vmem %s14575_s5, %s10883_s10 }
  0x12   : > { %v11016_v12 = vld [vmem:[%s11005_s14 + $0x8] sm:$0xff]  ;;  %v401_v14 = vshll.u32 %v10338_v11, 16  ;;  %v470_v16 = vshll.u32 %v10098_v9, 16  ;;  %v399_v18 = vshrl.u32 %v10338_v11, 16  ;;  %v474_v23 = vshrl.u32 %v10098_v9, 16  ;;  %v10155_v36 = vld [vmem:[%s14571_s1 + $0xf8] sm:$0xff] }
  0x13   : > { %v406_v19 = vshll.u32 %v11016_v12, 16  ;;  %v478_v24 = vshll.u32 %v11022_v15, 16  ;;  %v10129_v37 = vld [vmem:[%s14571_s1 + $0xb0] sm:$0xff]  ;;  %v10100_v40 = vld [vmem:[%s11005_s14 + $0x58] sm:$0xff]  ;;  %v10128_v42 = vld [vmem:[%s14571_s1 + $0xa8] sm:$0xff]  ;;  %v410_v44 = vshrl.u32 %v11016_v12, 16 }
  0x14   : > { %614 = vmatpush.bf16.msra.mxu0 %v10120_v4  ;;  %10868 = vmatpush.bf16.msra.mxu2 %v10120_v4  ;;  %v403_v21 = vrot.slane %v401_v14, 1  ;;  %v11031_v22 = vrot.slane %v470_v16, 1  ;;  %v10162_v38 = vld [vmem:[%s14571_s1 + $0x130] sm:$0xff]  ;;  %v10161_v43 = vld [vmem:[%s14571_s1 + $0x128] sm:$0xff]  ;;  %v482_v46 = vshrl.u32 %v11022_v15, 16  ;;  %v486_v47 = vshll.u32 %v10100_v40, 16 }
  0x15   : > { %779 = vmatpush.bf16.msra.mxu1 %v10112_v5  ;;  %10876 = vmatpush.bf16.msra.mxu3 %v10112_v5  ;;  %v408_v28 = vrot.slane %v406_v19, 1  ;;  %v480_v30 = vrot.slane %v478_v24, 1  ;;  %v11062_v39 = vld [vmem:[%s11005_s14 + $0x10] sm:$0xff]  ;;  %v10153_v48 = vld [vmem:[%s14571_s1 + $0xe8] sm:$0xff]  ;;  %v11083_v55 = vld [vmem:[%s11005_s14 + $0x18] sm:$0xff]  ;;  %v490_v62 = vshrl.u32 %v10100_v40, 16 }
  0x16   : > { %v404_v27 = vor.u32 %v403_v21, %v399_v18  ;;  %v476_v29 = vor.u32 %v474_v23, %v11031_v22  ;;  %v10154_v41 = vld [vmem:[%s14571_s1 + $0xf0] sm:$0xff]  ;;  %v414_v45 = vshll.u32 %v11062_v39, 16  ;;  %v488_v52 = vrot.slane %v486_v47, 1  ;;  %v10101_v56 = vld [vmem:[%s11005_s14 + $0x60] sm:$0xff]  ;;  %v11117_v21 = vld [vmem:[%s11005_s14 + $0x28] sm:$0xff] }
  0x17   : > { %v412_v49 = vor.u32 %v410_v44, %v408_v28  ;;  %v484_v51 = vor.u32 %v482_v46, %v480_v30  ;;  %v10127_v57 = vld [vmem:[%s14571_s1 + $0xa0] sm:$0xff]  ;;  %v418_v60 = vshrl.u32 %v11062_v39, 16  ;;  %v422_v61 = vshll.u32 %v11083_v55, 16  ;;  %v10103_v23 = vld [vmem:[%s11005_s14 + $0x70] sm:$0xff]  ;;  %v10151_v24 = vld [vmem:[%s14571_s1 + $0xd8] sm:$0xff] }
  0x18   : > { %615 = vmatpush.bf16.msra.mxu0 %v10119_v6  ;;  %10869 = vmatpush.bf16.msra.mxu2 %v10119_v6  ;;  %v409_v34 = vsel %vm397_vm0, %v404_v27, %v408_v28  ;;  %v481_v35 = vsel %vm397_vm0, %v476_v29, %v480_v30  ;;  %v416_v50 = vrot.slane %v414_v45, 1  ;;  %v10160_v58 = vld [vmem:[%s14571_s1 + $0x120] sm:$0xff]  ;;  %v494_v63 = vshll.u32 %v10101_v56, 16 }
  0x19   : > { %780 = vmatpush.bf16.msra.mxu1 %v10111_v7  ;;  %10877 = vmatpush.bf16.msra.mxu3 %v10111_v7  ;;  %v489_v54 = vsel %vm397_vm0, %v484_v51, %v488_v52  ;;  %v10152_v59 = vld [vmem:[%s14571_s1 + $0xe0] sm:$0xff]  ;;  %v424_v1 = vrot.slane %v422_v61, 1  ;;  %v492_v2 = vor.u32 %v490_v62, %v488_v52  ;;  %v10102_v7 = vld [vmem:[%s11005_s14 + $0x68] sm:$0xff]  ;;  %v438_v28 = vshll.u32 %v11117_v21, 16 }
  0x1a   : > { %v417_v53 = vsel %vm397_vm0, %v412_v49, %v416_v50  ;;  %v420_v0 = vor.u32 %v418_v60, %v416_v50  ;;  %v496_v3 = vrot.slane %v494_v63, 1  ;;  %v11102_v6 = vld [vmem:[%s11005_s14 + $0x20] sm:$0xff]  ;;  %v502_v14 = vshll.u32 %v10102_v7, 16 }
  0x1b   : > { %v434_v27 = vshrl.u32 %v11102_v6, 16  ;;  %v506_v29 = vshrl.u32 %v10102_v7, 16  ;;  %v510_v30 = vshll.u32 %v10103_v23, 16  ;;  %v514_v45 = vshrl.u32 %v10103_v23, 16 }
  0x1c   : > { %616 = vmatpush.bf16.msra.mxu0 %v10118_v8  ;;  %10870 = vmatpush.bf16.msra.mxu2 %v10118_v8  ;;  %v425_v4 = vsel %vm397_vm0, %v420_v0, %v424_v1  ;;  %v497_v5 = vsel %vm397_vm0, %v492_v2, %v496_v3  ;;  %v10126_v8 = vld [vmem:[%s14571_s1 + $0x98] sm:$0xff]  ;;  %v504_v18 = vrot.slane %v502_v14, 1  ;;  %v10170_v2 = vld [vmem:[%s14571_s1 + $0x170] sm:$0xff] }
  0x1d   : > { %781 = vmatpush.bf16.msra.mxu1 %v10110_v10  ;;  %10878 = vmatpush.bf16.msra.mxu3 %v10110_v10  ;;  %v426_v10 = vshrl.u32 %v11083_v55, 16 }
  0x20   : > { %617 = vmatpush.bf16.msra.mxu0 %v10117_v13  ;;  %10871 = vmatpush.bf16.msra.mxu2 %v10117_v13  ;;  %v498_v13 = vshrl.u32 %v10101_v56, 16 }
  0x21   : > { %782 = vmatpush.bf16.msra.mxu1 %v10109_v17  ;;  %10879 = vmatpush.bf16.msra.mxu3 %v10109_v17 }
  0x22   : > { %v500_v17 = vor.u32 %v498_v13, %v496_v3 }
  0x24   : > { %618 = vmatpush.bf16.msra.mxu0 %v10116_v20  ;;  %10872 = vmatpush.bf16.msra.mxu2 %v10116_v20  ;;  %v505_v20 = vsel %vm397_vm0, %v500_v17, %v504_v18  ;;  %v10148_v17 = vld [vmem:[%s14571_s1 + $0xc0] sm:$0xff] }
  0x25   : > { %783 = vmatpush.bf16.msra.mxu1 %v10108_v25  ;;  %10880 = vmatpush.bf16.msra.mxu3 %v10108_v25  ;;  %v10125_v25 = vld [vmem:[%s14571_s1 + $0x90] sm:$0xff] }
  0x28   : > { %619 = vmatpush.bf16.msra.mxu0 %v10115_v26  ;;  %10873 = vmatpush.bf16.msra.mxu2 %v10115_v26  ;;  %v10158_v26 = vld [vmem:[%s14571_s1 + $0x110] sm:$0xff] }
  0x29   : > { %784 = vmatpush.bf16.msra.mxu1 %v10107_v31  ;;  %10881 = vmatpush.bf16.msra.mxu3 %v10107_v31 }
  0x2b   : > { %620 = vmatmul.bf16.vlgmr.msra.gmra.mxu0 %v409_v34  ;;  %665 = vmatmul.bf16.vlgmr.msra.gmra.mxu2 %v481_v35  ;;  %v512_v34 = vrot.slane %v510_v30, 1  ;;  %v10165_v30 = vld [vmem:[%s14571_s1 + $0x148] sm:$0xff] }
  0x2c   : > { %1001 = vmatpush.bf16.msrb.mxu2 %v10130_v32  ;;  %785 = vmatmul.bf16.vlgmr.msra.gmra.mxu1 %v10338_v11  ;;  %v430_v11 = vshll.u32 %v11102_v6, 16  ;;  %v440_v32 = vrot.slane %v438_v28, 1 }
  0x2d   : > { %1574 = vmatpush.bf16.msrb.mxu3 %v10163_v33  ;;  %1779 = vmatpush.bf16.msrb.mxu0 %v10155_v36  ;;  %v508_v33 = vor.u32 %v506_v29, %v504_v18  ;;  %v516_v49 = vor.u32 %v514_v45, %v512_v34  ;;  %v10167_v18 = vld [vmem:[%s14571_s1 + $0x158] sm:$0xff] }
  0x2e   : > { %830 = vmatmul.bf16.vlgmr.msra.gmra.mxu3 %v10098_v9  ;;  %v10159_v9 = vld [vmem:[%s14571_s1 + $0x118] sm:$0xff]  ;;  %v432_v16 = vrot.slane %v430_v11, 1  ;;  %v10168_v11 = vld [vmem:[%s14571_s1 + $0x160] sm:$0xff] }
  0x2f   : > { %v513_v36 = vsel %vm397_vm0, %v508_v33, %v512_v34  ;;  %v10196_v33 = vld [vmem:[%s14571_s1 + $0x1b8] sm:$0xff] }
  0x30   : > { %1002 = vmatpush.bf16.msrb.mxu2 %v10129_v37  ;;  %v436_v31 = vor.u32 %v434_v27, %v432_v16  ;;  %v11135_v37 = vld [vmem:[%s11005_s14 + $0x30] sm:$0xff] }
  0x31   : > { %1575 = vmatpush.bf16.msrb.mxu3 %v10162_v38  ;;  %1780 = vmatpush.bf16.msrb.mxu0 %v10154_v41  ;;  %v10104_v38 = vld [vmem:[%s11005_s14 + $0x78] sm:$0xff]  ;;  %v10124_v41 = vld [vmem:[%s14571_s1 + $0x88] sm:$0xff]  ;;  %v446_v44 = vshll.u32 %v11135_v37, 16 }
  0x32   : > { %v441_v35 = vsel %vm397_vm0, %v436_v31, %v440_v32  ;;  %v518_v46 = vshll.u32 %v10104_v38, 16  ;;  %v522_v60 = vshrl.u32 %v10104_v38, 16 }
  0x34   : > { %1003 = vmatpush.bf16.msrb.mxu2 %v10128_v42  ;;  %v10157_v42 = vld [vmem:[%s14571_s1 + $0x108] sm:$0xff]  ;;  %v520_v50 = vrot.slane %v518_v46, 1 }
  0x35   : > { %1576 = vmatpush.bf16.msrb.mxu3 %v10161_v43  ;;  %1781 = vmatpush.bf16.msrb.mxu0 %v10153_v48  ;;  %v442_v43 = vshrl.u32 %v11117_v21, 16  ;;  %v448_v48 = vrot.slane %v446_v44, 1 }
  0x36   : > { %v521_v52 = vsel %vm397_vm0, %v516_v49, %v520_v50  ;;  %v524_v0 = vor.u32 %v522_v60, %v520_v50 }
  0x37   : > { %v444_v47 = vor.u32 %v442_v43, %v440_v32  ;;  %v10204_v32 = vld [vmem:[%s14571_s1 + $0x1f8] sm:$0xff] }
  0x38   : > { %1004 = vmatpush.bf16.msrb.mxu2 %v10127_v57  ;;  %v10171_v57 = vld [vmem:[%s14571_s1 + $0x178] sm:$0xff] }
  0x39   : > { %1577 = vmatpush.bf16.msrb.mxu3 %v10160_v58  ;;  %1782 = vmatpush.bf16.msrb.mxu0 %v10152_v59  ;;  %v449_v51 = vsel %vm397_vm0, %v444_v47, %v448_v48  ;;  %v450_v58 = vshrl.u32 %v11135_v37, 16 }
  0x3a   : > { %2003 = vmatpush.bf16.msrb.mxu1 %v10171_v57  ;;  %v1878_v57 = vld [vmem:[%s11005_s14 + $0x8] sm:$0xc] }
  0x3b   : > { %625 = vmatmul.bf16.gmra.mxu0 %v417_v53  ;;  %670 = vmatmul.bf16.gmra.mxu2 %v489_v54  ;;  %v11153_v53 = vld [vmem:[%s11005_s14 + $0x38] sm:$0xff]  ;;  %v10105_v54 = vld [vmem:[%s11005_s14 + $0x80] sm:$0xff]  ;;  %v452_v62 = vor.u32 %v450_v58, %v448_v48 }
  0x3c   : > { %790 = vmatmul.bf16.gmra.mxu1 %v11016_v12  ;;  %1005 = vmatpush.bf16.msrb.mxu2 %v10126_v8  ;;  %v454_v59 = vshll.u32 %v11153_v53, 16  ;;  %v526_v61 = vshll.u32 %v10105_v54, 16  ;;  %v10169_v8 = vld [vmem:[%s14571_s1 + $0x168] sm:$0xff]  ;;  %v458_v13 = vshrl.u32 %v11153_v53, 16  ;;  %v10665_v58 = vld [vmem:[%s11005_s14] sm:$0xf0] }
  0x3d   : > { %1578 = vmatpush.bf16.msrb.mxu3 %v10159_v9  ;;  %1783 = vmatpush.bf16.msrb.mxu0 %v10151_v24  ;;  %v11181_v9 = vld [vmem:[%s11005_s14 + $0x40] sm:$0xff] }
  0x3e   : > { %835 = vmatmul.bf16.gmra.mxu3 %v11022_v15  ;;  %v428_v15 = vor.u32 %v426_v10, %v424_v1  ;;  %v456_v63 = vrot.slane %v454_v59, 1  ;;  %v528_v1 = vrot.slane %v526_v61, 1  ;;  %2004 = vmatpush.bf16.msrb.mxu1 %v10170_v2  ;;  %v10106_v10 = vld [vmem:[%s11005_s14 + $0x88] sm:$0xff]  ;;  %v462_v14 = vshll.u32 %v11181_v9, 16  ;;  %v10666_v59 = vld [vmem:[%s11005_s14] sm:$0xe] }
  0x3f   : > { %v466_v34 = vshrl.u32 %v11181_v9, 16  ;;  %v10667_v2 = vor.u32 %v10666_v59, %v10665_v58 }
  0x40   : > { %v433_v19 = vsel %vm397_vm0, %v428_v15, %v432_v16  ;;  %1006 = vmatpush.bf16.msrb.mxu2 %v10125_v25  ;;  %v457_v3 = vsel %vm397_vm0, %v452_v62, %v456_v63  ;;  %v530_v15 = vshrl.u32 %v10105_v54, 16  ;;  %v534_v16 = vshll.u32 %v10106_v10, 16  ;;  %v286_v25 = vld [vmem:[%s11005_s14 + $0x90] sm:$0x1] }
  0x41   : > { %1579 = vmatpush.bf16.msrb.mxu3 %v10158_v26  ;;  %v10166_v26 = vld [vmem:[%s14571_s1 + $0x150] sm:$0xff]  ;;  %v377_v29 = vunpack.c.l.b16 %v286_v25 }
  0x42   : > { %2005 = vmatpush.bf16.msrb.mxu1 %v10169_v8  ;;  %v536_v24 = vrot.slane %v534_v16, 1  ;;  %v899_v16 = vrot.slane %v11016_v12, 1 }
  0x43   : > { %v11205_v31 = vpack.c.b16 %v377_v29, %v377_v29 }
  0x44   : > { %1007 = vmatpush.bf16.msrb.mxu2 %v10124_v41  ;;  %v1173_v41 = vld [vmem:[%s11005_s14 + $0xc] sm:$0xf] }
  0x45   : > { %1580 = vmatpush.bf16.msrb.mxu3 %v10157_v42  ;;  %v10212_v42 = vld [vmem:[%s14571_s1 + $0x238] sm:$0xff]  ;;  %v1282_v47 = vunpack.c.l.b16 %v1173_v41 }
  0x46   : > { %2006 = vmatpush.bf16.msrb.mxu1 %v10168_v11 }
  0x4a   : > { %2007 = vmatpush.bf16.msrb.mxu1 %v10167_v18 }
  0x4b   : > { %630 = vmatmul.bf16.gmra.mxu0 %v425_v4  ;;  %675 = vmatmul.bf16.gmra.mxu2 %v497_v5  ;;  %v529_v4 = vsel %vm397_vm0, %v524_v0, %v528_v1  ;;  %v10123_v5 = vld [vmem:[%s14571_s1 + $0x80] sm:$0xff] }
  0x4c   : > { %795 = vmatmul.bf16.gmra.mxu1 %v11062_v39  ;;  %1008 = vmatpush.bf16.msrb.mxu2 %v10123_v5 }
  0x4e   : > { %840 = vmatmul.bf16.gmra.mxu3 %v10100_v40  ;;  %v10150_v40 = vld [vmem:[%s14571_s1 + $0xd0] sm:$0xff]  ;;  %2008 = vmatpush.bf16.msrb.mxu1 %v10166_v26 }
  0x4f   : > { %1784 = vmatpush.bf16.msrb.mxu0 %v10150_v40  ;;  %v1172_v40 = vld [vmem:[%s11005_s14 + $0x8] sm:$0xe] }
  0x50   : > { %2648 = vmatpush.bf16.msra.mxu2 %v10204_v32  ;;  %v1281_v46 = vunpack.c.l.b16 %v1172_v40 }
  0x52   : > { %2009 = vmatpush.bf16.msrb.mxu1 %v10165_v30 }
  0x5b   : > { %635 = vmatmul.bf16.gmra.mxu0 %v433_v19  ;;  %680 = vmatmul.bf16.gmra.mxu2 %v505_v20  ;;  %v460_v19 = vor.u32 %v458_v13, %v456_v63  ;;  %v464_v20 = vrot.slane %v462_v14, 1  ;;  %v1897_v63 = vunpack.c.l.b16 %v1878_v57 }
  0x5c   : > { %800 = vmatmul.bf16.gmra.mxu1 %v11083_v55 }
  0x5d   : > { %v465_v27 = vsel %vm397_vm0, %v460_v19, %v464_v20  ;;  %v468_v43 = vor.u32 %v466_v34, %v464_v20  ;;  %v1898_v13 = vpack.c.b16 %v1282_v47, %v1897_v63  ;;  %v11251_v34 = vld [vmem:[%s11005_s14 + $0x18] sm:$0xff] }
  0x5e   : > { %845 = vmatmul.bf16.gmra.mxu3 %v10101_v56  ;;  %v10149_v56 = vld [vmem:[%s14571_s1 + $0xc8] sm:$0xff] }
  0x5f   : > { %1785 = vmatpush.bf16.msrb.mxu0 %v10149_v56  ;;  %v473_v49 = vsel %vm397_vm0, %v468_v43, %v11031_v22 }
  0x63   : > { %1786 = vmatpush.bf16.msrb.mxu0 %v10148_v17 }
  0x67   : > { %3077 = vmatpush.bf16.msra.mxu0 %v10212_v42 }
  0x6b   : > { %640 = vmatmul.bf16.gmra.mxu0 %v441_v35  ;;  %685 = vmatmul.bf16.gmra.mxu2 %v513_v36  ;;  %v10164_v35 = vld [vmem:[%s14571_s1 + $0x140] sm:$0xff]  ;;  %v538_v36 = vshrl.u32 %v10106_v10, 16 }
  0x6c   : > { %805 = vmatmul.bf16.gmra.mxu1 %v11102_v6 }
  0x6d   : > { %2010 = vmatpush.bf16.msrb.mxu1 %v10164_v35  ;;  %v540_v44 = vor.u32 %v538_v36, %v536_v24  ;;  %v1356_v36 = vshrl.u32 %v11251_v34, 16 }
  0x6e   : > { %850 = vmatmul.bf16.gmra.mxu3 %v10102_v7  ;;  %v10156_v7 = vld [vmem:[%s14571_s1 + $0x100] sm:$0xff] }
  0x6f   : > { %1581 = vmatpush.bf16.msrb.mxu3 %v10156_v7 }
  0x73   : > { %2853 = vmatpush.bf16.msra.mxu3 %v10196_v33 }
  0x7b   : > { %645 = vmatmul.bf16.gmra.mxu0 %v449_v51  ;;  %690 = vmatmul.bf16.gmra.mxu2 %v521_v52  ;;  %v1318_v51 = vpack.c.b16 %v1282_v47, %v1281_v46  ;;  %v1358_v47 = vrot.slane %v1356_v36, 1 }
  0x7c   : > { %810 = vmatmul.bf16.gmra.mxu1 %v11117_v21 }
  0x7d   : > { %v1339_v60 = vshrl.u32 %v1318_v51, 16  ;;  %v1342_v61 = vshll.u32 %v1318_v51, 16  ;;  %v1676_v18 = vrot.slane %v1318_v51, 1  ;;  %v1679_v51 = vrot.slane %v11251_v34, 1 }
  0x7e   : > { %855 = vmatmul.bf16.gmra.mxu3 %v10103_v23  ;;  %v532_v23 = vor.u32 %v530_v15, %v528_v1  ;;  %v898_v15 = vrot.slane %v10667_v2, 1 }
  0x7f   : > { %v1341_v5 = vrot.slane %v1339_v60, 1  ;;  %v1344_v7 = vrot.slane %v1342_v61, 2 }
  0x80   : > { %v537_v28 = vsel %vm397_vm0, %v532_v23, %v536_v24  ;;  %v1900_v23 = vrot.slane %v1898_v13, 2  ;;  %v900_v29 = vsel %vm897_vm1, %v898_v15, %v899_v16 }
  0x81   : > { %v1345_v17 = vor.u32 %v1344_v7, %v1341_v5 }
  0x8b   : > { %650 = vmatmul.bf16.gmra.mxu0 %v457_v3  ;;  %695 = vmatmul.bf16.gmra.mxu2 %v529_v4 }
  0x8c   : > { %815 = vmatmul.bf16.gmra.mxu1 %v11135_v37 }
  0x8e   : > { %860 = vmatmul.bf16.gmra.mxu3 %v10104_v38  ;;  %v542_v38 = vshll.u32 %v11205_v31, 16 }
  0x90   : > { %v544_v45 = vrot.slane %v542_v38, 1  ;;  %v1359_v38 = vshll.u32 %v11251_v34, 16 }
  0x92   : > { %v545_v50 = vsel %vm397_vm0, %v540_v44, %v544_v45  ;;  %v10203_v44 = vld [vmem:[%s14571_s1 + $0x1f0] sm:$0xff] }
  0x93   : > { %v10195_v45 = vld [vmem:[%s14571_s1 + $0x1b0] sm:$0xff]  ;;  %2649 = vmatpush.bf16.msra.mxu2 %v10203_v44 }
  0x94   : > { %2854 = vmatpush.bf16.msra.mxu3 %v10195_v45 }
  0x9b   : > { %655 = vmatmul.bf16.gmra.mxu0 %v465_v27  ;;  %700 = vmatmul.bf16.gmra.mxu2 %v537_v28 }
  0x9c   : > { %820 = vmatmul.bf16.gmra.mxu1 %v11153_v53 }
  0x9e   : > { %865 = vmatmul.bf16.gmra.mxu3 %v10105_v54  ;;  %v11227_v54 = vld [vmem:[%s11005_s14 + $0x10] sm:$0xff] }
  0x9f   : > { %v1347_v22 = vshrl.u32 %v11227_v54, 16  ;;  %v1350_v62 = vshll.u32 %v11227_v54, 16  ;;  %v1677_v19 = vrot.slane %v11227_v54, 1  ;;  %v1901_v24 = vrot.slane %v11227_v54, 2 }
  0xa0   : > { %v1903_v54 = vrot.slane %v11251_v34, 2 }
  0xa1   : > { %v1349_v11 = vrot.slane %v1347_v22, 1  ;;  %v1678_v12 = vsel %vm897_vm1, %v1676_v18, %v1677_v19  ;;  %v1902_v33 = vsel %vm1899_vm3, %v1900_v23, %v1901_v24  ;;  %v1680_v22 = vsel %vm897_vm1, %v1677_v19, %v1679_v51 }
  0xa2   : > { %v903_v18 = vrot.slane %v11083_v55, 1  ;;  %v11300_v55 = vld [vmem:[%s11005_s14 + $0x28] sm:$0xff] }
  0xa3   : > { %v1374_v36 = vshrl.u32 %v11300_v55, 16 }
  0xa8   : > { %v621_v48 = vpop.f32.mrf.mxu0 }
  0xa9   : > { %v786_v52 = vpop.f32.mrf.mxu1 }
  0xaa   : > { %v11229_v56 = vadd.f32 %v786_v52, %v621_v48  ;;  %v1361_v48 = vrot.slane %v1359_v38, 2  ;;  %v1377_v38 = vshll.u32 %v11300_v55, 16 }
  0xab   : > { %660 = vmatmul.bf16.gmra.mxu0 %v473_v49  ;;  %705 = vmatmul.bf16.gmra.mxu2 %v545_v50  ;;  %v901_v50 = vrot.slane %v11062_v39, 1 }
  0xac   : > { %825 = vmatmul.bf16.gmra.mxu1 %v11181_v9  ;;  %v1362_v52 = vor.u32 %v1361_v48, %v1358_v47  ;;  %v1379_v47 = vrot.slane %v1377_v38, 2 }
  0xad   : > { %v902_v61 = vsel %vm897_vm1, %v899_v16, %v901_v50 }
  0xae   : > { %870 = vmatmul.bf16.gmra.mxu3 %v10106_v10  ;;  %v666_v0 = vpop.f32.mrf.mxu2  ;;  %v1352_v10 = vrot.slane %v1350_v62, 2  ;;  %v10211_v62 = vld [vmem:[%s14571_s1 + $0x230] sm:$0xff] }
  0xaf   : > { %3078 = vmatpush.bf16.msra.mxu0 %v10211_v62 }
  0xb0   : > { %v623_v4 = vpop.f32.mrf.mxu0  ;;  %v1353_v20 = vor.u32 %v1352_v10, %v1349_v11 }
  0xb1   : > { %v831_v1 = vpop.f32.mrf.mxu3  ;;  %v788_v8 = vpop.f32.mrf.mxu1 }
  0xb2   : > { %v11237_v3 = vadd.f32 %v831_v1, %v666_v0  ;;  %v11239_v14 = vadd.f32 %v788_v8, %v623_v4  ;;  %v1354_v32 = vsel %vm1337_vm2, %v1345_v17, %v1353_v20  ;;  %v1363_v39 = vsel %vm1337_vm2, %v1353_v20, %v1362_v52  ;;  %v11280_v1 = vld [vmem:[%s11005_s14 + $0x20] sm:$0xff] }
  0xb3   : > { %v1904_v0 = vsel %vm1899_vm3, %v1901_v24, %v1903_v54  ;;  %v1365_v4 = vshrl.u32 %v11280_v1, 16  ;;  %v1368_v5 = vshll.u32 %v11280_v1, 16  ;;  %v1681_v19 = vrot.slane %v11280_v1, 1 }
  0xb4   : > { %v1905_v23 = vrot.slane %v11280_v1, 2 }
  0xb5   : > { %v1367_v15 = vrot.slane %v1365_v4, 1  ;;  %v1370_v16 = vrot.slane %v1368_v5, 2  ;;  %v11326_v4 = vld [vmem:[%s11005_s14 + $0x30] sm:$0xff] }
  0xb6   : > { %v668_v25 = vpop.f32.mrf.mxu2 }
  0xb7   : > { %v1371_v20 = vor.u32 %v1370_v16, %v1367_v15 }
  0xb8   : > { %v626_v28 = vpop.f32.mrf.mxu0 }
  0xb9   : > { %v833_v26 = vpop.f32.mrf.mxu3  ;;  %v791_v30 = vpop.f32.mrf.mxu1 }
  0xba   : > { %v11244_v27 = vadd.f32 %v833_v26, %v668_v25  ;;  %v11253_v35 = vadd.f32 %v791_v30, %v626_v28 }
  0xbb   : > { %1009 = vmatmul.bf16.vlgmr.msrb.gmra.mxu2 %v900_v29  ;;  %1787 = vmatmul.bf16.vlgmr.msrb.gmra.mxu0 %v1678_v12  ;;  %v904_v29 = vsel %vm897_vm1, %v901_v50, %v903_v18  ;;  %v1682_v12 = vsel %vm897_vm1, %v1679_v51, %v1681_v19  ;;  %v10202_v50 = vld [vmem:[%s14571_s1 + $0x1e8] sm:$0xff] }
  0xbc   : > { %2011 = vmatmul.bf16.vlgmr.msrb.gmra.mxu1 %v1902_v33  ;;  %v1906_v33 = vsel %vm1899_vm3, %v1903_v54, %v1905_v23  ;;  %v10194_v51 = vld [vmem:[%s14571_s1 + $0x1a8] sm:$0xff]  ;;  %v1683_v54 = vrot.slane %v11300_v55, 1  ;;  %2650 = vmatpush.bf16.msra.mxu2 %v10202_v50 }
  0xbd   : > { %2855 = vmatpush.bf16.msra.mxu3 %v10194_v51 }
  0xbe   : > { %1582 = vmatmul.bf16.vlgmr.msrb.gmra.mxu3 %v1354_v32  ;;  %v671_v40 = vpop.f32.mrf.mxu2  ;;  %v1372_v32 = vsel %vm1337_vm2, %v1362_v52, %v1371_v20  ;;  %v905_v52 = vrot.slane %v11102_v6, 1 }
  0xc0   : > { %v628_v43 = vpop.f32.mrf.mxu0 }
  0xc1   : > { %v836_v41 = vpop.f32.mrf.mxu3  ;;  %v793_v46 = vpop.f32.mrf.mxu1 }
  0xc2   : > { %v11257_v42 = vadd.f32 %v836_v41, %v671_v40  ;;  %v11265_v49 = vadd.f32 %v793_v46, %v628_v43  ;;  %v1376_v46 = vrot.slane %v1374_v36, 1 }
  0xc6   : > { %v673_v57 = vpop.f32.mrf.mxu2 }
  0xc8   : > { %v631_v60 = vpop.f32.mrf.mxu0 }
  0xc9   : > { %v838_v58 = vpop.f32.mrf.mxu3  ;;  %v796_v63 = vpop.f32.mrf.mxu1 }
  0xca   : > { %v11270_v59 = vadd.f32 %v838_v58, %v673_v57  ;;  %v11282_v2 = vadd.f32 %v796_v63, %v631_v60  ;;  %v1380_v57 = vor.u32 %v1379_v47, %v1376_v46  ;;  %v1907_v58 = vrot.slane %v11300_v55, 2 }
  0xcb   : > { %1014 = vmatmul.bf16.gmra.mxu2 %v902_v61  ;;  %1792 = vmatmul.bf16.gmra.mxu0 %v1680_v22  ;;  %v906_v63 = vsel %vm897_vm1, %v903_v18, %v905_v52 }
  0xcc   : > { %2016 = vmatmul.bf16.gmra.mxu1 %v1904_v0  ;;  %v1381_v1 = vsel %vm1337_vm2, %v1371_v20, %v1380_v57  ;;  %v1908_v6 = vsel %vm1899_vm3, %v1905_v23, %v1907_v58 }
  0xce   : > { %1587 = vmatmul.bf16.gmra.mxu3 %v1363_v39  ;;  %v676_v7 = vpop.f32.mrf.mxu2  ;;  %v1684_v39 = vsel %vm897_vm1, %v1681_v19, %v1683_v54 }
  0xd0   : > { %v633_v10 = vpop.f32.mrf.mxu0 }
  0xd1   : > { %v841_v8 = vpop.f32.mrf.mxu3  ;;  %v798_v13 = vpop.f32.mrf.mxu1 }
  0xd2   : > { %v11286_v11 = vadd.f32 %v841_v8, %v676_v7  ;;  %v11288_v17 = vadd.f32 %v798_v13, %v633_v10  ;;  %v10210_v7 = vld [vmem:[%s14571_s1 + $0x228] sm:$0xff]  ;;  %v1383_v8 = vshrl.u32 %v11326_v4, 16  ;;  %v1386_v10 = vshll.u32 %v11326_v4, 16 }
  0xd3   : > { %3079 = vmatpush.bf16.msra.mxu0 %v10210_v7 }
  0xd4   : > { %v1385_v20 = vrot.slane %v1383_v8, 1  ;;  %v1388_v23 = vrot.slane %v1386_v10, 2 }
  0xd6   : > { %v678_v24 = vpop.f32.mrf.mxu2 }
  0xd8   : > { %v636_v28 = vpop.f32.mrf.mxu0 }
  0xd9   : > { %v843_v25 = vpop.f32.mrf.mxu3  ;;  %v801_v30 = vpop.f32.mrf.mxu1 }
  0xda   : > { %v11293_v26 = vadd.f32 %v843_v25, %v678_v24  ;;  %v11302_v34 = vadd.f32 %v801_v30, %v636_v28  ;;  %v907_v25 = vrot.slane %v11117_v21, 1  ;;  %v1685_v28 = vrot.slane %v11326_v4, 1  ;;  %v11349_v21 = vld [vmem:[%s11005_s14 + $0x38] sm:$0xff] }
  0xdb   : > { %1019 = vmatmul.bf16.gmra.mxu2 %v904_v29  ;;  %1797 = vmatmul.bf16.gmra.mxu0 %v1682_v12  ;;  %v1389_v29 = vor.u32 %v1388_v23, %v1385_v20  ;;  %v1909_v12 = vrot.slane %v11326_v4, 2  ;;  %v1392_v46 = vshrl.u32 %v11349_v21, 16  ;;  %v1395_v47 = vshll.u32 %v11349_v21, 16  ;;  %v11375_v20 = vld [vmem:[%s11005_s14 + $0x40] sm:$0xff] }
  0xdc   : > { %2021 = vmatmul.bf16.gmra.mxu1 %v1906_v33  ;;  %v908_v36 = vsel %vm897_vm1, %v905_v52, %v907_v25  ;;  %v1686_v38 = vsel %vm897_vm1, %v1683_v54, %v1685_v28 }
  0xde   : > { %1592 = vmatmul.bf16.gmra.mxu3 %v1372_v32  ;;  %v681_v40 = vpop.f32.mrf.mxu2 }
  0xe0   : > { %v638_v44 = vpop.f32.mrf.mxu0 }
  0xe1   : > { %v846_v41 = vpop.f32.mrf.mxu3  ;;  %v803_v45 = vpop.f32.mrf.mxu1 }
  0xe2   : > { %v11306_v43 = vadd.f32 %v846_v41, %v681_v40  ;;  %v11308_v48 = vadd.f32 %v803_v45, %v638_v44  ;;  %v1390_v41 = vsel %vm1337_vm2, %v1380_v57, %v1389_v29  ;;  %v1910_v44 = vsel %vm1899_vm3, %v1907_v58, %v1909_v12 }
  0xe3   : > { %v1397_v58 = vrot.slane %v1395_v47, 2  ;;  %v1913_v47 = vrot.slane %v11375_v20, 2 }
  0xe6   : > { %v683_v60 = vpop.f32.mrf.mxu2 }
  0xe8   : > { %v641_v62 = vpop.f32.mrf.mxu0 }
  0xe9   : > { %v848_v61 = vpop.f32.mrf.mxu3  ;;  %v806_v0 = vpop.f32.mrf.mxu1 }
  0xea   : > { %v11319_v22 = vadd.f32 %v848_v61, %v683_v60  ;;  %v11328_v5 = vadd.f32 %v806_v0, %v641_v62  ;;  %v1394_v60 = vrot.slane %v1392_v46, 1  ;;  %v909_v62 = vrot.slane %v11135_v37, 1  ;;  %v10193_v37 = vld [vmem:[%s14571_s1 + $0x1a0] sm:$0xff] }
  0xeb   : > { %1024 = vmatmul.bf16.gmra.mxu2 %v906_v63  ;;  %1802 = vmatmul.bf16.gmra.mxu0 %v1684_v39  ;;  %v1687_v63 = vrot.slane %v11349_v21, 1  ;;  %v1911_v0 = vrot.slane %v11349_v21, 2  ;;  %v1689_v21 = vrot.slane %v11375_v20, 1 }
  0xec   : > { %2026 = vmatmul.bf16.gmra.mxu1 %v1908_v6  ;;  %v1398_v39 = vor.u32 %v1397_v58, %v1394_v60  ;;  %v910_v8 = vsel %vm897_vm1, %v907_v25, %v909_v62  ;;  %2856 = vmatpush.bf16.msra.mxu3 %v10193_v37  ;;  %v1401_v25 = vshrl.u32 %v11375_v20, 16 }
  0xed   : > { %v1688_v10 = vsel %vm897_vm1, %v1685_v28, %v1687_v63  ;;  %v1404_v28 = vshll.u32 %v11375_v20, 16  ;;  %v1690_v58 = vsel %vm897_vm1, %v1687_v63, %v1689_v21  ;;  %v913_v20 = vrot.slane %v11181_v9, 1  ;;  %v11418_v9 = vld [vmem:[%s11005_s14 + $0x50] sm:$0xff] }
  0xee   : > { %1597 = vmatmul.bf16.gmra.mxu3 %v1381_v1  ;;  %v686_v13 = vpop.f32.mrf.mxu2 }
  0xf0   : > { %v643_v18 = vpop.f32.mrf.mxu0 }
  0xf1   : > { %v851_v15 = vpop.f32.mrf.mxu3  ;;  %v808_v19 = vpop.f32.mrf.mxu1 }
  0xf2   : > { %v11335_v16 = vadd.f32 %v851_v15, %v686_v13  ;;  %v11337_v24 = vadd.f32 %v808_v19, %v643_v18  ;;  %v10201_v13 = vld [vmem:[%s14571_s1 + $0x1e0] sm:$0xff]  ;;  %v1399_v18 = vsel %vm1337_vm2, %v1389_v29, %v1398_v39  ;;  %v1912_v19 = vsel %vm1899_vm3, %v1909_v12, %v1911_v0 }
  0xf3   : > { %2651 = vmatpush.bf16.msra.mxu2 %v10201_v13  ;;  %v10209_v12 = vld [vmem:[%s14571_s1 + $0x220] sm:$0xff] }
  0xf4   : > { %3080 = vmatpush.bf16.msra.mxu0 %v10209_v12 }
  0xf6   : > { %v688_v30 = vpop.f32.mrf.mxu2 }
  0xf8   : > { %v646_v55 = vpop.f32.mrf.mxu0 }
  0xf9   : > { %v853_v32 = vpop.f32.mrf.mxu3  ;;  %v811_v40 = vpop.f32.mrf.mxu1 }
  0xfa   : > { %v11342_v33 = vadd.f32 %v853_v32, %v688_v30  ;;  %v11351_v45 = vadd.f32 %v811_v40, %v646_v55  ;;  %v1406_v40 = vrot.slane %v1404_v28, 2 }
  0xfb   : > { %1029 = vmatmul.bf16.gmra.mxu2 %v908_v36  ;;  %1807 = vmatmul.bf16.gmra.mxu0 %v1686_v38  ;;  %v1403_v38 = vrot.slane %v1401_v25, 1 }
  0xfc   : > { %2031 = vmatmul.bf16.gmra.mxu1 %v1910_v44  ;;  %v911_v44 = vrot.slane %v11153_v53, 1  ;;  %v11398_v53 = vld [vmem:[%s11005_s14 + $0x48] sm:$0xff] }
  0xfd   : > { %v1407_v46 = vor.u32 %v1406_v40, %v1403_v38  ;;  %v1413_v13 = vshll.u32 %v11398_v53, 16  ;;  %v1691_v25 = vrot.slane %v11398_v53, 1 }
  0xfe   : > { %1602 = vmatmul.bf16.gmra.mxu3 %v1390_v41  ;;  %v691_v50 = vpop.f32.mrf.mxu2  ;;  %v912_v60 = vsel %vm897_vm1, %v909_v62, %v911_v44  ;;  %v914_v38 = vsel %vm897_vm1, %v911_v44, %v913_v20  ;;  %v10200_v44 = vld [vmem:[%s14571_s1 + $0x1d8] sm:$0xff] }
  0xff   : > { %v1692_v40 = vsel %vm897_vm1, %v1689_v21, %v1691_v25  ;;  %v10192_v21 = vld [vmem:[%s14571_s1 + $0x198] sm:$0xff]  ;;  %2652 = vmatpush.bf16.msra.mxu2 %v10200_v44 }
 0x100   : > { %v648_v54 = vpop.f32.mrf.mxu0  ;;  %2857 = vmatpush.bf16.msra.mxu3 %v10192_v21 }
 0x101   : > { %v856_v51 = vpop.f32.mrf.mxu3  ;;  %v813_v57 = vpop.f32.mrf.mxu1 }
 0x102   : > { %v11355_v52 = vadd.f32 %v856_v51, %v691_v50  ;;  %v11357_v61 = vadd.f32 %v813_v57, %v648_v54 }
 0x106   : > { %v693_v1 = vpop.f32.mrf.mxu2 }
 0x108   : > { %v651_v7 = vpop.f32.mrf.mxu0 }
 0x109   : > { %v858_v6 = vpop.f32.mrf.mxu3  ;;  %v816_v15 = vpop.f32.mrf.mxu1 }
 0x10a   : > { %v11362_v4 = vadd.f32 %v858_v6, %v693_v1  ;;  %v11377_v23 = vadd.f32 %v816_v15, %v651_v7  ;;  %v1408_v6 = vsel %vm1337_vm2, %v1398_v39, %v1407_v46  ;;  %v1914_v7 = vsel %vm1899_vm3, %v1911_v0, %v1913_v47 }
 0x10b   : > { %1034 = vmatmul.bf16.gmra.mxu2 %v910_v8  ;;  %1812 = vmatmul.bf16.gmra.mxu0 %v1688_v10  ;;  %v1410_v10 = vshrl.u32 %v11398_v53, 16  ;;  %v1415_v0 = vrot.slane %v1413_v13, 2 }
 0x10c   : > { %2036 = vmatmul.bf16.gmra.mxu1 %v1912_v19 }
 0x10e   : > { %1607 = vmatmul.bf16.gmra.mxu3 %v1399_v18  ;;  %v696_v30 = vpop.f32.mrf.mxu2  ;;  %v1412_v18 = vrot.slane %v1410_v10, 1 }
 0x110   : > { %v653_v29 = vpop.f32.mrf.mxu0  ;;  %v1416_v28 = vor.u32 %v1415_v0, %v1412_v18  ;;  %v10208_v18 = vld [vmem:[%s14571_s1 + $0x218] sm:$0xff] }
 0x111   : > { %v861_v32 = vpop.f32.mrf.mxu3  ;;  %v818_v36 = vpop.f32.mrf.mxu1  ;;  %3081 = vmatpush.bf16.msra.mxu0 %v10208_v18 }
 0x112   : > { %v11381_v55 = vadd.f32 %v861_v32, %v696_v30  ;;  %v11386_v41 = vadd.f32 %v818_v36, %v653_v29  ;;  %v1915_v30 = vrot.slane %v11398_v53, 2 }
 0x116   : > { %v698_v50 = vpop.f32.mrf.mxu2 }
 0x118   : > { %v656_v57 = vpop.f32.mrf.mxu0 }
 0x119   : > { %v863_v51 = vpop.f32.mrf.mxu3  ;;  %v821_v1 = vpop.f32.mrf.mxu1 }
 0x11a   : > { %v11391_v54 = vadd.f32 %v863_v51, %v698_v50  ;;  %v11400_v8 = vadd.f32 %v821_v1, %v656_v57  ;;  %v1417_v51 = vsel %vm1337_vm2, %v1407_v46, %v1416_v28  ;;  %v1916_v57 = vsel %vm1899_vm3, %v1913_v47, %v1915_v30 }
 0x11b   : > { %1039 = vmatmul.bf16.gmra.mxu2 %v912_v60  ;;  %1817 = vmatmul.bf16.gmra.mxu0 %v1690_v58  ;;  %v1419_v46 = vshrl.u32 %v11418_v9, 16  ;;  %v1422_v47 = vshll.u32 %v11418_v9, 16 }
 0x11c   : > { %2041 = vmatmul.bf16.gmra.mxu1 %v1914_v7 }
 0x11d   : > { %v1421_v10 = vrot.slane %v1419_v46, 1  ;;  %v1424_v13 = vrot.slane %v1422_v47, 2  ;;  %v11447_v46 = vld [vmem:[%s11005_s14 + $0x58] sm:$0xff] }
 0x11e   : > { %1612 = vmatmul.bf16.gmra.mxu3 %v1408_v6  ;;  %v701_v62 = vpop.f32.mrf.mxu2  ;;  %v1431_v47 = vshll.u32 %v11447_v46, 16 }
 0x11f   : > { %v1425_v0 = vor.u32 %v1424_v13, %v1421_v10 }
 0x120   : > { %v658_v15 = vpop.f32.mrf.mxu0 }
 0x121   : > { %v866_v37 = vpop.f32.mrf.mxu3  ;;  %v823_v39 = vpop.f32.mrf.mxu1 }
 0x122   : > { %v11404_v63 = vadd.f32 %v866_v37, %v701_v62  ;;  %v11406_v19 = vadd.f32 %v823_v39, %v658_v15  ;;  %v10895_v37 = vld [vmem:[%s11005_s14 + $0x48] sm:$0xff]  ;;  %v1693_v39 = vrot.slane %v11418_v9, 1 }
 0x123   : > { %v915_v15 = vrot.slane %v10895_v37, 1  ;;  %v10896_v37 = vld [vmem:[%s11005_s14 + $0x50] sm:$0xff] }
 0x124   : > { %v917_v18 = vrot.slane %v10896_v37, 1 }
 0x126   : > { %v703_v32 = vpop.f32.mrf.mxu2 }
 0x128   : > { %v661_v36 = vpop.f32.mrf.mxu0 }
 0x129   : > { %v868_v29 = vpop.f32.mrf.mxu3  ;;  %v826_v50 = vpop.f32.mrf.mxu1 }
 0x12a   : > { %v11411_v12 = vadd.f32 %v868_v29, %v703_v32  ;;  %v11420_v60 = vadd.f32 %v826_v50, %v661_v36  ;;  %v1917_v32 = vrot.slane %v11418_v9, 2  ;;  %v916_v50 = vsel %vm897_vm1, %v913_v20, %v915_v15 }
 0x12b   : > { %1044 = vmatmul.bf16.gmra.mxu2 %v914_v38  ;;  %1822 = vmatmul.bf16.gmra.mxu0 %v1692_v40  ;;  %v1428_v9 = vshrl.u32 %v11447_v46, 16 }
 0x12c   : > { %2046 = vmatmul.bf16.gmra.mxu1 %v1916_v57  ;;  %v1426_v57 = vsel %vm1337_vm2, %v1416_v28, %v1425_v0  ;;  %v1918_v21 = vsel %vm1899_vm3, %v1915_v30, %v1917_v32  ;;  %v1433_v30 = vrot.slane %v1431_v47, 2 }
 0x12e   : > { %1617 = vmatmul.bf16.gmra.mxu3 %v1417_v51  ;;  %v706_v58 = vpop.f32.mrf.mxu2  ;;  %v1694_v51 = vsel %vm897_vm1, %v1691_v25, %v1693_v39 }
 0x130   : > { %v663_v7 = vpop.f32.mrf.mxu0 }
 0x131   : > { %v871_v1 = vpop.f32.mrf.mxu3  ;;  %v828_v53 = vpop.f32.mrf.mxu1 }
 0x132   : > { %v11430_v6 = vadd.f32 %v871_v1, %v706_v58  ;;  %v11432_v62 = vadd.f32 %v828_v53, %v663_v7  ;;  %v1430_v53 = vrot.slane %v1428_v9, 1  ;;  %v918_v9 = vsel %vm897_vm1, %v915_v15, %v917_v18 }
 0x136   : > { %v708_v29 = vpop.f32.mrf.mxu2 }
 0x138   : > { %v1788_v40 = vpop.f32.mrf.mxu0 }
 0x139   : > { %v873_v36 = vpop.f32.mrf.mxu3  ;;  %v2012_v44 = vpop.f32.mrf.mxu1 }
 0x13a   : > { %v11440_v38 = vadd.f32 %v873_v36, %v708_v29  ;;  %v1695_v29 = vrot.slane %v11447_v46, 1  ;;  %v10245_v36 = vld [vmem:[%s14573_s3 + $0x78] sm:$0xff] }
 0x13b   : > { %1049 = vmatmul.bf16.gmra.mxu2 %v916_v50  ;;  %1827 = vmatmul.bf16.gmra.mxu0 %v1694_v51  ;;  %v1434_v50 = vor.u32 %v1433_v30, %v1430_v53 }
 0x13c   : > { %2051 = vmatmul.bf16.gmra.mxu1 %v1918_v21  ;;  %v1696_v47 = vsel %vm897_vm1, %v1693_v39, %v1695_v29 }
 0x13d   : > { %5176 = vmatpush.bf16.msra.mxu1 %v10245_v36 }
 0x13e   : > { %1622 = vmatmul.bf16.gmra.mxu3 %v1426_v57  ;;  %v1010_v58 = vpop.f32.mrf.mxu2 }
 0x13f   : > { %v1100_v20 = vadd.f32 %v1010_v58, %v11229_v56  ;;  %v1919_v56 = vrot.slane %v11447_v46, 2  ;;  %v1435_v58 = vsel %vm1337_vm2, %v1425_v0, %v1434_v50 }
 0x140   : > { %v1790_v28 = vpop.f32.mrf.mxu0 }
 0x141   : > { %v1583_v25 = vpop.f32.mrf.mxu3  ;;  %v2014_v7 = vpop.f32.mrf.mxu1 }
 0x142   : > { %v1789_v1 = vadd.f32 %v1788_v40, %v1583_v25  ;;  %v1920_v25 = vsel %vm1899_vm3, %v1917_v32, %v1919_v56 }
 0x144   : > { %v2102_v10 = vadd.f32 %v2012_v44, %v1789_v1  ;;  %v11466_v1 = vld [vmem:[%s11005_s14 + $0x60] sm:$0xff] }
 0x145   : > { %v1440_v15 = vshll.u32 %v11466_v1, 16 }
 0x146   : > { %v11452_v13 = vadd.f32 %v2102_v10, %v1100_v20  ;;  %v1012_v40 = vpop.f32.mrf.mxu2  ;;  %v10191_v10 = vld [vmem:[%s14571_s1 + $0x190] sm:$0xff] }
 0x147   : > { %v1101_v51 = vadd.f32 %v1012_v40, %v11239_v14  ;;  %v1437_v14 = vshrl.u32 %v11466_v1, 16  ;;  %v1442_v40 = vrot.slane %v1440_v15, 2  ;;  %2858 = vmatpush.bf16.msra.mxu3 %v10191_v10 }
 0x148   : > { %v1793_v21 = vpop.f32.mrf.mxu0 }
 0x149   : > { %v1585_v57 = vpop.f32.mrf.mxu3  ;;  %v2017_v20 = vpop.f32.mrf.mxu1  ;;  %v1439_v36 = vrot.slane %v1437_v14, 1 }
 0x14a   : > { %v1791_v44 = vadd.f32 %v1790_v28, %v1585_v57 }
 0x14b   : > { %1054 = vmatmul.bf16.gmra.mxu2 %v918_v9  ;;  %1832 = vmatmul.bf16.gmra.mxu0 %v1696_v47  ;;  %v1443_v9 = vor.u32 %v1442_v40, %v1439_v36  ;;  %v1921_v47 = vrot.slane %v11466_v1, 2 }
 0x14c   : > { %v2103_v53 = vadd.f32 %v2014_v7, %v1791_v44  ;;  %2056 = vmatmul.bf16.gmra.mxu1 %v1920_v25  ;;  %v10199_v7 = vld [vmem:[%s14571_s1 + $0x1d0] sm:$0xff] }
 0x14d   : > { %2653 = vmatpush.bf16.msra.mxu2 %v10199_v7  ;;  %v1922_v7 = vsel %vm1899_vm3, %v1919_v56, %v1921_v47 }
 0x14e   : > { %v11468_v46 = vadd.f32 %v2103_v53, %v1101_v51  ;;  %1627 = vmatmul.bf16.gmra.mxu3 %v1435_v58  ;;  %v1015_v39 = vpop.f32.mrf.mxu2 }
 0x14f   : > { %v1102_v0 = vadd.f32 %v1015_v39, %v11253_v35  ;;  %v10897_v35 = vld [vmem:[%s11005_s14 + $0x58] sm:$0xff] }
 0x150   : > { %v1795_v32 = vpop.f32.mrf.mxu0  ;;  %v919_v44 = vrot.slane %v10897_v35, 1 }
 0x151   : > { %v1588_v28 = vpop.f32.mrf.mxu3  ;;  %v2019_v37 = vpop.f32.mrf.mxu1 }
 0x152   : > { %v1794_v30 = vadd.f32 %v1793_v21, %v1588_v28  ;;  %v1697_v21 = vrot.slane %v11466_v1, 1  ;;  %v1444_v28 = vsel %vm1337_vm2, %v1434_v50, %v1443_v9  ;;  %v11493_v1 = vld [vmem:[%s11005_s14 + $0x68] sm:$0xff] }
 0x154   : > { %v2104_v51 = vadd.f32 %v2017_v20, %v1794_v30  ;;  %v920_v20 = vsel %vm897_vm1, %v917_v18, %v919_v44  ;;  %v1698_v15 = vsel %vm897_vm1, %v1695_v29, %v1697_v21  ;;  %v1446_v18 = vshrl.u32 %v11493_v1, 16 }
 0x155   : > { %v1449_v29 = vshll.u32 %v11493_v1, 16 }
 0x156   : > { %v11479_v57 = vadd.f32 %v2104_v51, %v1102_v0  ;;  %v1017_v58 = vpop.f32.mrf.mxu2  ;;  %v10207_v0 = vld [vmem:[%s14571_s1 + $0x210] sm:$0xff] }
 0x157   : > { %v1103_v25 = vadd.f32 %v1017_v58, %v11265_v49  ;;  %3082 = vmatpush.bf16.msra.mxu0 %v10207_v0  ;;  %v1451_v35 = vrot.slane %v1449_v29, 2 }
 0x158   : > { %v1798_v14 = vpop.f32.mrf.mxu0 }
 0x159   : > { %v1590_v53 = vpop.f32.mrf.mxu3  ;;  %v2022_v30 = vpop.f32.mrf.mxu1 }
 0x15a   : > { %v1796_v39 = vadd.f32 %v1795_v32, %v1590_v53 }
 0x15b   : > { %1059 = vmatmul.bf16.gmra.mxu2 %v920_v20  ;;  %1837 = vmatmul.bf16.gmra.mxu0 %v1698_v15  ;;  %v1699_v20 = vrot.slane %v11493_v1, 1  ;;  %v10244_v15 = vld [vmem:[%s14573_s3 + $0x70] sm:$0xff] }
 0x15c   : > { %v2105_v10 = vadd.f32 %v2019_v37, %v1796_v39  ;;  %2061 = vmatmul.bf16.gmra.mxu1 %v1922_v7  ;;  %v1448_v37 = vrot.slane %v1446_v18, 1 }
 0x15d   : > { %5177 = vmatpush.bf16.msra.mxu1 %v10244_v15  ;;  %v1700_v29 = vsel %vm897_vm1, %v1697_v21, %v1699_v20 }
 0x15e   : > { %v11495_v49 = vadd.f32 %v2105_v10, %v1103_v25  ;;  %1632 = vmatmul.bf16.gmra.mxu3 %v1444_v28  ;;  %v1020_v32 = vpop.f32.mrf.mxu2  ;;  %v10898_v25 = vld [vmem:[%s11005_s14 + $0x60] sm:$0xff]  ;;  %v1452_v0 = vor.u32 %v1451_v35, %v1448_v37 }
 0x15f   : > { %v1104_v50 = vadd.f32 %v1020_v32, %v11282_v2  ;;  %v921_v39 = vrot.slane %v10898_v25, 1  ;;  %v1923_v2 = vrot.slane %v11493_v1, 2 }
 0x160   : > { %v1800_v40 = vpop.f32.mrf.mxu0  ;;  %v1453_v32 = vsel %vm1337_vm2, %v1443_v9, %v1452_v0 }
 0x161   : > { %v1593_v36 = vpop.f32.mrf.mxu3  ;;  %v2024_v51 = vpop.f32.mrf.mxu1  ;;  %v922_v18 = vsel %vm897_vm1, %v919_v44, %v921_v39 }
 0x162   : > { %v1799_v56 = vadd.f32 %v1798_v14, %v1593_v36  ;;  %v1924_v36 = vsel %vm1899_vm3, %v1921_v47, %v1923_v2 }
 0x164   : > { %v2106_v58 = vadd.f32 %v2022_v30, %v1799_v56  ;;  %v11514_v56 = vld [vmem:[%s11005_s14 + $0x70] sm:$0xff] }
 0x165   : > { %v1458_v44 = vshll.u32 %v11514_v56, 16 }
 0x166   : > { %v11500_v53 = vadd.f32 %v2106_v58, %v1104_v50  ;;  %v1022_v14 = vpop.f32.mrf.mxu2 }
 0x167   : > { %v1105_v28 = vadd.f32 %v1022_v14, %v11288_v17  ;;  %v1455_v17 = vshrl.u32 %v11514_v56, 16 }
 0x168   : > { %v1803_v10 = vpop.f32.mrf.mxu0 }
 0x169   : > { %v1595_v7 = vpop.f32.mrf.mxu3  ;;  %v2027_v50 = vpop.f32.mrf.mxu1  ;;  %v1457_v25 = vrot.slane %v1455_v17, 1 }
 0x16a   : > { %v1801_v30 = vadd.f32 %v1800_v40, %v1595_v7 }
 0x16b   : > { %1064 = vmatmul.bf16.gmra.mxu2 %v922_v18  ;;  %1842 = vmatmul.bf16.gmra.mxu0 %v1700_v29  ;;  %v10198_v18 = vld [vmem:[%s14571_s1 + $0x1c8] sm:$0xff]  ;;  %v1925_v29 = vrot.slane %v11514_v56, 2 }
 0x16c   : > { %v2107_v37 = vadd.f32 %v2024_v51, %v1801_v30  ;;  %2066 = vmatmul.bf16.gmra.mxu1 %v1924_v36  ;;  %v1460_v51 = vrot.slane %v1458_v44, 2  ;;  %v1701_v30 = vrot.slane %v11514_v56, 1  ;;  %2654 = vmatpush.bf16.msra.mxu2 %v10198_v18 }
 0x16e   : > { %v11516_v1 = vadd.f32 %v2107_v37, %v1105_v28  ;;  %1637 = vmatmul.bf16.gmra.mxu3 %v1453_v32  ;;  %v1025_v21 = vpop.f32.mrf.mxu2  ;;  %v10899_v28 = vld [vmem:[%s11005_s14 + $0x68] sm:$0xff] }
 0x16f   : > { %v1106_v9 = vadd.f32 %v1025_v21, %v11302_v34  ;;  %v923_v7 = vrot.slane %v10899_v28, 1  ;;  %v10190_v34 = vld [vmem:[%s14571_s1 + $0x188] sm:$0xff]  ;;  %v1702_v21 = vsel %vm897_vm1, %v1699_v20, %v1701_v30 }
 0x170   : > { %v1805_v47 = vpop.f32.mrf.mxu0  ;;  %2859 = vmatpush.bf16.msra.mxu3 %v10190_v34 }
 0x171   : > { %v1598_v40 = vpop.f32.mrf.mxu3  ;;  %v2029_v58 = vpop.f32.mrf.mxu1  ;;  %v924_v44 = vsel %vm897_vm1, %v921_v39, %v923_v7 }
 0x172   : > { %v1804_v35 = vadd.f32 %v1803_v10, %v1598_v40  ;;  %v1461_v10 = vor.u32 %v1460_v51, %v1457_v25  ;;  %v11538_v25 = vld [vmem:[%s11005_s14 + $0x78] sm:$0xff] }
 0x173   : > { %v1464_v39 = vshrl.u32 %v11538_v25, 16  ;;  %v1467_v20 = vshll.u32 %v11538_v25, 16 }
 0x174   : > { %v2108_v15 = vadd.f32 %v2027_v50, %v1804_v35  ;;  %v1926_v35 = vsel %vm1899_vm3, %v1923_v2, %v1925_v29 }
 0x175   : > { %v1466_v18 = vrot.slane %v1464_v39, 1  ;;  %v1469_v34 = vrot.slane %v1467_v20, 2 }
 0x176   : > { %v11521_v14 = vadd.f32 %v2108_v15, %v1106_v9  ;;  %v1027_v32 = vpop.f32.mrf.mxu2  ;;  %v1462_v9 = vsel %vm1337_vm2, %v1452_v0, %v1461_v10 }
 0x177   : > { %v1107_v50 = vadd.f32 %v1027_v32, %v11308_v48  ;;  %v10206_v48 = vld [vmem:[%s14571_s1 + $0x208] sm:$0xff] }
 0x178   : > { %v1808_v17 = vpop.f32.mrf.mxu0  ;;  %3083 = vmatpush.bf16.msra.mxu0 %v10206_v48 }
 0x179   : > { %v1600_v36 = vpop.f32.mrf.mxu3  ;;  %v2032_v40 = vpop.f32.mrf.mxu1 }
 0x17a   : > { %v1806_v37 = vadd.f32 %v1805_v47, %v1600_v36  ;;  %v10900_v36 = vld [vmem:[%s11005_s14 + $0x70] sm:$0xff] }
 0x17b   : > { %1069 = vmatmul.bf16.gmra.mxu2 %v924_v44  ;;  %1847 = vmatmul.bf16.gmra.mxu0 %v1702_v21  ;;  %v1703_v44 = vrot.slane %v11538_v25, 1  ;;  %v1470_v21 = vor.u32 %v1469_v34, %v1466_v18 }
 0x17c   : > { %v2109_v56 = vadd.f32 %v2029_v58, %v1806_v37  ;;  %2071 = vmatmul.bf16.gmra.mxu1 %v1926_v35  ;;  %v925_v37 = vrot.slane %v10900_v36, 1 }
 0x17d   : > { %v1471_v20 = vsel %vm1337_vm2, %v1461_v10, %v1470_v21 }
 0x17e   : > { %v11540_v51 = vadd.f32 %v2109_v56, %v1107_v50  ;;  %1642 = vmatmul.bf16.gmra.mxu3 %v1462_v9  ;;  %v1030_v0 = vpop.f32.mrf.mxu2  ;;  %v1927_v9 = vrot.slane %v11538_v25, 2  ;;  %v926_v39 = vsel %vm897_vm1, %v923_v7, %v925_v37 }
 0x17f   : > { %v1108_v2 = vadd.f32 %v1030_v0, %v11328_v5 }
 0x180   : > { %v1810_v15 = vpop.f32.mrf.mxu0 }
 0x181   : > { %v1603_v47 = vpop.f32.mrf.mxu3  ;;  %v2034_v28 = vpop.f32.mrf.mxu1 }
 0x182   : > { %v1809_v58 = vadd.f32 %v1808_v17, %v1603_v47  ;;  %v11559_v47 = vld [vmem:[%s11005_s14 + $0x80] sm:$0xff] }
 0x183   : > { %v1473_v7 = vshrl.u32 %v11559_v47, 16 }
 0x184   : > { %v2110_v32 = vadd.f32 %v2032_v40, %v1809_v58  ;;  %v1704_v40 = vsel %vm897_vm1, %v1701_v30, %v1703_v44  ;;  %v1476_v30 = vshll.u32 %v11559_v47, 16 }
 0x186   : > { %v11548_v50 = vadd.f32 %v2110_v32, %v1108_v2  ;;  %v1032_v35 = vpop.f32.mrf.mxu2  ;;  %v1928_v2 = vsel %vm1899_vm3, %v1925_v29, %v1927_v9  ;;  %v1475_v32 = vrot.slane %v1473_v7, 1  ;;  %v1478_v36 = vrot.slane %v1476_v30, 2  ;;  %v10197_v30 = vld [vmem:[%s14571_s1 + $0x1c0] sm:$0xff] }
 0x187   : > { %v1109_v5 = vadd.f32 %v1032_v35, %v11337_v24  ;;  %v10243_v24 = vld [vmem:[%s14573_s3 + $0x68] sm:$0xff]  ;;  %2655 = vmatpush.bf16.msra.mxu2 %v10197_v30 }
 0x188   : > { %v1813_v48 = vpop.f32.mrf.mxu0  ;;  %5178 = vmatpush.bf16.msra.mxu1 %v10243_v24 }
 0x189   : > { %v1605_v56 = vpop.f32.mrf.mxu3  ;;  %v2037_v0 = vpop.f32.mrf.mxu1 }
 0x18a   : > { %v1811_v17 = vadd.f32 %v1810_v15, %v1605_v56  ;;  %v10901_v56 = vld [vmem:[%s11005_s14 + $0x78] sm:$0xff] }
 0x18b   : > { %1074 = vmatmul.bf16.gmra.mxu2 %v926_v39  ;;  %1852 = vmatmul.bf16.gmra.mxu0 %v1704_v40  ;;  %v1705_v39 = vrot.slane %v11559_v47, 1  ;;  %v1479_v40 = vor.u32 %v1478_v36, %v1475_v32 }
 0x18c   : > { %v2111_v58 = vadd.f32 %v2034_v28, %v1811_v17  ;;  %2076 = vmatmul.bf16.gmra.mxu1 %v1928_v2  ;;  %v927_v17 = vrot.slane %v10901_v56, 1 }
 0x18e   : > { %v11561_v25 = vadd.f32 %v2111_v58, %v1109_v5  ;;  %1647 = vmatmul.bf16.gmra.mxu3 %v1471_v20  ;;  %v1035_v10 = vpop.f32.mrf.mxu2  ;;  %v1929_v20 = vrot.slane %v11559_v47, 2  ;;  %v928_v7 = vsel %vm897_vm1, %v925_v37, %v927_v17  ;;  %v1480_v47 = vsel %vm1337_vm2, %v1470_v21, %v1479_v40 }
 0x18f   : > { %v1110_v29 = vadd.f32 %v1035_v10, %v11351_v45  ;;  %v10189_v10 = vld [vmem:[%s14571_s1 + $0x180] sm:$0xff] }
 0x190   : > { %v1815_v18 = vpop.f32.mrf.mxu0  ;;  %2860 = vmatpush.bf16.msra.mxu3 %v10189_v10 }
 0x191   : > { %v1608_v15 = vpop.f32.mrf.mxu3  ;;  %v2039_v34 = vpop.f32.mrf.mxu1 }
 0x192   : > { %v1814_v28 = vadd.f32 %v1813_v48, %v1608_v15  ;;  %v11586_v15 = vld [vmem:[%s11005_s14 + $0x88] sm:$0xff] }
 0x193   : > { %v1707_v30 = vrot.slane %v11586_v15, 1 }
 0x194   : > { %v2112_v35 = vadd.f32 %v2037_v0, %v1814_v28  ;;  %v1706_v0 = vsel %vm897_vm1, %v1703_v44, %v1705_v39  ;;  %v1482_v44 = vshrl.u32 %v11586_v15, 16 }
 0x196   : > { %v11569_v5 = vadd.f32 %v2112_v35, %v1110_v29  ;;  %v1037_v2 = vpop.f32.mrf.mxu2 }
 0x197   : > { %v1111_v45 = vadd.f32 %v1037_v2, %v11357_v61  ;;  %v1930_v61 = vsel %vm1899_vm3, %v1927_v9, %v1929_v20  ;;  %v1484_v2 = vrot.slane %v1482_v44, 1 }
 0x198   : > { %v1818_v24 = vpop.f32.mrf.mxu0 }
 0x199   : > { %v1610_v58 = vpop.f32.mrf.mxu3  ;;  %v2042_v29 = vpop.f32.mrf.mxu1 }
 0x19a   : > { %v1816_v48 = vadd.f32 %v1815_v18, %v1610_v58  ;;  %v1485_v18 = vshll.u32 %v11586_v15, 16 }
 0x19b   : > { %1079 = vmatmul.bf16.gmra.mxu2 %v928_v7  ;;  %1857 = vmatmul.bf16.gmra.mxu0 %v1706_v0  ;;  %v10902_v7 = vld [vmem:[%s11005_s14 + $0x80] sm:$0xff] }
 0x19c   : > { %v2113_v28 = vadd.f32 %v2039_v34, %v1816_v48  ;;  %2081 = vmatmul.bf16.gmra.mxu1 %v1930_v61  ;;  %v10205_v34 = vld [vmem:[%s14571_s1 + $0x200] sm:$0xff]  ;;  %v929_v0 = vrot.slane %v10902_v7, 1 }
 0x19d   : > { %3084 = vmatpush.bf16.msra.mxu0 %v10205_v34 }
 0x19e   : > { %v11588_v37 = vadd.f32 %v2113_v28, %v1111_v45  ;;  %1652 = vmatmul.bf16.gmra.mxu3 %v1480_v47  ;;  %v1040_v21 = vpop.f32.mrf.mxu2  ;;  %v1487_v45 = vrot.slane %v1485_v18, 2  ;;  %v930_v44 = vsel %vm897_vm1, %v927_v17, %v929_v0 }
 0x19f   : > { %v1112_v32 = vadd.f32 %v1040_v21, %v11377_v23 }
 0x1a0   : > { %v1820_v35 = vpop.f32.mrf.mxu0  ;;  %v1488_v23 = vor.u32 %v1487_v45, %v1484_v2 }
 0x1a1   : > { %v1613_v9 = vpop.f32.mrf.mxu3  ;;  %v2044_v56 = vpop.f32.mrf.mxu1 }
 0x1a2   : > { %v1819_v36 = vadd.f32 %v1818_v24, %v1613_v9  ;;  %v1931_v24 = vrot.slane %v11586_v15, 2  ;;  %v1489_v18 = vsel %vm1337_vm2, %v1479_v40, %v1488_v23 }
 0x1a4   : > { %v2114_v58 = vadd.f32 %v2042_v29, %v1819_v36  ;;  %v1708_v29 = vsel %vm897_vm1, %v1705_v39, %v1707_v30  ;;  %v1932_v9 = vsel %vm1899_vm3, %v1929_v20, %v1931_v24  ;;  %v11607_v36 = vld [vmem:[%s11005_s14 + $0x90] sm:$0xff] }
 0x1a5   : > { %v1491_v17 = vshrl.u32 %v11607_v36, 16  ;;  %v1494_v39 = vshll.u32 %v11607_v36, 16 }
 0x1a6   : > { %v11596_v48 = vadd.f32 %v2114_v58, %v1112_v32  ;;  %v1042_v10 = vpop.f32.mrf.mxu2 }
 0x1a7   : > { %v1113_v47 = vadd.f32 %v1042_v10, %v11386_v41  ;;  %v10242_v41 = vld [vmem:[%s14573_s3 + $0x60] sm:$0xff]  ;;  %v1493_v58 = vrot.slane %v1491_v17, 1  ;;  %v1496_v7 = vrot.slane %v1494_v39, 2 }
 0x1a8   : > { %v1823_v21 = vpop.f32.mrf.mxu0  ;;  %5179 = vmatpush.bf16.msra.mxu1 %v10242_v41 }
 0x1a9   : > { %v1615_v61 = vpop.f32.mrf.mxu3  ;;  %v2047_v32 = vpop.f32.mrf.mxu1 }
 0x1aa   : > { %v1821_v28 = vadd.f32 %v1820_v35, %v1615_v61 }
 0x1ab   : > { %1084 = vmatmul.bf16.gmra.mxu2 %v930_v44  ;;  %1862 = vmatmul.bf16.gmra.mxu0 %v1708_v29  ;;  %v1709_v29 = vrot.slane %v11607_v36, 1 }
 0x1ac   : > { %v2115_v34 = vadd.f32 %v2044_v56, %v1821_v28  ;;  %2086 = vmatmul.bf16.gmra.mxu1 %v1932_v9  ;;  %v10903_v28 = vld [vmem:[%s11005_s14 + $0x88] sm:$0xff]  ;;  %v1933_v9 = vrot.slane %v11607_v36, 2 }
 0x1ad   : > { %v931_v44 = vrot.slane %v10903_v28, 1  ;;  %v1710_v39 = vsel %vm897_vm1, %v1707_v30, %v1709_v29 }
 0x1ae   : > { %v11609_v15 = vadd.f32 %v2115_v34, %v1113_v47  ;;  %1657 = vmatmul.bf16.gmra.mxu3 %v1489_v18  ;;  %v1045_v40 = vpop.f32.mrf.mxu2  ;;  %v1226_v47 = vld [vmem:[%s11005_s14 + $0x98] sm:$0x3]  ;;  %v1497_v18 = vor.u32 %v1496_v7, %v1493_v58 }
 0x1af   : > { %v1114_v20 = vadd.f32 %v1045_v40, %v11400_v8  ;;  %v1317_v34 = vunpack.c.l.b16 %v1226_v47  ;;  %v1208_v58 = vld [vmem:[%s11005_s14 + $0x98] sm:$0x1] }
 0x1b0   : > { %v1825_v2 = vpop.f32.mrf.mxu0 }
 0x1b1   : > { %v1618_v35 = vpop.f32.mrf.mxu3  ;;  %v2049_v45 = vpop.f32.mrf.mxu1 }
 0x1b2   : > { %v1824_v56 = vadd.f32 %v1823_v21, %v1618_v35 }
 0x1b4   : > { %v2116_v10 = vadd.f32 %v2047_v32, %v1824_v56  ;;  %v932_v32 = vsel %vm897_vm1, %v929_v0, %v931_v44  ;;  %v1934_v56 = vsel %vm1899_vm3, %v1931_v24, %v1933_v9 }
 0x1b6   : > { %v11618_v61 = vadd.f32 %v2116_v10, %v1114_v20  ;;  %v1047_v8 = vpop.f32.mrf.mxu2  ;;  %v1498_v20 = vsel %vm1337_vm2, %v1488_v23, %v1497_v18  ;;  %v1336_v10 = vpack.c.b16 %v1317_v34, %v1317_v34 }
 0x1b7   : > { %v1115_v21 = vadd.f32 %v1047_v8, %v11406_v19  ;;  %v2246_v8 = vld [vmem:[%s11005_s14 + $0x10] sm:$0xc] }
 0x1b8   : > { %14625 = vst [vmem:[#allocation4_spill] sm:$0xff] %v11618_v61  ;;  %v1828_v17 = vpop.f32.mrf.mxu0  ;;  %v1500_v0 = vshrl.u32 %v1336_v10, 16  ;;  %v1503_v7 = vshll.u32 %v1336_v10, 16 }
 0x1b9   : > { %v1620_v41 = vpop.f32.mrf.mxu3  ;;  %v2052_v35 = vpop.f32.mrf.mxu1 }
 0x1ba   : > { %v1826_v40 = vadd.f32 %v1825_v2, %v1620_v41  ;;  %v1674_v2 = vunpack.c.l.b16 %v1208_v58  ;;  %v2247_v41 = vld [vmem:[%s11005_s14 + $0x14] sm:$0xf]  ;;  %v933_v58 = vrot.slane %v11205_v31, 1 }
 0x1bb   : > { %1089 = vmatmul.bf16.gmra.mxu2 %v932_v32  ;;  %1867 = vmatmul.bf16.gmra.mxu0 %v1710_v39  ;;  %v1505_v32 = vrot.slane %v1503_v7, 2 }
 0x1bc   : > { %v2117_v36 = vadd.f32 %v2049_v45, %v1826_v40  ;;  %2091 = vmatmul.bf16.gmra.mxu1 %v1934_v56  ;;  %v1675_v34 = vpack.c.b16 %v1674_v2, %v1674_v2  ;;  %v1502_v40 = vrot.slane %v1500_v0, 1 }
 0x1be   : > { %v11629_v19 = vadd.f32 %v2117_v36, %v1115_v21  ;;  %1662 = vmatmul.bf16.gmra.mxu3 %v1498_v20  ;;  %v1050_v30 = vpop.f32.mrf.mxu2  ;;  %v2355_v21 = vunpack.c.l.b16 %v2246_v8  ;;  %v2356_v20 = vunpack.c.l.b16 %v2247_v41  ;;  %v1711_v36 = vrot.slane %v1675_v34, 1  ;;  %v2952_v8 = vld [vmem:[%s11005_s14 + $0x10] sm:$0x8] }
 0x1bf   : > { %v1116_v23 = vadd.f32 %v1050_v30, %v11420_v60  ;;  %v1506_v60 = vor.u32 %v1505_v32, %v1502_v40  ;;  %v1935_v30 = vrot.slane %v1336_v10, 2 }
 0x1c0   : > { %14626 = vst [vmem:[#allocation5_spill] sm:$0xff] %v11629_v19  ;;  %v1830_v24 = vpop.f32.mrf.mxu0  ;;  %v2392_v19 = vpack.c.b16 %v2356_v20, %v2355_v21  ;;  %v1712_v7 = vsel %vm897_vm1, %v1709_v29, %v1711_v36 }
 0x1c1   : > { %v1623_v47 = vpop.f32.mrf.mxu3  ;;  %v2054_v45 = vpop.f32.mrf.mxu1  ;;  %v1936_v34 = vsel %vm1899_vm3, %v1933_v9, %v1935_v30 }
 0x1c2   : > { %v1829_v28 = vadd.f32 %v1828_v17, %v1623_v47  ;;  %v2416_v41 = vshll.u32 %v2392_v19, 16 }
 0x1c4   : > { %v2118_v39 = vadd.f32 %v2052_v35, %v1829_v28  ;;  %v934_v35 = vsel %vm897_vm1, %v931_v44, %v933_v58  ;;  %v11641_v28 = vld [vmem:[%s11005_s14 + $0x18] sm:$0xff]  ;;  %v2418_v21 = vrot.slane %v2416_v41, 3 }
 0x1c5   : > { %v2421_v44 = vshrl.u32 %v11641_v28, 16  ;;  %v2424_v29 = vshll.u32 %v11641_v28, 16 }
 0x1c6   : > { %v11634_v56 = vadd.f32 %v2118_v39, %v1116_v23  ;;  %v1052_v17 = vpop.f32.mrf.mxu2  ;;  %v1507_v23 = vsel %vm1337_vm2, %v1497_v18, %v1506_v60 }
 0x1c7   : > { %v1117_v2 = vadd.f32 %v1052_v17, %v11432_v62  ;;  %v2413_v62 = vshrl.u32 %v2392_v19, 16  ;;  %v2423_v58 = vrot.slane %v2421_v44, 2  ;;  %v2426_v36 = vrot.slane %v2424_v29, 3  ;;  %v11662_v29 = vld [vmem:[%s11005_s14 + $0x20] sm:$0xff] }
 0x1c8   : > { %v1833_v0 = vpop.f32.mrf.mxu0 }
 0x1c9   : > { %v1625_v47 = vpop.f32.mrf.mxu3  ;;  %v2057_v31 = vpop.f32.mrf.mxu1  ;;  %v2415_v9 = vrot.slane %v2413_v62, 2 }
 0x1ca   : > { %v1831_v61 = vadd.f32 %v1830_v24, %v1625_v47  ;;  %v2971_v24 = vunpack.c.l.b16 %v2952_v8 }
 0x1cb   : > { %1094 = vmatmul.bf16.gmra.mxu2 %v934_v35  ;;  %1872 = vmatmul.bf16.gmra.mxu0 %v1712_v7  ;;  %v2427_v35 = vor.u32 %v2426_v36, %v2423_v58 }
 0x1cc   : > { %v2119_v10 = vadd.f32 %v2054_v45, %v1831_v61  ;;  %2096 = vmatmul.bf16.gmra.mxu1 %v1936_v34  ;;  %v2972_v60 = vpack.c.b16 %v2356_v20, %v2971_v24  ;;  %v2751_v34 = vrot.slane %v11641_v28, 2 }
 0x1ce   : > { %v11646_v40 = vadd.f32 %v2119_v10, %v1117_v2  ;;  %1667 = vmatmul.bf16.gmra.mxu3 %v1507_v23  ;;  %v1055_v32 = vpop.f32.mrf.mxu2  ;;  %v2419_v2 = vor.u32 %v2418_v21, %v2415_v9  ;;  %v2974_v7 = vrot.slane %v2972_v60, 3  ;;  %v2975_v23 = vrot.slane %v11641_v28, 3 }
 0x1cf   : > { %v1118_v18 = vadd.f32 %v1055_v32, %v11237_v3  ;;  %v10241_v3 = vld [vmem:[%s14573_s3 + $0x58] sm:$0xff] }
 0x1d0   : > { %v1835_v45 = vpop.f32.mrf.mxu0  ;;  %5180 = vmatpush.bf16.msra.mxu1 %v10241_v3  ;;  %v2428_v41 = vsel %vm2411_vm4, %v2419_v2, %v2427_v35  ;;  %v2976_v44 = vsel %vm2973_vm5, %v2974_v7, %v2975_v23  ;;  %v2977_v7 = vrot.slane %v11662_v29, 3  ;;  %v2753_v3 = vrot.slane %v11662_v29, 2 }
 0x1d1   : > { %v1628_v39 = vpop.f32.mrf.mxu3  ;;  %v2059_v30 = vpop.f32.mrf.mxu1 }
 0x1d2   : > { %v1834_v61 = vadd.f32 %v1833_v0, %v1628_v39  ;;  %v2750_v0 = vrot.slane %v2392_v19, 2 }
 0x1d4   : > { %v2120_v17 = vadd.f32 %v2057_v31, %v1834_v61  ;;  %v2752_v24 = vsel %vm1899_vm3, %v2750_v0, %v2751_v34 }
 0x1d6   : > { %v11651_v47 = vadd.f32 %v2120_v17, %v1118_v18  ;;  %v1057_v20 = vpop.f32.mrf.mxu2  ;;  %v2433_v18 = vshll.u32 %v11662_v29, 16 }
 0x1d7   : > { %v1119_v31 = vadd.f32 %v1057_v20, %v11244_v27  ;;  %v2430_v27 = vshrl.u32 %v11662_v29, 16 }
 0x1d8   : > { %v1838_v62 = vpop.f32.mrf.mxu0  ;;  %v2435_v36 = vrot.slane %v2433_v18, 3 }
 0x1d9   : > { %v1630_v8 = vpop.f32.mrf.mxu3  ;;  %v2062_v32 = vpop.f32.mrf.mxu1  ;;  %v2432_v58 = vrot.slane %v2430_v27, 2 }
 0x1da   : > { %v1836_v10 = vadd.f32 %v1835_v45, %v1630_v8 }
 0x1db   : > { %2656 = vmatmul.bf16.vlgmr.msra.gmra.mxu2 %v2428_v41  ;;  %3085 = vmatmul.bf16.vlgmr.msra.gmra.mxu0 %v2976_v44  ;;  %v2436_v2 = vor.u32 %v2435_v36, %v2432_v58  ;;  %v11678_v41 = vld [vmem:[%s11005_s14 + $0x28] sm:$0xff]  ;;  %v2754_v44 = vsel %vm1899_vm3, %v2751_v34, %v2753_v3 }
 0x1dc   : > { %v2121_v19 = vadd.f32 %v2059_v30, %v1836_v10  ;;  %v2442_v29 = vshll.u32 %v11678_v41, 16  ;;  %v2979_v36 = vrot.slane %v11678_v41, 3 }
 0x1dd   : > { %v2437_v10 = vsel %vm2411_vm4, %v2427_v35, %v2436_v2 }
 0x1de   : > { %v11665_v28 = vadd.f32 %v2121_v19, %v1119_v31  ;;  %2861 = vmatmul.bf16.vlgmr.msra.gmra.mxu3 %v2752_v24  ;;  %v1060_v39 = vpop.f32.mrf.mxu2 }
 0x1df   : > { %v1120_v9 = vadd.f32 %v1060_v39, %v11257_v42 }
 0x1e0   : > { %v1840_v45 = vpop.f32.mrf.mxu0 }
 0x1e1   : > { %v1633_v21 = vpop.f32.mrf.mxu3  ;;  %v2064_v60 = vpop.f32.mrf.mxu1 }
 0x1e2   : > { %v1839_v61 = vadd.f32 %v1838_v62, %v1633_v21  ;;  %v2978_v62 = vsel %vm2973_vm5, %v2975_v23, %v2977_v7  ;;  %v2444_v21 = vrot.slane %v2442_v29, 3 }
 0x1e4   : > { %v2122_v30 = vadd.f32 %v2062_v32, %v1839_v61 }
 0x1e6   : > { %v11670_v17 = vadd.f32 %v2122_v30, %v1120_v9  ;;  %v1062_v0 = vpop.f32.mrf.mxu2  ;;  %v2755_v30 = vrot.slane %v11678_v41, 2 }
 0x1e7   : > { %v1121_v20 = vadd.f32 %v1062_v0, %v11270_v59  ;;  %v2439_v59 = vshrl.u32 %v11678_v41, 16 }
 0x1e8   : > { %14627 = vst [vmem:[#allocation6_spill] sm:$0xff] %v11670_v17  ;;  %v1843_v8 = vpop.f32.mrf.mxu0 }
 0x1e9   : > { %v1635_v31 = vpop.f32.mrf.mxu3  ;;  %v2067_v24 = vpop.f32.mrf.mxu1  ;;  %v2441_v9 = vrot.slane %v2439_v59, 2 }
 0x1ea   : > { %v1841_v42 = vadd.f32 %v1840_v45, %v1635_v31 }
 0x1eb   : > { %2661 = vmatmul.bf16.gmra.mxu2 %v2437_v10  ;;  %3090 = vmatmul.bf16.gmra.mxu0 %v2978_v62  ;;  %v2445_v58 = vor.u32 %v2444_v21, %v2441_v9  ;;  %v2980_v10 = vsel %vm2973_vm5, %v2977_v7, %v2979_v36  ;;  %v11697_v62 = vld [vmem:[%s11005_s14 + $0x30] sm:$0xff] }
 0x1ec   : > { %v2123_v32 = vadd.f32 %v2064_v60, %v1841_v42  ;;  %v10240_v60 = vld [vmem:[%s14573_s3 + $0x50] sm:$0xff]  ;;  %v2451_v59 = vshll.u32 %v11697_v62, 16 }
 0x1ed   : > { %5181 = vmatpush.bf16.msra.mxu1 %v10240_v60 }
 0x1ee   : > { %v11681_v19 = vadd.f32 %v2123_v32, %v1121_v20  ;;  %2866 = vmatmul.bf16.gmra.mxu3 %v2754_v44  ;;  %v1065_v27 = vpop.f32.mrf.mxu2  ;;  %v2756_v44 = vsel %vm1899_vm3, %v2753_v3, %v2755_v30  ;;  %v2453_v3 = vrot.slane %v2451_v59, 3 }
 0x1ef   : > { %v1122_v35 = vadd.f32 %v1065_v27, %v11286_v11 }
 0x1f0   : > { %14628 = vst [vmem:[#allocation7_spill] sm:$0xff] %v11681_v19  ;;  %v1845_v39 = vpop.f32.mrf.mxu0 }
 0x1f1   : > { %v1638_v18 = vpop.f32.mrf.mxu3  ;;  %v2069_v34 = vpop.f32.mrf.mxu1 }
 0x1f2   : > { %v1844_v23 = vadd.f32 %v1843_v8, %v1638_v18  ;;  %v2446_v8 = vsel %vm2411_vm4, %v2436_v2, %v2445_v58 }
 0x1f4   : > { %v2124_v61 = vadd.f32 %v2067_v24, %v1844_v23 }
 0x1f6   : > { %v11686_v45 = vadd.f32 %v2124_v61, %v1122_v35  ;;  %v1067_v11 = vpop.f32.mrf.mxu2  ;;  %v2757_v61 = vrot.slane %v11697_v62, 2 }
 0x1f7   : > { %v1123_v0 = vadd.f32 %v1067_v11, %v11293_v26  ;;  %v2448_v26 = vshrl.u32 %v11697_v62, 16 }
 0x1f8   : > { %14629 = vst [vmem:[#allocation8_spill] sm:$0xff] %v11686_v45  ;;  %v1848_v42 = vpop.f32.mrf.mxu0 }
 0x1f9   : > { %v1640_v20 = vpop.f32.mrf.mxu3  ;;  %v2072_v24 = vpop.f32.mrf.mxu1  ;;  %v2450_v18 = vrot.slane %v2448_v26, 2 }
 0x1fa   : > { %v1846_v31 = vadd.f32 %v1845_v39, %v1640_v20 }
 0x1fb   : > { %2666 = vmatmul.bf16.gmra.mxu2 %v2446_v8  ;;  %3095 = vmatmul.bf16.gmra.mxu0 %v2980_v10  ;;  %v2454_v21 = vor.u32 %v2453_v3, %v2450_v18  ;;  %v11713_v8 = vld [vmem:[%s11005_s14 + $0x38] sm:$0xff]  ;;  %v2758_v10 = vsel %vm1899_vm3, %v2755_v30, %v2757_v61 }
 0x1fc   : > { %v2125_v32 = vadd.f32 %v2069_v34, %v1846_v31  ;;  %v2981_v34 = vrot.slane %v11697_v62, 3  ;;  %v2460_v62 = vshll.u32 %v11713_v8, 16  ;;  %v2983_v3 = vrot.slane %v11713_v8, 3 }
 0x1fd   : > { %v2455_v31 = vsel %vm2411_vm4, %v2445_v58, %v2454_v21 }
 0x1fe   : > { %v11700_v41 = vadd.f32 %v2125_v32, %v1123_v0  ;;  %2871 = vmatmul.bf16.gmra.mxu3 %v2756_v44  ;;  %v1070_v29 = vpop.f32.mrf.mxu2  ;;  %v2462_v30 = vrot.slane %v2460_v62, 3 }
 0x1ff   : > { %v1124_v2 = vadd.f32 %v1070_v29, %v11306_v43 }
 0x200   : > { %14630 = vst [vmem:[#allocation9_spill] sm:$0xff] %v11700_v41  ;;  %v1850_v35 = vpop.f32.mrf.mxu0 }
 0x201   : > { %v1643_v27 = vpop.f32.mrf.mxu3  ;;  %v2074_v23 = vpop.f32.mrf.mxu1 }
 0x202   : > { %v1849_v7 = vadd.f32 %v1848_v42, %v1643_v27  ;;  %v2982_v42 = vsel %vm2973_vm5, %v2979_v36, %v2981_v34 }
 0x204   : > { %v2126_v39 = vadd.f32 %v2072_v24, %v1849_v7 }
 0x206   : > { %v11705_v9 = vadd.f32 %v2126_v39, %v1124_v2  ;;  %v1072_v60 = vpop.f32.mrf.mxu2 }
 0x207   : > { %v1125_v11 = vadd.f32 %v1072_v60, %v11319_v22  ;;  %v2457_v22 = vshrl.u32 %v11713_v8, 16 }
 0x208   : > { %14631 = vst [vmem:[#allocation10_spill] sm:$0xff] %v11705_v9  ;;  %v1853_v20 = vpop.f32.mrf.mxu0 }
 0x209   : > { %v1645_v0 = vpop.f32.mrf.mxu3  ;;  %v2077_v44 = vpop.f32.mrf.mxu1  ;;  %v2459_v2 = vrot.slane %v2457_v22, 2 }
 0x20a   : > { %v1851_v43 = vadd.f32 %v1850_v35, %v1645_v0 }
 0x20b   : > { %2671 = vmatmul.bf16.gmra.mxu2 %v2455_v31  ;;  %3100 = vmatmul.bf16.gmra.mxu0 %v2982_v42  ;;  %v2463_v18 = vor.u32 %v2462_v30, %v2459_v2  ;;  %v11729_v31 = vld [vmem:[%s11005_s14 + $0x40] sm:$0xff] }
 0x20c   : > { %v2127_v24 = vadd.f32 %v2074_v23, %v1851_v43  ;;  %v2759_v23 = vrot.slane %v11713_v8, 2  ;;  %v2469_v8 = vshll.u32 %v11729_v31, 16 }
 0x20d   : > { %v2464_v43 = vsel %vm2411_vm4, %v2454_v21, %v2463_v18  ;;  %v10239_v21 = vld [vmem:[%s14573_s3 + $0x48] sm:$0xff] }
 0x20e   : > { %v11716_v32 = vadd.f32 %v2127_v24, %v1125_v11  ;;  %2876 = vmatmul.bf16.gmra.mxu3 %v2758_v10  ;;  %v1075_v26 = vpop.f32.mrf.mxu2  ;;  %v2760_v42 = vsel %vm1899_vm3, %v2757_v61, %v2759_v23  ;;  %5182 = vmatpush.bf16.msra.mxu1 %v10239_v21 }
 0x20f   : > { %v1126_v58 = vadd.f32 %v1075_v26, %v11335_v16 }
 0x210   : > { %14632 = vst [vmem:[#allocation11_spill] sm:$0xff] %v11716_v32  ;;  %v1855_v29 = vpop.f32.mrf.mxu0 }
 0x211   : > { %v1648_v59 = vpop.f32.mrf.mxu3  ;;  %v2079_v27 = vpop.f32.mrf.mxu1 }
 0x212   : > { %v1854_v36 = vadd.f32 %v1853_v20, %v1648_v59  ;;  %v2984_v20 = vsel %vm2973_vm5, %v2981_v34, %v2983_v3  ;;  %v2471_v59 = vrot.slane %v2469_v8, 3  ;;  %v3432_v8 = vlaneseq }
 0x214   : > { %v2128_v7 = vadd.f32 %v2077_v44, %v1854_v36 }
 0x216   : > { %v11721_v35 = vadd.f32 %v2128_v7, %v1126_v58  ;;  %v1077_v39 = vpop.f32.mrf.mxu2  ;;  %v2761_v7 = vrot.slane %v11729_v31, 2 }
 0x217   : > { %v1127_v60 = vadd.f32 %v1077_v39, %v11342_v33  ;;  %v2466_v33 = vshrl.u32 %v11729_v31, 16 }
 0x218   : > { %14633 = vst [vmem:[#allocation12_spill] sm:$0xff] %v11721_v35  ;;  %v1858_v0 = vpop.f32.mrf.mxu0 }
 0x219   : > { %v1650_v11 = vpop.f32.mrf.mxu3  ;;  %v2082_v10 = vpop.f32.mrf.mxu1  ;;  %v2468_v58 = vrot.slane %v2466_v33, 2 }
 0x21a   : > { %v1856_v16 = vadd.f32 %v1855_v29, %v1650_v11 }
 0x21b   : > { %2676 = vmatmul.bf16.gmra.mxu2 %v2464_v43  ;;  %3105 = vmatmul.bf16.gmra.mxu0 %v2984_v20  ;;  %v2472_v30 = vor.u32 %v2471_v59, %v2468_v58  ;;  %v11760_v59 = vld [vmem:[%s11005_s14 + $0x50] sm:$0xff] }
 0x21c   : > { %v2129_v44 = vadd.f32 %v2079_v27, %v1856_v16  ;;  %v2985_v27 = vrot.slane %v11729_v31, 3  ;;  %v11746_v16 = vld [vmem:[%s11005_s14 + $0x48] sm:$0xff] }
 0x21d   : > { %v2473_v43 = vsel %vm2411_vm4, %v2463_v18, %v2472_v30  ;;  %v2475_v31 = vshrl.u32 %v11746_v16, 16 }
 0x21e   : > { %v11732_v24 = vadd.f32 %v2129_v44, %v1127_v60  ;;  %2881 = vmatmul.bf16.gmra.mxu3 %v2760_v42  ;;  %v1080_v34 = vpop.f32.mrf.mxu2  ;;  %v2986_v20 = vsel %vm2973_vm5, %v2983_v3, %v2985_v27  ;;  %v2762_v42 = vsel %vm1899_vm3, %v2759_v23, %v2761_v7 }
 0x21f   : > { %v1128_v61 = vadd.f32 %v1080_v34, %v11355_v52  ;;  %v11755_v34 = vshrl.u32 %v3432_v8, 7  ;;  %v2477_v23 = vrot.slane %v2475_v31, 2 }
 0x220   : > { %14634 = vst [vmem:[#allocation13_spill] sm:$0xff] %v11732_v24  ;;  %v1860_v26 = vpop.f32.mrf.mxu0 }
 0x221   : > { %v1653_v22 = vpop.f32.mrf.mxu3  ;;  %v2084_v36 = vpop.f32.mrf.mxu1 }
 0x222   : > { %v1859_v62 = vadd.f32 %v1858_v0, %v1653_v22 }
 0x224   : > { %v2130_v29 = vadd.f32 %v2082_v10, %v1859_v62 }
 0x226   : > { %v11740_v2 = vadd.f32 %v2130_v29, %v1128_v61  ;;  %v1082_v39 = vpop.f32.mrf.mxu2  ;;  %v3473_v29 = vshrl.u32 %v11755_v34, 16 }
 0x227   : > { %v1129_v60 = vadd.f32 %v1082_v39, %v11362_v4  ;;  %v2478_v4 = vshll.u32 %v11746_v16, 16 }
 0x228   : > { %14635 = vst [vmem:[#allocation14_spill] sm:$0xff] %v11740_v2  ;;  %v1863_v0 = vpop.f32.mrf.mxu0  ;;  %v2989_v2 = vrot.slane %v11760_v59, 3 }
 0x229   : > { %v1655_v11 = vpop.f32.mrf.mxu3  ;;  %v2087_v10 = vpop.f32.mrf.mxu1  ;;  %v2480_v61 = vrot.slane %v2478_v4, 3 }
 0x22a   : > { %v1861_v52 = vadd.f32 %v1860_v26, %v1655_v11  ;;  %v3472_v26 = vand.u32 65535, %v11755_v34  ;;  %v14577_v11 = vrot.slane %v11746_v16, 3 }
 0x22b   : > { %2681 = vmatmul.bf16.gmra.mxu2 %v2473_v43  ;;  %3110 = vmatmul.bf16.gmra.mxu0 %v2986_v20  ;;  %v3477_v43 = vmul.u32 14564, %v3473_v29 }
 0x22c   : > { %v2131_v44 = vadd.f32 %v2084_v36, %v1861_v52  ;;  %v3476_v39 = vmul.u32 58254, %v3472_v26 }
 0x22d   : > { %v3481_v4 = vshll.u32 %v3477_v43, 16 }
 0x22e   : > { %v11753_v33 = vadd.f32 %v2131_v44, %v1129_v60  ;;  %2886 = vmatmul.bf16.gmra.mxu3 %v2762_v42  ;;  %v1085_v21 = vpop.f32.mrf.mxu2  ;;  %v11763_v60 = vor.u32 %v2480_v61, %v2477_v23  ;;  %v3479_v20 = vshll.u32 %v3476_v39, 16  ;;  %v2484_v42 = vshrl.u32 %v11760_v59, 16 }
 0x22f   : > { %v1130_v18 = vadd.f32 %v1085_v21, %v11381_v55  ;;  %v3475_v55 = vmul.u32 14564, %v3472_v26  ;;  %v2487_v44 = vshll.u32 %v11760_v59, 16  ;;  %v14578_v23 = vmov 0  }
 0x230   : > { %14636 = vst [vmem:[#allocation15_spill] sm:$0xff] %v11753_v33  ;;  %v1865_v62 = vpop.f32.mrf.mxu0 }
 0x231   : > { %v1658_v3 = vpop.f32.mrf.mxu3  ;;  %v2089_v58 = vpop.f32.mrf.mxu1  ;;  %vm3483_vm6 = vc.u32 %v3475_v55, %v3479_v20  ;;  %227 = vst [vmem:[#allocation2 + $0x4] sm:$0xf] %v14578_v23  ;;  %v2489_v33 = vrot.slane %v2487_v44, 3 }
 0x232   : > { %v1864_v22 = vadd.f32 %v1863_v0, %v1658_v3  ;;  %v14576_v0 = vrot.slane %v11746_v16, 2  ;;  %v2988_v3 = vsel %vm2973_vm5, %v2985_v27, %v14577_v11  ;;  %v3484_v61 = vsel %vm3483_vm6, 1, %v14578_v23  ;;  %v11786_v27 = vld [vmem:[%s11005_s14 + $0x58] sm:$0xff]  ;;  %228 = vst [vmem:[#allocation2 + $0x8] sm:$0xf] %v14578_v23 }
 0x233   : > { %229 = vst [vmem:[#allocation2 + $0xc] sm:$0xf] %v14578_v23 }
 0x234   : > { %v2132_v36 = vadd.f32 %v2087_v10, %v1864_v22  ;;  %v3478_v10 = vmul.u32 58254, %v3473_v29  ;;  %230 = vst [vmem:[#allocation2 + $0xa0] sm:$0xf] %v14578_v23 }
 0x235   : > { %231 = vst [vmem:[#allocation2 + $0xa4] sm:$0xf] %v14578_v23 }
 0x236   : > { %v11766_v52 = vadd.f32 %v2132_v36, %v1130_v18  ;;  %v1087_v31 = vpop.f32.mrf.mxu2  ;;  %v2482_v18 = vsel %vm2411_vm4, %v2472_v30, %v11763_v60  ;;  %v3485_v36 = vadd.s32 %v3479_v20, %v3475_v55  ;;  %v3486_v29 = vadd.s32 %v3484_v61, %v3478_v10  ;;  %232 = vst [vmem:[#allocation2 + $0xa8] sm:$0xf] %v14578_v23 }
 0x237   : > { %v1131_v8 = vadd.f32 %v1087_v31, %v11391_v54  ;;  %v11780_v54 = vadd.s32 8, %v11755_v34  ;;  %v2764_v30 = vsel %vm1899_vm3, %v2761_v7, %v14576_v0  ;;  %v10238_v7 = vld [vmem:[%s14573_s3 + $0x40] sm:$0xff] }
 0x238   : > { %14637 = vst [vmem:[#allocation16_spill] sm:$0xff] %v11766_v52  ;;  %v1868_v26 = vpop.f32.mrf.mxu0  ;;  %v2486_v52 = vrot.slane %v2484_v42, 2  ;;  %vm3487_vm7 = vc.u32 %v3485_v36, %v3481_v4  ;;  %v3482_v42 = vshrl.u32 %v3477_v43, 16  ;;  %v2496_v4 = vshll.u32 %v11786_v27, 16  ;;  %5183 = vmatpush.bf16.msra.mxu1 %v10238_v7 }
 0x239   : > { %v1660_v21 = vpop.f32.mrf.mxu3  ;;  %v2092_v31 = vpop.f32.mrf.mxu1  ;;  %v3501_v55 = vand.u32 65535, %v11780_v54  ;;  %v3488_v20 = vsel %vm3487_vm7, 1, %v14578_v23  ;;  %v11804_v36 = vadd.s32 16, %v11755_v34 }
 0x23a   : > { %v1866_v22 = vadd.f32 %v1865_v62, %v1660_v21  ;;  %v3480_v21 = vshrl.u32 %v3476_v39, 16  ;;  %v3490_v44 = vadd.s32 %v3488_v20, %v3486_v29  ;;  %v2493_v39 = vshrl.u32 %v11786_v27, 16 }
 0x23b   : > { %2686 = vmatmul.bf16.gmra.mxu2 %v2482_v18  ;;  %3115 = vmatmul.bf16.gmra.mxu0 %v2988_v3  ;;  %v3504_v18 = vmul.u32 14564, %v3501_v55  ;;  %v2490_v61 = vor.u32 %v2489_v33, %v2486_v52  ;;  %v3530_v52 = vand.u32 65535, %v11804_v36  ;;  %v2498_v7 = vrot.slane %v2496_v4, 3 }
 0x23c   : > { %v2133_v62 = vadd.f32 %v2089_v58, %v1866_v22  ;;  %v3502_v58 = vshrl.u32 %v11780_v54, 16  ;;  %v3491_v22 = vadd.s32 %v3490_v44, %v3480_v21  ;;  %v2495_v21 = vrot.slane %v2493_v39, 2 }
 0x23e   : > { %v11792_v10 = vadd.f32 %v2133_v62, %v1131_v8  ;;  %2891 = vmatmul.bf16.gmra.mxu3 %v2764_v30  ;;  %v3505_v8 = vmul.u32 58254, %v3501_v55  ;;  %v1090_v3 = vpop.f32.mrf.mxu2  ;;  %v3506_v43 = vmul.u32 14564, %v3502_v58  ;;  %v2765_v62 = vrot.slane %v11760_v59, 2 }
 0x23f   : > { %v1132_v29 = vadd.f32 %v1090_v3, %v11404_v63  ;;  %v3507_v20 = vmul.u32 58254, %v3502_v58  ;;  %v3492_v55 = vadd.s32 %v3491_v22, %v3482_v42  ;;  %v14639_v3 = vmov 0  }
 0x240   : > { %14638 = vst [vmem:[#allocation17_spill] sm:$0xff] %v11792_v10  ;;  %v3508_v0 = vshll.u32 %v3505_v8, 16  ;;  %v1870_v10 = vpop.f32.mrf.mxu0  ;;  %v3510_v33 = vshll.u32 %v3506_v43, 16  ;;  %v3509_v58 = vshrl.u32 %v3505_v8, 16  ;;  %v3531_v42 = vshrl.u32 %v11804_v36, 16 }
 0x241   : > { %v1663_v30 = vpop.f32.mrf.mxu3  ;;  %v3493_v63 = vshrl.u32 %v3492_v55, 4  ;;  %v2094_v35 = vpop.f32.mrf.mxu1 }
 0x242   : > { %v1869_v11 = vadd.f32 %v1868_v26, %v1663_v30  ;;  %vm3512_vm8 = vc.u32 %v3504_v18, %v3508_v0  ;;  %v3514_v44 = vadd.s32 %v3508_v0, %v3504_v18  ;;  %v11812_v26 = vld [vmem:[%s11005_s14 + $0x60] sm:$0xff]  ;;  %v11818_v0 = vmul.u32 58254, %v3530_v52 }
 0x243   : > { %v3513_v24 = vsel %vm3512_vm8, 1, %v14639_v3  ;;  %v3494_v39 = vmul.u32 18, %v3493_v63  ;;  %v14641_v30 = vrot.slane %v11746_v16, 3  ;;  %v3533_v63 = vmul.u32 14564, %v3530_v52 }
 0x244   : > { %v2134_v23 = vadd.f32 %v2092_v31, %v1869_v11  ;;  %v3515_v32 = vadd.s32 %v3513_v24, %v3507_v20  ;;  %vm3516_vm9 = vc.u32 %v3514_v44, %v3510_v33  ;;  %v11820_v11 = vor.u32 %v2498_v7, %v2495_v21 }
 0x245   : > { %v3517_v4 = vsel %vm3516_vm9, 1, %v14639_v3  ;;  %v3511_v31 = vshrl.u32 %v3506_v43, 16  ;;  %v2491_v24 = vsel %vm2411_vm4, %v11763_v60, %v2490_v61  ;;  %v2505_v20 = vshll.u32 %v11812_v26, 16 }
 0x246   : > { %v11815_v22 = vadd.f32 %v2134_v23, %v1132_v29  ;;  %v3519_v18 = vadd.s32 %v3517_v4, %v3515_v32  ;;  %v1092_v8 = vpop.f32.mrf.mxu2  ;;  %v2990_v23 = vsel %vm2973_vm5, %v14641_v30, %v2989_v2  ;;  %v2502_v29 = vshrl.u32 %v11812_v26, 16 }
 0x247   : > { %v1133_v55 = vadd.f32 %v1092_v8, %v11411_v12  ;;  %v11832_v21 = vsub.s32 %v11755_v34, %v3494_v39  ;;  %v11834_v32 = vmul.u32 14564, %v3531_v42  ;;  %v14580_v60 = vrot.slane %v11786_v27, 3 }
 0x248   : > { %14640 = vst [vmem:[#allocation18_spill] sm:$0xff] %v11815_v22  ;;  %v3520_v43 = vadd.s32 %v3519_v18, %v3509_v58  ;;  %v1873_v44 = vpop.f32.mrf.mxu0  ;;  %v3537_v4 = vshll.u32 %v11818_v0, 16  ;;  %v14642_v30 = vrot.slane %v11746_v16, 2  ;;  %v11843_v12 = vsel %vm2411_vm4, %v2490_v61, %v11820_v11 }
 0x249   : > { %v1665_v33 = vpop.f32.mrf.mxu3  ;;  %v14643_v39 = vrot.slane %v11786_v27, 2  ;;  %v2504_v8 = vrot.slane %v2502_v29, 2  ;;  %v3536_v52 = vmul.u32 58254, %v3531_v42  ;;  %vm4513_vm10 = vcmp.ne.s32.totalorder %v11832_v21, 0  ;;  %v2097_v42 = vpop.f32.mrf.mxu1 }
 0x24a   : > { %v1871_v7 = vadd.f32 %v1870_v10, %v1665_v33  ;;  %v2766_v59 = vsel %vm1899_vm3, %v14642_v30, %v2765_v62  ;;  %v3521_v10 = vadd.s32 %v3520_v43, %v3511_v31  ;;  %v2507_v33 = vrot.slane %v2505_v20, 3 }
 0x24b   : > { %v11848_v58 = vsel %vm1899_vm3, %v2765_v62, %v14643_v39  ;;  %2691 = vmatmul.bf16.gmra.mxu2 %v2491_v24  ;;  %3120 = vmatmul.bf16.gmra.mxu0 %v2990_v23  ;;  %vm4549_vm11 = vcmp.lt.s32.totalorder %v11832_v21, 0  ;;  %v3539_v61 = vshll.u32 %v11834_v32, 16  ;;  %v11858_v62 = vsel %vm2973_vm5, %v2989_v2, %v14580_v60 }
 0x24c   : > { %v2135_v18 = vadd.f32 %v2094_v35, %v1871_v7  ;;  %v3522_v16 = vshrl.u32 %v3521_v10, 4  ;;  %v11861_v35 = vadd.s32 18, %v11832_v21  ;;  %vm3541_vm12 = vc.u32 %v3533_v63, %v3537_v4  ;;  %vm11869_vm13 = vmand %vm4549_vm11, %vm4513_vm10 }
 0x24d   : > { %v3542_v24 = vsel %vm3541_vm12, 1, %v14639_v3  ;;  %v3543_v23 = vadd.s32 %v3537_v4, %v3533_v63  ;;  %v11865_v29 = vadd.s32 24, %v11755_v34  ;;  %v11873_v2 = vor.u32 %v2507_v33, %v2504_v8 }
 0x24e   : > { %v11853_v30 = vadd.f32 %v2135_v18, %v1133_v55  ;;  %2896 = vmatmul.bf16.gmra.mxu3 %v2766_v59  ;;  %v3523_v31 = vmul.u32 18, %v3522_v16  ;;  %v1095_v20 = vpop.f32.mrf.mxu2  ;;  %v14581_v55 = vrot.slane %v11812_v26, 2  ;;  %v3538_v43 = vshrl.u32 %v11818_v0, 16  ;;  %v10253_v59 = vld [vmem:[%s14573_s3 + $0xb8] sm:$0xff] }
 0x24f   : > { %v3544_v7 = vadd.s32 %v3542_v24, %v3536_v52  ;;  %v1134_v39 = vadd.f32 %v1095_v20, %v11430_v6  ;;  %vm3545_vm14 = vc.u32 %v3543_v23, %v3539_v61  ;;  %v3559_v4 = vand.u32 65535, %v11865_v29  ;;  %v11906_v52 = vld [vmem:[%s11005_s14 + $0x68] sm:$0xff]  ;;  %5786 = vmatpush.bf16.msrb.mxu3 %v10253_v59 }
 0x250   : > { %14644 = vst [vmem:[#allocation19_spill] sm:$0xff] %v11853_v30  ;;  %v11880_v10 = vadd.s32 32, %v11755_v34  ;;  %v1875_v16 = vpop.f32.mrf.mxu0  ;;  %v11883_v8 = vsub.s32 %v11780_v54, %v3523_v31  ;;  %v3546_v33 = vsel %vm3545_vm14, 1, %v14639_v3  ;;  %v3560_v0 = vshrl.u32 %v11865_v29, 16 }
 0x251   : > { %v1668_v63 = vpop.f32.mrf.mxu3  ;;  %v3540_v61 = vshrl.u32 %v11834_v32, 16  ;;  %v3548_v24 = vadd.s32 %v3546_v33, %v3544_v7  ;;  %v3562_v23 = vmul.u32 14564, %v3559_v4  ;;  %v3563_v20 = vmul.u32 58254, %v3559_v4 }
 0x252   : > { %v1874_v18 = vadd.f32 %v1873_v44, %v1668_v63  ;;  %v3564_v63 = vmul.u32 14564, %v3560_v0  ;;  %v11896_v54 = vsel %vm2411_vm4, %v11820_v11, %v11873_v2  ;;  %v14647_v31 = vrot.slane %v11786_v27, 2 }
 0x253   : > { %v3549_v60 = vadd.s32 %v3548_v24, %v3538_v43  ;;  %v3588_v32 = vand.u32 65535, %v11880_v10  ;;  %vm4514_vm15 = vcmp.ne.s32.totalorder %v11883_v8, 0  ;;  %v3565_v7 = vmul.u32 58254, %v3560_v0 }
 0x254   : > { %v2136_v44 = vadd.f32 %v2097_v42, %v1874_v18  ;;  %v11903_v6 = vsel %vm1899_vm3, %v14647_v31, %v14581_v55  ;;  %v3566_v4 = vshll.u32 %v3563_v20, 16  ;;  %vm4550_vm6 = vcmp.lt.s32.totalorder %v11883_v8, 0  ;;  %v2099_v55 = vpop.f32.mrf.mxu1 }
 0x255   : > { %v3550_v11 = vadd.s32 %v3549_v60, %v3540_v61  ;;  %v3568_v18 = vshll.u32 %v3564_v63, 16  ;;  %v2511_v33 = vshrl.u32 %v11906_v52, 16  ;;  %v11915_v31 = vadd.s32 18, %v11883_v8  ;;  %vm11925_vm9 = vmand %vm4550_vm6, %vm4514_vm15 }
 0x256   : > { %v11909_v42 = vadd.f32 %v2136_v44, %v1134_v39  ;;  %v1097_v30 = vpop.f32.mrf.mxu2  ;;  %vm3570_vm7 = vc.u32 %v3562_v23, %v3566_v4  ;;  %v3572_v43 = vadd.s32 %v3566_v4, %v3562_v23  ;;  %v2514_v24 = vshll.u32 %v11906_v52, 16 }
 0x257   : > { %v1135_v39 = vadd.f32 %v1097_v30, %v11440_v38  ;;  %v3551_v0 = vshrl.u32 %v3550_v11, 4  ;;  %v3589_v60 = vshrl.u32 %v11880_v10, 16  ;;  %v3567_v9 = vshrl.u32 %v3563_v20, 16 }
 0x258   : > { %14648 = vst [vmem:[#allocation20_spill] sm:$0xff] %v11909_v42  ;;  %v3571_v42 = vsel %vm3570_vm7, 1, %v14639_v3  ;;  %v3086_v22 = vpop.f32.mrf.mxu0  ;;  %vm3574_vm8 = vc.u32 %v3572_v43, %v3568_v18  ;;  %v2513_v4 = vrot.slane %v2511_v33, 2  ;;  %v2516_v11 = vrot.slane %v2514_v24, 3 }
 0x259   : > { %v1670_v44 = vpop.f32.mrf.mxu3  ;;  %v3573_v41 = vadd.s32 %v3571_v42, %v3565_v7  ;;  %v3552_v38 = vmul.u32 18, %v3551_v0  ;;  %v3575_v30 = vsel %vm3574_vm8, 1, %v14639_v3  ;;  %v3569_v19 = vshrl.u32 %v3564_v63, 16 }
 0x25a   : > { %v1876_v61 = vadd.f32 %v1875_v16, %v1670_v44  ;;  %v3592_v44 = vmul.u32 58254, %v3588_v32  ;;  %v14651_v20 = vrot.slane %v11812_v26, 3  ;;  %v14652_v42 = vrot.slane %v11786_v27, 3 }
 0x25b   : > { %v3577_v16 = vadd.s32 %v3575_v30, %v3573_v41  ;;  %2696 = vmatmul.bf16.gmra.mxu2 %v11843_v12  ;;  %3125 = vmatmul.bf16.gmra.mxu0 %v11858_v62  ;;  %v11940_v18 = vsub.s32 %v11804_v36, %v3552_v38  ;;  %v3591_v33 = vmul.u32 14564, %v3588_v32  ;;  %v3593_v43 = vmul.u32 14564, %v3589_v60  ;;  %v4962_v32 = vld [vmem:[#allocation2 + $0x4] sm:$0x8] }
 0x25c   : > { %v2137_v45 = vadd.f32 %v2099_v55, %v1876_v61  ;;  %v11937_v7 = vsel %vm2973_vm5, %v14652_v42, %v14651_v20  ;;  %v4658_v41 = vsel %vm11925_vm9, %v11915_v31, %v11883_v8  ;;  %v14584_v27 = vrot.slane %v11906_v52, 2 }
 0x25d   : > { %v3578_v12 = vadd.s32 %v3577_v16, %v3567_v9  ;;  %v11950_v62 = vor.u32 %v2516_v11, %v2513_v4  ;;  %v14582_v63 = vrot.slane %v11906_v52, 3  ;;  %v3594_v36 = vmul.u32 58254, %v3589_v60 }
 0x25e   : > { %v11942_v55 = vadd.f32 %v2137_v45, %v1135_v39  ;;  %2901 = vmatmul.bf16.gmra.mxu3 %v11848_v58  ;;  %v3595_v24 = vshll.u32 %v3592_v44, 16  ;;  %v2657_v0 = vpop.f32.mrf.mxu2  ;;  %vm4515_vm10 = vcmp.ne.s32.totalorder %v11940_v18, 0  ;;  %vm4551_vm11 = vcmp.lt.s32.totalorder %v11940_v18, 0  ;;  %v11955_v39 = vld [vmem:[#allocation2 + $0x8] sm:$0xf] }
 0x25f   : > { %v3579_v45 = vadd.s32 %v3578_v12, %v3569_v19  ;;  %v3597_v58 = vshll.u32 %v3593_v43, 16  ;;  %14654 = vst [vmem:[#allocation22_spill] sm:$0xff] %v11955_v39  ;;  %v11958_v9 = vadd.s32 18, %v11940_v18  ;;  %v3596_v31 = vshrl.u32 %v3592_v44, 16  ;;  %v11968_v44 = vld [vmem:[%s14572_s2] ss:$0 sm:$0xff]  ;;  %vm11974_vm15 = vmand %vm4551_vm11, %vm4515_vm10 }
 0x260   : > { %14653 = vst [vmem:[#allocation21_spill] sm:$0xff] %v11942_v55  ;;  %vm3599_vm12 = vc.u32 %v3591_v33, %v3595_v24  ;;  %v3601_v61 = vadd.s32 %v3595_v24, %v3591_v33  ;;  %v3088_v60 = vpop.f32.mrf.mxu0  ;;  %v5017_v4 = vunpack.c.l.b16 %v4962_v32  ;;  %v14583_v19 = vunpack.c.l.b16 %v11955_v39 }
 0x261   : > { %v2862_v8 = vpop.f32.mrf.mxu3  ;;  %v3580_v38 = vshrl.u32 %v3579_v45, 4  ;;  %v3600_v30 = vsel %vm3599_vm12, 1, %v14639_v3  ;;  %v11963_v16 = vadd.s32 40, %v11755_v34 }
 0x262   : > { %v2863_v23 = vadd.f32 %v2862_v8, %v2657_v0  ;;  %v3602_v11 = vadd.s32 %v3600_v30, %v3594_v36  ;;  %vm3603_vm14 = vc.u32 %v3601_v61, %v3597_v58  ;;  %v11980_v36 = vadd.s32 48, %v11755_v34 }
 0x263   : > { %v3581_v33 = vmul.u32 18, %v3580_v38  ;;  %v3604_v12 = vsel %vm3603_vm14, 1, %v14639_v3  ;;  %v3617_v32 = vand.u32 65535, %v11963_v16  ;;  %v3618_v0 = vshrl.u32 %v11963_v16, 16 }
 0x264   : > { %v3176_v20 = vadd.f32 %v3086_v22, %v2863_v23  ;;  %v3598_v22 = vshrl.u32 %v3593_v43, 16  ;;  %v3606_v24 = vadd.s32 %v3604_v12, %v3602_v11  ;;  %v14657_v58 = vsel %vm11869_vm13, %v11861_v35, %v11832_v21 }
 0x265   : > { %vm11990_vm6 = vcmp.lt.s32.totalorder %v14657_v58, 16  ;;  %v11995_v61 = vsub.s32 %v11865_v29, %v3581_v33  ;;  %v14660_v43 = vrot.slane %v11812_v26, 2  ;;  %v10237_v29 = vld [vmem:[%s14573_s3 + $0x38] sm:$0xff]  ;;  %v12026_v30 = vmul.u32 58254, %v3617_v32 }
 0x266   : > { %v3248_v45 = vadd.f32 %v3176_v20, %v11452_v13  ;;  %v14661_v13 = vrot.slane %v11812_v26, 3  ;;  %v12024_v26 = vsel %vm2411_vm4, %v11873_v2, %v11950_v62  ;;  %v3607_v38 = vadd.s32 %v3606_v24, %v3596_v31  ;;  %v2659_v20 = vpop.f32.mrf.mxu2  ;;  %5514 = vmatpush.bf16.msrb.mxu2 %v10237_v29 }
 0x267   : > { %v12002_v23 = vsel %vm1899_vm3, %v14660_v43, %v14584_v27  ;;  %v12031_v33 = vpack.c.b16 %v14583_v19, %v5017_v4  ;;  %v3620_v12 = vmul.u32 14564, %v3617_v32  ;;  %v3646_v58 = vand.u32 65535, %v11980_v36 }
 0x268   : > { %v12009_v21 = vsel %vm2973_vm5, %v14661_v13, %v14582_v63  ;;  %v3360_v11 = vadd.f32 %v11968_v44, %v3248_v45  ;;  %vm12034_vm13 = vcmp.lt.s32.totalorder %v4658_v41, 16  ;;  %v3608_v2 = vadd.s32 %v3607_v38, %v3598_v22  ;;  %v12040_v45 = vld [vmem:[%s11005_s14 + $0x70] sm:$0xff]  ;;  %v3091_v19 = vpop.f32.mrf.mxu0  ;;  %v10269_v38 = vld [vmem:[%s14573_s3 + $0x138] sm:$0xff] }
 0x269   : > { %v2864_v43 = vpop.f32.mrf.mxu3  ;;  %v3622_v31 = vmul.u32 14564, %v3618_v0  ;;  %v3624_v24 = vshll.u32 %v12026_v30, 16  ;;  %v3647_v63 = vshrl.u32 %v11980_v36, 16  ;;  %vm4516_vm7 = vcmp.ne.s32.totalorder %v11995_v61, 0  ;;  %6184 = vmatpush.bf16.msrb.mxu0 %v10269_v38 }
 0x26a   : > { %v2865_v4 = vadd.f32 %v2864_v43, %v2659_v20  ;;  %vm4552_vm8 = vcmp.lt.s32.totalorder %v11995_v61, 0  ;;  %v3623_v41 = vmul.u32 58254, %v3618_v0  ;;  %v3396_v32 = vmax.f32 %v3360_v11, 0.0  ;;  %v10261_v20 = vld [vmem:[%s14573_s3 + $0xf8] sm:$0xff] }
 0x26b   : > { %v12046_v35 = vadd.s32 18, %v11995_v61  ;;  %v3609_v29 = vshrl.u32 %v3608_v2, 4  ;;  %v3626_v22 = vshll.u32 %v3622_v31, 16  ;;  %v3625_v43 = vshrl.u32 %v12026_v30, 16  ;;  %2701 = vmatmul.bf16.gmra.mxu2 %v11896_v54  ;;  %3130 = vmatmul.bf16.gmra.mxu0 %v11937_v7  ;;  %vm12066_vm10 = vmand %vm4552_vm8, %vm4516_vm7 }
 0x26c   : > { %v3177_v59 = vadd.f32 %v3088_v60, %v2865_v4  ;;  %vm3628_vm9 = vc.u32 %v3620_v12, %v3624_v24  ;;  %v3630_v27 = vadd.s32 %v3624_v24, %v3620_v12  ;;  %v2520_v60 = vshrl.u32 %v12040_v45, 16  ;;  %6540 = vmatpush.bf16.msrb.mxu1 %v10261_v20 }
 0x26d   : > { %v3610_v0 = vmul.u32 18, %v3609_v29  ;;  %v3629_v11 = vsel %vm3628_vm9, 1, %v14639_v3  ;;  %v2523_v2 = vshll.u32 %v12040_v45, 16  ;;  %v2773_v7 = vrot.slane %v12040_v45, 2 }
 0x26e   : > { %v3249_v4 = vadd.f32 %v3177_v59, %v11468_v46  ;;  %2906 = vmatmul.bf16.gmra.mxu3 %v11903_v6  ;;  %v3631_v54 = vadd.s32 %v3629_v11, %v3623_v41  ;;  %vm3632_vm11 = vc.u32 %v3630_v27, %v3626_v22  ;;  %v5073_v46 = vrot.slane %v12031_v33, 3  ;;  %v2662_v59 = vpop.f32.mrf.mxu2 }
 0x26f   : > { %v12072_v12 = vsub.s32 %v11880_v10, %v3610_v0  ;;  %v3627_v6 = vshrl.u32 %v3622_v31, 16  ;;  %v3633_v24 = vsel %vm3632_vm11, 1, %v14639_v3  ;;  %v2522_v17 = vrot.slane %v2520_v60, 2 }
 0x270   : > { %v3361_v29 = vadd.f32 %v11968_v44, %v3249_v4  ;;  %v3635_v55 = vadd.s32 %v3633_v24, %v3631_v54  ;;  %v2525_v39 = vrot.slane %v2523_v2, 3  ;;  %v4801_v27 = vsel %vm11990_vm6, %v3396_v32, 0.0  ;;  %v3093_v11 = vpop.f32.mrf.mxu0 }
 0x271   : > { %v2867_v41 = vpop.f32.mrf.mxu3  ;;  %v4660_v10 = vsel %vm12066_vm10, %v12046_v35, %v11995_v61  ;;  %v14666_v31 = vrot.slane %v11906_v52, 2  ;;  %v2997_v38 = vrot.slane %v12040_v45, 3  ;;  %vm4517_vm12 = vcmp.ne.s32.totalorder %v12072_v12, 0 }
 0x272   : > { %v3397_v20 = vmax.f32 %v3361_v29, 0.0  ;;  %v2868_v0 = vadd.f32 %v2867_v41, %v2662_v59  ;;  %v3636_v8 = vadd.s32 %v3635_v55, %v3625_v43  ;;  %v14667_v61 = vsel %vm11974_vm15, %v11958_v9, %v11940_v18 }
 0x273   : > { %v12088_v22 = vsel %vm1899_vm3, %v14666_v31, %v2773_v7  ;;  %vm12097_vm14 = vcmp.lt.s32.totalorder %v14667_v61, 16  ;;  %vm4553_vm6 = vcmp.lt.s32.totalorder %v12072_v12, 0  ;;  %v12103_v32 = vadd.s32 18, %v12072_v12 }
 0x274   : > { %v3649_v60 = vmul.u32 14564, %v3646_v58  ;;  %v3650_v2 = vmul.u32 58254, %v3646_v58  ;;  %v4802_v4 = vsel %vm12034_vm13, %v3397_v20, 0.0  ;;  %v3178_v55 = vadd.f32 %v3091_v19, %v2868_v0  ;;  %vm12131_vm7 = vmand %vm4553_vm6, %vm4517_vm12 }
 0x275   : > { %v3637_v43 = vadd.s32 %v3636_v8, %v3627_v6  ;;  %v12107_v42 = vor.u32 %v2525_v39, %v2522_v17  ;;  %v10344_v30 = vpack.c.bf16 %v4802_v4, %v4801_v27  ;;  %v3651_v18 = vmul.u32 14564, %v3647_v63 }
 0x276   : > { %v3652_v9 = vmul.u32 58254, %v3647_v63  ;;  %v3653_v54 = vshll.u32 %v3650_v2, 16  ;;  %v3250_v24 = vadd.f32 %v3178_v55, %v11479_v57  ;;  %v14670_v59 = vrot.slane %v11906_v52, 3  ;;  %v2664_v6 = vpop.f32.mrf.mxu2 }
 0x277   : > { %v3638_v29 = vshrl.u32 %v3637_v43, 4  ;;  %v12118_v13 = vadd.s32 56, %v11755_v34  ;;  %10668 = vst [vmem:[#allocation2 + $0x10] sm:$0xff] %v10344_v30   ;;  %v3654_v17 = vshrl.u32 %v3650_v2, 16  ;;  %v3655_v39 = vshll.u32 %v3651_v18, 16  ;;  %v12141_v43 = vld [vmem:[%s11005_s14 + $0x78] sm:$0xff] }
 0x278   : > { %v12115_v58 = vsel %vm2973_vm5, %v14670_v59, %v2997_v38  ;;  %vm3657_vm15 = vc.u32 %v3649_v60, %v3653_v54  ;;  %v3659_v19 = vadd.s32 %v3653_v54, %v3649_v60  ;;  %v3362_v63 = vadd.f32 %v11968_v44, %v3250_v24  ;;  %v3096_v4 = vpop.f32.mrf.mxu0 }
 0x279   : > { %v3639_v57 = vmul.u32 18, %v3638_v29  ;;  %v3658_v27 = vsel %vm3657_vm15, 1, %v14639_v3  ;;  %v3675_v52 = vand.u32 65535, %v12118_v13  ;;  %v2869_v41 = vpop.f32.mrf.mxu3  ;;  %vm12123_vm13 = vcmp.lt.s32.totalorder %v4660_v10, 16 }
 0x27a   : > { %v3656_v0 = vshrl.u32 %v3651_v18, 16  ;;  %v3660_v8 = vadd.s32 %v3658_v27, %v3652_v9  ;;  %vm3661_vm8 = vc.u32 %v3659_v19, %v3655_v39  ;;  %v3676_v61 = vshrl.u32 %v12118_v13, 16 }
 0x27b   : > { %v3398_v60 = vmax.f32 %v3362_v63, 0.0  ;;  %v2870_v2 = vadd.f32 %v2869_v41, %v2664_v6  ;;  %v12137_v10 = vsub.s32 %v11963_v16, %v3639_v57  ;;  %v3662_v55 = vsel %vm3661_vm8, 1, %v14639_v3  ;;  %2706 = vmatmul.bf16.gmra.mxu2 %v12024_v26  ;;  %3135 = vmatmul.bf16.gmra.mxu0 %v12009_v21 }
 0x27c   : > { %v3664_v30 = vadd.s32 %v3662_v55, %v3660_v8  ;;  %v3678_v54 = vmul.u32 14564, %v3675_v52  ;;  %v3679_v24 = vmul.u32 58254, %v3675_v52  ;;  %v3680_v29 = vmul.u32 14564, %v3676_v61 }
 0x27d   : > { %v3179_v59 = vadd.f32 %v3093_v11, %v2870_v2  ;;  %v4661_v18 = vsel %vm12131_vm7, %v12103_v32, %v12072_v12  ;;  %vm4518_vm9 = vcmp.ne.s32.totalorder %v12137_v10, 0  ;;  %v12151_v16 = vsel %vm2411_vm4, %v11950_v62, %v12107_v42 }
 0x27e   : > { %vm4554_vm10 = vcmp.lt.s32.totalorder %v12137_v10, 0  ;;  %v3665_v9 = vadd.s32 %v3664_v30, %v3654_v17  ;;  %v3681_v11 = vmul.u32 58254, %v3676_v61  ;;  %v3682_v39 = vshll.u32 %v3679_v24, 16  ;;  %2911 = vmatmul.bf16.gmra.mxu3 %v12002_v23  ;;  %v12160_v32 = vld [vmem:[#allocation2 + $0xc] sm:$0xff]  ;;  %v2667_v57 = vpop.f32.mrf.mxu2 }
 0x27f   : > { %v4803_v19 = vsel %vm12097_vm14, %v3398_v60, 0.0  ;;  %v3251_v12 = vadd.f32 %v3179_v59, %v11495_v49  ;;  %v3684_v62 = vshll.u32 %v3680_v29, 16  ;;  %v2529_v63 = vshrl.u32 %v12141_v43, 16  ;;  %vm12170_vm12 = vmand %vm4554_vm10, %vm4518_vm9 }
 0x280   : > { %v4626_v26 = vadd.s32 18, %v12137_v10  ;;  %v3666_v21 = vadd.s32 %v3665_v9, %v3656_v0  ;;  %vm3686_vm11 = vc.u32 %v3678_v54, %v3682_v39  ;;  %v3688_v6 = vadd.s32 %v3682_v39, %v3678_v54  ;;  %v3098_v60 = vpop.f32.mrf.mxu0 }
 0x281   : > { %v3363_v17 = vadd.f32 %v11968_v44, %v3251_v12  ;;  %v5074_v35 = vrot.slane %v12160_v32, 3  ;;  %v3683_v23 = vshrl.u32 %v3679_v24, 16  ;;  %v3687_v27 = vsel %vm3686_vm11, 1, %v14639_v3  ;;  %v2872_v52 = vpop.f32.mrf.mxu3 }
 0x282   : > { %v3667_v41 = vshrl.u32 %v3666_v21, 4  ;;  %v3685_v20 = vshrl.u32 %v3680_v29, 16  ;;  %v3689_v0 = vadd.s32 %v3687_v27, %v3681_v11  ;;  %vm3690_vm14 = vc.u32 %v3688_v6, %v3684_v62 }
 0x283   : > { %v3399_v8 = vmax.f32 %v3363_v17, 0.0  ;;  %v2873_v61 = vadd.f32 %v2872_v52, %v2667_v57  ;;  %v5075_v2 = vsel %vm2973_vm5, %v5073_v46, %v5074_v35  ;;  %v3691_v55 = vsel %vm3690_vm14, 1, %v14639_v3 }
 0x284   : > { %5184 = vmatmul.bf16.vlgmr.msra.gmra.mxu1 %v5075_v2  ;;  %v4662_v30 = vsel %vm12170_vm12, %v4626_v26, %v12137_v10  ;;  %v3668_v54 = vmul.u32 18, %v3667_v41  ;;  %v3693_v24 = vadd.s32 %v3691_v55, %v3689_v0  ;;  %v2532_v29 = vshll.u32 %v12141_v43, 16 }
 0x285   : > { %v4804_v59 = vsel %vm12123_vm13, %v3399_v8, 0.0  ;;  %v3180_v9 = vadd.f32 %v3096_v4, %v2873_v61  ;;  %v2531_v11 = vrot.slane %v2529_v63, 2  ;;  %v12188_v39 = vadd.s32 64, %v11755_v34 }
 0x286   : > { %v10349_v46 = vpack.c.bf16 %v4804_v59, %v4803_v19  ;;  %v12191_v12 = vsub.s32 %v11980_v36, %v3668_v54  ;;  %v3694_v62 = vadd.s32 %v3693_v24, %v3683_v23  ;;  %v2534_v21 = vrot.slane %v2532_v29, 3  ;;  %v10252_v19 = vld [vmem:[%s14573_s3 + $0xb0] sm:$0xff]  ;;  %v2669_v17 = vpop.f32.mrf.mxu2 }
 0x287   : > { %v3252_v10 = vadd.f32 %v3180_v9, %v11500_v53  ;;  %v2775_v26 = vrot.slane %v12141_v43, 2  ;;  %v2999_v6 = vrot.slane %v12141_v43, 3  ;;  %v3704_v31 = vand.u32 65535, %v12188_v39  ;;  %v10236_v53 = vld [vmem:[%s14573_s3 + $0x30] sm:$0xff]  ;;  %5787 = vmatpush.bf16.msrb.mxu3 %v10252_v19 }
 0x288   : > { %10669 = vst [vmem:[#allocation2 + $0x18] sm:$0xff] %v10349_v46   ;;  %vm12197_vm6 = vcmp.lt.s32.totalorder %v4661_v18, 16  ;;  %vm4519_vm15 = vcmp.ne.s32.totalorder %v12191_v12, 0  ;;  %vm4555_vm13 = vcmp.lt.s32.totalorder %v12191_v12, 0  ;;  %v3695_v36 = vadd.s32 %v3694_v62, %v3685_v20  ;;  %5515 = vmatpush.bf16.msrb.mxu2 %v10236_v53  ;;  %v3101_v55 = vpop.f32.mrf.mxu0  ;;  %v10260_v62 = vld [vmem:[%s14573_s3 + $0xf0] sm:$0xff] }
 0x289   : > { %v3364_v63 = vadd.f32 %v11968_v44, %v3252_v10  ;;  %v4627_v18 = vadd.s32 18, %v12191_v12  ;;  %v12211_v57 = vor.u32 %v2534_v21, %v2531_v11  ;;  %v3705_v49 = vshrl.u32 %v12188_v39, 16  ;;  %v2874_v23 = vpop.f32.mrf.mxu3  ;;  %vm12218_vm8 = vmand %vm4555_vm13, %vm4519_vm15  ;;  %6541 = vmatpush.bf16.msrb.mxu1 %v10260_v62 }
 0x28a   : > { %vm12214_vm7 = vcmp.lt.s32.totalorder %v4662_v30, 16  ;;  %v3696_v41 = vshrl.u32 %v3695_v36, 4  ;;  %v3707_v20 = vmul.u32 14564, %v3704_v31  ;;  %v12222_v0 = vmul.u32 58254, %v3704_v31 }
 0x28b   : > { %v12225_v8 = vadd.s32 72, %v11755_v34  ;;  %v3400_v61 = vmax.f32 %v3364_v63, 0.0  ;;  %v2875_v2 = vadd.f32 %v2874_v23, %v2669_v17  ;;  %v12232_v30 = vsel %vm1899_vm3, %v2773_v7, %v2775_v26  ;;  %2711 = vmatmul.bf16.gmra.mxu2 %v12151_v16  ;;  %3140 = vmatmul.bf16.gmra.mxu0 %v12115_v58 }
 0x28c   : > { %v12239_v54 = vsel %vm2973_vm5, %v2997_v38, %v2999_v6  ;;  %v3697_v24 = vmul.u32 18, %v3696_v41  ;;  %v12241_v29 = vmul.u32 14564, %v3705_v49  ;;  %v3710_v59 = vmul.u32 58254, %v3705_v49  ;;  %v10268_v38 = vld [vmem:[%s14573_s3 + $0x130] sm:$0xff] }
 0x28d   : > { %v3711_v9 = vshll.u32 %v12222_v0, 16  ;;  %v4805_v11 = vsel %vm12197_vm6, %v3400_v61, 0.0  ;;  %v3181_v46 = vadd.f32 %v3098_v60, %v2875_v2  ;;  %v4663_v7 = vsel %vm12218_vm8, %v4627_v18, %v12191_v12  ;;  %6185 = vmatpush.bf16.msrb.mxu0 %v10268_v38 }
 0x28e   : > { %v12252_v45 = vsel %vm2411_vm4, %v12107_v42, %v12211_v57  ;;  %v3698_v60 = vsub.s32 %v12118_v13, %v3697_v24  ;;  %v3713_v12 = vshll.u32 %v12241_v29, 16  ;;  %v3733_v42 = vand.u32 65535, %v12225_v8  ;;  %2916 = vmatmul.bf16.gmra.mxu3 %v12088_v22  ;;  %v2672_v53 = vpop.f32.mrf.mxu2  ;;  %v12290_v24 = vld [vmem:[%s11005_s14 + $0x80] sm:$0xff] }
 0x28f   : > { %vm3715_vm9 = vc.u32 %v3707_v20, %v3711_v9  ;;  %v3253_v21 = vadd.f32 %v3181_v46, %v11516_v1  ;;  %v12267_v10 = vld [vmem:[#allocation2 + $0x14] sm:$0xff]  ;;  %v3717_v4 = vadd.s32 %v3711_v9, %v3707_v20  ;;  %v3734_v16 = vshrl.u32 %v12225_v8, 16 }
 0x290   : > { %v3716_v31 = vsel %vm3715_vm9, 1, %v14639_v3  ;;  %vm4520_vm10 = vcmp.ne.s32.totalorder %v3698_v60, 0  ;;  %vm4556_vm11 = vcmp.lt.s32.totalorder %v3698_v60, 0  ;;  %v4628_v58 = vadd.s32 18, %v3698_v60  ;;  %v3103_v61 = vpop.f32.mrf.mxu0 }
 0x291   : > { %v3718_v13 = vadd.s32 %v3716_v31, %v3710_v59  ;;  %v3365_v36 = vadd.f32 %v11968_v44, %v3253_v21  ;;  %v5076_v1 = vrot.slane %v12267_v10, 3  ;;  %vm12273_vm12 = vmand %vm4556_vm11, %vm4520_vm10  ;;  %v3712_v19 = vshrl.u32 %v12222_v0, 16  ;;  %v2877_v63 = vpop.f32.mrf.mxu3 }
 0x292   : > { %vm3719_vm14 = vc.u32 %v3717_v4, %v3713_v12  ;;  %vm12278_vm6 = vcmp.lt.s32.totalorder %v4663_v7, 16  ;;  %v3736_v49 = vmul.u32 14564, %v3733_v42  ;;  %v3737_v23 = vmul.u32 58254, %v3733_v42 }
 0x293   : > { %v3720_v18 = vsel %vm3719_vm14, 1, %v14639_v3  ;;  %v3738_v52 = vmul.u32 14564, %v3734_v16  ;;  %v3401_v41 = vmax.f32 %v3365_v36, 0.0  ;;  %v2878_v20 = vadd.f32 %v2877_v63, %v2672_v53 }
 0x294   : > { %v5077_v0 = vsel %vm2973_vm5, %v5074_v35, %v5076_v1  ;;  %v3714_v2 = vshrl.u32 %v12241_v29, 16  ;;  %v4664_v59 = vsel %vm12273_vm12, %v4628_v58, %v3698_v60  ;;  %v3722_v9 = vadd.s32 %v3720_v18, %v3718_v13 }
 0x295   : > { %5189 = vmatmul.bf16.gmra.mxu1 %v5077_v0  ;;  %v3739_v46 = vmul.u32 58254, %v3734_v16  ;;  %v3740_v7 = vshll.u32 %v3737_v23, 16  ;;  %v4806_v38 = vsel %vm12214_vm7, %v3401_v41, 0.0  ;;  %v3182_v62 = vadd.f32 %v3101_v55, %v2878_v20 }
 0x296   : > { %v3741_v12 = vshrl.u32 %v3737_v23, 16  ;;  %v3742_v42 = vshll.u32 %v3738_v52, 16  ;;  %v10354_v32 = vpack.c.bf16 %v4806_v38, %v4805_v11  ;;  %v3723_v21 = vadd.s32 %v3722_v9, %v3712_v19  ;;  %v2674_v11 = vpop.f32.mrf.mxu2 }
 0x297   : > { %vm3744_vm15 = vc.u32 %v3736_v49, %v3740_v7  ;;  %v3746_v35 = vadd.s32 %v3740_v7, %v3736_v49  ;;  %v3254_v29 = vadd.f32 %v3182_v62, %v11521_v14  ;;  %v2538_v4 = vshrl.u32 %v12290_v24, 16 }
 0x298   : > { %v3745_v31 = vsel %vm3744_vm15, 1, %v14639_v3  ;;  %v2541_v60 = vshll.u32 %v12290_v24, 16  ;;  %10670 = vst [vmem:[#allocation2 + $0x20] sm:$0xff] %v10354_v32   ;;  %v3724_v16 = vadd.s32 %v3723_v21, %v3714_v2  ;;  %v2777_v27 = vrot.slane %v12290_v24, 2  ;;  %v3106_v20 = vpop.f32.mrf.mxu0 }
 0x299   : > { %v3747_v58 = vadd.s32 %v3745_v31, %v3739_v46  ;;  %vm3748_vm13 = vc.u32 %v3746_v35, %v3742_v42  ;;  %v3366_v55 = vadd.f32 %v11968_v44, %v3254_v29  ;;  %v2540_v36 = vrot.slane %v2538_v4, 2  ;;  %v2879_v14 = vpop.f32.mrf.mxu3 }
 0x29a   : > { %v3749_v13 = vsel %vm3748_vm13, 1, %v14639_v3  ;;  %v2543_v53 = vrot.slane %v2541_v60, 3  ;;  %vm12303_vm7 = vcmp.lt.s32.totalorder %v4664_v59, 16  ;;  %v3725_v19 = vshrl.u32 %v3724_v16, 4 }
 0x29b   : > { %v3743_v63 = vshrl.u32 %v3738_v52, 16  ;;  %v3751_v18 = vadd.s32 %v3749_v13, %v3747_v58  ;;  %v3001_v49 = vrot.slane %v12290_v24, 3  ;;  %v3402_v23 = vmax.f32 %v3366_v55, 0.0  ;;  %2716 = vmatmul.bf16.gmra.mxu2 %v12252_v45  ;;  %3145 = vmatmul.bf16.gmra.mxu0 %v12239_v54 }
 0x29c   : > { %v2880_v41 = vadd.f32 %v2879_v14, %v2674_v11  ;;  %v12308_v0 = vor.u32 %v2543_v53, %v2540_v36  ;;  %v12311_v2 = vadd.s32 80, %v11755_v34  ;;  %v3726_v9 = vmul.u32 18, %v3725_v19 }
 0x29d   : > { %v3752_v46 = vadd.s32 %v3751_v18, %v3741_v12  ;;  %v12318_v59 = vsel %vm1899_vm3, %v2775_v26, %v2777_v27  ;;  %v12321_v52 = vadd.s32 88, %v11755_v34  ;;  %v4807_v7 = vsel %vm12278_vm6, %v3402_v23, 0.0 }
 0x29e   : > { %v3183_v38 = vadd.f32 %v3103_v61, %v2880_v41  ;;  %v12330_v62 = vsel %vm2973_vm5, %v2999_v6, %v3001_v49  ;;  %v3762_v12 = vand.u32 65535, %v12311_v2  ;;  %v3727_v26 = vsub.s32 %v12188_v39, %v3726_v9  ;;  %2921 = vmatmul.bf16.gmra.mxu3 %v12232_v30 }
 0x29f   : > { %v3753_v42 = vadd.s32 %v3752_v46, %v3743_v63  ;;  %v12339_v17 = vsel %vm2411_vm4, %v12211_v57, %v12308_v0  ;;  %v3763_v61 = vshrl.u32 %v12311_v2, 16  ;;  %v12344_v6 = vld [vmem:[#allocation2 + $0x1c] sm:$0xff]  ;;  %v3791_v54 = vand.u32 65535, %v12321_v52  ;;  %v2677_v57 = vpop.f32.mrf.mxu2 }
 0x2a0   : > { %v3255_v43 = vadd.f32 %v3183_v38, %v11540_v51  ;;  %v3765_v32 = vmul.u32 14564, %v3762_v12  ;;  %v3766_v45 = vmul.u32 58254, %v3762_v12  ;;  %vm4521_vm8 = vcmp.ne.s32.totalorder %v3727_v26, 0  ;;  %v3108_v13 = vpop.f32.mrf.mxu0 }
 0x2a1   : > { %vm4557_vm9 = vcmp.lt.s32.totalorder %v3727_v26, 0  ;;  %v4629_v39 = vadd.s32 18, %v3727_v26  ;;  %v3754_v21 = vshrl.u32 %v3753_v42, 4  ;;  %v5078_v29 = vrot.slane %v12344_v6, 3  ;;  %v2882_v30 = vpop.f32.mrf.mxu3 }
 0x2a2   : > { %v3367_v35 = vadd.f32 %v11968_v44, %v3255_v43  ;;  %vm4593_vm10 = vmand %vm4557_vm9, %vm4521_vm8  ;;  %v3767_v31 = vmul.u32 14564, %v3763_v61  ;;  %v3792_v51 = vshrl.u32 %v12321_v52, 16  ;;  %v3768_v16 = vmul.u32 58254, %v3763_v61 }
 0x2a3   : > { %v4665_v4 = vsel %vm4593_vm10, %v4629_v39, %v3727_v26  ;;  %v3755_v60 = vmul.u32 18, %v3754_v21  ;;  %v3769_v58 = vshll.u32 %v3766_v45, 16  ;;  %v2883_v11 = vadd.f32 %v2882_v30, %v2677_v57  ;;  %v12369_v26 = vld [vmem:[%s11005_s14 + $0x88] sm:$0xff] }
 0x2a4   : > { %v3403_v55 = vmax.f32 %v3367_v35, 0.0  ;;  %v5079_v36 = vsel %vm2973_vm5, %v5076_v1, %v5078_v29  ;;  %v3770_v53 = vshrl.u32 %v3766_v45, 16  ;;  %vm12355_vm11 = vcmp.lt.s32.totalorder %v4665_v4, 16 }
 0x2a5   : > { %5194 = vmatmul.bf16.gmra.mxu1 %v5079_v36  ;;  %v3756_v19 = vsub.s32 %v12225_v8, %v3755_v60  ;;  %v3771_v63 = vshll.u32 %v3767_v31, 16  ;;  %vm3773_vm12 = vc.u32 %v3765_v32, %v3769_v58  ;;  %v3184_v23 = vadd.f32 %v3106_v20, %v2883_v11 }
 0x2a6   : > { %v4808_v18 = vsel %vm12303_vm7, %v3403_v55, 0.0  ;;  %v3774_v41 = vsel %vm3773_vm12, 1, %v14639_v3  ;;  %v3775_v10 = vadd.s32 %v3769_v58, %v3765_v32  ;;  %v3794_v12 = vmul.u32 14564, %v3791_v54 }
 0x2a7   : > { %v10359_v9 = vpack.c.bf16 %v4808_v18, %v4807_v7  ;;  %vm4522_vm14 = vcmp.ne.s32.totalorder %v3756_v19, 0  ;;  %vm4558_vm6 = vcmp.lt.s32.totalorder %v3756_v19, 0  ;;  %v4630_v1 = vadd.s32 18, %v3756_v19 }
 0x2a8   : > { %v3256_v46 = vadd.f32 %v3184_v23, %v11548_v50  ;;  %vm12364_vm15 = vmand %vm4558_vm6, %vm4522_vm14  ;;  %v3776_v8 = vadd.s32 %v3774_v41, %v3768_v16  ;;  %vm3777_vm13 = vc.u32 %v3775_v10, %v3771_v63  ;;  %v3795_v7 = vmul.u32 58254, %v3791_v54  ;;  %v2679_v50 = vpop.f32.mrf.mxu2  ;;  %v3111_v58 = vpop.f32.mrf.mxu0  ;;  %v10235_v23 = vld [vmem:[%s14573_s3 + $0x28] sm:$0xff] }
 0x2a9   : > { %10671 = vst [vmem:[#allocation2 + $0x28] sm:$0xff] %v10359_v9   ;;  %v4666_v22 = vsel %vm12364_vm15, %v4630_v1, %v3756_v19  ;;  %v3778_v20 = vsel %vm3777_vm13, 1, %v14639_v3  ;;  %v3796_v42 = vmul.u32 14564, %v3792_v51  ;;  %v3772_v43 = vshrl.u32 %v3767_v31, 16  ;;  %v2884_v39 = vpop.f32.mrf.mxu3  ;;  %5516 = vmatpush.bf16.msrb.mxu2 %v10235_v23 }
 0x2aa   : > { %v3368_v61 = vadd.f32 %v11968_v44, %v3256_v46  ;;  %v3780_v32 = vadd.s32 %v3778_v20, %v3776_v8  ;;  %v3797_v45 = vmul.u32 58254, %v3792_v51  ;;  %vm12375_vm7 = vcmp.lt.s32.totalorder %v4666_v22, 16 }
 0x2ab   : > { %v3798_v35 = vshll.u32 %v3795_v7, 16  ;;  %v3799_v57 = vshrl.u32 %v3795_v7, 16  ;;  %v3800_v30 = vshll.u32 %v3796_v42, 16  ;;  %v3801_v4 = vshrl.u32 %v3796_v42, 16  ;;  %2721 = vmatmul.bf16.gmra.mxu2 %v12339_v17  ;;  %3150 = vmatmul.bf16.gmra.mxu0 %v12330_v62 }
 0x2ac   : > { %v3404_v60 = vmax.f32 %v3368_v61, 0.0  ;;  %v2885_v16 = vadd.f32 %v2884_v39, %v2679_v50  ;;  %v3781_v54 = vadd.s32 %v3780_v32, %v3770_v53  ;;  %v2547_v55 = vshrl.u32 %v12369_v26, 16  ;;  %v10251_v53 = vld [vmem:[%s14573_s3 + $0xa8] sm:$0xff] }
 0x2ad   : > { %vm3802_vm8 = vc.u32 %v3794_v12, %v3798_v35  ;;  %v3804_v11 = vadd.s32 %v3798_v35, %v3794_v12  ;;  %v2550_v31 = vshll.u32 %v12369_v26, 16  ;;  %v2779_v51 = vrot.slane %v12369_v26, 2  ;;  %5788 = vmatpush.bf16.msrb.mxu3 %v10251_v53 }
 0x2ae   : > { %v4809_v36 = vsel %vm12355_vm11, %v3404_v60, 0.0  ;;  %v3185_v19 = vadd.f32 %v3108_v13, %v2885_v16  ;;  %v3782_v63 = vadd.s32 %v3781_v54, %v3772_v43  ;;  %v3803_v18 = vsel %vm3802_vm8, 1, %v14639_v3  ;;  %2926 = vmatmul.bf16.gmra.mxu3 %v12318_v59 }
 0x2af   : > { %v3805_v41 = vadd.s32 %v3803_v18, %v3797_v45  ;;  %vm3806_vm9 = vc.u32 %v3804_v11, %v3800_v30  ;;  %v2549_v14 = vrot.slane %v2547_v55, 2  ;;  %v2552_v10 = vrot.slane %v2550_v31, 3 }
 0x2b0   : > { %v3257_v13 = vadd.f32 %v3185_v19, %v11561_v25  ;;  %v3783_v9 = vshrl.u32 %v3782_v63, 4  ;;  %v12395_v1 = vld [vmem:[#allocation2 + $0x24] sm:$0xff]  ;;  %v3807_v46 = vsel %vm3806_vm9, 1, %v14639_v3  ;;  %v12403_v17 = vsel %vm1899_vm3, %v2777_v27, %v2779_v51  ;;  %v2682_v12 = vpop.f32.mrf.mxu2  ;;  %v3113_v35 = vpop.f32.mrf.mxu0 }
 0x2b1   : > { %v3809_v62 = vadd.s32 %v3807_v46, %v3805_v41  ;;  %v12405_v38 = vor.u32 %v2552_v10, %v2549_v14  ;;  %v3003_v25 = vrot.slane %v12369_v26, 3  ;;  %v12409_v59 = vadd.s32 96, %v11755_v34  ;;  %v2887_v27 = vpop.f32.mrf.mxu3 }
 0x2b2   : > { %v3369_v8 = vadd.f32 %v11968_v44, %v3257_v13  ;;  %v3784_v22 = vmul.u32 18, %v3783_v9  ;;  %v5080_v20 = vrot.slane %v12395_v1, 3  ;;  %v12414_v7 = vadd.s32 104, %v11755_v34 }
 0x2b3   : > { %v3810_v42 = vadd.s32 %v3809_v62, %v3799_v57  ;;  %v2554_v61 = vsel %vm2411_vm4, %v12308_v0, %v12405_v38  ;;  %v3004_v50 = vsel %vm2973_vm5, %v3001_v49, %v3003_v25  ;;  %v3820_v43 = vand.u32 65535, %v12409_v59 }
 0x2b4   : > { %v3405_v32 = vmax.f32 %v3369_v8, 0.0  ;;  %v2888_v45 = vadd.f32 %v2887_v27, %v2682_v12  ;;  %v3785_v39 = vsub.s32 %v12311_v2, %v3784_v22  ;;  %v5081_v57 = vsel %vm2973_vm5, %v5078_v29, %v5080_v20  ;;  %v10267_v12 = vld [vmem:[%s14573_s3 + $0x128] sm:$0xff] }
 0x2b5   : > { %5199 = vmatmul.bf16.gmra.mxu1 %v5081_v57  ;;  %v3811_v0 = vadd.s32 %v3810_v42, %v3801_v4  ;;  %v3821_v30 = vshrl.u32 %v12409_v59, 16  ;;  %v3823_v24 = vmul.u32 14564, %v3820_v43  ;;  %v3824_v60 = vmul.u32 58254, %v3820_v43  ;;  %v10259_v22 = vld [vmem:[%s14573_s3 + $0xe8] sm:$0xff]  ;;  %6186 = vmatpush.bf16.msrb.mxu0 %v10267_v12 }
 0x2b6   : > { %v4810_v49 = vsel %vm12375_vm7, %v3405_v32, 0.0  ;;  %v3186_v16 = vadd.f32 %v3111_v58, %v2888_v45  ;;  %vm4523_vm10 = vcmp.ne.s32.totalorder %v3785_v39, 0  ;;  %vm4559_vm11 = vcmp.lt.s32.totalorder %v3785_v39, 0  ;;  %6542 = vmatpush.bf16.msrb.mxu1 %v10259_v22 }
 0x2b7   : > { %v10364_v2 = vpack.c.bf16 %v4810_v49, %v4809_v36  ;;  %vm4595_vm12 = vmand %vm4559_vm11, %vm4523_vm10  ;;  %v4631_v54 = vadd.s32 18, %v3785_v39  ;;  %v3812_v55 = vshrl.u32 %v3811_v0, 4  ;;  %v3825_v11 = vmul.u32 14564, %v3821_v30 }
 0x2b8   : > { %v3258_v6 = vadd.f32 %v3186_v16, %v11569_v5  ;;  %v3826_v29 = vmul.u32 58254, %v3821_v30  ;;  %v3827_v31 = vshll.u32 %v3824_v60, 16  ;;  %v3828_v4 = vshrl.u32 %v3824_v60, 16  ;;  %v2684_v36 = vpop.f32.mrf.mxu2  ;;  %v3116_v62 = vpop.f32.mrf.mxu0 }
 0x2b9   : > { %10672 = vst [vmem:[#allocation2 + $0x30] sm:$0xff] %v10364_v2   ;;  %v4667_v19 = vsel %vm4595_vm12, %v4631_v54, %v3785_v39  ;;  %v3813_v63 = vmul.u32 18, %v3812_v55  ;;  %v3829_v18 = vshll.u32 %v3825_v11, 16  ;;  %v3830_v23 = vshrl.u32 %v3825_v11, 16  ;;  %v2889_v41 = vpop.f32.mrf.mxu3 }
 0x2ba   : > { %v3370_v21 = vadd.f32 %v11968_v44, %v3258_v6  ;;  %vm12436_vm14 = vcmp.lt.s32.totalorder %v4667_v19, 16  ;;  %vm3831_vm6 = vc.u32 %v3823_v24, %v3827_v31  ;;  %v3833_v53 = vadd.s32 %v3827_v31, %v3823_v24 }
 0x2bb   : > { %v3814_v5 = vsub.s32 %v12321_v52, %v3813_v63  ;;  %v3832_v14 = vsel %vm3831_vm6, 1, %v14639_v3  ;;  %v3849_v10 = vand.u32 65535, %v12414_v7  ;;  %v3850_v13 = vshrl.u32 %v12414_v7, 16  ;;  %v12451_v52 = vld [vmem:[%s11005_s14 + $0x90] sm:$0xff]  ;;  %2726 = vmatmul.bf16.gmra.mxu2 %v2554_v61  ;;  %3155 = vmatmul.bf16.gmra.mxu0 %v3004_v50 }
 0x2bc   : > { %v3406_v9 = vmax.f32 %v3370_v21, 0.0  ;;  %v2890_v46 = vadd.f32 %v2889_v41, %v2684_v36  ;;  %v3834_v8 = vadd.s32 %v3832_v14, %v3826_v29  ;;  %vm3835_vm15 = vc.u32 %v3833_v53, %v3829_v18 }
 0x2bd   : > { %vm4524_vm13 = vcmp.ne.s32.totalorder %v3814_v5, 0  ;;  %vm4560_vm7 = vcmp.lt.s32.totalorder %v3814_v5, 0  ;;  %v4632_v27 = vadd.s32 18, %v3814_v5  ;;  %v3836_v42 = vsel %vm3835_vm15, 1, %v14639_v3 }
 0x2be   : > { %v4811_v43 = vsel %vm12436_vm14, %v3406_v9, 0.0  ;;  %v3187_v32 = vadd.f32 %v3113_v35, %v2890_v46  ;;  %vm4596_vm8 = vmand %vm4560_vm7, %vm4524_vm13  ;;  %v3838_v45 = vadd.s32 %v3836_v42, %v3834_v8  ;;  %v3852_v39 = vmul.u32 14564, %v3849_v10  ;;  %2931 = vmatmul.bf16.gmra.mxu3 %v12403_v17 }
 0x2bf   : > { %v4668_v57 = vsel %vm4596_vm8, %v4632_v27, %v3814_v5  ;;  %v3853_v0 = vmul.u32 58254, %v3849_v10  ;;  %v12456_v30 = vmul.u32 14564, %v3850_v13  ;;  %v3855_v24 = vmul.u32 58254, %v3850_v13  ;;  %v12485_v5 = vld [vmem:[%s11005_s14 + $0x98] sm:$0xff] }
 0x2c0   : > { %v3259_v60 = vadd.f32 %v3187_v32, %v11588_v37  ;;  %vm12459_vm9 = vcmp.lt.s32.totalorder %v4668_v57, 16  ;;  %v3839_v35 = vadd.s32 %v3838_v45, %v3828_v4  ;;  %v12464_v16 = vld [vmem:[#allocation2 + $0x2c] sm:$0xff]  ;;  %v2556_v2 = vshrl.u32 %v12451_v52, 16  ;;  %v2687_v37 = vpop.f32.mrf.mxu2  ;;  %v3118_v36 = vpop.f32.mrf.mxu0 }
 0x2c1   : > { %v3856_v54 = vshll.u32 %v3853_v0, 16  ;;  %v3857_v61 = vshrl.u32 %v3853_v0, 16  ;;  %v3858_v50 = vshll.u32 %v12456_v30, 16  ;;  %v3859_v55 = vshrl.u32 %v12456_v30, 16  ;;  %v2892_v17 = vpop.f32.mrf.mxu3 }
 0x2c2   : > { %v3371_v11 = vadd.f32 %v11968_v44, %v3259_v60  ;;  %v3840_v6 = vadd.s32 %v3839_v35, %v3830_v23  ;;  %v5082_v29 = vrot.slane %v12464_v16, 3  ;;  %v2558_v31 = vrot.slane %v2556_v2, 2  ;;  %v10234_v16 = vld [vmem:[%s14573_s3 + $0x20] sm:$0xff] }
 0x2c3   : > { %vm3860_vm10 = vc.u32 %v3852_v39, %v3856_v54  ;;  %v3862_v4 = vadd.s32 %v3856_v54, %v3852_v39  ;;  %v2559_v19 = vshll.u32 %v12451_v52, 16  ;;  %v2781_v63 = vrot.slane %v12451_v52, 2  ;;  %5517 = vmatpush.bf16.msrb.mxu2 %v10234_v16 }
 0x2c4   : > { %v3407_v18 = vmax.f32 %v3371_v11, 0.0  ;;  %v2893_v21 = vadd.f32 %v2892_v17, %v2687_v37  ;;  %v3841_v58 = vshrl.u32 %v3840_v6, 4  ;;  %v5083_v44 = vsel %vm2973_vm5, %v5080_v20, %v5082_v29 }
 0x2c5   : > { %5204 = vmatmul.bf16.gmra.mxu1 %v5083_v44  ;;  %v3861_v23 = vsel %vm3860_vm10, 1, %v14639_v3  ;;  %vm3864_vm11 = vc.u32 %v3862_v4, %v3858_v50  ;;  %v2561_v53 = vrot.slane %v2559_v19, 3  ;;  %v2782_v41 = vsel %vm1899_vm3, %v2779_v51, %v2781_v63 }
 0x2c6   : > { %v4812_v14 = vsel %vm12459_vm9, %v3407_v18, 0.0  ;;  %v3188_v10 = vadd.f32 %v3116_v62, %v2893_v21  ;;  %v3842_v1 = vmul.u32 18, %v3841_v58  ;;  %v3863_v13 = vadd.s32 %v3861_v23, %v3855_v24 }
 0x2c7   : > { %v10369_v20 = vpack.c.bf16 %v4812_v14, %v4811_v43  ;;  %v3865_v9 = vsel %vm3864_vm11, 1, %v14639_v3  ;;  %v12490_v46 = vor.u32 %v2561_v53, %v2558_v31  ;;  %v3005_v8 = vrot.slane %v12451_v52, 3 }
 0x2c8   : > { %v3260_v12 = vadd.f32 %v3188_v10, %v11596_v48  ;;  %v3843_v22 = vsub.s32 %v12409_v59, %v3842_v1  ;;  %v3867_v51 = vadd.s32 %v3865_v9, %v3863_v13  ;;  %v12496_v27 = vadd.s32 112, %v11755_v34  ;;  %v12513_v59 = vld [vmem:[%s14572_s2] ss:$0 sm:$0xff]  ;;  %v2689_v45 = vpop.f32.mrf.mxu2  ;;  %v3121_v49 = vpop.f32.mrf.mxu0 }
 0x2c9   : > { %10673 = vst [vmem:[#allocation2 + $0x38] sm:$0xff] %v10369_v20   ;;  %v2563_v62 = vsel %vm2411_vm4, %v12405_v38, %v12490_v46  ;;  %v3006_v42 = vsel %vm2973_vm5, %v3003_v25, %v3005_v8  ;;  %v12507_v43 = vadd.s32 120, %v11755_v34  ;;  %v2565_v48 = vshrl.u32 %v12485_v5, 16  ;;  %v2894_v26 = vpop.f32.mrf.mxu3 }
 0x2ca   : > { %v3372_v32 = vadd.f32 %v12513_v59, %v3260_v12  ;;  %vm4525_vm12 = vcmp.ne.s32.totalorder %v3843_v22, 0  ;;  %vm4561_vm14 = vcmp.lt.s32.totalorder %v3843_v22, 0  ;;  %v4633_v38 = vadd.s32 18, %v3843_v22 }
 0x2cb   : > { %vm4597_vm6 = vmand %vm4561_vm14, %vm4525_vm12  ;;  %v3868_v39 = vadd.s32 %v3867_v51, %v3857_v61  ;;  %v3878_v25 = vand.u32 65535, %v12496_v27  ;;  %v3879_v57 = vshrl.u32 %v12496_v27, 16  ;;  %v3907_v0 = vand.u32 65535, %v12507_v43  ;;  %2731 = vmatmul.bf16.gmra.mxu2 %v2563_v62  ;;  %3160 = vmatmul.bf16.gmra.mxu0 %v3006_v42 }
 0x2cc   : > { %v3408_v30 = vmax.f32 %v3372_v32, 0.0  ;;  %v4669_v24 = vsel %vm4597_vm6, %v4633_v38, %v3843_v22  ;;  %v2895_v60 = vadd.f32 %v2894_v26, %v2689_v45  ;;  %v3908_v35 = vshrl.u32 %v12507_v43, 16 }
 0x2cd   : > { %vm4705_vm15 = vcmp.lt.s32.totalorder %v4669_v24, 16  ;;  %v3869_v2 = vadd.s32 %v3868_v39, %v3859_v55  ;;  %v3881_v54 = vmul.u32 14564, %v3878_v25  ;;  %v3882_v50 = vmul.u32 58254, %v3878_v25  ;;  %v10266_v24 = vld [vmem:[%s14573_s3 + $0x120] sm:$0xff] }
 0x2ce   : > { %v12520_v11 = vsel %vm4705_vm15, %v3408_v30, 0.0  ;;  %v3189_v37 = vadd.f32 %v3118_v36, %v2895_v60  ;;  %v3883_v61 = vmul.u32 14564, %v3879_v57  ;;  %v3884_v6 = vmul.u32 58254, %v3879_v57  ;;  %2936 = vmatmul.bf16.gmra.mxu3 %v2782_v41  ;;  %v14699_v60 = vld [vmem:[#allocation4_spill] sm:$0xff]  ;;  %6187 = vmatpush.bf16.msrb.mxu0 %v10266_v24 }
 0x2cf   : > { %v3870_v31 = vshrl.u32 %v3869_v2, 4  ;;  %v3885_v17 = vshll.u32 %v3882_v50, 16  ;;  %v3886_v4 = vshrl.u32 %v3882_v50, 16  ;;  %v3910_v19 = vmul.u32 14564, %v3907_v0 }
 0x2d0   : > { %v3261_v18 = vadd.f32 %v3189_v37, %v11609_v15  ;;  %v3887_v21 = vshll.u32 %v3883_v61, 16  ;;  %v3888_v58 = vshrl.u32 %v3883_v61, 16  ;;  %v12523_v44 = vld [vmem:[#allocation2 + $0x34] sm:$0xff]  ;;  %v12525_v55 = vmul.u32 58254, %v3907_v0  ;;  %v2692_v10 = vpop.f32.mrf.mxu2  ;;  %v3123_v42 = vpop.f32.mrf.mxu0 }
 0x2d1   : > { %v3871_v23 = vmul.u32 18, %v3870_v31  ;;  %vm3889_vm13 = vc.u32 %v3881_v54, %v3885_v17  ;;  %v3891_v36 = vadd.s32 %v3885_v17, %v3881_v54  ;;  %v12527_v53 = vmul.u32 14564, %v3908_v35  ;;  %v2897_v20 = vpop.f32.mrf.mxu3 }
 0x2d2   : > { %v3373_v14 = vadd.f32 %v12513_v59, %v3261_v18  ;;  %v3890_v1 = vsel %vm3889_vm13, 1, %v14639_v3  ;;  %v5084_v13 = vrot.slane %v12523_v44, 3  ;;  %v3913_v15 = vmul.u32 58254, %v3908_v35  ;;  %v10263_v44 = vld [vmem:[%s14573_s3 + $0x108] sm:$0xff] }
 0x2d3   : > { %v3872_v41 = vsub.s32 %v12414_v7, %v3871_v23  ;;  %v3892_v9 = vadd.s32 %v3890_v1, %v3884_v6  ;;  %vm3893_vm7 = vc.u32 %v3891_v36, %v3887_v21  ;;  %v3914_v12 = vshll.u32 %v12525_v55, 16  ;;  %v10265_v23 = vld [vmem:[%s14573_s3 + $0x118] sm:$0xff] }
 0x2d4   : > { %v3409_v22 = vmax.f32 %v3373_v14, 0.0  ;;  %v2898_v51 = vadd.f32 %v2897_v20, %v2692_v10  ;;  %v3894_v62 = vsel %vm3893_vm7, 1, %v14639_v3  ;;  %v5085_v32 = vsel %vm2973_vm5, %v5082_v29, %v5084_v13  ;;  %v10250_v29 = vld [vmem:[%s14573_s3 + $0xa0] sm:$0xff]  ;;  %6188 = vmatpush.bf16.msrb.mxu0 %v10265_v23 }
 0x2d5   : > { %vm4526_vm8 = vcmp.ne.s32.totalorder %v3872_v41, 0  ;;  %vm4562_vm9 = vcmp.lt.s32.totalorder %v3872_v41, 0  ;;  %v4634_v38 = vadd.s32 18, %v3872_v41  ;;  %v3896_v7 = vadd.s32 %v3894_v62, %v3892_v9  ;;  %5209 = vmatmul.bf16.gmra.mxu1 %v5085_v32  ;;  %5789 = vmatpush.bf16.msrb.mxu3 %v10250_v29 }
 0x2d6   : > { %vm4598_vm10 = vmand %vm4562_vm9, %vm4526_vm8  ;;  %v3190_v45 = vadd.f32 %v3121_v49, %v2898_v51  ;;  %v3915_v26 = vshrl.u32 %v12525_v55, 16  ;;  %v3916_v39 = vshll.u32 %v12527_v53, 16  ;;  %v3917_v25 = vshrl.u32 %v12527_v53, 16  ;;  %v10249_v55 = vld [vmem:[%s14573_s3 + $0x98] sm:$0xff] }
 0x2d7   : > { %v4670_v57 = vsel %vm4598_vm10, %v4634_v38, %v3872_v41  ;;  %v3897_v0 = vadd.s32 %v3896_v7, %v3886_v4  ;;  %vm3918_vm11 = vc.u32 %v3910_v19, %v3914_v12  ;;  %v3920_v30 = vadd.s32 %v3914_v12, %v3910_v19  ;;  %v14700_v38 = vld [vmem:[#allocation5_spill] sm:$0xff] }
 0x2d8   : > { %vm4706_vm12 = vcmp.lt.s32.totalorder %v4670_v57, 16  ;;  %v3262_v49 = vadd.f32 %v3190_v45, %v14699_v60  ;;  %v3919_v35 = vsel %vm3918_vm11, 1, %v14639_v3  ;;  %v2567_v2 = vrot.slane %v2565_v48, 2  ;;  %v2694_v31 = vpop.f32.mrf.mxu2  ;;  %v3126_v53 = vpop.f32.mrf.mxu0 }
 0x2d9   : > { %v4814_v54 = vsel %vm4706_vm12, %v3409_v22, 0.0  ;;  %v3898_v50 = vadd.s32 %v3897_v0, %v3888_v58  ;;  %v3921_v37 = vadd.s32 %v3919_v35, %v3913_v15  ;;  %vm3922_vm14 = vc.u32 %v3920_v30, %v3916_v39  ;;  %v2899_v18 = vpop.f32.mrf.mxu3  ;;  %5790 = vmatpush.bf16.msrb.mxu3 %v10249_v55 }
 0x2da   : > { %v10374_v61 = vpack.c.bf16 %v4814_v54, %v12520_v11  ;;  %v12558_v6 = vadd.f32 %v12513_v59, %v3262_v49  ;;  %v3923_v17 = vsel %vm3922_vm14, 1, %v14639_v3  ;;  %v2568_v4 = vshll.u32 %v12485_v5, 16  ;;  %v10233_v11 = vld [vmem:[%s14573_s3 + $0x18] sm:$0xff] }
 0x2db   : > { %v3899_v19 = vshrl.u32 %v3898_v50, 4  ;;  %v3925_v48 = vadd.s32 %v3923_v17, %v3921_v37  ;;  %v2783_v21 = vrot.slane %v12485_v5, 2  ;;  %v3007_v58 = vrot.slane %v12485_v5, 3  ;;  %5518 = vmatpush.bf16.msrb.mxu2 %v10233_v11 }
 0x2dc   : > { %10674 = vst [vmem:[#allocation2 + $0x40] sm:$0xff] %v10374_v61   ;;  %v2900_v36 = vadd.f32 %v2899_v18, %v2694_v31  ;;  %v2570_v14 = vrot.slane %v2568_v4, 3  ;;  %v12574_v10 = vadd.s32 128, %v11755_v34  ;;  %v3410_v62 = vmax.f32 %v12558_v6, 0.0  ;;  %v10258_v61 = vld [vmem:[%s14573_s3 + $0xe0] sm:$0xff]  ;;  %v10232_v4 = vld [vmem:[%s14573_s3 + $0x10] sm:$0xff] }
 0x2dd   : > { %v3900_v1 = vmul.u32 18, %v3899_v19  ;;  %v3926_v15 = vadd.s32 %v3925_v48, %v3915_v26  ;;  %v2784_v41 = vsel %vm1899_vm3, %v2781_v63, %v2783_v21  ;;  %v3008_v20 = vsel %vm2973_vm5, %v3005_v8, %v3007_v58  ;;  %v12596_v8 = vld [vmem:[%s11005_s14 + $0xa0] sm:$0x7]  ;;  %v10248_v19 = vld [vmem:[%s14573_s3 + $0x90] sm:$0xff]  ;;  %6543 = vmatpush.bf16.msrb.mxu1 %v10258_v61 }
 0x2de   : > { %v3191_v9 = vadd.f32 %v3123_v42, %v2900_v36  ;;  %v12586_v12 = vor.u32 %v2570_v14, %v2567_v2  ;;  %v3936_v22 = vand.u32 65535, %v12574_v10  ;;  %v3937_v51 = vshrl.u32 %v12574_v10, 16  ;;  %3165 = vmatmul.bf16.gmra.mxu0 %v3008_v20  ;;  %2941 = vmatmul.bf16.gmra.mxu3 %v2784_v41  ;;  %v10264_v18 = vld [vmem:[%s14573_s3 + $0x110] sm:$0xff]  ;;  %v10262_v61 = vld [vmem:[%s14573_s3 + $0x100] sm:$0xff] }
 0x2df   : > { %v3901_v63 = vsub.s32 %v12496_v27, %v3900_v1  ;;  %v3927_v32 = vadd.s32 %v3926_v15, %v3917_v25  ;;  %v12593_v52 = vadd.s32 136, %v11755_v34  ;;  %v2391_v16 = vunpack.c.l.b16 %v12596_v8  ;;  %5519 = vmatpush.bf16.msrb.mxu2 %v10232_v4  ;;  %5791 = vmatpush.bf16.msrb.mxu3 %v10248_v19 }
 0x2e0   : > { %v3263_v42 = vadd.f32 %v3191_v9, %v14700_v38  ;;  %v2572_v7 = vsel %vm2411_vm4, %v12490_v46, %v12586_v12  ;;  %v3939_v45 = vmul.u32 14564, %v3936_v22  ;;  %v12602_v26 = vmul.u32 58254, %v3936_v22  ;;  %v2697_v57 = vpop.f32.mrf.mxu2  ;;  %v3128_v50 = vpop.f32.mrf.mxu0  ;;  %6189 = vmatpush.bf16.msrb.mxu0 %v10264_v18  ;;  %v10247_v22 = vld [vmem:[%s14573_s3 + $0x88] sm:$0xff] }
 0x2e1   : > { %vm4527_vm6 = vcmp.ne.s32.totalorder %v3901_v63, 0  ;;  %vm4563_vm15 = vcmp.lt.s32.totalorder %v3901_v63, 0  ;;  %v4635_v27 = vadd.s32 18, %v3901_v63  ;;  %v3928_v39 = vshrl.u32 %v3927_v32, 4  ;;  %2736 = vmatmul.bf16.gmra.mxu2 %v2572_v7  ;;  %v2902_v24 = vpop.f32.mrf.mxu3 }
 0x2e2   : > { %vm4599_vm13 = vmand %vm4563_vm15, %vm4527_vm6  ;;  %v3375_v25 = vadd.f32 %v12513_v59, %v3263_v42  ;;  %v12605_v0 = vmul.u32 14564, %v3937_v51  ;;  %v3943_v30 = vshll.u32 %v12602_v26, 16  ;;  %v3942_v60 = vmul.u32 58254, %v3937_v51 }
 0x2e3   : > { %v4671_v46 = vsel %vm4599_vm13, %v4635_v27, %v3901_v63  ;;  %v3929_v29 = vmul.u32 18, %v3928_v39  ;;  %v3944_v49 = vshrl.u32 %v12602_v26, 16  ;;  %v12610_v35 = vld [vmem:[#allocation2 + $0x3c] sm:$0xff]  ;;  %v2903_v2 = vadd.f32 %v2902_v24, %v2697_v57  ;;  %5792 = vmatpush.bf16.msrb.mxu3 %v10247_v22 }
 0x2e4   : > { %vm4707_vm7 = vcmp.lt.s32.totalorder %v4671_v46, 16  ;;  %v3945_v54 = vshll.u32 %v12605_v0, 16  ;;  %v3965_v37 = vand.u32 65535, %v12593_v52  ;;  %v3411_v31 = vmax.f32 %v3375_v25, 0.0  ;;  %6190 = vmatpush.bf16.msrb.mxu0 %v10263_v44 }
 0x2e5   : > { %v4815_v6 = vsel %vm4707_vm7, %v3410_v62, 0.0  ;;  %v3930_v17 = vsub.s32 %v12507_v43, %v3929_v29  ;;  %vm3947_vm8 = vc.u32 %v3939_v45, %v3943_v30  ;;  %v3192_v48 = vadd.f32 %v3126_v53, %v2903_v2 }
 0x2e6   : > { %v3948_v11 = vsel %vm3947_vm8, 1, %v14639_v3  ;;  %v3949_v55 = vadd.s32 %v3943_v30, %v3939_v45  ;;  %v5086_v23 = vrot.slane %v12610_v35, 3  ;;  %v3966_v1 = vshrl.u32 %v12593_v52, 16  ;;  %v2282_v30 = vld [vmem:[%s11005_s14 + $0xa0] sm:$0x3] }
 0x2e7   : > { %vm4528_vm9 = vcmp.ne.s32.totalorder %v3930_v17, 0  ;;  %vm4564_vm10 = vcmp.lt.s32.totalorder %v3930_v17, 0  ;;  %v4636_v43 = vadd.s32 18, %v3930_v17  ;;  %v3950_v36 = vadd.s32 %v3948_v11, %v3942_v60 }
 0x2e8   : > { %vm4600_vm11 = vmand %vm4564_vm10, %vm4528_vm9  ;;  %v3264_v14 = vadd.f32 %v3192_v48, %v11634_v56  ;;  %vm3951_vm12 = vc.u32 %v3949_v55, %v3945_v54  ;;  %v5087_v53 = vsel %vm2973_vm5, %v5084_v13, %v5086_v23  ;;  %v3968_v20 = vmul.u32 14564, %v3965_v37  ;;  %v10231_v56 = vld [vmem:[%s14573_s3 + $0x8] sm:$0xff]  ;;  %v2699_v62 = vpop.f32.mrf.mxu2  ;;  %v3131_v57 = vpop.f32.mrf.mxu0  ;;  %6191 = vmatpush.bf16.msrb.mxu0 %v10262_v61 }
 0x2e9   : > { %v4672_v15 = vsel %vm4600_vm11, %v4636_v43, %v3930_v17  ;;  %v3952_v41 = vsel %vm3951_vm12, 1, %v14639_v3  ;;  %5214 = vmatmul.bf16.gmra.mxu1 %v5087_v53  ;;  %v3969_v9 = vmul.u32 58254, %v3965_v37  ;;  %v3946_v13 = vshrl.u32 %v12605_v0, 16  ;;  %v2904_v42 = vpop.f32.mrf.mxu3  ;;  %5520 = vmatpush.bf16.msrb.mxu2 %v10231_v56  ;;  %v10246_v37 = vld [vmem:[%s14573_s3 + $0x80] sm:$0xff] }
 0x2ea   : > { %vm4708_vm14 = vcmp.lt.s32.totalorder %v4672_v15, 16  ;;  %v3954_v51 = vadd.s32 %v3952_v41, %v3950_v36  ;;  %v3970_v63 = vmul.u32 14564, %v3966_v1  ;;  %v12648_v38 = vadd.f32 %v12513_v59, %v3264_v14  ;;  %5793 = vmatpush.bf16.msrb.mxu3 %v10246_v37 }
 0x2eb   : > { %v4816_v32 = vsel %vm4708_vm14, %v3411_v31, 0.0  ;;  %v3971_v7 = vmul.u32 58254, %v3966_v1  ;;  %v3972_v45 = vshll.u32 %v3969_v9, 16  ;;  %v2905_v39 = vadd.f32 %v2904_v42, %v2699_v62 }
 0x2ec   : > { %v10379_v26 = vpack.c.bf16 %v4816_v32, %v4815_v6  ;;  %v3955_v27 = vadd.s32 %v3954_v51, %v3944_v49  ;;  %v3973_v25 = vshrl.u32 %v3969_v9, 16  ;;  %v3974_v0 = vshll.u32 %v3970_v63, 16  ;;  %v10230_v49 = vld [vmem:[%s14573_s3] sm:$0xff] }
 0x2ed   : > { %v3975_v46 = vshrl.u32 %v3970_v63, 16  ;;  %vm3976_vm6 = vc.u32 %v3968_v20, %v3972_v45  ;;  %v3978_v29 = vadd.s32 %v3972_v45, %v3968_v20  ;;  %v3193_v60 = vadd.f32 %v3128_v50, %v2905_v39  ;;  %5521 = vmatpush.bf16.msrb.mxu2 %v10230_v49 }
 0x2ee   : > { %10675 = vst [vmem:[#allocation2 + $0x48] sm:$0xff] %v10379_v26   ;;  %v3956_v24 = vadd.s32 %v3955_v27, %v3946_v13  ;;  %v3977_v2 = vsel %vm3976_vm6, 1, %v14639_v3  ;;  %v2410_v54 = vpack.c.b16 %v2391_v16, %v2391_v16  ;;  %v2748_v50 = vunpack.c.l.b16 %v2282_v30 }
 0x2ef   : > { %v3979_v6 = vadd.s32 %v3977_v2, %v3971_v7  ;;  %vm3980_vm15 = vc.u32 %v3978_v29, %v3974_v0  ;;  %v12665_v31 = vadd.s32 144, %v11755_v34  ;;  %v3265_v16 = vadd.f32 %v3193_v60, %v11646_v40 }
 0x2f0   : > { %v3957_v8 = vshrl.u32 %v3956_v24, 4  ;;  %v3981_v17 = vsel %vm3980_vm15, 1, %v14639_v3  ;;  %v2574_v4 = vshrl.u32 %v2410_v54, 16  ;;  %v2577_v18 = vshll.u32 %v2410_v54, 16  ;;  %v2702_v14 = vpop.f32.mrf.mxu2 }
 0x2f1   : > { %v3983_v19 = vadd.s32 %v3981_v17, %v3979_v6  ;;  %v2749_v48 = vpack.c.b16 %v2748_v50, %v2748_v50  ;;  %v3009_v11 = vrot.slane %v2410_v54, 3  ;;  %v3412_v55 = vmax.f32 %v12648_v38, 0.0  ;;  %v2907_v20 = vpop.f32.mrf.mxu3  ;;  %v3133_v38 = vpop.f32.mrf.mxu0  ;;  %v4909_v50 = vld [vmem:[#allocation2 + $0x4] sm:$0xc] }
 0x2f2   : > { %v3958_v43 = vmul.u32 18, %v3957_v8  ;;  %v2576_v36 = vrot.slane %v2574_v4, 2  ;;  %v3994_v53 = vand.u32 65535, %v12665_v31  ;;  %v2579_v15 = vrot.slane %v2577_v18, 3 }
 0x2f3   : > { %v3984_v1 = vadd.s32 %v3983_v19, %v3973_v25  ;;  %v2785_v40 = vrot.slane %v2749_v48, 2  ;;  %v3010_v41 = vsel %vm2973_vm5, %v3007_v58, %v3009_v11  ;;  %v12676_v56 = vadd.f32 %v12513_v59, %v3265_v16 }
 0x2f4   : > { %v3959_v9 = vsub.s32 %v12574_v10, %v3958_v43  ;;  %3170 = vmatmul.bf16.gmra.mxu0 %v3010_v41  ;;  %v2908_v22 = vadd.f32 %v2907_v20, %v2702_v14  ;;  %v3995_v44 = vshrl.u32 %v12665_v31, 16  ;;  %v2580_v51 = vor.u32 %v2579_v15, %v2576_v36  ;;  %v10905_v43 = vld [vmem:[#allocation2 + $0xc] sm:$0xff] }
 0x2f5   : > { %v3985_v13 = vadd.s32 %v3984_v1, %v3975_v46  ;;  %v2786_v62 = vsel %vm1899_vm3, %v2783_v21, %v2785_v40  ;;  %v3997_v63 = vmul.u32 14564, %v3994_v53  ;;  %v12682_v32 = vld [vmem:[#allocation2 + $0x44] sm:$0xff]  ;;  %v3998_v45 = vmul.u32 58254, %v3994_v53 }
 0x2f6   : > { %vm4529_vm13 = vcmp.ne.s32.totalorder %v3959_v9, 0  ;;  %vm4565_vm7 = vcmp.lt.s32.totalorder %v3959_v9, 0  ;;  %v4637_v58 = vadd.s32 18, %v3959_v9  ;;  %2946 = vmatmul.bf16.gmra.mxu3 %v2786_v62  ;;  %v3194_v10 = vadd.f32 %v3131_v57, %v2908_v22 }
 0x2f7   : > { %vm4601_vm8 = vmand %vm4565_vm7, %vm4529_vm13  ;;  %v3986_v42 = vshrl.u32 %v3985_v13, 4  ;;  %v2581_v7 = vsel %vm2411_vm4, %v12586_v12, %v2580_v51  ;;  %v3999_v26 = vmul.u32 14564, %v3995_v44  ;;  %v3413_v5 = vmax.f32 %v12676_v56, 0.0 }
 0x2f8   : > { %v4673_v27 = vsel %vm4601_vm8, %v4637_v58, %v3959_v9  ;;  %2741 = vmatmul.bf16.gmra.mxu2 %v2581_v7  ;;  %v3266_v21 = vadd.f32 %v3194_v10, %v11651_v47  ;;  %v5088_v39 = vrot.slane %v12682_v32, 3  ;;  %v4000_v30 = vmul.u32 58254, %v3995_v44  ;;  %v2704_v24 = vpop.f32.mrf.mxu2  ;;  %v14701_v9 = vld [vmem:[#allocation22_spill] sm:$0xff] }
 0x2f9   : > { %vm4709_vm3 = vcmp.lt.s32.totalorder %v4673_v27, 16  ;;  %v3987_v25 = vmul.u32 18, %v3986_v42  ;;  %v4001_v57 = vshll.u32 %v3998_v45, 16  ;;  %v4002_v29 = vshrl.u32 %v3998_v45, 16  ;;  %v2909_v54 = vpop.f32.mrf.mxu3 }
 0x2fa   : > { %v4817_v0 = vsel %vm4709_vm3, %v3412_v55, 0.0  ;;  %v12690_v46 = vadd.f32 %v12513_v59, %v3266_v21  ;;  %v4003_v12 = vshll.u32 %v3999_v26, 16  ;;  %v5089_v47 = vsel %vm2973_vm5, %v5086_v23, %v5088_v39  ;;  %v12707_v55 = vpop.f32.mrf.mxu0 }
 0x2fb   : > { %v3988_v60 = vsub.s32 %v12593_v52, %v3987_v25  ;;  %vm4005_vm9 = vc.u32 %v3997_v63, %v4001_v57  ;;  %v4007_v2 = vadd.s32 %v4001_v57, %v3997_v63  ;;  %v4004_v49 = vshrl.u32 %v3999_v26, 16  ;;  %5219 = vmatmul.bf16.gmra.mxu1 %v5089_v47  ;;  %v10686_v63 = vld [vmem:[#allocation2 + $0x10] sm:$0xff]  }
 0x2fc   : > { %v4006_v37 = vsel %vm4005_vm9, 1, %v14639_v3  ;;  %v2910_v61 = vadd.f32 %v2909_v54, %v2704_v24  ;;  %v12700_v6 = vadd.s32 152, %v11755_v34  ;;  %v3414_v4 = vmax.f32 %v12690_v46, 0.0 }
 0x2fd   : > { %vm4530_vm10 = vcmp.ne.s32.totalorder %v3988_v60, 0  ;;  %vm4566_vm11 = vcmp.lt.s32.totalorder %v3988_v60, 0  ;;  %v4638_v52 = vadd.s32 18, %v3988_v60  ;;  %v4008_v8 = vadd.s32 %v4006_v37, %v4000_v30 }
 0x2fe   : > { %vm4602_vm12 = vmand %vm4566_vm11, %vm4530_vm10  ;;  %vm4009_vm14 = vc.u32 %v4007_v2, %v4003_v12  ;;  %v3195_v16 = vadd.f32 %v3133_v38, %v2910_v61  ;;  %v4023_v35 = vand.u32 65535, %v12700_v6  ;;  %v4024_v23 = vshrl.u32 %v12700_v6, 16 }
 0x2ff   : > { %v4674_v17 = vsel %vm4602_vm12, %v4638_v52, %v3988_v60  ;;  %v4010_v19 = vsel %vm4009_vm14, 1, %v14639_v3  ;;  %v5276_v18 = vunpack.c.l.b16 %v4909_v50  ;;  %v5287_v36 = vshrl.u32 %v10905_v43, 16 }
 0x300   : > { %vm4710_vm6 = vcmp.lt.s32.totalorder %v4674_v17, 16  ;;  %v4012_v48 = vadd.s32 %v4010_v19, %v4008_v8  ;;  %v3267_v11 = vadd.f32 %v3195_v16, %v11665_v28  ;;  %v4026_v53 = vmul.u32 14564, %v4023_v35  ;;  %v2707_v44 = vpop.f32.mrf.mxu2 }
 0x301   : > { %v4818_v14 = vsel %vm4710_vm6, %v3413_v5, 0.0  ;;  %v4027_v1 = vmul.u32 58254, %v4023_v35  ;;  %v4028_v15 = vmul.u32 14564, %v4024_v23  ;;  %v4029_v20 = vmul.u32 58254, %v4024_v23  ;;  %v2912_v58 = vpop.f32.mrf.mxu3  ;;  %v12721_v8 = vpop.f32.mrf.mxu1 }
 0x302   : > { %v10384_v40 = vpack.c.bf16 %v4818_v14, %v4817_v0  ;;  %v4013_v41 = vadd.s32 %v4012_v48, %v4002_v29  ;;  %v14702_v56 = vunpack.c.l.b16 %v14701_v9  ;;  %v12712_v13 = vadd.f32 %v12513_v59, %v3267_v11  ;;  %v3138_v16 = vpop.f32.mrf.mxu0 }
 0x303   : > { %v4030_v51 = vshll.u32 %v4027_v1, 16  ;;  %v4031_v28 = vshrl.u32 %v4027_v1, 16  ;;  %v4032_v62 = vshll.u32 %v4028_v15, 16  ;;  %v4033_v38 = vshrl.u32 %v4028_v15, 16 }
 0x304   : > { %v5277_v22 = vpack.c.b16 %v14702_v56, %v5276_v18  ;;  %10676 = vst [vmem:[#allocation2 + $0x50] sm:$0xff] %v10384_v40   ;;  %v4014_v10 = vadd.s32 %v4013_v41, %v4004_v49  ;;  %6192 = vmatmul.bf16.vlgmr.msrb.gmra.mxu0 %v10686_v63  ;;  %v5289_v26 = vrot.slane %v5287_v36, 2  ;;  %v5290_v27 = vshll.u32 %v10905_v43, 16  ;;  %v14703_v56 = vld [vmem:[#allocation6_spill] sm:$0xff] }
 0x305   : > { %vm4034_vm15 = vc.u32 %v4026_v53, %v4030_v51  ;;  %v4036_v45 = vadd.s32 %v4030_v51, %v4026_v53  ;;  %vm5634_vm7 = vsmask.f32 4352  ;;  %v5636_v60 = vshrl.u32 %v12031_v33, 16 }
 0x306   : > { %v5279_v42 = vshrl.u32 %v5277_v22, 16  ;;  %v5282_v7 = vshll.u32 %v5277_v22, 16  ;;  %v4015_v5 = vshrl.u32 %v4014_v10, 4  ;;  %v4035_v21 = vsel %vm4034_vm15, 1, %v14639_v3 }
 0x307   : > { %v4037_v57 = vadd.s32 %v4035_v21, %v4029_v20  ;;  %vm4038_vm13 = vc.u32 %v4036_v45, %v4032_v62  ;;  %v5292_v0 = vrot.slane %v5290_v27, 3  ;;  %v5639_v54 = vshll.u32 %v12031_v33, 16 }
 0x308   : > { %v5281_v25 = vrot.slane %v5279_v42, 2  ;;  %v5284_v30 = vrot.slane %v5282_v7, 3  ;;  %v4016_v29 = vmul.u32 18, %v4015_v5  ;;  %v4039_v12 = vsel %vm4038_vm13, 1, %v14639_v3  ;;  %v2709_v33 = vpop.f32.mrf.mxu2  ;;  %v10906_v5 = vld [vmem:[#allocation2 + $0x14] sm:$0xff] }
 0x309   : > { %v4041_v2 = vadd.s32 %v4039_v12, %v4037_v57  ;;  %v12717_v47 = vor.u32 %v5292_v0, %v5289_v26  ;;  %v5643_v49 = vrot.slane %v5287_v36, 3  ;;  %v5638_v61 = vrot.slane %v5636_v60, 3  ;;  %v2914_v48 = vpop.f32.mrf.mxu3  ;;  %v10687_v26 = vld [vmem:[#allocation2 + $0x18] sm:$0xff]   ;;  %v12754_v32 = vpop.f32.mrf.mxu1  ;;  %v14704_v12 = vld [vmem:[#allocation7_spill] sm:$0xff] }
 0x30a   : > { %v5285_v24 = vor.u32 %v5284_v30, %v5281_v25  ;;  %v4017_v37 = vsub.s32 %v12665_v31, %v4016_v29  ;;  %v5644_v50 = vrot.slane %v5290_v27, 4  ;;  %v2913_v52 = vadd.f32 %v2912_v58, %v2707_v44 }
 0x30b   : > { %v4042_v35 = vadd.s32 %v4041_v2, %v4031_v28  ;;  %v5641_v17 = vrot.slane %v5639_v54, 4  ;;  %v12726_v19 = vadd.s32 160, %v11755_v34  ;;  %v12728_v18 = vld [vmem:[#allocation2 + $0x4c] sm:$0xff]  ;;  %v2915_v41 = vadd.f32 %v2914_v48, %v2709_v33 }
 0x30c   : > { %v5294_v23 = vsel %vm2411_vm4, %v5285_v24, %v12717_v47  ;;  %vm4531_vm8 = vcmp.ne.s32.totalorder %v4017_v37, 0  ;;  %vm4567_vm3 = vcmp.lt.s32.totalorder %v4017_v37, 0  ;;  %v4639_v31 = vadd.s32 18, %v4017_v37 }
 0x30d   : > { %5522 = vmatmul.bf16.vlgmr.msrb.gmra.mxu2 %v5294_v23  ;;  %v12730_v11 = vor.u32 %v5644_v50, %v5643_v49  ;;  %vm4603_vm9 = vmand %vm4567_vm3, %vm4531_vm8  ;;  %v4043_v43 = vadd.s32 %v4042_v35, %v4033_v38  ;;  %v5642_v36 = vor.u32 %v5641_v17, %v5638_v61  ;;  %v3196_v14 = vadd.f32 %v12707_v55, %v2913_v52 }
 0x30e   : > { %v4052_v53 = vand.u32 65535, %v12726_v19  ;;  %v4675_v1 = vsel %vm4603_vm9, %v4639_v31, %v4017_v37  ;;  %v4053_v15 = vshrl.u32 %v12726_v19, 16  ;;  %v5090_v40 = vrot.slane %v12728_v18, 3 }
 0x30f   : > { %vm4711_vm10 = vcmp.lt.s32.totalorder %v4675_v1, 16  ;;  %v4044_v20 = vshrl.u32 %v4043_v43, 4  ;;  %v5646_v9 = vsel %vm5634_vm7, %v5642_v36, %v12730_v11  ;;  %v3268_v22 = vadd.f32 %v3196_v14, %v14703_v56  ;;  %v10257_v36 = vld [vmem:[%s14573_s3 + $0xd8] sm:$0xff] }
 0x310   : > { %5794 = vmatmul.bf16.vlgmr.msrb.gmra.mxu3 %v5646_v9  ;;  %v4055_v44 = vmul.u32 14564, %v4052_v53  ;;  %v4056_v51 = vmul.u32 58254, %v4052_v53  ;;  %v4057_v28 = vmul.u32 14564, %v4053_v15  ;;  %v4819_v55 = vsel %vm4711_vm10, %v3414_v4, 0.0  ;;  %v2712_v57 = vpop.f32.mrf.mxu2  ;;  %6544 = vmatpush.bf16.msrb.mxu1 %v10257_v36 }
 0x311   : > { %v3415_v62 = vmax.f32 %v12712_v13, 0.0  ;;  %v4045_v63 = vmul.u32 18, %v4044_v20  ;;  %v5091_v58 = vsel %vm2973_vm5, %v5088_v39, %v5090_v40  ;;  %v12748_v10 = vadd.f32 %v12513_v59, %v3268_v22  ;;  %v3141_v39 = vpop.f32.mrf.mxu0  ;;  %v2917_v0 = vpop.f32.mrf.mxu3 }
 0x312   : > { %v4058_v38 = vmul.u32 58254, %v4053_v15  ;;  %v4059_v42 = vshll.u32 %v4056_v51, 16  ;;  %v4061_v7 = vshll.u32 %v4057_v28, 16  ;;  %5224 = vmatmul.bf16.gmra.mxu1 %v5091_v58  ;;  %v4060_v46 = vshrl.u32 %v4056_v51, 16 }
 0x313   : > { %v4046_v45 = vsub.s32 %v12700_v6, %v4045_v63  ;;  %v3197_v4 = vadd.f32 %v3138_v16, %v2915_v41  ;;  %v12752_v13 = vadd.s32 168, %v11755_v34  ;;  %v5296_v21 = vshrl.u32 %v10906_v5, 16 }
 0x314   : > { %vm4063_vm11 = vc.u32 %v4055_v44, %v4059_v42  ;;  %v4065_v27 = vadd.s32 %v4059_v42, %v4055_v44  ;;  %v5299_v25 = vshll.u32 %v10906_v5, 16  ;;  %6197 = vmatmul.bf16.gmra.mxu0 %v10687_v26  ;;  %v4062_v54 = vshrl.u32 %v4057_v28, 16 }
 0x315   : > { %vm4532_vm12 = vcmp.ne.s32.totalorder %v4046_v45, 0  ;;  %vm4568_vm14 = vcmp.lt.s32.totalorder %v4046_v45, 0  ;;  %v4640_v30 = vadd.s32 18, %v4046_v45  ;;  %v4064_v6 = vsel %vm4063_vm11, 1, %v14639_v3 }
 0x316   : > { %vm4604_vm6 = vmand %vm4568_vm14, %vm4532_vm12  ;;  %v4066_v29 = vadd.s32 %v4064_v6, %v4058_v38  ;;  %vm4067_vm15 = vc.u32 %v4065_v27, %v4061_v7  ;;  %v3269_v24 = vadd.f32 %v3197_v4, %v14704_v12  ;;  %v4081_v60 = vand.u32 65535, %v12752_v13 }
 0x317   : > { %v4676_v2 = vsel %vm4604_vm6, %v4640_v30, %v4046_v45  ;;  %v4068_v49 = vsel %vm4067_vm15, 1, %v14639_v3  ;;  %v4082_v37 = vshrl.u32 %v12752_v13, 16  ;;  %v5298_v52 = vrot.slane %v5296_v21, 2 }
 0x318   : > { %vm4712_vm13 = vcmp.lt.s32.totalorder %v4676_v2, 16  ;;  %v4070_v61 = vadd.s32 %v4068_v49, %v4066_v29  ;;  %v12762_v50 = vadd.f32 %v12513_v59, %v3269_v24  ;;  %v4084_v35 = vmul.u32 14564, %v4081_v60  ;;  %v2714_v58 = vpop.f32.mrf.mxu2  ;;  %v10688_v49 = vld [vmem:[#allocation2 + $0x20] sm:$0xff]  }
 0x319   : > { %v4820_v16 = vsel %vm4712_vm13, %v3415_v62, 0.0  ;;  %v4085_v23 = vmul.u32 58254, %v4081_v60  ;;  %v4086_v17 = vmul.u32 14564, %v4082_v37  ;;  %v4087_v31 = vmul.u32 58254, %v4082_v37  ;;  %v2919_v38 = vpop.f32.mrf.mxu3  ;;  %v3143_v4 = vpop.f32.mrf.mxu0 }
 0x31a   : > { %v10389_v33 = vpack.c.bf16 %v4820_v16, %v4819_v55  ;;  %v4071_v48 = vadd.s32 %v4070_v61, %v4060_v46  ;;  %v5301_v43 = vrot.slane %v5299_v25, 3  ;;  %v5647_v9 = vrot.slane %v5296_v21, 3  ;;  %v12779_v46 = vpop.f32.mrf.mxu1 }
 0x31b   : > { %v4088_v14 = vshll.u32 %v4085_v23, 16  ;;  %v4089_v53 = vshrl.u32 %v4085_v23, 16  ;;  %v4090_v1 = vshll.u32 %v4086_v17, 16  ;;  %v4091_v15 = vshrl.u32 %v4086_v17, 16 }
 0x31c   : > { %10677 = vst [vmem:[#allocation2 + $0x58] sm:$0xff] %v10389_v33   ;;  %v4072_v41 = vadd.s32 %v4071_v48, %v4062_v54  ;;  %v12767_v20 = vor.u32 %v5301_v43, %v5298_v52  ;;  %v5648_v56 = vrot.slane %v5299_v25, 4  ;;  %v2918_v44 = vadd.f32 %v2917_v0, %v2712_v57  ;;  %v14705_v25 = vld [vmem:[#allocation8_spill] sm:$0xff] }
 0x31d   : > { %vm4092_vm8 = vc.u32 %v4084_v35, %v4088_v14  ;;  %v4094_v22 = vadd.s32 %v4088_v14, %v4084_v35  ;;  %v12770_v51 = vadd.s32 176, %v11755_v34  ;;  %v3416_v57 = vmax.f32 %v12748_v10, 0.0 }
 0x31e   : > { %v4073_v28 = vshrl.u32 %v4072_v41, 4  ;;  %v4093_v55 = vsel %vm4092_vm8, 1, %v14639_v3  ;;  %v5303_v62 = vsel %vm2411_vm4, %v12717_v47, %v12767_v20  ;;  %v12776_v63 = vor.u32 %v5648_v56, %v5647_v9  ;;  %v14708_v56 = vld [vmem:[#allocation9_spill] sm:$0xff] }
 0x31f   : > { %v4095_v42 = vadd.s32 %v4093_v55, %v4087_v31  ;;  %vm4096_vm3 = vc.u32 %v4094_v22, %v4090_v1  ;;  %5527 = vmatmul.bf16.gmra.mxu2 %v5303_v62  ;;  %v3198_v7 = vadd.f32 %v3141_v39, %v2918_v44  ;;  %v4110_v45 = vand.u32 65535, %v12770_v51  ;;  %v10907_v55 = vld [vmem:[#allocation2 + $0x1c] sm:$0xff] }
 0x320   : > { %v4074_v26 = vmul.u32 18, %v4073_v28  ;;  %v4097_v27 = vsel %vm4096_vm3, 1, %v14639_v3  ;;  %v5650_v47 = vsel %vm5634_vm7, %v12730_v11, %v12776_v63  ;;  %v4111_v5 = vshrl.u32 %v12770_v51, 16  ;;  %v2717_v1 = vpop.f32.mrf.mxu2 }
 0x321   : > { %v4099_v21 = vadd.s32 %v4097_v27, %v4095_v42  ;;  %5799 = vmatmul.bf16.gmra.mxu3 %v5650_v47  ;;  %v3270_v30 = vadd.f32 %v3198_v7, %v14705_v25  ;;  %v4113_v6 = vmul.u32 14564, %v4110_v45  ;;  %v4114_v39 = vmul.u32 58254, %v4110_v45  ;;  %v3146_v28 = vpop.f32.mrf.mxu0 }
 0x322   : > { %v4075_v0 = vsub.s32 %v12726_v19, %v4074_v26  ;;  %v3417_v29 = vmax.f32 %v12762_v50, 0.0  ;;  %v4115_v12 = vmul.u32 14564, %v4111_v5  ;;  %v4116_v60 = vmul.u32 58254, %v4111_v5  ;;  %v12811_v44 = vpop.f32.mrf.mxu1 }
 0x323   : > { %v4100_v24 = vadd.s32 %v4099_v21, %v4089_v53  ;;  %v4117_v2 = vshll.u32 %v4114_v39, 16  ;;  %v12790_v54 = vld [vmem:[#allocation2 + $0x54] sm:$0xff]  ;;  %v2920_v11 = vadd.f32 %v2919_v38, %v2714_v58  ;;  %v12793_v10 = vadd.f32 %v12513_v59, %v3270_v30  ;;  %14709 = vst [vmem:[#allocation4_spill] sm:$0xff] %v12811_v44 }
 0x324   : > { %vm4533_vm9 = vcmp.ne.s32.totalorder %v4075_v0, 0  ;;  %vm4569_vm10 = vcmp.lt.s32.totalorder %v4075_v0, 0  ;;  %v4641_v37 = vadd.s32 18, %v4075_v0  ;;  %v4119_v61 = vshll.u32 %v4115_v12, 16  ;;  %6202 = vmatmul.bf16.gmra.mxu0 %v10688_v49 }
 0x325   : > { %vm4605_vm11 = vmand %vm4569_vm10, %vm4533_vm9  ;;  %v4101_v52 = vadd.s32 %v4100_v24, %v4091_v15  ;;  %v4118_v19 = vshrl.u32 %v4114_v39, 16  ;;  %vm4121_vm12 = vc.u32 %v4113_v6, %v4117_v2  ;;  %v4123_v23 = vadd.s32 %v4117_v2, %v4113_v6  ;;  %v2922_v15 = vpop.f32.mrf.mxu3 }
 0x326   : > { %v4677_v16 = vsel %vm4605_vm11, %v4641_v37, %v4075_v0  ;;  %v4122_v35 = vsel %vm4121_vm12, 1, %v14639_v3  ;;  %v5092_v17 = vrot.slane %v12790_v54, 3  ;;  %v3199_v43 = vadd.f32 %v3143_v4, %v2920_v11 }
 0x327   : > { %vm12797_vm14 = vcmp.lt.s32.totalorder %v4677_v16, 16  ;;  %v4102_v48 = vshrl.u32 %v4101_v52, 4  ;;  %v4124_v31 = vadd.s32 %v4122_v35, %v4116_v60  ;;  %v4120_v36 = vshrl.u32 %v4115_v12, 16 }
 0x328   : > { %vm4125_vm6 = vc.u32 %v4123_v23, %v4119_v61  ;;  %v5093_v14 = vsel %vm2973_vm5, %v5090_v40, %v5092_v17  ;;  %v12807_v53 = vadd.s32 184, %v11755_v34  ;;  %v3271_v22 = vadd.f32 %v3199_v43, %v14708_v56  ;;  %v2719_v16 = vpop.f32.mrf.mxu2 }
 0x329   : > { %v4103_v41 = vmul.u32 18, %v4102_v48  ;;  %v4126_v9 = vsel %vm4125_vm6, 1, %v14639_v3  ;;  %5229 = vmatmul.bf16.gmra.mxu1 %v5093_v14  ;;  %v5305_v62 = vshrl.u32 %v10907_v55, 16  ;;  %v4821_v18 = vsel %vm12797_vm14, %v3416_v57, 0.0 }
 0x32a   : > { %v4128_v40 = vadd.s32 %v4126_v9, %v4124_v31  ;;  %v4139_v58 = vand.u32 65535, %v12807_v53  ;;  %v4140_v38 = vshrl.u32 %v12807_v53, 16  ;;  %v12819_v7 = vadd.f32 %v12513_v59, %v3271_v22  ;;  %v3148_v31 = vpop.f32.mrf.mxu0  ;;  %v10689_v9 = vld [vmem:[#allocation2 + $0x28] sm:$0xff]  }
 0x32b   : > { %v4104_v42 = vsub.s32 %v12752_v13, %v4103_v41  ;;  %v5307_v45 = vrot.slane %v5305_v62, 2  ;;  %v5308_v4 = vshll.u32 %v10907_v55, 16  ;;  %v5651_v25 = vrot.slane %v5305_v62, 3  ;;  %v14710_v55 = vld [vmem:[#allocation10_spill] sm:$0xff] }
 0x32c   : > { %v4129_v26 = vadd.s32 %v4128_v40, %v4118_v19  ;;  %v4142_v27 = vmul.u32 14564, %v4139_v58  ;;  %v4143_v47 = vmul.u32 58254, %v4139_v58  ;;  %v4144_v5 = vmul.u32 14564, %v4140_v38 }
 0x32d   : > { %vm4534_vm15 = vcmp.ne.s32.totalorder %v4104_v42, 0  ;;  %vm4570_vm13 = vcmp.lt.s32.totalorder %v4104_v42, 0  ;;  %v4642_v21 = vadd.s32 18, %v4104_v42  ;;  %v4145_v6 = vmul.u32 58254, %v4140_v38  ;;  %v2924_v35 = vpop.f32.mrf.mxu3 }
 0x32e   : > { %vm4606_vm8 = vmand %vm4570_vm13, %vm4534_vm15  ;;  %v4130_v30 = vadd.s32 %v4129_v26, %v4120_v36  ;;  %v4146_v39 = vshll.u32 %v4143_v47, 16  ;;  %v4147_v57 = vshrl.u32 %v4143_v47, 16  ;;  %v4148_v13 = vshll.u32 %v4144_v5, 16 }
 0x32f   : > { %v4678_v0 = vsel %vm4606_vm8, %v4642_v21, %v4104_v42  ;;  %v4149_v12 = vshrl.u32 %v4144_v5, 16  ;;  %v5310_v59 = vrot.slane %v5308_v4, 3  ;;  %v5652_v37 = vrot.slane %v5308_v4, 4  ;;  %v12849_v4 = vld [vmem:[#allocation2 + $0x24] sm:$0xff] }
 0x330   : > { %vm4714_vm3 = vcmp.lt.s32.totalorder %v4678_v0, 16  ;;  %v4131_v24 = vshrl.u32 %v4130_v30, 4  ;;  %vm4150_vm9 = vc.u32 %v4142_v27, %v4146_v39  ;;  %v4152_v60 = vadd.s32 %v4146_v39, %v4142_v27 }
 0x331   : > { %v4822_v2 = vsel %vm4714_vm3, %v3417_v29, 0.0  ;;  %v4151_v11 = vsel %vm4150_vm9, 1, %v14639_v3  ;;  %v12824_v49 = vor.u32 %v5310_v59, %v5307_v45  ;;  %v12830_v48 = vor.u32 %v5652_v37, %v5651_v25  ;;  %v12832_v29 = vpop.f32.mrf.mxu1 }
 0x332   : > { %v10394_v61 = vpack.c.bf16 %v4822_v2, %v4821_v18  ;;  %v4132_v52 = vmul.u32 18, %v4131_v24  ;;  %v4153_v19 = vadd.s32 %v4151_v11, %v4145_v6  ;;  %vm4154_vm10 = vc.u32 %v4152_v60, %v4148_v13  ;;  %v14711_v24 = vld [vmem:[#allocation11_spill] sm:$0xff] }
 0x333   : > { %v4155_v23 = vsel %vm4154_vm10, 1, %v14639_v3  ;;  %v5312_v33 = vsel %vm2411_vm4, %v12767_v20, %v12824_v49  ;;  %v2923_v50 = vadd.f32 %v2922_v15, %v2717_v1  ;;  %v12836_v14 = vadd.s32 192, %v11755_v34 }
 0x334   : > { %10678 = vst [vmem:[#allocation2 + $0x60] sm:$0xff] %v10394_v61   ;;  %v4133_v43 = vsub.s32 %v12770_v51, %v4132_v52  ;;  %v4157_v36 = vadd.s32 %v4155_v23, %v4153_v19  ;;  %5532 = vmatmul.bf16.gmra.mxu2 %v5312_v33  ;;  %v2925_v41 = vadd.f32 %v2924_v35, %v2719_v16  ;;  %v12842_v1 = vadd.s32 200, %v11755_v34  ;;  %v3151_v52 = vpop.f32.mrf.mxu0 }
 0x335   : > { %v5654_v20 = vsel %vm5634_vm7, %v12776_v63, %v12830_v48  ;;  %v3200_v56 = vadd.f32 %v3146_v28, %v2923_v50  ;;  %6207 = vmatmul.bf16.gmra.mxu0 %v10689_v9  ;;  %v3418_v22 = vmax.f32 %v12793_v10, 0.0  ;;  %v4168_v18 = vand.u32 65535, %v12836_v14  ;;  %v2927_v0 = vpop.f32.mrf.mxu3 }
 0x336   : > { %vm4535_vm11 = vcmp.ne.s32.totalorder %v4133_v43, 0  ;;  %vm4571_vm12 = vcmp.lt.s32.totalorder %v4133_v43, 0  ;;  %v4643_v15 = vadd.s32 18, %v4133_v43  ;;  %v4158_v51 = vadd.s32 %v4157_v36, %v4147_v57  ;;  %5804 = vmatmul.bf16.gmra.mxu3 %v5654_v20  ;;  %v2722_v57 = vpop.f32.mrf.mxu2 }
 0x337   : > { %vm4607_vm14 = vmand %vm4571_vm12, %vm4535_vm11  ;;  %v3272_v62 = vadd.f32 %v3200_v56, %v14710_v55  ;;  %v4169_v40 = vshrl.u32 %v12836_v14, 16  ;;  %v3419_v28 = vmax.f32 %v12819_v7, 0.0  ;;  %v3201_v38 = vadd.f32 %v3148_v31, %v2925_v41  ;;  %v12857_v7 = vld [vmem:[%s14572_s2] ss:$0 sm:$0xff] }
 0x338   : > { %v4679_v63 = vsel %vm4607_vm14, %v4643_v15, %v4133_v43  ;;  %v4159_v58 = vadd.s32 %v4158_v51, %v4149_v12  ;;  %v4171_v42 = vmul.u32 14564, %v4168_v18  ;;  %v4172_v45 = vmul.u32 58254, %v4168_v18 }
 0x339   : > { %vm4715_vm6 = vcmp.lt.s32.totalorder %v4679_v63, 16  ;;  %v5314_v26 = vshrl.u32 %v12849_v4, 16  ;;  %v4173_v27 = vmul.u32 14564, %v4169_v40  ;;  %v4197_v47 = vand.u32 65535, %v12842_v1  ;;  %v12866_v61 = vpop.f32.mrf.mxu1  ;;  %v10256_v63 = vld [vmem:[%s14573_s3 + $0xd0] sm:$0xff] }
 0x33a   : > { %v4160_v10 = vshrl.u32 %v4159_v58, 4  ;;  %v4198_v5 = vshrl.u32 %v12842_v1, 16  ;;  %v4823_v21 = vsel %vm4715_vm6, %v3418_v22, 0.0  ;;  %v12860_v25 = vadd.f32 %v12857_v7, %v3272_v62  ;;  %14712 = vst [vmem:[#allocation5_spill] sm:$0xff] %v12866_v61  ;;  %v10690_v58 = vld [vmem:[#allocation2 + $0x30] sm:$0xff]   ;;  %6545 = vmatpush.bf16.msrb.mxu1 %v10256_v63  ;;  %v13321_v61 = vld [vmem:[#allocation2 + $0x28] sm:$0xff] }
 0x33b   : > { %v4174_v30 = vmul.u32 58254, %v4169_v40  ;;  %v4175_v6 = vshll.u32 %v4172_v45, 16  ;;  %v12862_v39 = vld [vmem:[#allocation2 + $0x5c] sm:$0xff]  ;;  %v4176_v12 = vshrl.u32 %v4172_v45, 16  ;;  %v4177_v59 = vshll.u32 %v4173_v27, 16 }
 0x33c   : > { %v4161_v13 = vmul.u32 18, %v4160_v10  ;;  %v3273_v60 = vadd.f32 %v3201_v38, %v14711_v24  ;;  %v4178_v2 = vshrl.u32 %v4173_v27, 16  ;;  %v5094_v37 = vrot.slane %v12862_v39, 3 }
 0x33d   : > { %vm4179_vm15 = vc.u32 %v4171_v42, %v4175_v6  ;;  %v4181_v11 = vadd.s32 %v4175_v6, %v4171_v42  ;;  %v4201_v35 = vmul.u32 58254, %v4197_v47  ;;  %v4202_v23 = vmul.u32 14564, %v4198_v5  ;;  %v2929_v27 = vpop.f32.mrf.mxu3 }
 0x33e   : > { %v4162_v19 = vsub.s32 %v12807_v53, %v4161_v13  ;;  %v4180_v16 = vsel %vm4179_vm15, 1, %v14639_v3  ;;  %v5095_v50 = vsel %vm2973_vm5, %v5092_v17, %v5094_v37  ;;  %v4200_v31 = vmul.u32 14564, %v4197_v47  ;;  %v2724_v10 = vpop.f32.mrf.mxu2 }
 0x33f   : > { %v4182_v33 = vadd.s32 %v4180_v16, %v4174_v30  ;;  %vm4183_vm13 = vc.u32 %v4181_v11, %v4177_v59  ;;  %5234 = vmatmul.bf16.gmra.mxu1 %v5095_v50  ;;  %v4203_v41 = vmul.u32 58254, %v4198_v5  ;;  %v4204_v9 = vshll.u32 %v4201_v35, 16 }
 0x340   : > { %vm4536_vm8 = vcmp.ne.s32.totalorder %v4162_v19, 0  ;;  %vm4572_vm3 = vcmp.lt.s32.totalorder %v4162_v19, 0  ;;  %v4644_v43 = vadd.s32 18, %v4162_v19  ;;  %v4184_v36 = vsel %vm4183_vm13, 1, %v14639_v3 }
 0x341   : > { %vm4608_vm9 = vmand %vm4572_vm3, %vm4536_vm8  ;;  %v4186_v53 = vadd.s32 %v4184_v36, %v4182_v33  ;;  %v4205_v20 = vshrl.u32 %v4201_v35, 16  ;;  %v4206_v15 = vshll.u32 %v4202_v23, 16  ;;  %v4207_v51 = vshrl.u32 %v4202_v23, 16  ;;  %v12885_v13 = vpop.f32.mrf.mxu1  ;;  %v14713_v33 = vld [vmem:[#allocation12_spill] sm:$0xff] }
 0x342   : > { %v4680_v56 = vsel %vm4608_vm9, %v4644_v43, %v4162_v19  ;;  %v5316_v22 = vrot.slane %v5314_v26, 2  ;;  %vm4208_vm11 = vc.u32 %v4200_v31, %v4204_v9  ;;  %v4210_v17 = vadd.s32 %v4204_v9, %v4200_v31 }
 0x343   : > { %vm4716_vm10 = vcmp.lt.s32.totalorder %v4680_v56, 16  ;;  %v4187_v54 = vadd.s32 %v4186_v53, %v4176_v12  ;;  %v4209_v62 = vsel %vm4208_vm11, 1, %v14639_v3  ;;  %v5317_v18 = vshll.u32 %v12849_v4, 16 }
 0x344   : > { %v4824_v55 = vsel %vm4716_vm10, %v3419_v28, 0.0  ;;  %v5655_v40 = vrot.slane %v5314_v26, 3  ;;  %v4211_v45 = vadd.s32 %v4209_v62, %v4203_v41  ;;  %vm4212_vm12 = vc.u32 %v4210_v17, %v4206_v15 }
 0x345   : > { %v10399_v38 = vpack.c.bf16 %v4824_v55, %v4823_v21  ;;  %v4188_v42 = vadd.s32 %v4187_v54, %v4178_v2  ;;  %6212 = vmatmul.bf16.gmra.mxu0 %v10690_v58  ;;  %v4213_v47 = vsel %vm4212_vm12, 1, %v14639_v3  ;;  %v5319_v28 = vrot.slane %v5317_v18, 3  ;;  %v3153_v21 = vpop.f32.mrf.mxu0  ;;  %v14714_v55 = vld [vmem:[#allocation13_spill] sm:$0xff] }
 0x346   : > { %v5656_v5 = vrot.slane %v5317_v18, 4  ;;  %v2928_v30 = vadd.f32 %v2927_v0, %v2722_v57  ;;  %v4215_v26 = vadd.s32 %v4213_v47, %v4211_v45  ;;  %v12883_v6 = vadd.s32 208, %v11755_v34 }
 0x347   : > { %10679 = vst [vmem:[#allocation2 + $0x68] sm:$0xff] %v10399_v38   ;;  %v4189_v4 = vshrl.u32 %v4188_v42, 4  ;;  %v2930_v12 = vadd.f32 %v2929_v27, %v2724_v10  ;;  %v12888_v59 = vadd.f32 %v12857_v7, %v3273_v60  ;;  %v12890_v24 = vor.u32 %v5319_v28, %v5316_v22 }
 0x348   : > { %v12892_v2 = vor.u32 %v5656_v5, %v5655_v40  ;;  %v3202_v11 = vadd.f32 %v3151_v52, %v2928_v30  ;;  %v4216_v0 = vadd.s32 %v4215_v26, %v4205_v20  ;;  %v4226_v19 = vand.u32 65535, %v12883_v6  ;;  %v2727_v5 = vpop.f32.mrf.mxu2  ;;  %v2932_v30 = vpop.f32.mrf.mxu3 }
 0x349   : > { %v4190_v57 = vmul.u32 18, %v4189_v4  ;;  %v4227_v16 = vshrl.u32 %v12883_v6, 16  ;;  %v3420_v35 = vmax.f32 %v12860_v25, 0.0  ;;  %v5321_v23 = vsel %vm2411_vm4, %v12824_v49, %v12890_v24  ;;  %v12920_v45 = vpop.f32.mrf.mxu1 }
 0x34a   : > { %v5658_v60 = vsel %vm5634_vm7, %v12830_v48, %v12892_v2  ;;  %v3274_v50 = vadd.f32 %v3202_v11, %v14713_v33  ;;  %v4217_v31 = vadd.s32 %v4216_v0, %v4207_v51  ;;  %5537 = vmatmul.bf16.gmra.mxu2 %v5321_v23  ;;  %v4230_v43 = vmul.u32 58254, %v4226_v19  ;;  %14715 = vst [vmem:[#allocation22_spill] sm:$0xff] %v12920_v45  ;;  %v10691_v11 = vld [vmem:[#allocation2 + $0x38] sm:$0xff]  }
 0x34b   : > { %v4191_v52 = vsub.s32 %v12836_v14, %v4190_v57  ;;  %5809 = vmatmul.bf16.gmra.mxu3 %v5658_v60  ;;  %v3203_v36 = vadd.f32 %v3153_v21, %v2930_v12  ;;  %v3421_v53 = vmax.f32 %v12888_v59, 0.0  ;;  %v4229_v25 = vmul.u32 14564, %v4226_v19  ;;  %v10910_v57 = vld [vmem:[#allocation2 + $0x2c] sm:$0xff] }
 0x34c   : > { %v4231_v41 = vmul.u32 14564, %v4227_v16  ;;  %v12907_v9 = vadd.s32 216, %v11755_v34  ;;  %v4218_v48 = vshrl.u32 %v4217_v31, 4  ;;  %v12910_v20 = vadd.f32 %v12857_v7, %v3274_v50 }
 0x34d   : > { %vm4537_vm14 = vcmp.ne.s32.totalorder %v4191_v52, 0  ;;  %vm4573_vm6 = vcmp.lt.s32.totalorder %v4191_v52, 0  ;;  %v4645_v49 = vadd.s32 18, %v4191_v52  ;;  %v4232_v14 = vmul.u32 58254, %v4227_v16  ;;  %v3156_v10 = vpop.f32.mrf.mxu0 }
 0x34e   : > { %vm4609_vm15 = vmand %vm4573_vm6, %vm4537_vm14  ;;  %v4233_v56 = vshll.u32 %v4230_v43, 16  ;;  %v4235_v15 = vshll.u32 %v4231_v41, 16  ;;  %v12912_v51 = vld [vmem:[#allocation2 + $0x64] sm:$0xff]  ;;  %v4219_v54 = vmul.u32 18, %v4218_v48  ;;  %v4234_v17 = vshrl.u32 %v4230_v43, 16 }
 0x34f   : > { %v4681_v22 = vsel %vm4609_vm15, %v4645_v49, %v4191_v52  ;;  %v12915_v62 = vadd.f32 %v3203_v36, %v14714_v55  ;;  %v5096_v40 = vrot.slane %v12912_v51, 3  ;;  %v4236_v38 = vshrl.u32 %v4231_v41, 16 }
 0x350   : > { %vm4717_vm13 = vcmp.lt.s32.totalorder %v4681_v22, 16  ;;  %vm4237_vm8 = vc.u32 %v4229_v25, %v4233_v56  ;;  %v4239_v18 = vadd.s32 %v4233_v56, %v4229_v25  ;;  %v4220_v58 = vsub.s32 %v12842_v1, %v4219_v54 }
 0x351   : > { %v4825_v63 = vsel %vm4717_vm13, %v3420_v35, 0.0  ;;  %v4238_v42 = vsel %vm4237_vm8, 1, %v14639_v3  ;;  %v5097_v47 = vsel %vm2973_vm5, %v5094_v37, %v5096_v40  ;;  %v4255_v28 = vand.u32 65535, %v12907_v9  ;;  %v12936_v55 = vpop.f32.mrf.mxu1 }
 0x352   : > { %v4240_v27 = vadd.s32 %v4238_v42, %v4232_v14  ;;  %vm4241_vm3 = vc.u32 %v4239_v18, %v4235_v15  ;;  %vm4538_vm9 = vcmp.ne.s32.totalorder %v4220_v58, 0  ;;  %vm4574_vm10 = vcmp.lt.s32.totalorder %v4220_v58, 0  ;;  %5239 = vmatmul.bf16.gmra.mxu1 %v5097_v47  ;;  %v14716_v42 = vld [vmem:[#allocation14_spill] sm:$0xff]  ;;  %v2729_v47 = vpop.f32.mrf.mxu2 }
 0x353   : > { %v4646_v1 = vadd.s32 18, %v4220_v58  ;;  %v4242_v4 = vsel %vm4241_vm3, 1, %v14639_v3  ;;  %vm4610_vm11 = vmand %vm4574_vm10, %vm4538_vm9  ;;  %v4256_v21 = vshrl.u32 %v12907_v9, 16  ;;  %v4258_v12 = vmul.u32 14564, %v4255_v28 }
 0x354   : > { %v4244_v26 = vadd.s32 %v4242_v4, %v4240_v27  ;;  %v4259_v59 = vmul.u32 58254, %v4255_v28  ;;  %v5323_v37 = vshrl.u32 %v10910_v57, 16  ;;  %v5326_v0 = vshll.u32 %v10910_v57, 16  ;;  %v2934_v28 = vpop.f32.mrf.mxu3 }
 0x355   : > { %v4682_v39 = vsel %vm4610_vm11, %v4646_v1, %v4220_v58  ;;  %v2933_v19 = vadd.f32 %v2932_v30, %v2727_v5  ;;  %6217 = vmatmul.bf16.gmra.mxu0 %v10691_v11  ;;  %v4260_v35 = vmul.u32 14564, %v4256_v21  ;;  %v4261_v23 = vmul.u32 58254, %v4256_v21  ;;  %v3158_v18 = vpop.f32.mrf.mxu0 }
 0x356   : > { %vm4718_vm12 = vcmp.lt.s32.totalorder %v4682_v39, 16  ;;  %v4245_v16 = vadd.s32 %v4244_v26, %v4234_v17  ;;  %v4262_v33 = vshll.u32 %v4259_v59, 16  ;;  %v4263_v50 = vshrl.u32 %v4259_v59, 16 }
 0x357   : > { %v4826_v60 = vsel %vm4718_vm12, %v3421_v53, 0.0  ;;  %v5325_v52 = vrot.slane %v5323_v37, 2  ;;  %v4264_v36 = vshll.u32 %v4260_v35, 16  ;;  %v4265_v25 = vshrl.u32 %v4260_v35, 16 }
 0x358   : > { %v10404_v31 = vpack.c.bf16 %v4826_v60, %v4825_v63  ;;  %v4246_v43 = vadd.s32 %v4245_v16, %v4236_v38  ;;  %vm4266_vm14 = vc.u32 %v4258_v12, %v4262_v33  ;;  %v4268_v41 = vadd.s32 %v4262_v33, %v4258_v12 }
 0x359   : > { %v5328_v49 = vrot.slane %v5326_v0, 3  ;;  %v5659_v48 = vrot.slane %v5323_v37, 3  ;;  %v4267_v56 = vsel %vm4266_vm14, 1, %v14639_v3  ;;  %v5660_v15 = vrot.slane %v5326_v0, 4 }
 0x35a   : > { %10680 = vst [vmem:[#allocation2 + $0x70] sm:$0xff] %v10404_v31   ;;  %v4247_v14 = vshrl.u32 %v4246_v43, 4  ;;  %v3204_v22 = vadd.f32 %v3156_v10, %v2933_v19  ;;  %v4269_v54 = vadd.s32 %v4267_v56, %v4261_v23  ;;  %vm4270_vm6 = vc.u32 %v4268_v41, %v4264_v36 }
 0x35b   : > { %v12931_v53 = vor.u32 %v5328_v49, %v5325_v52  ;;  %v12934_v17 = vadd.s32 224, %v11755_v34  ;;  %v4271_v58 = vsel %vm4270_vm6, 1, %v14639_v3  ;;  %v12939_v38 = vor.u32 %v5660_v15, %v5659_v48 }
 0x35c   : > { %v4248_v63 = vmul.u32 18, %v4247_v14  ;;  %v3276_v27 = vadd.f32 %v3204_v22, %v14716_v42  ;;  %v4273_v10 = vadd.s32 %v4271_v58, %v4269_v54  ;;  %v12950_v26 = vadd.f32 %v12857_v7, %v12915_v62  ;;  %v12972_v14 = vpop.f32.mrf.mxu1  ;;  %v2732_v58 = vpop.f32.mrf.mxu2 }
 0x35d   : > { %v5330_v5 = vsel %vm2411_vm4, %v12890_v24, %v12931_v53  ;;  %v4284_v30 = vand.u32 65535, %v12934_v17  ;;  %v4285_v1 = vshrl.u32 %v12934_v17, 16  ;;  %v5662_v21 = vsel %vm5634_vm7, %v12892_v2, %v12939_v38  ;;  %14719 = vst [vmem:[#allocation6_spill] sm:$0xff] %v12972_v14  ;;  %v12974_v56 = vpop.f32.mrf.mxu0  ;;  %v2937_v42 = vpop.f32.mrf.mxu3 }
 0x35e   : > { %v4249_v4 = vsub.s32 %v12883_v6, %v4248_v63  ;;  %5542 = vmatmul.bf16.gmra.mxu2 %v5330_v5  ;;  %v12956_v12 = vadd.f32 %v12857_v7, %v3276_v27  ;;  %v4274_v59 = vadd.s32 %v4273_v10, %v4263_v50  ;;  %5814 = vmatmul.bf16.gmra.mxu3 %v5662_v21  ;;  %v3422_v62 = vmax.f32 %v12910_v20, 0.0 }
 0x35f   : > { %v4287_v24 = vmul.u32 14564, %v4284_v30  ;;  %v4288_v11 = vmul.u32 58254, %v4284_v30  ;;  %v4289_v39 = vmul.u32 14564, %v4285_v1  ;;  %v2935_v57 = vadd.f32 %v2934_v28, %v2729_v47  ;;  %v14720_v30 = vld [vmem:[#allocation15_spill] sm:$0xff] }
 0x360   : > { %vm4539_vm15 = vcmp.ne.s32.totalorder %v4249_v4, 0  ;;  %vm4575_vm13 = vcmp.lt.s32.totalorder %v4249_v4, 0  ;;  %v4647_v6 = vadd.s32 18, %v4249_v4  ;;  %v4275_v37 = vadd.s32 %v4274_v59, %v4265_v25  ;;  %v10692_v25 = vld [vmem:[#allocation2 + $0x40] sm:$0xff]  }
 0x361   : > { %vm4611_vm8 = vmand %vm4575_vm13, %vm4539_vm15  ;;  %v4290_v0 = vmul.u32 58254, %v4285_v1  ;;  %v4291_v19 = vshll.u32 %v4288_v11, 16  ;;  %v12959_v16 = vld [vmem:[#allocation2 + $0x6c] sm:$0xff]  ;;  %v3423_v35 = vmax.f32 %v12950_v26, 0.0  ;;  %v3424_v23 = vmax.f32 %v12956_v12, 0.0 }
 0x362   : > { %v4683_v2 = vsel %vm4611_vm8, %v4647_v6, %v4249_v4  ;;  %v4293_v60 = vshll.u32 %v4289_v39, 16  ;;  %v4276_v33 = vshrl.u32 %v4275_v37, 4  ;;  %v4292_v50 = vshrl.u32 %v4288_v11, 16 }
 0x363   : > { %vm4295_vm3 = vc.u32 %v4287_v24, %v4291_v19  ;;  %v4297_v52 = vadd.s32 %v4291_v19, %v4287_v24  ;;  %vm12963_vm9 = vcmp.lt.s32.totalorder %v4683_v2, 16  ;;  %v5098_v43 = vrot.slane %v12959_v16, 3 }
 0x364   : > { %v4296_v20 = vsel %vm4295_vm3, 1, %v14639_v3  ;;  %v3205_v36 = vadd.f32 %v3158_v18, %v2935_v57  ;;  %v4277_v41 = vmul.u32 18, %v4276_v33  ;;  %v12970_v48 = vadd.s32 232, %v11755_v34  ;;  %v10911_v18 = vld [vmem:[#allocation2 + $0x34] sm:$0xff] }
 0x365   : > { %v4298_v49 = vadd.s32 %v4296_v20, %v4290_v0  ;;  %vm4299_vm10 = vc.u32 %v4297_v52, %v4293_v60  ;;  %6222 = vmatmul.bf16.gmra.mxu0 %v10692_v25  ;;  %v4294_v15 = vshrl.u32 %v4289_v39, 16  ;;  %v5099_v54 = vsel %vm2973_vm5, %v5096_v40, %v5098_v43 }
 0x366   : > { %v4300_v22 = vsel %vm4299_vm10, 1, %v14639_v3  ;;  %v5332_v63 = vshrl.u32 %v10911_v18, 16  ;;  %v4278_v27 = vsub.s32 %v12907_v9, %v4277_v41  ;;  %5244 = vmatmul.bf16.gmra.mxu1 %v5099_v54  ;;  %v4313_v28 = vand.u32 65535, %v12970_v48 }
 0x367   : > { %v4302_v47 = vadd.s32 %v4300_v22, %v4298_v49  ;;  %v4314_v10 = vshrl.u32 %v12970_v48, 16  ;;  %v4827_v5 = vsel %vm12963_vm9, %v3422_v62, 0.0  ;;  %v3277_v1 = vadd.f32 %v3205_v36, %v14720_v30  ;;  %v12996_v49 = vpop.f32.mrf.mxu1 }
 0x368   : > { %v5334_v51 = vrot.slane %v5332_v63, 2  ;;  %v5335_v4 = vshll.u32 %v10911_v18, 16  ;;  %vm4540_vm11 = vcmp.ne.s32.totalorder %v4278_v27, 0  ;;  %vm4576_vm12 = vcmp.lt.s32.totalorder %v4278_v27, 0  ;;  %v2734_v18 = vpop.f32.mrf.mxu2 }
 0x369   : > { %v4648_v40 = vadd.s32 18, %v4278_v27  ;;  %v4303_v26 = vadd.s32 %v4302_v47, %v4292_v50  ;;  %vm4612_vm14 = vmand %vm4576_vm12, %vm4540_vm11  ;;  %v4316_v21 = vmul.u32 14564, %v4313_v28  ;;  %v4317_v9 = vmul.u32 58254, %v4313_v28 }
 0x36a   : > { %v4318_v59 = vmul.u32 14564, %v4314_v10  ;;  %v5663_v24 = vrot.slane %v5332_v63, 3  ;;  %v5337_v6 = vrot.slane %v5335_v4, 3  ;;  %v5664_v57 = vrot.slane %v5335_v4, 4  ;;  %v2939_v63 = vpop.f32.mrf.mxu3 }
 0x36b   : > { %v4684_v11 = vsel %vm4612_vm14, %v4648_v40, %v4278_v27  ;;  %v4304_v39 = vadd.s32 %v4303_v26, %v4294_v15  ;;  %v4319_v37 = vmul.u32 58254, %v4314_v10  ;;  %v4320_v62 = vshll.u32 %v4317_v9, 16  ;;  %v10693_v40 = vld [vmem:[#allocation2 + $0x48] sm:$0xff]  }
 0x36c   : > { %vm4720_vm6 = vcmp.lt.s32.totalorder %v4684_v11, 16  ;;  %v4322_v0 = vshll.u32 %v4318_v59, 16  ;;  %v4321_v60 = vshrl.u32 %v4317_v9, 16  ;;  %v12988_v33 = vor.u32 %v5337_v6, %v5334_v51  ;;  %v10255_v11 = vld [vmem:[%s14573_s3 + $0xc8] sm:$0xff] }
 0x36d   : > { %v4828_v19 = vsel %vm4720_vm6, %v3423_v35, 0.0  ;;  %v4305_v2 = vshrl.u32 %v4304_v39, 4  ;;  %vm4324_vm15 = vc.u32 %v4316_v21, %v4320_v62  ;;  %v4326_v50 = vadd.s32 %v4320_v62, %v4316_v21  ;;  %v3163_v35 = vpop.f32.mrf.mxu0  ;;  %v14721_v39 = vld [vmem:[#allocation16_spill] sm:$0xff]  ;;  %6546 = vmatpush.bf16.msrb.mxu1 %v10255_v11 }
 0x36e   : > { %v10409_v52 = vpack.c.bf16 %v4828_v19, %v4827_v5  ;;  %v12990_v31 = vor.u32 %v5664_v57, %v5663_v24  ;;  %v4325_v36 = vsel %vm4324_vm15, 1, %v14639_v3  ;;  %v5339_v25 = vsel %vm2411_vm4, %v12931_v53, %v12988_v33 }
 0x36f   : > { %v4306_v20 = vmul.u32 18, %v4305_v2  ;;  %v2938_v41 = vadd.f32 %v2937_v42, %v2732_v58  ;;  %v4327_v15 = vadd.s32 %v4325_v36, %v4319_v37  ;;  %vm4328_vm13 = vc.u32 %v4326_v50, %v4322_v0  ;;  %5547 = vmatmul.bf16.gmra.mxu2 %v5339_v25  ;;  %v13030_v25 = vpop.f32.mrf.mxu1 }
 0x370   : > { %10681 = vst [vmem:[#allocation2 + $0x78] sm:$0xff] %v10409_v52   ;;  %v5666_v22 = vsel %vm5634_vm7, %v12939_v38, %v12990_v31  ;;  %v13002_v54 = vadd.s32 240, %v11755_v34  ;;  %v13006_v53 = vadd.f32 %v12857_v7, %v3277_v1  ;;  %v4323_v58 = vshrl.u32 %v4318_v59, 16 }
 0x371   : > { %v4307_v27 = vsub.s32 %v12934_v17, %v4306_v20  ;;  %v4329_v42 = vsel %vm4328_vm13, 1, %v14639_v3  ;;  %5819 = vmatmul.bf16.gmra.mxu3 %v5666_v22  ;;  %v3206_v28 = vadd.f32 %v12974_v56, %v2938_v41  ;;  %v2940_v30 = vadd.f32 %v2939_v63, %v2734_v18  ;;  %14722 = vst [vmem:[#allocation7_spill] sm:$0xff] %v13030_v25 }
 0x372   : > { %v4331_v47 = vadd.s32 %v4329_v42, %v4327_v15  ;;  %v4342_v10 = vand.u32 65535, %v13002_v54  ;;  %v4343_v38 = vshrl.u32 %v13002_v54, 16  ;;  %v3425_v21 = vmax.f32 %v13006_v53, 0.0  ;;  %v2942_v22 = vpop.f32.mrf.mxu3 }
 0x373   : > { %vm4541_vm8 = vcmp.ne.s32.totalorder %v4307_v27, 0  ;;  %vm4577_vm3 = vcmp.lt.s32.totalorder %v4307_v27, 0  ;;  %v4649_v5 = vadd.s32 18, %v4307_v27  ;;  %v13014_v9 = vadd.s32 248, %v11755_v34 }
 0x374   : > { %vm4613_vm9 = vmand %vm4577_vm3, %vm4541_vm8  ;;  %v4332_v17 = vadd.s32 %v4331_v47, %v4321_v60  ;;  %v4345_v51 = vmul.u32 14564, %v4342_v10  ;;  %v4346_v1 = vmul.u32 58254, %v4342_v10  ;;  %v4347_v4 = vmul.u32 14564, %v4343_v38  ;;  %v14723_v47 = vld [vmem:[#allocation17_spill] sm:$0xff] }
 0x375   : > { %v4685_v26 = vsel %vm4613_vm9, %v4649_v5, %v4307_v27  ;;  %6227 = vmatmul.bf16.gmra.mxu0 %v10693_v40  ;;  %v4348_v59 = vmul.u32 58254, %v4343_v38  ;;  %v13020_v6 = vadd.f32 %v3206_v28, %v14721_v39  ;;  %v3207_v0 = vadd.f32 %v3163_v35, %v2940_v30  ;;  %v13032_v41 = vpop.f32.mrf.mxu0 }
 0x376   : > { %vm4721_vm10 = vcmp.lt.s32.totalorder %v4685_v26, 16  ;;  %v4333_v56 = vadd.s32 %v4332_v17, %v4323_v58  ;;  %v4349_v24 = vshll.u32 %v4346_v1, 16  ;;  %v4350_v57 = vshrl.u32 %v4346_v1, 16  ;;  %v10912_v17 = vld [vmem:[#allocation2 + $0x3c] sm:$0xff] }
 0x377   : > { %v4351_v37 = vshll.u32 %v4347_v4, 16  ;;  %v13022_v62 = vld [vmem:[#allocation2 + $0x74] sm:$0xff]  ;;  %v4829_v19 = vsel %vm4721_vm10, %v3424_v23, 0.0  ;;  %v4371_v20 = vand.u32 65535, %v13014_v9  ;;  %v4372_v36 = vshrl.u32 %v13014_v9, 16  ;;  %v2737_v23 = vpop.f32.mrf.mxu2 }
 0x378   : > { %v4334_v2 = vshrl.u32 %v4333_v56, 4  ;;  %vm4353_vm11 = vc.u32 %v4345_v51, %v4349_v24  ;;  %v4355_v60 = vadd.s32 %v4349_v24, %v4345_v51  ;;  %v5100_v50 = vrot.slane %v13022_v62, 3 }
 0x379   : > { %v4354_v52 = vsel %vm4353_vm11, 1, %v14639_v3  ;;  %v4352_v15 = vshrl.u32 %v4347_v4, 16  ;;  %v4374_v27 = vmul.u32 14564, %v4371_v20  ;;  %v4375_v53 = vmul.u32 58254, %v4371_v20 }
 0x37a   : > { %v4335_v35 = vmul.u32 18, %v4334_v2  ;;  %v4356_v12 = vadd.s32 %v4354_v52, %v4348_v59  ;;  %vm4357_vm12 = vc.u32 %v4355_v60, %v4351_v37  ;;  %v5101_v63 = vsel %vm2973_vm5, %v5098_v43, %v5100_v50 }
 0x37b   : > { %v4358_v18 = vsel %vm4357_vm12, 1, %v14639_v3  ;;  %5249 = vmatmul.bf16.gmra.mxu1 %v5101_v63  ;;  %v3279_v28 = vadd.f32 %v3207_v0, %v14723_v47  ;;  %v4376_v10 = vmul.u32 14564, %v4372_v36  ;;  %v4377_v38 = vmul.u32 58254, %v4372_v36  ;;  %v13044_v36 = vpop.f32.mrf.mxu1  ;;  %v2944_v63 = vpop.f32.mrf.mxu3 }
 0x37c   : > { %v4336_v58 = vsub.s32 %v12970_v48, %v4335_v35  ;;  %v4360_v42 = vadd.s32 %v4358_v18, %v4356_v12  ;;  %v4378_v5 = vshll.u32 %v4375_v53, 16  ;;  %v4379_v30 = vshrl.u32 %v4375_v53, 16 }
 0x37d   : > { %v5341_v51 = vshrl.u32 %v10912_v17, 16  ;;  %v4380_v43 = vshll.u32 %v4376_v10, 16  ;;  %v4381_v4 = vshrl.u32 %v4376_v10, 16  ;;  %v5344_v11 = vshll.u32 %v10912_v17, 16  ;;  %v3168_v35 = vpop.f32.mrf.mxu0  ;;  %v10694_v17 = vld [vmem:[#allocation2 + $0x50] sm:$0xff]  }
 0x37e   : > { %vm4542_vm14 = vcmp.ne.s32.totalorder %v4336_v58, 0  ;;  %vm4578_vm6 = vcmp.lt.s32.totalorder %v4336_v58, 0  ;;  %v4650_v1 = vadd.s32 18, %v4336_v58  ;;  %v4361_v16 = vadd.s32 %v4360_v42, %v4350_v57 }
 0x37f   : > { %vm4614_vm15 = vmand %vm4578_vm6, %vm4542_vm14  ;;  %vm4382_vm13 = vc.u32 %v4374_v27, %v4378_v5  ;;  %v4384_v40 = vadd.s32 %v4378_v5, %v4374_v27  ;;  %v5343_v59 = vrot.slane %v5341_v51, 2  ;;  %v5667_v2 = vrot.slane %v5341_v51, 3  ;;  %v2739_v18 = vpop.f32.mrf.mxu2 }
 0x380   : > { %v4686_v48 = vsel %vm4614_vm15, %v4650_v1, %v4336_v58  ;;  %v4362_v26 = vadd.s32 %v4361_v16, %v4352_v15  ;;  %v4383_v56 = vsel %vm4382_vm13, 1, %v14639_v3  ;;  %v5346_v52 = vrot.slane %v5344_v11, 3 }
 0x381   : > { %vm4722_vm8 = vcmp.lt.s32.totalorder %v4686_v48, 16  ;;  %v4385_v24 = vadd.s32 %v4383_v56, %v4377_v38  ;;  %vm4386_vm3 = vc.u32 %v4384_v40, %v4380_v43  ;;  %v5668_v20 = vrot.slane %v5344_v11, 4 }
 0x382   : > { %v4830_v39 = vsel %vm4722_vm8, %v3425_v21, 0.0  ;;  %v4363_v37 = vshrl.u32 %v4362_v26, 4  ;;  %v4387_v0 = vsel %vm4386_vm3, 1, %v14639_v3  ;;  %v13047_v12 = vadd.s32 256, %v11755_v34 }
 0x383   : > { %v10414_v57 = vpack.c.bf16 %v4830_v39, %v4829_v19  ;;  %v4389_v60 = vadd.s32 %v4387_v0, %v4385_v24  ;;  %v3390_v21 = vadd.f32 %v12857_v7, %v13020_v6  ;;  %v13051_v53 = vor.u32 %v5346_v52, %v5343_v59 }
 0x384   : > { %v4364_v15 = vmul.u32 18, %v4363_v37  ;;  %v13053_v19 = vor.u32 %v5668_v20, %v5667_v2  ;;  %v13057_v42 = vadd.f32 %v12857_v7, %v3279_v28  ;;  %v4400_v47 = vand.u32 65535, %v13047_v12  ;;  %v13081_v2 = vpop.f32.mrf.mxu1 }
 0x385   : > { %10682 = vst [vmem:[#allocation2 + $0x80] sm:$0xff] %v10414_v57   ;;  %v4390_v27 = vadd.s32 %v4389_v60, %v4379_v30  ;;  %v4401_v10 = vshrl.u32 %v13047_v12, 16  ;;  %v5348_v5 = vsel %vm2411_vm4, %v12988_v33, %v13051_v53  ;;  %v2943_v30 = vadd.f32 %v2942_v22, %v2737_v23  ;;  %6232 = vmatmul.bf16.gmra.mxu0 %v10694_v17  ;;  %v13083_v57 = vpop.f32.mrf.mxu0 }
 0x386   : > { %v4365_v58 = vsub.s32 %v13002_v54, %v4364_v15  ;;  %v5670_v6 = vsel %vm5634_vm7, %v12990_v31, %v13053_v19  ;;  %5552 = vmatmul.bf16.gmra.mxu2 %v5348_v5  ;;  %v2945_v28 = vadd.f32 %v2944_v63, %v2739_v18  ;;  %v4403_v1 = vmul.u32 14564, %v4400_v47 }
 0x387   : > { %v4391_v38 = vadd.s32 %v4390_v27, %v4381_v4  ;;  %5824 = vmatmul.bf16.gmra.mxu3 %v5670_v6  ;;  %v4404_v16 = vmul.u32 58254, %v4400_v47  ;;  %v4405_v43 = vmul.u32 14564, %v4401_v10  ;;  %v3426_v4 = vmax.f32 %v3390_v21, 0.0  ;;  %v13089_v15 = vpop.f32.mrf.mxu2  ;;  %v10913_v6 = vld [vmem:[#allocation2 + $0x44] sm:$0xff] }
 0x388   : > { %vm4543_vm9 = vcmp.ne.s32.totalorder %v4365_v58, 0  ;;  %vm4579_vm10 = vcmp.lt.s32.totalorder %v4365_v58, 0  ;;  %v4651_v54 = vadd.s32 18, %v4365_v58  ;;  %v13068_v40 = vadd.s32 264, %v11755_v34 }
 0x389   : > { %vm4615_vm11 = vmand %vm4579_vm10, %vm4543_vm9  ;;  %v4392_v51 = vshrl.u32 %v4391_v38, 4  ;;  %v3427_v31 = vmax.f32 %v13057_v42, 0.0  ;;  %v4406_v22 = vmul.u32 58254, %v4401_v10  ;;  %v4407_v48 = vshll.u32 %v4404_v16, 16 }
 0x38a   : > { %v4687_v33 = vsel %vm4615_vm11, %v4651_v54, %v4365_v58  ;;  %v3208_v56 = vadd.f32 %v13032_v41, %v2943_v30  ;;  %v4409_v59 = vshll.u32 %v4405_v43, 16  ;;  %v13078_v11 = vadd.f32 %v3168_v35, %v2945_v28  ;;  %v13091_v35 = vpop.f32.mrf.mxu3 }
 0x38b   : > { %v4393_v23 = vmul.u32 18, %v4392_v51  ;;  %vm13071_vm12 = vcmp.lt.s32.totalorder %v4687_v33, 16  ;;  %v4408_v37 = vshrl.u32 %v4404_v16, 16  ;;  %vm4411_vm14 = vc.u32 %v4403_v1, %v4407_v48  ;;  %v14726_v16 = vld [vmem:[#allocation18_spill] sm:$0xff] }
 0x38c   : > { %v13076_v24 = vld [vmem:[#allocation2 + $0x7c] sm:$0xff]  ;;  %v4413_v0 = vadd.s32 %v4407_v48, %v4403_v1  ;;  %v4412_v60 = vsel %vm4411_vm14, 1, %v14639_v3  ;;  %v4429_v41 = vand.u32 65535, %v13068_v40  ;;  %v4430_v20 = vshrl.u32 %v13068_v40, 16 }
 0x38d   : > { %v4394_v39 = vsub.s32 %v13014_v9, %v4393_v23  ;;  %v5102_v52 = vrot.slane %v13076_v24, 3  ;;  %v4414_v18 = vadd.s32 %v4412_v60, %v4406_v22  ;;  %v4831_v63 = vsel %vm13071_vm12, %v3426_v4, 0.0 }
 0x38e   : > { %vm4415_vm8 = vc.u32 %v4413_v0, %v4409_v59  ;;  %v4432_v27 = vmul.u32 14564, %v4429_v41  ;;  %v4433_v47 = vmul.u32 58254, %v4429_v41  ;;  %v4434_v10 = vmul.u32 14564, %v4430_v20  ;;  %v13106_v41 = vpop.f32.mrf.mxu1 }
 0x38f   : > { %vm4544_vm6 = vcmp.ne.s32.totalorder %v4394_v39, 0  ;;  %vm4580_vm15 = vcmp.lt.s32.totalorder %v4394_v39, 0  ;;  %v4652_v9 = vadd.s32 18, %v4394_v39  ;;  %v5103_v21 = vsel %vm2973_vm5, %v5100_v50, %v5102_v52 }
 0x390   : > { %vm4616_vm13 = vmand %vm4580_vm15, %vm4544_vm6  ;;  %v4416_v42 = vsel %vm4415_vm8, 1, %v14639_v3  ;;  %5254 = vmatmul.bf16.gmra.mxu1 %v5103_v21  ;;  %v4410_v38 = vshrl.u32 %v4405_v43, 16  ;;  %v5350_v30 = vshrl.u32 %v10913_v6, 16  ;;  %v4435_v28 = vmul.u32 58254, %v4430_v20 }
 0x391   : > { %v4688_v58 = vsel %vm4616_vm13, %v4652_v9, %v4394_v39  ;;  %v4418_v5 = vadd.s32 %v4416_v42, %v4414_v18  ;;  %v4436_v17 = vshll.u32 %v4433_v47, 16  ;;  %v4438_v51 = vshll.u32 %v4434_v10, 16 }
 0x392   : > { %vm4724_vm3 = vcmp.lt.s32.totalorder %v4688_v58, 16  ;;  %v3280_v4 = vadd.f32 %v3208_v56, %v14726_v16  ;;  %v5352_v33 = vrot.slane %v5350_v30, 2  ;;  %v5353_v22 = vshll.u32 %v10913_v6, 16  ;;  %v13108_v56 = vpop.f32.mrf.mxu0  ;;  %v2949_v21 = vpop.f32.mrf.mxu3  ;;  %v14727_v6 = vld [vmem:[#allocation19_spill] sm:$0xff] }
 0x393   : > { %v4832_v54 = vsel %vm4724_vm3, %v3427_v31, 0.0  ;;  %v4419_v50 = vadd.s32 %v4418_v5, %v4408_v37  ;;  %vm4440_vm9 = vc.u32 %v4432_v27, %v4436_v17  ;;  %v4442_v23 = vadd.s32 %v4436_v17, %v4432_v27  ;;  %v10695_v27 = vld [vmem:[#allocation2 + $0x58] sm:$0xff]  }
 0x394   : > { %v10419_v1 = vpack.c.bf16 %v4832_v54, %v4831_v63  ;;  %v5671_v48 = vrot.slane %v5350_v30, 3  ;;  %v4437_v59 = vshrl.u32 %v4433_v47, 16  ;;  %v4441_v43 = vsel %vm4440_vm9, 1, %v14639_v3  ;;  %v2744_v63 = vpop.f32.mrf.mxu2 }
 0x395   : > { %v4420_v26 = vadd.s32 %v4419_v50, %v4410_v38  ;;  %v13104_v39 = vadd.s32 272, %v11755_v34  ;;  %v4443_v31 = vadd.s32 %v4441_v43, %v4435_v28  ;;  %vm4444_vm10 = vc.u32 %v4442_v23, %v4438_v51  ;;  %6237 = vmatmul.bf16.gmra.mxu0 %v10695_v27  ;;  %v10254_v27 = vld [vmem:[%s14573_s3 + $0xc0] sm:$0xff] }
 0x396   : > { %10683 = vst [vmem:[#allocation2 + $0x88] sm:$0xff] %v10419_v1   ;;  %v5355_v0 = vrot.slane %v5353_v22, 3  ;;  %v5672_v60 = vrot.slane %v5353_v22, 4  ;;  %v4439_v20 = vshrl.u32 %v4434_v10, 16  ;;  %v4445_v9 = vsel %vm4444_vm10, 1, %v14639_v3  ;;  %6547 = vmatpush.bf16.msrb.mxu1 %v10254_v27 }
 0x397   : > { %v4421_v37 = vshrl.u32 %v4420_v26, 4  ;;  %v4458_v18 = vand.u32 65535, %v13104_v39  ;;  %v4447_v58 = vadd.s32 %v4445_v9, %v4443_v31  ;;  %v4459_v38 = vshrl.u32 %v13104_v39, 16  ;;  %v13146_v9 = vpop.f32.mrf.mxu1 }
 0x398   : > { %v13112_v42 = vor.u32 %v5355_v0, %v5352_v33  ;;  %v13114_v47 = vor.u32 %v5672_v60, %v5671_v48  ;;  %v3281_v30 = vadd.f32 %v13078_v11, %v14727_v6  ;;  %v13126_v16 = vadd.f32 %v12857_v7, %v3280_v4 }
 0x399   : > { %v4422_v5 = vmul.u32 18, %v4421_v37  ;;  %v4461_v10 = vmul.u32 14564, %v4458_v18  ;;  %v4462_v54 = vmul.u32 58254, %v4458_v18  ;;  %v4448_v28 = vadd.s32 %v4447_v58, %v4437_v59 }
 0x39a   : > { %v5357_v17 = vsel %vm2411_vm4, %v13051_v53, %v13112_v42  ;;  %v5674_v51 = vsel %vm5634_vm7, %v13053_v19, %v13114_v47  ;;  %v4463_v1 = vmul.u32 14564, %v4459_v38  ;;  %v4464_v23 = vmul.u32 58254, %v4459_v38  ;;  %v13148_v18 = vpop.f32.mrf.mxu0 }
 0x39b   : > { %v4423_v50 = vsub.s32 %v13047_v12, %v4422_v5  ;;  %5557 = vmatmul.bf16.gmra.mxu2 %v5357_v17  ;;  %5829 = vmatmul.bf16.gmra.mxu3 %v5674_v51  ;;  %v4465_v11 = vshll.u32 %v4462_v54, 16  ;;  %v4449_v33 = vadd.s32 %v4448_v28, %v4439_v20  ;;  %v13132_v26 = vadd.f32 %v12857_v7, %v3281_v30  ;;  %v5795_v30 = vpop.f32.mrf.mxu3 }
 0x39c   : > { %v4467_v22 = vshll.u32 %v4463_v1, 16  ;;  %v14589_v43 = vmax.f32 %v13126_v16, 0.0  ;;  %v4466_v31 = vshrl.u32 %v4462_v54, 16  ;;  %v13142_v60 = vadd.s32 280, %v11755_v34  ;;  %v5523_v6 = vpop.f32.mrf.mxu2 }
 0x39d   : > { %v13129_v48 = vld [vmem:[#allocation2 + $0x84] sm:$0xff]  ;;  %vm4545_vm11 = vcmp.ne.s32.totalorder %v4423_v50, 0  ;;  %vm4581_vm12 = vcmp.lt.s32.totalorder %v4423_v50, 0  ;;  %v4653_v53 = vadd.s32 18, %v4423_v50  ;;  %v4450_v4 = vshrl.u32 %v4449_v33, 4 }
 0x39e   : > { %vm13134_vm14 = vmand %vm4581_vm12, %vm4545_vm11  ;;  %vm4469_vm6 = vc.u32 %v4461_v10, %v4465_v11  ;;  %v4471_v12 = vadd.s32 %v4465_v11, %v4461_v10  ;;  %v5104_v59 = vrot.slane %v13129_v48, 3  ;;  %v14586_v58 = vmax.f32 %v13132_v26, 0.0  ;;  %v10914_v11 = vld [vmem:[#allocation2 + $0x4c] sm:$0xff] }
 0x39f   : > { %v4470_v0 = vsel %vm4469_vm6, 1, %v14639_v3  ;;  %v4689_v7 = vsel %vm13134_vm14, %v4653_v53, %v4423_v50  ;;  %v4451_v37 = vmul.u32 18, %v4450_v4  ;;  %v4468_v38 = vshrl.u32 %v4463_v1, 16 }
 0x3a0   : > { %v4472_v20 = vadd.s32 %v4470_v0, %v4464_v23  ;;  %vm4473_vm15 = vc.u32 %v4471_v12, %v4467_v22  ;;  %v5105_v5 = vsel %vm2973_vm5, %v5102_v52, %v5104_v59  ;;  %v4487_v28 = vand.u32 65535, %v13142_v60 }
 0x3a1   : > { %v4474_v34 = vsel %vm4473_vm15, 1, %v14639_v3  ;;  %v4452_v10 = vsub.s32 %v13068_v40, %v4451_v37  ;;  %5259 = vmatmul.bf16.gmra.mxu1 %v5105_v5  ;;  %v4488_v17 = vshrl.u32 %v13142_v60, 16  ;;  %vm13163_vm13 = vcmp.lt.s32.totalorder %v4689_v7, 16  ;;  %v10295_v7 = vld [vmem:[%s14573_s3 + $0x178] sm:$0xff] }
 0x3a2   : > { %v4476_v54 = vadd.s32 %v4474_v34, %v4472_v20  ;;  %v2948_v1 = vadd.f32 %v13091_v35, %v13089_v15  ;;  %v2950_v50 = vadd.f32 %v2949_v21, %v2744_v63  ;;  %v5359_v52 = vshrl.u32 %v10914_v11, 16  ;;  %v10328_v37 = vld [vmem:[%s14573_s3 + $0x1f8] sm:$0xff]  ;;  %v10696_v20 = vld [vmem:[#allocation2 + $0x60] sm:$0xff]   ;;  %7000 = vmatpush.bf16.msra.mxu2 %v10295_v7 }
 0x3a3   : > { %vm4546_vm8 = vcmp.ne.s32.totalorder %v4452_v10, 0  ;;  %vm4582_vm3 = vcmp.lt.s32.totalorder %v4452_v10, 0  ;;  %v4654_v40 = vadd.s32 18, %v4452_v10  ;;  %v4490_v23 = vmul.u32 14564, %v4487_v28  ;;  %7511 = vmatpush.bf16.msra.mxu3 %v10328_v37 }
 0x3a4   : > { %v4477_v33 = vadd.s32 %v4476_v54, %v4466_v31  ;;  %vm4618_vm9 = vmand %vm4582_vm3, %vm4546_vm8  ;;  %v4491_v22 = vmul.u32 58254, %v4487_v28  ;;  %v4492_v53 = vmul.u32 14564, %v4488_v17  ;;  %v5362_v19 = vshll.u32 %v10914_v11, 16  ;;  %v13194_v11 = vpop.f32.mrf.mxu3 }
 0x3a5   : > { %v4833_v4 = vsel %vm13163_vm13, %v14589_v43, 0.0  ;;  %v4690_v12 = vsel %vm4618_vm9, %v4654_v40, %v4452_v10  ;;  %v4493_v35 = vmul.u32 58254, %v4488_v17  ;;  %v5361_v0 = vrot.slane %v5359_v52, 2  ;;  %v13188_v10 = vpop.f32.mrf.mxu1  ;;  %6242 = vmatmul.bf16.gmra.mxu0 %v10696_v20  ;;  %v13192_v17 = vpop.f32.mrf.mxu2  ;;  %v10831_v43 = vld [vmem:[#allocation2 + $0x14] sm:$0xff]  }
 0x3a6   : > { %v4478_v15 = vadd.s32 %v4477_v33, %v4468_v38  ;;  %vm13173_vm10 = vcmp.lt.s32.totalorder %v4690_v12, 16  ;;  %v4494_v21 = vshll.u32 %v4491_v22, 16  ;;  %v5524_v31 = vadd.f32 %v5523_v6, %v12721_v8  ;;  %v13190_v8 = vpop.f32.mrf.mxu0 }
 0x3a7   : > { %v4834_v27 = vsel %vm13173_vm10, %v14586_v58, 0.0  ;;  %v4495_v34 = vshrl.u32 %v4491_v22, 16  ;;  %v4496_v5 = vshll.u32 %v4492_v53, 16  ;;  %v5364_v28 = vrot.slane %v5362_v19, 3 }
 0x3a8   : > { %v4479_v38 = vshrl.u32 %v4478_v15, 4  ;;  %v10424_v6 = vpack.c.bf16 %v4834_v27, %v4833_v4  ;;  %vm4498_vm11 = vc.u32 %v4490_v23, %v4494_v21  ;;  %v4500_v54 = vadd.s32 %v4494_v21, %v4490_v23 }
 0x3a9   : > { %v4499_v33 = vsel %vm4498_vm11, 1, %v14639_v3  ;;  %v5675_v22 = vrot.slane %v5359_v52, 3  ;;  %v5676_v12 = vrot.slane %v5362_v19, 4  ;;  %v13197_v58 = vor.u32 %v5364_v28, %v5361_v0 }
 0x3aa   : > { %v4480_v40 = vmul.u32 18, %v4479_v38  ;;  %10684 = vst [vmem:[#allocation2 + $0x90] sm:$0xff] %v10424_v6   ;;  %v4501_v15 = vadd.s32 %v4499_v33, %v4493_v35  ;;  %vm4502_vm12 = vc.u32 %v4500_v54, %v4496_v5  ;;  %v13199_v4 = vadd.f32 %v5795_v30, %v5524_v31 }
 0x3ab   : > { %v3210_v23 = vadd.f32 %v13083_v57, %v2948_v1  ;;  %v3211_v21 = vadd.f32 %v13108_v56, %v2950_v50  ;;  %v4503_v20 = vsel %vm4502_vm12, 1, %v14639_v3  ;;  %v13204_v7 = vor.u32 %v5676_v12, %v5675_v22  ;;  %v10320_v3 = vld [vmem:[%s14573_s3 + $0x1b8] sm:$0xff]  ;;  %v14734_v56 = vld [vmem:[#allocation20_spill] sm:$0xff] }
 0x3ac   : > { %v4481_v37 = vsub.s32 %v13104_v39, %v4480_v40  ;;  %v4497_v27 = vshrl.u32 %v4492_v53, 16  ;;  %v4505_v52 = vadd.s32 %v4503_v20, %v4501_v15  ;;  %v5366_v19 = vsel %vm2411_vm4, %v13112_v42, %v13197_v58  ;;  %v14735_v39 = vld [vmem:[#allocation21_spill] sm:$0xff]  ;;  %7827 = vmatpush.bf16.msra.mxu0 %v10320_v3  ;;  %v10916_v40 = vld [vmem:[%s14572_s2] ss:$0 sm:$0xff] }
 0x3ad   : > { %5562 = vmatmul.bf16.gmra.mxu2 %v5366_v19  ;;  %v5678_v30 = vsel %vm5634_vm7, %v13114_v47, %v13204_v7  ;;  %v3282_v1 = vadd.f32 %v3210_v23, %v14734_v56  ;;  %v3283_v50 = vadd.f32 %v3211_v21, %v14735_v39  ;;  %v13218_v53 = vpop.f32.mrf.mxu1  ;;  %v10915_v42 = vld [vmem:[#allocation2 + $0x54] sm:$0xff]  ;;  %v5528_v38 = vpop.f32.mrf.mxu2  ;;  %v14591_v44 = vshrl.u32 %v13321_v61, 16 }
 0x3ae   : > { %v4506_v57 = vadd.s32 %v4505_v52, %v4495_v34  ;;  %5834 = vmatmul.bf16.gmra.mxu3 %v5678_v30  ;;  %v13220_v35 = vpop.f32.mrf.mxu0  ;;  %v5368_v0 = vshrl.u32 %v10915_v42, 16  ;;  %vm4547_vm14 = vcmp.ne.s32.totalorder %v4481_v37, 0  ;;  %vm4583_vm6 = vcmp.lt.s32.totalorder %v4481_v37, 0  ;;  %v5800_v34 = vpop.f32.mrf.mxu3  ;;  %v10336_v56 = vld [vmem:[%s14573_s3 + $0x238] sm:$0xff] }
 0x3af   : > { %14736 = vst [vmem:[#allocation8_spill] sm:$0xff] %v13220_v35  ;;  %v5371_v47 = vshll.u32 %v10915_v42, 16  ;;  %v5529_v6 = vadd.f32 %v5528_v38, %v12779_v46  ;;  %v4655_v54 = vadd.s32 18, %v4481_v37  ;;  %v13228_v33 = vadd.f32 %v10916_v40, %v3282_v1  ;;  %vm13230_vm15 = vmand %vm4583_vm6, %vm4547_vm14  ;;  %8098 = vmatpush.bf16.msra.mxu1 %v10336_v56  ;;  %v13287_v56 = vld [vmem:[#allocation2 + $0x20] sm:$0xff] }
 0x3b0   : > { %v4507_v31 = vadd.s32 %v4506_v57, %v4497_v27  ;;  %v13234_v12 = vadd.f32 %v10916_v40, %v3283_v50  ;;  %v5370_v46 = vrot.slane %v5368_v0, 2  ;;  %v5679_v52 = vrot.slane %v5368_v0, 3  ;;  %vm10922_vm14 = vmpackc.low %vm13173_vm10, %vm13163_vm13 }
 0x3b1   : > { %v13222_v5 = vld [vmem:[#allocation2 + $0x8c] sm:$0xff]  ;;  %v13237_v23 = vadd.f32 %v5800_v34, %v5529_v6  ;;  %v5373_v20 = vrot.slane %v5371_v47, 3  ;;  %v5680_v19 = vrot.slane %v5371_v47, 4  ;;  %v4691_v30 = vsel %vm13230_vm15, %v4655_v54, %v4481_v37  ;;  %v4945_v3 = vld [vmem:[#allocation2 + $0x94] sm:$0x7]  ;;  %v10793_v6 = vld [vmem:[#allocation2 + $0x18] sm:$0xff]  }
 0x3b2   : > { %v4508_v28 = vshrl.u32 %v4507_v31, 4  ;;  %v5106_v15 = vrot.slane %v13222_v5, 3  ;;  %v14588_v1 = vmax.f32 %v13228_v33, 0.0  ;;  %v14587_v39 = vmax.f32 %v13234_v12, 0.0 }
 0x3b3   : > { %14739 = vst [vmem:[#allocation9_spill] sm:$0xff] %v13237_v23  ;;  %v13254_v37 = vor.u32 %v5373_v20, %v5370_v46  ;;  %vm13260_vm9 = vcmp.lt.s32.totalorder %v4691_v30, 16  ;;  %v5681_v47 = vor.u32 %v5680_v19, %v5679_v52  ;;  %v5053_v38 = vunpack.c.l.b16 %v4945_v3  ;;  %v10697_v20 = vld [vmem:[#allocation2 + $0x68] sm:$0xff]   ;;  %v10917_v19 = vld [vmem:[#allocation2 + $0x5c] sm:$0xff] }
 0x3b4   : > { %v4509_v21 = vmul.u32 18, %v4508_v28  ;;  %v5107_v27 = vsel %vm2973_vm5, %v5104_v59, %v5106_v15  ;;  %v4835_v54 = vsel %vm13260_vm9, %v14588_v1, 0.0  ;;  %v5377_v30 = vshrl.u32 %v10917_v19, 16 }
 0x3b5   : > { %5264 = vmatmul.bf16.gmra.mxu1 %v5107_v27  ;;  %v13250_v50 = vpop.f32.mrf.mxu1  ;;  %v5375_v40 = vsel %vm2411_vm4, %v13197_v58, %v13254_v37  ;;  %v13281_v46 = vpack.c.b16 %v5053_v38, %v5053_v38  ;;  %6247 = vmatmul.bf16.gmra.mxu0 %v10697_v20  ;;  %v10863_v38 = vld [vmem:[#allocation2 + $0x18] sm:$0xf0]  ;;  %v5434_v31 = vshll.u32 %v13222_v5, 16 }
 0x3b6   : > { %v4510_v57 = vsub.s32 %v13142_v60, %v4509_v21  ;;  %v13252_v59 = vpop.f32.mrf.mxu0  ;;  %v13256_v60 = vpop.f32.mrf.mxu2  ;;  %v5682_v21 = vsel %vm5634_vm7, %v13204_v7, %v5681_v47 }
 0x3b7   : > { %14740 = vst [vmem:[#allocation10_spill] sm:$0xff] %v13252_v59  ;;  %v13258_v0 = vpop.f32.mrf.mxu3 }
 0x3b8   : > { %vm4548_vm8 = vcmp.ne.s32.totalorder %v4510_v57, 0  ;;  %vm4584_vm3 = vcmp.lt.s32.totalorder %v4510_v57, 0  ;;  %v4656_v42 = vadd.s32 18, %v4510_v57  ;;  %14741 = vst [vmem:[#allocation11_spill] sm:$0xff] %v13256_v60 }
 0x3b9   : > { %14742 = vst [vmem:[#allocation12_spill] sm:$0xff] %v13258_v0  ;;  %vm4620_vm11 = vmand %vm4584_vm3, %vm4548_vm8  ;;  %v10698_v0 = vld [vmem:[#allocation2 + $0x70] sm:$0xff]  }
 0x3ba   : > { %v4692_v34 = vsel %vm4620_vm11, %v4656_v42, %v4510_v57  ;;  %v5380_v57 = vshll.u32 %v10917_v19, 16  ;;  %v5108_v42 = vrot.slane %v13281_v46, 3 }
 0x3bb   : > { %vm13264_vm12 = vcmp.lt.s32.totalorder %v4692_v34, 16  ;;  %v10864_v34 = vld [vmem:[#allocation2 + $0x18] sm:$0xe] }
 0x3bc   : > { %v4836_v28 = vsel %vm13264_vm12, %v14587_v39, 0.0  ;;  %v5109_v19 = vsel %vm2973_vm5, %v5106_v15, %v5108_v42  ;;  %v5683_v39 = vrot.slane %v5377_v30, 3  ;;  %v5684_v1 = vrot.slane %v5380_v57, 4  ;;  %vm10925_vm13 = vmpackc.low %vm13264_vm12, %vm13260_vm9 }
 0x3bd   : > { %v10429_v22 = vpack.c.bf16 %v4836_v28, %v4835_v54  ;;  %5567 = vmatmul.bf16.gmra.mxu2 %v5375_v40  ;;  %v13283_v27 = vpop.f32.mrf.mxu1  ;;  %v10706_v28 = vld [vmem:[#allocation2 + $0xc] sm:$0x8]  ;;  %v5379_v40 = vrot.slane %v5377_v30, 2  ;;  %v13295_v25 = vor.u32 %v10864_v34, %v10863_v38  ;;  %v14752_v15 = vshrl.u32 %v13287_v56, 16 }
 0x3be   : > { %5839 = vmatmul.bf16.gmra.mxu3 %v5682_v21  ;;  %v13285_v52 = vpop.f32.mrf.mxu0  ;;  %v5533_v3 = vpop.f32.mrf.mxu2  ;;  %v10829_v21 = vld [vmem:[#allocation2 + $0xc] sm:$0xf0]   ;;  %v6313_v42 = vshrl.u32 %v10831_v43, 16  ;;  %v6316_v38 = vshll.u32 %v10831_v43, 16 }
 0x3bf   : > { %10685 = vst [vmem:[#allocation2 + $0x98] sm:$0xff] %v10429_v22   ;;  %v5805_v58 = vpop.f32.mrf.mxu3  ;;  %v5534_v7 = vadd.f32 %v5533_v3, %v12832_v29  ;;  %v5382_v22 = vrot.slane %v5380_v57, 3  ;;  %v14590_v29 = vshll.u32 %v13287_v56, 16  ;;  %v7955_v30 = vrot.slane %v14752_v15, 1 }
 0x3c0   : > { %14747 = vst [vmem:[#allocation13_spill] sm:$0xff] %v13285_v52  ;;  %v13310_v57 = vor.u32 %v5684_v1, %v5683_v39  ;;  %v7948_v34 = vshrl.u32 %v13295_v25, 16  ;;  %v6315_v1 = vrot.slane %v6313_v42, 3  ;;  %v6318_v39 = vrot.slane %v6316_v38, 4  ;;  %v10918_v38 = vld [vmem:[#allocation2 + $0x64] sm:$0xff] }
 0x3c1   : > { %v13291_v54 = vadd.f32 %v5805_v58, %v5534_v7  ;;  %v10707_v7 = vor.u32 %v10829_v21, %v10706_v28  ;;  %v13302_v14 = vor.u32 %v5382_v22, %v5379_v40  ;;  %v7956_v28 = vrot.slane %v14590_v29, 2 }
 0x3c2   : > { %v7950_v21 = vrot.slane %v7948_v34, 1  ;;  %v5686_v43 = vsel %vm5634_vm7, %v5681_v47, %v13310_v57  ;;  %v14592_v42 = vshll.u32 %v13321_v61, 16 }
 0x3c3   : > { %14748 = vst [vmem:[#allocation14_spill] sm:$0xff] %v13291_v54  ;;  %v6305_v40 = vshrl.u32 %v10707_v7, 16  ;;  %v6308_v22 = vshll.u32 %v10707_v7, 16  ;;  %v7957_v15 = vor.u32 %v7956_v28, %v7955_v30  ;;  %v10294_v7 = vld [vmem:[%s14573_s3 + $0x170] sm:$0xff]  ;;  %v5386_v28 = vshrl.u32 %v10918_v38, 16 }
 0x3c4   : > { %7001 = vmatpush.bf16.msra.mxu2 %v10294_v7 }
 0x3c5   : > { %5269 = vmatmul.bf16.gmra.mxu1 %v5109_v19  ;;  %v13298_v3 = vpop.f32.mrf.mxu1  ;;  %v7951_v19 = vshll.u32 %v13295_v25, 16  ;;  %v6307_v30 = vrot.slane %v6305_v40, 3  ;;  %6252 = vmatmul.bf16.gmra.mxu0 %v10698_v0  ;;  %v6319_v40 = vor.u32 %v6318_v39, %v6315_v1  ;;  %v7959_v0 = vrot.slane %v14591_v44, 1  ;;  %v13367_v44 = vld [vmem:[#allocation2 + $0x30] sm:$0xff] }
 0x3c6   : > { %v13300_v58 = vpop.f32.mrf.mxu0  ;;  %v13304_v45 = vpop.f32.mrf.mxu2  ;;  %v5687_v52 = vrot.slane %v5386_v28, 3 }
 0x3c7   : > { %14749 = vst [vmem:[#allocation15_spill] sm:$0xff] %v13300_v58  ;;  %v13306_v20 = vpop.f32.mrf.mxu3  ;;  %v5388_v58 = vrot.slane %v5386_v28, 2 }
 0x3c8   : > { %14750 = vst [vmem:[#allocation16_spill] sm:$0xff] %v13304_v45  ;;  %v7953_v45 = vrot.slane %v7951_v19, 2 }
 0x3c9   : > { %14751 = vst [vmem:[#allocation17_spill] sm:$0xff] %v13306_v20  ;;  %v5384_v20 = vsel %vm2411_vm4, %v13254_v37, %v13302_v14  ;;  %v10327_v37 = vld [vmem:[%s14573_s3 + $0x1f0] sm:$0xff] }
 0x3ca   : > { %v7954_v34 = vor.u32 %v7953_v45, %v7950_v21  ;;  %7512 = vmatpush.bf16.msra.mxu3 %v10327_v37  ;;  %v7960_v21 = vrot.slane %v14592_v42, 2 }
 0x3cc   : > { %v13336_v45 = vsel %vm1337_vm2, %v7954_v34, %v7957_v15  ;;  %v7961_v37 = vor.u32 %v7960_v21, %v7959_v0 }
 0x3cd   : > { %5572 = vmatmul.bf16.gmra.mxu2 %v5384_v20  ;;  %v6310_v20 = vrot.slane %v6308_v22, 4  ;;  %v13329_v19 = vpop.f32.mrf.mxu1  ;;  %14754 = vst [vmem:[#allocation19_spill] sm:$0xff] %v13336_v45  ;;  %v10833_v45 = vld [vmem:[#allocation2 + $0x1c] sm:$0xff]  }
 0x3ce   : > { %5844 = vmatmul.bf16.gmra.mxu3 %v5686_v43  ;;  %v13331_v47 = vpop.f32.mrf.mxu0  ;;  %v5389_v43 = vshll.u32 %v10918_v38, 16  ;;  %v5538_v29 = vpop.f32.mrf.mxu2  ;;  %v13357_v39 = vsel %vm1337_vm2, %v7957_v15, %v7961_v37  ;;  %v6322_v28 = vshrl.u32 %v10833_v45, 16 }
 0x3cf   : > { %14753 = vst [vmem:[#allocation18_spill] sm:$0xff] %v13331_v47  ;;  %v5810_v60 = vpop.f32.mrf.mxu3  ;;  %v5539_v22 = vadd.f32 %v5538_v29, %v12885_v13  ;;  %v6311_v47 = vor.u32 %v6310_v20, %v6307_v30  ;;  %v10319_v13 = vld [vmem:[%s14573_s3 + $0x1b0] sm:$0xff] }
 0x3d0   : > { %v5391_v7 = vrot.slane %v5389_v43, 3  ;;  %v5688_v34 = vrot.slane %v5389_v43, 4  ;;  %v10335_v29 = vld [vmem:[%s14573_s3 + $0x230] sm:$0xff]  ;;  %14757 = vst [vmem:[#allocation23_spill] sm:$0xff] %v13357_v39  ;;  %7828 = vmatpush.bf16.msra.mxu0 %v10319_v13  ;;  %v6325_v43 = vshll.u32 %v10833_v45, 16  ;;  %v6324_v21 = vrot.slane %v6322_v28, 3 }
 0x3d1   : > { %v13343_v38 = vadd.f32 %v5810_v60, %v5539_v22  ;;  %v6320_v54 = vsel %vm5634_vm7, %v6311_v47, %v6319_v40  ;;  %8099 = vmatpush.bf16.msra.mxu1 %v10335_v29  ;;  %v10919_v45 = vld [vmem:[#allocation2 + $0x6c] sm:$0xff] }
 0x3d2   : > { %v5392_v30 = vor.u32 %v5391_v7, %v5388_v58  ;;  %v6327_v15 = vrot.slane %v6325_v43, 4  ;;  %v10699_v58 = vld [vmem:[#allocation2 + $0x78] sm:$0xff]  }
 0x3d3   : > { %14755 = vst [vmem:[#allocation20_spill] sm:$0xff] %v13343_v38  ;;  %v10835_v38 = vld [vmem:[#allocation2 + $0x24] sm:$0xff]  }
 0x3d4   : > { %v5393_v22 = vsel %vm2411_vm4, %v13302_v14, %v5392_v30  ;;  %v5398_v14 = vshll.u32 %v10919_v45, 16  ;;  %v6328_v28 = vor.u32 %v6327_v15, %v6324_v21 }
 0x3d5   : > { %6548 = vmatmul.bf16.vlgmr.msrb.gmra.mxu1 %v6320_v54  ;;  %v13352_v1 = vpop.f32.mrf.mxu1  ;;  %v5689_v54 = vor.u32 %v5688_v34, %v5687_v52  ;;  %6257 = vmatmul.bf16.gmra.mxu0 %v10699_v58  ;;  %v14594_v52 = vshll.u32 %v13367_v44, 16  ;;  %v5395_v34 = vshrl.u32 %v10919_v45, 16 }
 0x3d6   : > { %v13354_v60 = vpop.f32.mrf.mxu0  ;;  %v13359_v20 = vpop.f32.mrf.mxu2  ;;  %v6329_v45 = vsel %vm5634_vm7, %v6319_v40, %v6328_v28  ;;  %v5692_v39 = vrot.slane %v5398_v14, 4 }
 0x3d7   : > { %14756 = vst [vmem:[#allocation21_spill] sm:$0xff] %v13354_v60  ;;  %v13361_v47 = vpop.f32.mrf.mxu3  ;;  %v5690_v0 = vsel %vm5634_vm7, %v13310_v57, %v5689_v54  ;;  %v14593_v57 = vshrl.u32 %v13367_v44, 16  ;;  %v7964_v42 = vrot.slane %v14594_v52, 2  ;;  %v5397_v58 = vrot.slane %v5395_v34, 2 }
 0x3d8   : > { %14758 = vst [vmem:[#allocation24_spill] sm:$0xff] %v13359_v20  ;;  %v5400_v20 = vrot.slane %v5398_v14, 3  ;;  %v5691_v60 = vrot.slane %v5395_v34, 3  ;;  %v6334_v52 = vshll.u32 %v10835_v38, 16 }
 0x3d9   : > { %14759 = vst [vmem:[#allocation25_spill] sm:$0xff] %v13361_v47 }
 0x3dd   : > { %5577 = vmatmul.bf16.gmra.mxu2 %v5393_v22  ;;  %v13369_v7 = vpop.f32.mrf.mxu1 }
 0x3de   : > { %5849 = vmatmul.bf16.gmra.mxu3 %v5690_v0  ;;  %v13371_v13 = vpop.f32.mrf.mxu0  ;;  %v7963_v0 = vrot.slane %v14593_v57, 1 }
 0x3df   : > { %14760 = vst [vmem:[#allocation26_spill] sm:$0xff] %v13371_v13 }
 0x3e0   : > { %v7965_v13 = vor.u32 %v7964_v42, %v7963_v0  ;;  %v6336_v0 = vrot.slane %v6334_v52, 4 }
 0x3e1   : > { %v5543_v29 = vpop.f32.mrf.mxu2  ;;  %v5815_v22 = vpop.f32.mrf.mxu3 }
 0x3e2   : > { %v5544_v43 = vadd.f32 %v5543_v29, %v12936_v55  ;;  %v13388_v15 = vsel %vm1337_vm2, %v7961_v37, %v7965_v13  ;;  %v5401_v29 = vor.u32 %v5400_v20, %v5397_v58  ;;  %v10700_v37 = vld [vmem:[#allocation2 + $0x80] sm:$0xff]  }
 0x3e3   : > { %14763 = vst [vmem:[#allocation29_spill] sm:$0xff] %v13388_v15 }
 0x3e4   : > { %v13380_v47 = vadd.f32 %v5815_v22, %v5544_v43  ;;  %v5693_v22 = vor.u32 %v5692_v39, %v5691_v60  ;;  %v6331_v43 = vshrl.u32 %v10835_v38, 16  ;;  %v5402_v40 = vsel %vm2411_vm4, %v5392_v30, %v5401_v29 }
 0x3e5   : > { %6553 = vmatmul.bf16.gmra.mxu1 %v6329_v45  ;;  %v13383_v21 = vpop.f32.mrf.mxu1  ;;  %v13396_v45 = vld [vmem:[#allocation2 + $0x38] sm:$0xff]  ;;  %6262 = vmatmul.bf16.gmra.mxu0 %v10700_v37  ;;  %v5404_v60 = vshrl.u32 %v13022_v62, 16  ;;  %v5407_v39 = vshll.u32 %v13022_v62, 16 }
 0x3e6   : > { %14761 = vst [vmem:[#allocation27_spill] sm:$0xff] %v13380_v47  ;;  %v13385_v55 = vpop.f32.mrf.mxu0  ;;  %v5694_v34 = vsel %vm5634_vm7, %v5689_v54, %v5693_v22  ;;  %v6333_v14 = vrot.slane %v6331_v43, 3  ;;  %v14596_v38 = vshll.u32 %v13396_v45, 16  ;;  %v14595_v30 = vshrl.u32 %v13396_v45, 16 }
 0x3e7   : > { %14762 = vst [vmem:[#allocation28_spill] sm:$0xff] %v13385_v55  ;;  %v5406_v37 = vrot.slane %v5404_v60, 2  ;;  %v5695_v15 = vrot.slane %v5404_v60, 3  ;;  %v5696_v47 = vrot.slane %v5407_v39, 4  ;;  %v10334_v60 = vld [vmem:[%s14573_s3 + $0x228] sm:$0xff] }
 0x3e8   : > { %v6337_v54 = vor.u32 %v6336_v0, %v6333_v14  ;;  %v7967_v43 = vrot.slane %v14595_v30, 1  ;;  %v10837_v14 = vld [vmem:[#allocation2 + $0x2c] sm:$0xff]   ;;  %8100 = vmatpush.bf16.msra.mxu1 %v10334_v60 }
 0x3e9   : > { %v13390_v57 = vpop.f32.mrf.mxu2  ;;  %v13392_v42 = vpop.f32.mrf.mxu3  ;;  %v10326_v0 = vld [vmem:[%s14573_s3 + $0x1e8] sm:$0xff] }
 0x3ea   : > { %14764 = vst [vmem:[#allocation30_spill] sm:$0xff] %v13390_v57  ;;  %v6338_v62 = vsel %vm5634_vm7, %v6328_v28, %v6337_v54  ;;  %7513 = vmatpush.bf16.msra.mxu3 %v10326_v0 }
 0x3eb   : > { %14765 = vst [vmem:[#allocation31_spill] sm:$0xff] %v13392_v42  ;;  %v5409_v42 = vrot.slane %v5407_v39, 3 }
 0x3ed   : > { %5582 = vmatmul.bf16.gmra.mxu2 %v5402_v40  ;;  %v13398_v55 = vpop.f32.mrf.mxu1  ;;  %v7968_v40 = vrot.slane %v14596_v38, 2  ;;  %v5410_v39 = vor.u32 %v5409_v42, %v5406_v37  ;;  %v10701_v37 = vld [vmem:[#allocation2 + $0x88] sm:$0xff]  }
 0x3ee   : > { %5854 = vmatmul.bf16.gmra.mxu3 %v5694_v34  ;;  %v13400_v20 = vpop.f32.mrf.mxu0 }
 0x3ef   : > { %14766 = vst [vmem:[#allocation32_spill] sm:$0xff] %v13400_v20  ;;  %v7969_v20 = vor.u32 %v7968_v40, %v7967_v43  ;;  %v5697_v40 = vor.u32 %v5696_v47, %v5695_v15  ;;  %v5411_v30 = vsel %vm2411_vm4, %v5401_v29, %v5410_v39  ;;  %v5413_v29 = vshrl.u32 %v13076_v24, 16 }
 0x3f2   : > { %v5548_v58 = vpop.f32.mrf.mxu2 }
 0x3f3   : > { %v5549_v52 = vadd.f32 %v5548_v58, %v12996_v49  ;;  %v10293_v49 = vld [vmem:[%s14573_s3 + $0x168] sm:$0xff] }
 0x3f4   : > { %v5820_v34 = vpop.f32.mrf.mxu3  ;;  %v10318_v58 = vld [vmem:[%s14573_s3 + $0x1a8] sm:$0xff]  ;;  %7002 = vmatpush.bf16.msra.mxu2 %v10293_v49 }
 0x3f5   : > { %v13411_v57 = vadd.f32 %v5820_v34, %v5549_v52  ;;  %6558 = vmatmul.bf16.gmra.mxu1 %v6338_v62  ;;  %v13424_v52 = vsel %vm1337_vm2, %v7965_v13, %v7969_v20  ;;  %v6340_v34 = vshrl.u32 %v10837_v14, 16  ;;  %v6343_v62 = vshll.u32 %v10837_v14, 16  ;;  %7829 = vmatpush.bf16.msra.mxu0 %v10318_v58 }
 0x3f6   : > { %14768 = vst [vmem:[#allocation34_spill] sm:$0xff] %v13424_v52  ;;  %v13426_v28 = vpop.f32.mrf.mxu0  ;;  %v5698_v13 = vsel %vm5634_vm7, %v5693_v22, %v5697_v40  ;;  %v13435_v52 = vld [vmem:[#allocation2 + $0x40] sm:$0xff]  ;;  %6267 = vmatmul.bf16.gmra.mxu0 %v10701_v37 }
 0x3f7   : > { %14767 = vst [vmem:[#allocation33_spill] sm:$0xff] %v13411_v57  ;;  %v6342_v38 = vrot.slane %v6340_v34, 3  ;;  %v14598_v15 = vshll.u32 %v13435_v52, 16  ;;  %v14597_v22 = vshrl.u32 %v13435_v52, 16  ;;  %v5415_v34 = vrot.slane %v5413_v29, 2 }
 0x3f8   : > { %14769 = vst [vmem:[#allocation35_spill] sm:$0xff] %v13426_v28  ;;  %v13431_v43 = vpop.f32.mrf.mxu1  ;;  %v6345_v28 = vrot.slane %v6343_v62, 4 }
 0x3f9   : > { %v7971_v58 = vrot.slane %v14597_v22, 1  ;;  %v7972_v60 = vrot.slane %v14598_v15, 2 }
 0x3fa   : > { %v13437_v42 = vpop.f32.mrf.mxu2  ;;  %v6346_v14 = vor.u32 %v6345_v28, %v6342_v38 }
 0x3fb   : > { %14770 = vst [vmem:[#allocation36_spill] sm:$0xff] %v13437_v42 }
 0x3fc   : > { %v13439_v49 = vpop.f32.mrf.mxu3  ;;  %v6347_v37 = vsel %vm5634_vm7, %v6337_v54, %v6346_v14 }
 0x3fd   : > { %5587 = vmatmul.bf16.gmra.mxu2 %v5411_v30  ;;  %14771 = vst [vmem:[#allocation37_spill] sm:$0xff] %v13439_v49  ;;  %v5416_v30 = vshll.u32 %v13076_v24, 16  ;;  %v5699_v49 = vrot.slane %v5413_v29, 3 }
 0x3fe   : > { %5859 = vmatmul.bf16.gmra.mxu3 %v5698_v13  ;;  %v13441_v47 = vpop.f32.mrf.mxu0  ;;  %v7973_v13 = vor.u32 %v7972_v60, %v7971_v58 }
 0x3ff   : > { %14772 = vst [vmem:[#allocation38_spill] sm:$0xff] %v13441_v47  ;;  %v5418_v62 = vrot.slane %v5416_v30, 3  ;;  %v5700_v42 = vrot.slane %v5416_v30, 4  ;;  %v10839_v47 = vld [vmem:[#allocation2 + $0x34] sm:$0xff]  }
 0x400   : > { %v13447_v0 = vpop.f32.mrf.mxu1  ;;  %v13455_v24 = vsel %vm1337_vm2, %v7969_v20, %v7973_v13  ;;  %v6349_v23 = vshrl.u32 %v10839_v47, 16  ;;  %v6352_v15 = vshll.u32 %v10839_v47, 16 }
 0x401   : > { %v5419_v28 = vor.u32 %v5418_v62, %v5415_v34  ;;  %v5701_v57 = vor.u32 %v5700_v42, %v5699_v49 }
 0x402   : > { %v6351_v30 = vrot.slane %v6349_v23, 3  ;;  %v6354_v60 = vrot.slane %v6352_v15, 4  ;;  %v5422_v23 = vshrl.u32 %v13129_v48, 16 }
 0x403   : > { %v5420_v58 = vsel %vm2411_vm4, %v5410_v39, %v5419_v28  ;;  %v5702_v20 = vsel %vm5634_vm7, %v5697_v40, %v5701_v57  ;;  %v5425_v40 = vshll.u32 %v13129_v48, 16 }
 0x404   : > { %v6355_v47 = vor.u32 %v6354_v60, %v6351_v30  ;;  %v5424_v34 = vrot.slane %v5422_v23, 2  ;;  %v5703_v60 = vrot.slane %v5422_v23, 3 }
 0x405   : > { %6563 = vmatmul.bf16.gmra.mxu1 %v6347_v37  ;;  %v13466_v37 = vld [vmem:[#allocation2 + $0x48] sm:$0xff]  ;;  %v5427_v62 = vrot.slane %v5425_v40, 3 }
 0x406   : > { %v13457_v38 = vpop.f32.mrf.mxu0  ;;  %v14600_v39 = vshll.u32 %v13466_v37, 16  ;;  %v14599_v49 = vshrl.u32 %v13466_v37, 16  ;;  %v6356_v48 = vsel %vm5634_vm7, %v6346_v14, %v6355_v47 }
 0x407   : > { %v13506_v14 = vor.u32 %v5427_v62, %v5424_v34 }
 0x408   : > { %v7975_v63 = vrot.slane %v14599_v49, 1 }
 0x409   : > { %v5553_v22 = vpop.f32.mrf.mxu2 }
 0x40a   : > { %v5825_v59 = vpop.f32.mrf.mxu3  ;;  %v5554_v35 = vadd.f32 %v5553_v22, %v13044_v36  ;;  %v14773_v36 = vmax.f32 %v13126_v16, 0.0  ;;  %v7976_v16 = vrot.slane %v14600_v39, 2 }
 0x40c   : > { %v13463_v29 = vadd.f32 %v5825_v59, %v5554_v35  ;;  %v14774_v35 = vmax.f32 %v13132_v26, 0.0 }
 0x40d   : > { %v13461_v54 = vpop.f32.mrf.mxu1  ;;  %5592 = vmatmul.bf16.gmra.mxu2 %v5420_v58  ;;  %v10841_v58 = vld [vmem:[#allocation2 + $0x3c] sm:$0xff]  }
 0x40e   : > { %5864 = vmatmul.bf16.gmra.mxu3 %v5702_v20  ;;  %v13468_v42 = vpop.f32.mrf.mxu0  ;;  %v10923_v59 = vpack.c.bf16 %v14774_v35, %v14773_v36  ;;  %v13489_v20 = vor.u32 %v7976_v16, %v7975_v63  ;;  %v10292_v36 = vld [vmem:[%s14573_s3 + $0x160] sm:$0xff]  ;;  %v6361_v23 = vshll.u32 %v10841_v58, 16  ;;  %v5429_v16 = vsel %vm2411_vm4, %v5419_v28, %v13506_v14  ;;  %v10324_v28 = vld [vmem:[%s14573_s3 + $0x1d8] sm:$0xff] }
 0x40f   : > { %v10325_v35 = vld [vmem:[%s14573_s3 + $0x1e0] sm:$0xff]  ;;  %7003 = vmatpush.bf16.msra.mxu2 %v10292_v36 }
 0x410   : > { %10924 = vmatmul.msk.bf16.gmra.mxu0 %vm10922_vm14, %v10923_v59  ;;  %v13502_v59 = vsel %vm1337_vm2, %v7973_v13, %v13489_v20  ;;  %7514 = vmatpush.bf16.msra.mxu3 %v10325_v35  ;;  %v10317_v63 = vld [vmem:[%s14573_s3 + $0x1a0] sm:$0xff]  ;;  %v6363_v13 = vrot.slane %v6361_v23, 4 }
 0x411   : > { %v5555_v15 = vpop.f32.mrf.mxu2  ;;  %14775 = vst [vmem:[#allocation39_spill] sm:$0xff] %v13502_v59  ;;  %7830 = vmatpush.bf16.msra.mxu0 %v10317_v63  ;;  %v10333_v63 = vld [vmem:[%s14573_s3 + $0x220] sm:$0xff] }
 0x412   : > { %v5556_v51 = vadd.f32 %v5555_v15, %v13081_v2  ;;  %v5827_v26 = vpop.f32.mrf.mxu3  ;;  %v5704_v2 = vrot.slane %v5425_v40, 4  ;;  %8101 = vmatpush.bf16.msra.mxu1 %v10333_v63 }
 0x414   : > { %v13487_v22 = vadd.f32 %v5827_v26, %v5556_v51  ;;  %v6358_v51 = vshrl.u32 %v10841_v58, 16  ;;  %v13508_v40 = vor.u32 %v5704_v2, %v5703_v60  ;;  %v13517_v58 = vld [vmem:[#allocation2 + $0x50] sm:$0xff]  ;;  %v10291_v2 = vld [vmem:[%s14573_s3 + $0x158] sm:$0xff]  ;;  %7515 = vmatpush.bf16.msra.mxu3 %v10324_v28  ;;  %v10843_v28 = vld [vmem:[#allocation2 + $0x44] sm:$0xff]  }
 0x415   : > { %v13492_v30 = vpop.f32.mrf.mxu1  ;;  %6568 = vmatmul.bf16.gmra.mxu1 %v6356_v48  ;;  %7004 = vmatpush.bf16.msra.mxu2 %v10291_v2  ;;  %v5436_v2 = vrot.slane %v5434_v31, 3 }
 0x416   : > { %v13504_v15 = vpop.f32.mrf.mxu0  ;;  %v6360_v26 = vrot.slane %v6358_v51, 3  ;;  %v5706_v34 = vsel %vm5634_vm7, %v5701_v57, %v13508_v40  ;;  %v10316_v57 = vld [vmem:[%s14573_s3 + $0x198] sm:$0xff]  ;;  %v14779_v51 = vmax.f32 %v13234_v12, 0.0  ;;  %v14601_v12 = vshrl.u32 %v13517_v58, 16 }
 0x417   : > { %14776 = vst [vmem:[#allocation40_spill] sm:$0xff] %v13504_v15  ;;  %7831 = vmatpush.bf16.msra.mxu0 %v10316_v57  ;;  %v6370_v15 = vshll.u32 %v10843_v28, 16 }
 0x418   : > { %v7979_v63 = vrot.slane %v14601_v12, 1 }
 0x41d   : > { %5597 = vmatmul.bf16.gmra.mxu2 %v5429_v16 }
 0x41e   : > { %v5558_v62 = vpop.f32.mrf.mxu2  ;;  %v5830_v48 = vpop.f32.mrf.mxu3  ;;  %5869 = vmatmul.bf16.gmra.mxu3 %v5706_v34  ;;  %v13546_v34 = vor.u32 %v6363_v13, %v6360_v26  ;;  %v10323_v26 = vld [vmem:[%s14573_s3 + $0x1d0] sm:$0xff] }
 0x41f   : > { %v5559_v60 = vadd.f32 %v5558_v62, %v13106_v41  ;;  %v13529_v36 = vpop.f32.mrf.mxu1  ;;  %v13531_v35 = vpop.f32.mrf.mxu0  ;;  %v14778_v41 = vmax.f32 %v13228_v33, 0.0  ;;  %v5431_v62 = vshrl.u32 %v13222_v5, 16  ;;  %v14602_v33 = vshll.u32 %v13517_v58, 16  ;;  %v10315_v5 = vld [vmem:[%s14573_s3 + $0x190] sm:$0xff]  ;;  %7516 = vmatpush.bf16.msra.mxu3 %v10323_v26 }
 0x420   : > { %14777 = vst [vmem:[#allocation41_spill] sm:$0xff] %v13531_v35  ;;  %v6365_v13 = vsel %vm5634_vm7, %v6355_v47, %v13546_v34  ;;  %7832 = vmatpush.bf16.msra.mxu0 %v10315_v5  ;;  %v10289_v47 = vld [vmem:[%s14573_s3 + $0x148] sm:$0xff]  ;;  %v6367_v5 = vshrl.u32 %v10843_v28, 16  ;;  %v14784_v28 = vshll.u32 %v13287_v56, 16 }
 0x421   : > { %v10926_v23 = vpack.c.bf16 %v14779_v51, %v14778_v41  ;;  %v13544_v16 = vadd.f32 %v5830_v48, %v5559_v60  ;;  %v10290_v48 = vld [vmem:[%s14573_s3 + $0x150] sm:$0xff]  ;;  %v5433_v60 = vrot.slane %v5431_v62, 2  ;;  %v5707_v41 = vrot.slane %v5431_v62, 3  ;;  %v10322_v62 = vld [vmem:[%s14573_s3 + $0x1c8] sm:$0xff] }
 0x422   : > { %v5708_v51 = vrot.slane %v5434_v31, 4  ;;  %7005 = vmatpush.bf16.msra.mxu2 %v10290_v48  ;;  %v7980_v49 = vrot.slane %v14602_v33, 2  ;;  %v10314_v31 = vld [vmem:[%s14573_s3 + $0x188] sm:$0xff]  ;;  %v7616_v48 = vshll.u32 %v10793_v6, 16 }
 0x423   : > { %10927 = vmatmul.msk.bf16.gmra.mxu0 %vm10925_vm13, %v10926_v23  ;;  %14780 = vst [vmem:[#allocation42_spill] sm:$0xff] %v13544_v16  ;;  %v5613_v23 = vld [vmem:[#allocation2 + $0x94] sm:$0xf]  ;;  %7517 = vmatpush.bf16.msra.mxu3 %v10322_v62  ;;  %v13608_v62 = vld [vmem:[#allocation2 + $0x58] sm:$0xff] }
 0x424   : > { %v13585_v35 = vor.u32 %v5708_v51, %v5707_v41  ;;  %v5632_v59 = vunpack.c.l.b16 %v5613_v23  ;;  %7833 = vmatpush.bf16.msra.mxu0 %v10314_v31  ;;  %v7623_v41 = vrot.slane %v14784_v28, 1  ;;  %v6369_v23 = vrot.slane %v6367_v5, 3 }
 0x425   : > { %6573 = vmatmul.bf16.gmra.mxu1 %v6365_v13  ;;  %v7981_v13 = vor.u32 %v7980_v49, %v7979_v63  ;;  %v10321_v49 = vld [vmem:[%s14573_s3 + $0x1c0] sm:$0xff]  ;;  %v6372_v63 = vrot.slane %v6370_v15, 4 }
 0x426   : > { %v5560_v57 = vpop.f32.mrf.mxu2  ;;  %v5832_v26 = vpop.f32.mrf.mxu3  ;;  %7006 = vmatpush.bf16.msra.mxu2 %v10289_v47  ;;  %v5710_v51 = vsel %vm5634_vm7, %v13508_v40, %v13585_v35  ;;  %v5633_v47 = vpack.c.b16 %v5632_v59, %v5632_v59  ;;  %v14603_v59 = vshrl.u32 %v13608_v62, 16 }
 0x427   : > { %v5561_v39 = vadd.f32 %v5560_v57, %v13146_v9  ;;  %v13577_v12 = vpop.f32.mrf.mxu0  ;;  %v13581_v9 = vor.u32 %v5436_v2, %v5433_v60  ;;  %v13583_v57 = vpop.f32.mrf.mxu1  ;;  %v13589_v16 = vsel %vm1337_vm2, %v13489_v20, %v7981_v13  ;;  %v10313_v60 = vld [vmem:[%s14573_s3 + $0x180] sm:$0xff]  ;;  %v7614_v20 = vshrl.u32 %v10793_v6, 16  ;;  %7518 = vmatpush.bf16.msra.mxu3 %v10321_v49 }
 0x428   : > { %14781 = vst [vmem:[#allocation43_spill] sm:$0xff] %v13577_v12  ;;  %v7618_v12 = vrot.slane %v7616_v48, 1  ;;  %7834 = vmatpush.bf16.msra.mxu0 %v10313_v60  ;;  %v6373_v49 = vor.u32 %v6372_v63, %v6369_v23  ;;  %v7983_v60 = vrot.slane %v14603_v59, 1  ;;  %v10845_v63 = vld [vmem:[#allocation2 + $0x4c] sm:$0xff]  }
 0x429   : > { %v13579_v33 = vadd.f32 %v5832_v26, %v5561_v39  ;;  %14783 = vst [vmem:[#allocation45_spill] sm:$0xff] %v13589_v16  ;;  %v10288_v39 = vld [vmem:[%s14573_s3 + $0x140] sm:$0xff]  ;;  %v5438_v2 = vsel %vm2411_vm4, %v13506_v14, %v13581_v9  ;;  %v14604_v14 = vshll.u32 %v13608_v62, 16  ;;  %v5440_v26 = vshrl.u32 %v13281_v46, 16 }
 0x42a   : > { %7007 = vmatpush.bf16.msra.mxu2 %v10288_v39  ;;  %v7619_v31 = vor.u32 %v7618_v12, %v7614_v20  ;;  %v5712_v39 = vshrl.u32 %v5633_v47, 16  ;;  %v5715_v12 = vshll.u32 %v5633_v47, 16  ;;  %v6379_v16 = vshll.u32 %v10845_v63, 16 }
 0x42b   : > { %14782 = vst [vmem:[#allocation44_spill] sm:$0xff] %v13579_v33  ;;  %v7984_v20 = vrot.slane %v14604_v14, 2 }
 0x42c   : > { %v7624_v40 = vsel %vm397_vm0, %v7619_v31, %v7623_v41  ;;  %v5717_v23 = vrot.slane %v5715_v12, 4 }
 0x42d   : > { %5602 = vmatmul.bf16.gmra.mxu2 %v5438_v2  ;;  %v5443_v2 = vshll.u32 %v13281_v46, 16  ;;  %v7985_v47 = vor.u32 %v7984_v20, %v7983_v60  ;;  %v6381_v60 = vrot.slane %v6379_v16, 4  ;;  %v14790_v20 = vshll.u32 %v13321_v61, 16 }
 0x42e   : > { %5874 = vmatmul.bf16.gmra.mxu3 %v5710_v51  ;;  %v5442_v51 = vrot.slane %v5440_v26, 2 }
 0x42f   : > { %v13610_v48 = vpop.f32.mrf.mxu0  ;;  %v5445_v31 = vrot.slane %v5443_v2, 3  ;;  %v13631_v59 = vsel %vm1337_vm2, %v7981_v13, %v7985_v47  ;;  %v6376_v2 = vshrl.u32 %v10845_v63, 16 }
 0x430   : > { %14785 = vst [vmem:[#allocation46_spill] sm:$0xff] %v13610_v48  ;;  %v5563_v6 = vpop.f32.mrf.mxu2 }
 0x431   : > { %v5564_v15 = vadd.f32 %v5563_v6, %v13188_v10  ;;  %v5835_v5 = vpop.f32.mrf.mxu3  ;;  %v6374_v10 = vsel %vm5634_vm7, %v13546_v34, %v6373_v49  ;;  %v5714_v6 = vrot.slane %v5712_v39, 3  ;;  %14788 = vst [vmem:[#allocation49_spill] sm:$0xff] %v13631_v59  ;;  %v5446_v48 = vor.u32 %v5445_v31, %v5442_v51  ;;  %v10270_v51 = vld [vmem:[#allocation2 + $0x10] sm:$0xff] }
 0x432   : > { %v13622_v28 = vpop.f32.mrf.mxu1  ;;  %v6378_v12 = vrot.slane %v6376_v2, 3 }
 0x433   : > { %7835 = vmatmul.bf16.vlgmr.msra.gmra.mxu0 %v7624_v40  ;;  %v13624_v46 = vadd.f32 %v5835_v5, %v5564_v15  ;;  %v5718_v26 = vor.u32 %v5717_v23, %v5714_v6  ;;  %v5447_v39 = vsel %vm2411_vm4, %v13581_v9, %v5446_v48  ;;  %v13651_v23 = vld [vmem:[#allocation2 + $0x18] sm:$0xff] }
 0x435   : > { %14786 = vst [vmem:[#allocation47_spill] sm:$0xff] %v13624_v46  ;;  %6578 = vmatmul.bf16.gmra.mxu1 %v6374_v10  ;;  %v5719_v13 = vsel %vm5634_vm7, %v13585_v35, %v5718_v26  ;;  %v14792_v10 = vshrl.u32 %v13287_v56, 16  ;;  %v6789_v26 = vshll.u32 %v10270_v51, 16 }
 0x437   : > { %v13628_v40 = vpop.f32.mrf.mxu0  ;;  %v7627_v6 = vor.u32 %v14792_v10, %v7623_v41  ;;  %v10847_v10 = vld [vmem:[#allocation2 + $0x54] sm:$0xff]  }
 0x438   : > { %14787 = vst [vmem:[#allocation48_spill] sm:$0xff] %v13628_v40  ;;  %v5565_v14 = vpop.f32.mrf.mxu2 }
 0x439   : > { %v5566_v15 = vadd.f32 %v5565_v14, %v13218_v53  ;;  %v5837_v5 = vpop.f32.mrf.mxu3  ;;  %v7631_v53 = vrot.slane %v14790_v20, 1  ;;  %v13644_v14 = vld [vmem:[#allocation2 + $0x60] sm:$0xff]  ;;  %v6794_v20 = vshll.u32 %v13651_v23, 16 }
 0x43a   : > { %v13634_v46 = vpop.f32.mrf.mxu1  ;;  %v14606_v9 = vshll.u32 %v13644_v14, 16  ;;  %v14605_v35 = vshrl.u32 %v13644_v14, 16 }
 0x43b   : > { %v13636_v34 = vadd.f32 %v5837_v5, %v5566_v15  ;;  %v6382_v15 = vor.u32 %v6381_v60, %v6378_v12  ;;  %v7632_v5 = vsel %vm397_vm0, %v7627_v6, %v7631_v53  ;;  %v6791_v60 = vrot.slane %v6789_v26, 1  ;;  %v10332_v6 = vld [vmem:[%s14573_s3 + $0x218] sm:$0xff] }
 0x43c   : > { %v7987_v2 = vrot.slane %v14605_v35, 1  ;;  %v7988_v41 = vrot.slane %v14606_v9, 2  ;;  %8102 = vmatpush.bf16.msra.mxu1 %v10332_v6  ;;  %v6388_v26 = vshll.u32 %v10847_v10, 16 }
 0x43d   : > { %14789 = vst [vmem:[#allocation50_spill] sm:$0xff] %v13636_v34  ;;  %5607 = vmatmul.bf16.gmra.mxu2 %v5447_v39 }
 0x43e   : > { %5879 = vmatmul.bf16.gmra.mxu3 %v5719_v13  ;;  %v7989_v12 = vor.u32 %v7988_v41, %v7987_v2  ;;  %v7409_v2 = vrot.slane %v13287_v56, 1  ;;  %v6385_v41 = vshrl.u32 %v10847_v10, 16  ;;  %v6390_v6 = vrot.slane %v6388_v26, 4  ;;  %v13685_v56 = vld [vmem:[#allocation2 + $0x68] sm:$0xff] }
 0x43f   : > { %v13646_v31 = vpop.f32.mrf.mxu0 }
 0x440   : > { %14791 = vst [vmem:[#allocation51_spill] sm:$0xff] %v13646_v31  ;;  %v5568_v48 = vpop.f32.mrf.mxu2 }
 0x441   : > { %v5569_v16 = vadd.f32 %v5568_v48, %v13250_v50  ;;  %v5840_v63 = vpop.f32.mrf.mxu3  ;;  %v6383_v50 = vsel %vm5634_vm7, %v6373_v49, %v6382_v15 }
 0x442   : > { %v13660_v39 = vpop.f32.mrf.mxu1 }
 0x443   : > { %7840 = vmatmul.bf16.gmra.mxu0 %v7632_v5  ;;  %v13662_v13 = vadd.f32 %v5840_v63, %v5569_v16  ;;  %v13672_v5 = vsel %vm1337_vm2, %v7985_v47, %v7989_v12  ;;  %v6787_v16 = vshrl.u32 %v10270_v51, 16  ;;  %v6796_v63 = vrot.slane %v6794_v20, 1 }
 0x444   : > { %14795 = vst [vmem:[#allocation54_spill] sm:$0xff] %v13672_v5  ;;  %v6387_v20 = vrot.slane %v6385_v41, 3 }
 0x445   : > { %14793 = vst [vmem:[#allocation52_spill] sm:$0xff] %v13662_v13  ;;  %6583 = vmatmul.bf16.gmra.mxu1 %v6383_v50  ;;  %v6792_v50 = vor.u32 %v6791_v60, %v6787_v16 }
 0x447   : > { %v13669_v48 = vpop.f32.mrf.mxu0  ;;  %v6797_v47 = vsel %vm397_vm0, %v6792_v50, %v6796_v63  ;;  %v6391_v50 = vor.u32 %v6390_v6, %v6387_v20 }
 0x448   : > { %14794 = vst [vmem:[#allocation53_spill] sm:$0xff] %v13669_v48  ;;  %v5570_v35 = vpop.f32.mrf.mxu2  ;;  %v7408_v48 = vrot.slane %v13295_v25, 1  ;;  %v14608_v25 = vshll.u32 %v13685_v56, 16 }
 0x449   : > { %v5571_v9 = vadd.f32 %v5570_v35, %v13283_v27  ;;  %v5842_v49 = vpop.f32.mrf.mxu3  ;;  %v14797_v27 = vshll.u32 %v13367_v44, 16  ;;  %v6392_v5 = vsel %vm5634_vm7, %v6382_v15, %v6391_v50 }
 0x44a   : > { %v13676_v31 = vpop.f32.mrf.mxu1  ;;  %v7410_v51 = vsel %vm897_vm1, %v7408_v48, %v7409_v2  ;;  %v14607_v48 = vshrl.u32 %v13685_v56, 16 }
 0x44b   : > { %v13678_v40 = vadd.f32 %v5842_v49, %v5571_v9  ;;  %v7639_v35 = vrot.slane %v14797_v27, 1  ;;  %v14799_v9 = vshrl.u32 %v13321_v61, 16  ;;  %v13692_v49 = vld [vmem:[#allocation2 + $0x20] sm:$0xff] }
 0x44d   : > { %14796 = vst [vmem:[#allocation55_spill] sm:$0xff] %v13678_v40  ;;  %7008 = vmatmul.bf16.vlgmr.msra.gmra.mxu2 %v6797_v47  ;;  %v7635_v60 = vor.u32 %v14799_v9, %v7631_v53  ;;  %v7992_v53 = vrot.slane %v14608_v25, 2  ;;  %v7411_v25 = vrot.slane %v13321_v61, 1 }
 0x44e   : > { %7519 = vmatmul.bf16.vlgmr.msra.gmra.mxu3 %v7410_v51  ;;  %v7991_v51 = vrot.slane %v14607_v48, 1 }
 0x44f   : > { %v13687_v10 = vpop.f32.mrf.mxu0  ;;  %v7640_v47 = vsel %vm397_vm0, %v7635_v60, %v7639_v35 }
 0x450   : > { %14798 = vst [vmem:[#allocation56_spill] sm:$0xff] %v13687_v10  ;;  %v5573_v16 = vpop.f32.mrf.mxu2  ;;  %v6802_v10 = vshll.u32 %v13692_v49, 16 }
 0x451   : > { %v5574_v41 = vadd.f32 %v5573_v16, %v13298_v3  ;;  %v5845_v26 = vpop.f32.mrf.mxu3  ;;  %v10849_v3 = vld [vmem:[#allocation2 + $0x5c] sm:$0xff]   ;;  %v7993_v16 = vor.u32 %v7992_v53, %v7991_v51 }
 0x452   : > { %v13703_v9 = vpop.f32.mrf.mxu1  ;;  %v6804_v48 = vrot.slane %v6802_v10, 1  ;;  %v6397_v40 = vshll.u32 %v10849_v3, 16  ;;  %v14804_v10 = vshll.u32 %v13396_v45, 16 }
 0x453   : > { %7845 = vmatmul.bf16.gmra.mxu0 %v7640_v47  ;;  %v13701_v27 = vadd.f32 %v5845_v26, %v5574_v41  ;;  %v13710_v6 = vsel %vm1337_vm2, %v7989_v12, %v7993_v16  ;;  %v6798_v47 = vshrl.u32 %v13651_v23, 16  ;;  %v7412_v12 = vsel %vm897_vm1, %v7409_v2, %v7411_v25 }
 0x454   : > { %14802 = vst [vmem:[#allocation59_spill] sm:$0xff] %v13710_v6  ;;  %v6399_v23 = vrot.slane %v6397_v40, 4 }
 0x455   : > { %14800 = vst [vmem:[#allocation57_spill] sm:$0xff] %v13701_v27  ;;  %6588 = vmatmul.bf16.gmra.mxu1 %v6392_v5  ;;  %v6394_v27 = vshrl.u32 %v10849_v3, 16  ;;  %v6800_v15 = vor.u32 %v6798_v47, %v6796_v63  ;;  %v14806_v63 = vshrl.u32 %v13367_v44, 16 }
 0x457   : > { %v13707_v20 = vpop.f32.mrf.mxu0  ;;  %v6805_v51 = vsel %vm397_vm0, %v6800_v15, %v6804_v48  ;;  %v6396_v53 = vrot.slane %v6394_v27, 3  ;;  %v7643_v3 = vor.u32 %v14806_v63, %v7639_v35 }
 0x458   : > { %14801 = vst [vmem:[#allocation58_spill] sm:$0xff] %v13707_v20  ;;  %v5575_v60 = vpop.f32.mrf.mxu2 }
 0x459   : > { %v5576_v41 = vadd.f32 %v5575_v60, %v13329_v19  ;;  %v5847_v26 = vpop.f32.mrf.mxu3  ;;  %v7647_v19 = vrot.slane %v14804_v10, 1  ;;  %v13723_v60 = vld [vmem:[#allocation2 + $0x70] sm:$0xff]  ;;  %v6400_v15 = vor.u32 %v6399_v23, %v6396_v53 }
 0x45a   : > { %v13717_v5 = vpop.f32.mrf.mxu1  ;;  %v14610_v47 = vshll.u32 %v13723_v60, 16  ;;  %v14609_v2 = vshrl.u32 %v13723_v60, 16  ;;  %v10331_v53 = vld [vmem:[%s14573_s3 + $0x210] sm:$0xff] }
 0x45b   : > { %v13715_v59 = vadd.f32 %v5847_v26, %v5576_v41  ;;  %v13730_v26 = vld [vmem:[#allocation2 + $0x28] sm:$0xff]  ;;  %v6401_v20 = vsel %vm5634_vm7, %v6391_v50, %v6400_v15  ;;  %8103 = vmatpush.bf16.msra.mxu1 %v10331_v53  ;;  %v14811_v53 = vshll.u32 %v13435_v52, 16 }
 0x45c   : > { %v7996_v35 = vrot.slane %v14610_v47, 2 }
 0x45d   : > { %14803 = vst [vmem:[#allocation60_spill] sm:$0xff] %v13715_v59  ;;  %7013 = vmatmul.bf16.gmra.mxu2 %v6805_v51  ;;  %v7648_v51 = vsel %vm397_vm0, %v7643_v3, %v7647_v19 }
 0x45e   : > { %7524 = vmatmul.bf16.gmra.mxu3 %v7412_v12  ;;  %v7995_v12 = vrot.slane %v14609_v2, 1 }
 0x45f   : > { %v13725_v61 = vpop.f32.mrf.mxu0 }
 0x460   : > { %14805 = vst [vmem:[#allocation61_spill] sm:$0xff] %v13725_v61  ;;  %v5578_v41 = vpop.f32.mrf.mxu2  ;;  %v6810_v61 = vshll.u32 %v13730_v26, 16 }
 0x461   : > { %v5579_v40 = vadd.f32 %v5578_v41, %v13352_v1  ;;  %v5850_v27 = vpop.f32.mrf.mxu3  ;;  %v10851_v1 = vld [vmem:[#allocation2 + $0x64] sm:$0xff]   ;;  %v7997_v41 = vor.u32 %v7996_v35, %v7995_v12  ;;  %v7413_v12 = vrot.slane %v13367_v44, 1 }
 0x462   : > { %v13741_v63 = vpop.f32.mrf.mxu1  ;;  %v6406_v35 = vshll.u32 %v10851_v1, 16 }
 0x463   : > { %7850 = vmatmul.bf16.gmra.mxu0 %v7648_v51  ;;  %v13739_v10 = vadd.f32 %v5850_v27, %v5579_v40  ;;  %v13751_v3 = vsel %vm1337_vm2, %v7993_v16, %v7997_v41  ;;  %v6806_v27 = vshrl.u32 %v13692_v49, 16  ;;  %v6812_v51 = vrot.slane %v6810_v61, 1 }
 0x464   : > { %14809 = vst [vmem:[#allocation64_spill] sm:$0xff] %v13751_v3  ;;  %v6408_v61 = vrot.slane %v6406_v35, 4 }
 0x465   : > { %14807 = vst [vmem:[#allocation62_spill] sm:$0xff] %v13739_v10  ;;  %6593 = vmatmul.bf16.gmra.mxu1 %v6401_v20  ;;  %v6403_v20 = vshrl.u32 %v10851_v1, 16  ;;  %v6808_v47 = vor.u32 %v6806_v27, %v6804_v48  ;;  %v14813_v48 = vshrl.u32 %v13396_v45, 16 }
 0x467   : > { %v13748_v23 = vpop.f32.mrf.mxu0  ;;  %v6813_v16 = vsel %vm397_vm0, %v6808_v47, %v6812_v51  ;;  %v6405_v49 = vrot.slane %v6403_v20, 3  ;;  %v13771_v47 = vld [vmem:[#allocation2 + $0x30] sm:$0xff] }
 0x468   : > { %14808 = vst [vmem:[#allocation63_spill] sm:$0xff] %v13748_v23  ;;  %v5580_v40 = vpop.f32.mrf.mxu2  ;;  %v7414_v23 = vsel %vm897_vm1, %v7411_v25, %v7413_v12 }
 0x469   : > { %v5581_v2 = vadd.f32 %v5580_v40, %v13369_v7  ;;  %v5852_v50 = vpop.f32.mrf.mxu3  ;;  %v7655_v7 = vrot.slane %v14811_v53, 1  ;;  %v13764_v40 = vld [vmem:[#allocation2 + $0x78] sm:$0xff]  ;;  %v6409_v35 = vor.u32 %v6408_v61, %v6405_v49 }
 0x46a   : > { %v13758_v10 = vpop.f32.mrf.mxu1  ;;  %v14612_v1 = vshll.u32 %v13764_v40, 16  ;;  %v14611_v25 = vshrl.u32 %v13764_v40, 16 }
 0x46b   : > { %v13756_v6 = vadd.f32 %v5852_v50, %v5581_v2  ;;  %v7651_v2 = vor.u32 %v14813_v48, %v7647_v19  ;;  %v6410_v3 = vsel %vm5634_vm7, %v6400_v15, %v6409_v35 }
 0x46c   : > { %v8000_v19 = vrot.slane %v14612_v1, 2  ;;  %v7415_v1 = vrot.slane %v13396_v45, 1 }
 0x46d   : > { %14810 = vst [vmem:[#allocation65_spill] sm:$0xff] %v13756_v6  ;;  %7018 = vmatmul.bf16.gmra.mxu2 %v6813_v16  ;;  %v7656_v16 = vsel %vm397_vm0, %v7651_v2, %v7655_v7 }
 0x46e   : > { %7529 = vmatmul.bf16.gmra.mxu3 %v7414_v23  ;;  %v7999_v23 = vrot.slane %v14611_v25, 1 }
 0x46f   : > { %v13766_v44 = vpop.f32.mrf.mxu0 }
 0x470   : > { %14812 = vst [vmem:[#allocation66_spill] sm:$0xff] %v13766_v44  ;;  %v5583_v27 = vpop.f32.mrf.mxu2  ;;  %v6818_v44 = vshll.u32 %v13771_v47, 16 }
 0x471   : > { %v5584_v50 = vadd.f32 %v5583_v27, %v13383_v21  ;;  %v5855_v20 = vpop.f32.mrf.mxu3  ;;  %v10853_v21 = vld [vmem:[#allocation2 + $0x6c] sm:$0xff]   ;;  %v8001_v27 = vor.u32 %v8000_v19, %v7999_v23 }
 0x472   : > { %v13782_v48 = vpop.f32.mrf.mxu1  ;;  %v6820_v25 = vrot.slane %v6818_v44, 1  ;;  %v6415_v6 = vshll.u32 %v10853_v21, 16  ;;  %v14818_v44 = vshll.u32 %v13466_v37, 16 }
 0x473   : > { %7855 = vmatmul.bf16.gmra.mxu0 %v7656_v16  ;;  %v13780_v53 = vadd.f32 %v5855_v20, %v5584_v50  ;;  %v13789_v61 = vsel %vm1337_vm2, %v7997_v41, %v8001_v27  ;;  %v6814_v16 = vshrl.u32 %v13730_v26, 16  ;;  %v7416_v41 = vsel %vm897_vm1, %v7413_v12, %v7415_v1 }
 0x474   : > { %14816 = vst [vmem:[#allocation69_spill] sm:$0xff] %v13789_v61  ;;  %v6417_v26 = vrot.slane %v6415_v6, 4 }
 0x475   : > { %14814 = vst [vmem:[#allocation67_spill] sm:$0xff] %v13780_v53  ;;  %6598 = vmatmul.bf16.gmra.mxu1 %v6410_v3  ;;  %v6412_v53 = vshrl.u32 %v10853_v21, 16  ;;  %v6816_v15 = vor.u32 %v6814_v16, %v6812_v51  ;;  %v14820_v51 = vshrl.u32 %v13435_v52, 16 }
 0x477   : > { %v13786_v49 = vpop.f32.mrf.mxu0  ;;  %v6821_v23 = vsel %vm397_vm0, %v6816_v15, %v6820_v25  ;;  %v6414_v19 = vrot.slane %v6412_v53, 3  ;;  %v7659_v21 = vor.u32 %v14820_v51, %v7655_v7 }
 0x478   : > { %14815 = vst [vmem:[#allocation68_spill] sm:$0xff] %v13786_v49  ;;  %v5585_v2 = vpop.f32.mrf.mxu2 }
 0x479   : > { %v5586_v50 = vadd.f32 %v5585_v2, %v13398_v55  ;;  %v5857_v20 = vpop.f32.mrf.mxu3  ;;  %v7663_v55 = vrot.slane %v14818_v44, 1  ;;  %v13802_v2 = vld [vmem:[#allocation2 + $0x80] sm:$0xff]  ;;  %v6418_v15 = vor.u32 %v6417_v26, %v6414_v19 }
 0x47a   : > { %v13796_v3 = vpop.f32.mrf.mxu1  ;;  %v14614_v16 = vshll.u32 %v13802_v2, 16  ;;  %v14613_v12 = vshrl.u32 %v13802_v2, 16 }
 0x47b   : > { %v13794_v59 = vadd.f32 %v5857_v20, %v5586_v50  ;;  %v13809_v20 = vld [vmem:[#allocation2 + $0x38] sm:$0xff]  ;;  %v6419_v49 = vsel %vm5634_vm7, %v6409_v35, %v6418_v15 }
 0x47c   : > { %v8004_v7 = vrot.slane %v14614_v16, 2  ;;  %v7417_v16 = vrot.slane %v13435_v52, 1  ;;  %v14825_v52 = vshll.u32 %v13517_v58, 16 }
 0x47d   : > { %14817 = vst [vmem:[#allocation70_spill] sm:$0xff] %v13794_v59  ;;  %7023 = vmatmul.bf16.gmra.mxu2 %v6821_v23  ;;  %v7664_v23 = vsel %vm397_vm0, %v7659_v21, %v7663_v55 }
 0x47e   : > { %7534 = vmatmul.bf16.gmra.mxu3 %v7416_v41  ;;  %v8003_v41 = vrot.slane %v14613_v12, 1 }
 0x47f   : > { %v13804_v45 = vpop.f32.mrf.mxu0 }
 0x480   : > { %14819 = vst [vmem:[#allocation71_spill] sm:$0xff] %v13804_v45  ;;  %v5588_v50 = vpop.f32.mrf.mxu2  ;;  %v6826_v45 = vshll.u32 %v13809_v20, 16 }
 0x481   : > { %v5589_v6 = vadd.f32 %v5588_v50, %v13431_v43  ;;  %v5860_v53 = vpop.f32.mrf.mxu3  ;;  %v10855_v43 = vld [vmem:[#allocation2 + $0x74] sm:$0xff]   ;;  %v8005_v50 = vor.u32 %v8004_v7, %v8003_v41  ;;  %v7671_v7 = vrot.slane %v14825_v52, 1 }
 0x482   : > { %v13820_v51 = vpop.f32.mrf.mxu1  ;;  %v6828_v12 = vrot.slane %v6826_v45, 1  ;;  %v6421_v61 = vshrl.u32 %v10855_v43, 16 }
 0x483   : > { %7860 = vmatmul.bf16.gmra.mxu0 %v7664_v23  ;;  %v13818_v44 = vadd.f32 %v5860_v53, %v5589_v6  ;;  %v13827_v26 = vsel %vm1337_vm2, %v8001_v27, %v8005_v50  ;;  %v6822_v23 = vshrl.u32 %v13771_v47, 16  ;;  %v10330_v27 = vld [vmem:[%s14573_s3 + $0x208] sm:$0xff]  ;;  %v7418_v47 = vsel %vm897_vm1, %v7415_v1, %v7417_v16 }
 0x484   : > { %14823 = vst [vmem:[#allocation74_spill] sm:$0xff] %v13827_v26  ;;  %8104 = vmatpush.bf16.msra.mxu1 %v10330_v27 }
 0x485   : > { %14821 = vst [vmem:[#allocation72_spill] sm:$0xff] %v13818_v44  ;;  %6603 = vmatmul.bf16.gmra.mxu1 %v6419_v49  ;;  %v6424_v44 = vshll.u32 %v10855_v43, 16  ;;  %v6824_v35 = vor.u32 %v6822_v23, %v6820_v25  ;;  %v13843_v43 = vld [vmem:[#allocation2 + $0x88] sm:$0xff] }
 0x486   : > { %v14615_v1 = vshrl.u32 %v13843_v43, 16 }
 0x487   : > { %v13824_v19 = vpop.f32.mrf.mxu0  ;;  %v6829_v41 = vsel %vm397_vm0, %v6824_v35, %v6828_v12  ;;  %v6426_v45 = vrot.slane %v6424_v44, 4  ;;  %v13850_v35 = vld [vmem:[#allocation2 + $0x40] sm:$0xff] }
 0x488   : > { %14822 = vst [vmem:[#allocation73_spill] sm:$0xff] %v13824_v19  ;;  %v5590_v21 = vpop.f32.mrf.mxu2  ;;  %v8007_v27 = vrot.slane %v14615_v1, 1 }
 0x489   : > { %v5591_v6 = vadd.f32 %v5590_v21, %v13447_v0  ;;  %v5862_v53 = vpop.f32.mrf.mxu3  ;;  %v6423_v0 = vrot.slane %v6421_v61, 3  ;;  %v14827_v21 = vshrl.u32 %v13466_v37, 16 }
 0x48a   : > { %v13834_v49 = vpop.f32.mrf.mxu1 }
 0x48b   : > { %v13832_v59 = vadd.f32 %v5862_v53, %v5591_v6  ;;  %v7667_v23 = vor.u32 %v14827_v21, %v7663_v55  ;;  %v14616_v6 = vshll.u32 %v13843_v43, 16 }
 0x48d   : > { %14824 = vst [vmem:[#allocation75_spill] sm:$0xff] %v13832_v59  ;;  %7028 = vmatmul.bf16.gmra.mxu2 %v6829_v41  ;;  %v6427_v41 = vor.u32 %v6426_v45, %v6423_v0  ;;  %v7672_v52 = vsel %vm397_vm0, %v7667_v23, %v7671_v7  ;;  %v8008_v55 = vrot.slane %v14616_v6, 2  ;;  %v7419_v6 = vrot.slane %v13466_v37, 1 }
 0x48e   : > { %7539 = vmatmul.bf16.gmra.mxu3 %v7418_v47 }
 0x48f   : > { %v13845_v25 = vpop.f32.mrf.mxu0  ;;  %v6428_v19 = vsel %vm5634_vm7, %v6418_v15, %v6427_v41 }
 0x490   : > { %14826 = vst [vmem:[#allocation76_spill] sm:$0xff] %v13845_v25  ;;  %v5593_v53 = vpop.f32.mrf.mxu2  ;;  %v6834_v25 = vshll.u32 %v13850_v35, 16 }
 0x491   : > { %v5594_v61 = vadd.f32 %v5593_v53, %v13461_v54  ;;  %v5865_v44 = vpop.f32.mrf.mxu3  ;;  %v10857_v54 = vld [vmem:[#allocation2 + $0x7c] sm:$0xff]   ;;  %v8009_v53 = vor.u32 %v8008_v55, %v8007_v27 }
 0x492   : > { %v13861_v21 = vpop.f32.mrf.mxu1  ;;  %v6836_v1 = vrot.slane %v6834_v25, 1  ;;  %v6430_v26 = vshrl.u32 %v10857_v54, 16  ;;  %v14832_v25 = vshll.u32 %v13608_v62, 16 }
 0x493   : > { %7865 = vmatmul.bf16.gmra.mxu0 %v7672_v52  ;;  %v13859_v47 = vadd.f32 %v5865_v44, %v5594_v61  ;;  %v13868_v45 = vsel %vm1337_vm2, %v8005_v50, %v8009_v53  ;;  %v6830_v52 = vshrl.u32 %v13809_v20, 16  ;;  %v7420_v50 = vsel %vm897_vm1, %v7417_v16, %v7419_v6 }
 0x494   : > { %14830 = vst [vmem:[#allocation79_spill] sm:$0xff] %v13868_v45  ;;  %v6432_v55 = vrot.slane %v6430_v26, 3 }
 0x495   : > { %14828 = vst [vmem:[#allocation77_spill] sm:$0xff] %v13859_v47  ;;  %6608 = vmatmul.bf16.gmra.mxu1 %v6428_v19  ;;  %v6433_v47 = vshll.u32 %v10857_v54, 16  ;;  %v6832_v15 = vor.u32 %v6830_v52, %v6828_v12  ;;  %v14834_v12 = vshrl.u32 %v13517_v58, 16 }
 0x497   : > { %v13865_v0 = vpop.f32.mrf.mxu0  ;;  %v6837_v27 = vsel %vm397_vm0, %v6832_v15, %v6836_v1  ;;  %v6435_v20 = vrot.slane %v6433_v47, 4  ;;  %v7675_v54 = vor.u32 %v14834_v12, %v7671_v7 }
 0x498   : > { %14829 = vst [vmem:[#allocation78_spill] sm:$0xff] %v13865_v0  ;;  %v5595_v23 = vpop.f32.mrf.mxu2 }
 0x499   : > { %v5596_v61 = vadd.f32 %v5595_v23, %v13492_v30  ;;  %v5867_v44 = vpop.f32.mrf.mxu3  ;;  %v7679_v30 = vrot.slane %v14832_v25, 1  ;;  %v13881_v23 = vld [vmem:[#allocation2 + $0x90] sm:$0xff]  ;;  %v6436_v15 = vor.u32 %v6435_v20, %v6432_v55 }
 0x49a   : > { %v13875_v19 = vpop.f32.mrf.mxu1  ;;  %v14618_v52 = vshll.u32 %v13881_v23, 16  ;;  %v14617_v16 = vshrl.u32 %v13881_v23, 16 }
 0x49b   : > { %v13873_v59 = vadd.f32 %v5867_v44, %v5596_v61  ;;  %v13888_v44 = vld [vmem:[#allocation2 + $0x48] sm:$0xff]  ;;  %v6437_v0 = vsel %vm5634_vm7, %v6427_v41, %v6436_v15 }
 0x49c   : > { %v8012_v7 = vrot.slane %v14618_v52, 2  ;;  %v7421_v52 = vrot.slane %v13517_v58, 1  ;;  %v10329_v58 = vld [vmem:[%s14573_s3 + $0x200] sm:$0xff] }
 0x49d   : > { %14831 = vst [vmem:[#allocation80_spill] sm:$0xff] %v13873_v59  ;;  %7033 = vmatmul.bf16.gmra.mxu2 %v6837_v27  ;;  %v7680_v27 = vsel %vm397_vm0, %v7675_v54, %v7679_v30  ;;  %8105 = vmatpush.bf16.msra.mxu1 %v10329_v58 }
 0x49e   : > { %7544 = vmatmul.bf16.gmra.mxu3 %v7420_v50  ;;  %v8011_v50 = vrot.slane %v14617_v16, 1 }
 0x49f   : > { %v13883_v37 = vpop.f32.mrf.mxu0 }
 0x4a0   : > { %14833 = vst [vmem:[#allocation81_spill] sm:$0xff] %v13883_v37  ;;  %v5598_v61 = vpop.f32.mrf.mxu2  ;;  %v6842_v37 = vshll.u32 %v13888_v44, 16 }
 0x4a1   : > { %v5599_v26 = vadd.f32 %v5598_v61, %v13529_v36  ;;  %v5870_v47 = vpop.f32.mrf.mxu3  ;;  %v10859_v36 = vld [vmem:[#allocation2 + $0x84] sm:$0xff]   ;;  %v8013_v61 = vor.u32 %v8012_v7, %v8011_v50 }
 0x4a2   : > { %v13899_v12 = vpop.f32.mrf.mxu1  ;;  %v6844_v16 = vrot.slane %v6842_v37, 1  ;;  %v6439_v45 = vshrl.u32 %v10859_v36, 16  ;;  %v14839_v37 = vshll.u32 %v13644_v14, 16 }
 0x4a3   : > { %7870 = vmatmul.bf16.gmra.mxu0 %v7680_v27  ;;  %v13897_v25 = vadd.f32 %v5870_v47, %v5599_v26  ;;  %v13906_v20 = vsel %vm1337_vm2, %v8009_v53, %v8013_v61  ;;  %v6838_v27 = vshrl.u32 %v13850_v35, 16  ;;  %v7422_v53 = vsel %vm897_vm1, %v7419_v6, %v7421_v52 }
 0x4a4   : > { %14837 = vst [vmem:[#allocation84_spill] sm:$0xff] %v13906_v20  ;;  %v6441_v7 = vrot.slane %v6439_v45, 3  ;;  %v13930_v45 = vld [vmem:[#allocation2 + $0x50] sm:$0xff] }
 0x4a5   : > { %14835 = vst [vmem:[#allocation82_spill] sm:$0xff] %v13897_v25  ;;  %6613 = vmatmul.bf16.gmra.mxu1 %v6437_v0  ;;  %v6442_v25 = vshll.u32 %v10859_v36, 16  ;;  %v6840_v41 = vor.u32 %v6838_v27, %v6836_v1  ;;  %v13922_v1 = vld [vmem:[#allocation2 + $0x98] sm:$0xff] }
 0x4a7   : > { %v13903_v55 = vpop.f32.mrf.mxu0  ;;  %v6845_v50 = vsel %vm397_vm0, %v6840_v41, %v6844_v16  ;;  %v6444_v35 = vrot.slane %v6442_v25, 4 }
 0x4a8   : > { %14836 = vst [vmem:[#allocation83_spill] sm:$0xff] %v13903_v55  ;;  %v5600_v54 = vpop.f32.mrf.mxu2  ;;  %v6850_v55 = vshll.u32 %v13930_v45, 16 }
 0x4a9   : > { %v5601_v26 = vadd.f32 %v5600_v54, %v13583_v57  ;;  %v5872_v47 = vpop.f32.mrf.mxu3  ;;  %v7687_v57 = vrot.slane %v14839_v37, 1  ;;  %v14841_v54 = vshrl.u32 %v13608_v62, 16  ;;  %v6445_v41 = vor.u32 %v6444_v35, %v6441_v7 }
 0x4aa   : > { %v13913_v0 = vpop.f32.mrf.mxu1  ;;  %v14619_v37 = vshrl.u32 %v13922_v1, 16  ;;  %v6852_v20 = vrot.slane %v6850_v55, 1 }
 0x4ab   : > { %v13911_v59 = vadd.f32 %v5872_v47, %v5601_v26  ;;  %v7683_v27 = vor.u32 %v14841_v54, %v7679_v30  ;;  %v13928_v26 = vld [vmem:[#allocation2 + $0xa0] sm:$0xff]  ;;  %v6446_v58 = vsel %vm5634_vm7, %v6436_v15, %v6445_v41 }
 0x4ac   : > { %v14621_v54 = vshll.u32 %v13928_v26, 16  ;;  %v8015_v7 = vrot.slane %v14619_v37, 1 }
 0x4ad   : > { %14838 = vst [vmem:[#allocation85_spill] sm:$0xff] %v13911_v59  ;;  %7038 = vmatmul.bf16.gmra.mxu2 %v6845_v50  ;;  %v7688_v50 = vsel %vm397_vm0, %v7683_v27, %v7687_v57  ;;  %v14622_v27 = vshrl.u32 %v13928_v26, 16 }
 0x4ae   : > { %7549 = vmatmul.bf16.gmra.mxu3 %v7422_v53  ;;  %v14620_v53 = vshll.u32 %v13922_v1, 16 }
 0x4af   : > { %v13924_v36 = vpop.f32.mrf.mxu0 }
 0x4b0   : > { %14840 = vst [vmem:[#allocation86_spill] sm:$0xff] %v13924_v36  ;;  %v5603_v6 = vpop.f32.mrf.mxu2  ;;  %v8016_v35 = vrot.slane %v14620_v53, 2  ;;  %v7423_v53 = vrot.slane %v13608_v62, 1 }
 0x4b1   : > { %v5604_v25 = vadd.f32 %v5603_v6, %v13622_v28  ;;  %v5875_v47 = vpop.f32.mrf.mxu3  ;;  %v10861_v28 = vld [vmem:[#allocation2 + $0x8c] sm:$0xff]  }
 0x4b2   : > { %v13938_v30 = vpop.f32.mrf.mxu1  ;;  %v8017_v15 = vor.u32 %v8016_v35, %v8015_v7  ;;  %v6448_v59 = vshrl.u32 %v10861_v28, 16  ;;  %v6451_v13 = vshll.u32 %v10861_v28, 16  ;;  %v7424_v62 = vsel %vm897_vm1, %v7421_v52, %v7423_v53 }
 0x4b3   : > { %7875 = vmatmul.bf16.gmra.mxu0 %v7688_v50  ;;  %v13936_v36 = vadd.f32 %v5875_v47, %v5604_v25  ;;  %v8020_v25 = vrot.slane %v14621_v54, 2  ;;  %v6846_v50 = vshrl.u32 %v13888_v44, 16 }
 0x4b4   : > { %v6450_v28 = vrot.slane %v6448_v59, 3 }
 0x4b5   : > { %14842 = vst [vmem:[#allocation87_spill] sm:$0xff] %v13936_v36  ;;  %6618 = vmatmul.bf16.gmra.mxu1 %v6446_v58  ;;  %v8019_v58 = vrot.slane %v14622_v27, 1  ;;  %v6848_v34 = vor.u32 %v6846_v50, %v6844_v16  ;;  %v6453_v16 = vrot.slane %v6451_v13, 4 }
 0x4b7   : > { %v13948_v6 = vpop.f32.mrf.mxu0  ;;  %v13960_v54 = vor.u32 %v8020_v25, %v8019_v58  ;;  %v6853_v55 = vsel %vm397_vm0, %v6848_v34, %v6852_v20 }
 0x4b8   : > { %14843 = vst [vmem:[#allocation88_spill] sm:$0xff] %v13948_v6  ;;  %v5605_v47 = vpop.f32.mrf.mxu2  ;;  %v13958_v6 = vsel %vm1337_vm2, %v8013_v61, %v8017_v15  ;;  %v14848_v61 = vshll.u32 %v13685_v56, 16 }
 0x4b9   : > { %v5606_v37 = vadd.f32 %v5605_v47, %v13634_v46  ;;  %v5877_v36 = vpop.f32.mrf.mxu3  ;;  %14844 = vst [vmem:[#allocation89_spill] sm:$0xff] %v13958_v6  ;;  %v13969_v46 = vsel %vm1337_vm2, %v8017_v15, %v13960_v54  ;;  %v10279_v47 = vld [vmem:[#allocation2 + $0x58] sm:$0xff]  ;;  %v6454_v15 = vor.u32 %v6453_v16, %v6450_v28  ;;  %v7425_v28 = vrot.slane %v13644_v14, 1 }
 0x4ba   : > { %14845 = vst [vmem:[#allocation90_spill] sm:$0xff] %v13960_v54  ;;  %v13964_v44 = vpop.f32.mrf.mxu1  ;;  %v7695_v7 = vrot.slane %v14848_v61, 1  ;;  %v6858_v13 = vshll.u32 %v10279_v47, 16 }
 0x4bb   : > { %v13962_v33 = vadd.f32 %v5877_v36, %v5606_v37  ;;  %14847 = vst [vmem:[#allocation92_spill] sm:$0xff] %v13969_v46  ;;  %v14849_v36 = vshrl.u32 %v13644_v14, 16  ;;  %v6550_v14 = vadd.f32 %v13703_v9, %v13148_v18 }
 0x4bd   : > { %14846 = vst [vmem:[#allocation91_spill] sm:$0xff] %v13962_v33  ;;  %7043 = vmatmul.bf16.gmra.mxu2 %v6853_v55  ;;  %v7691_v37 = vor.u32 %v14849_v36, %v7687_v57  ;;  %v6455_v55 = vsel %vm5634_vm7, %v6445_v41, %v6454_v15  ;;  %v6854_v57 = vshrl.u32 %v13930_v45, 16  ;;  %v6860_v36 = vrot.slane %v6858_v13, 1 }
 0x4be   : > { %7554 = vmatmul.bf16.gmra.mxu3 %v7424_v62  ;;  %v10862_v62 = vld [vmem:[#allocation2 + $0x94] sm:$0xff]  }
 0x4bf   : > { %v7836_v35 = vpop.f32.mrf.mxu0  ;;  %v7696_v58 = vsel %vm397_vm0, %v7691_v37, %v7695_v7  ;;  %v6457_v37 = vshrl.u32 %v10862_v62, 16 }
 0x4c0   : > { %v5608_v25 = vpop.f32.mrf.mxu2 }
 0x4c1   : > { %v5609_v34 = vadd.f32 %v5608_v25, %v13660_v39  ;;  %v5880_v50 = vpop.f32.mrf.mxu3  ;;  %v6459_v45 = vrot.slane %v6457_v37, 3 }
 0x4c2   : > { %v13980_v59 = vpop.f32.mrf.mxu1 }
 0x4c3   : > { %7880 = vmatmul.bf16.gmra.mxu0 %v7696_v58  ;;  %v13978_v52 = vadd.f32 %v5880_v50, %v5609_v34  ;;  %v6460_v34 = vshll.u32 %v10862_v62, 16  ;;  %v6856_v50 = vor.u32 %v6854_v57, %v6852_v20  ;;  %v14853_v20 = vshrl.u32 %v13685_v56, 16 }
 0x4c5   : > { %14850 = vst [vmem:[#allocation93_spill] sm:$0xff] %v13978_v52  ;;  %6623 = vmatmul.bf16.gmra.mxu1 %v6455_v55  ;;  %v6861_v41 = vsel %vm397_vm0, %v6856_v50, %v6860_v36  ;;  %v7426_v55 = vsel %vm897_vm1, %v7423_v53, %v7425_v28  ;;  %v6462_v13 = vrot.slane %v6460_v34, 4  ;;  %v7699_v62 = vor.u32 %v14853_v20, %v7695_v7  ;;  %v10920_v34 = vld [vmem:[#allocation2 + $0x98] sm:$0xff] }
 0x4c7   : > { %v7838_v16 = vpop.f32.mrf.mxu0 }
 0x4c8   : > { %v5610_v61 = vpop.f32.mrf.mxu2 }
 0x4c9   : > { %v5611_v39 = vadd.f32 %v5610_v61, %v13676_v31  ;;  %v5882_v25 = vpop.f32.mrf.mxu3  ;;  %v14852_v31 = vshll.u32 %v13723_v60, 16 }
 0x4ca   : > { %v13988_v27 = vpop.f32.mrf.mxu1 }
 0x4cb   : > { %v13986_v58 = vadd.f32 %v5882_v25, %v5611_v39  ;;  %v7703_v61 = vrot.slane %v14852_v31, 1  ;;  %v13998_v39 = vld [vmem:[#allocation2 + $0x60] sm:$0xff]  ;;  %v10502_v31 = vunpack.c.h.b16 %v10920_v34 }
 0x4cc   : > { %v6866_v7 = vshll.u32 %v13998_v39, 16 }
 0x4cd   : > { %14851 = vst [vmem:[#allocation94_spill] sm:$0xff] %v13986_v58  ;;  %7048 = vmatmul.bf16.gmra.mxu2 %v6861_v41  ;;  %v6463_v41 = vor.u32 %v6462_v13, %v6459_v45  ;;  %v7704_v53 = vsel %vm397_vm0, %v7699_v62, %v7703_v61  ;;  %v6303_v13 = vpack.c.b16 %v10502_v31, %v10502_v31  ;;  %v6862_v62 = vshrl.u32 %v10279_v47, 16 }
 0x4ce   : > { %7559 = vmatmul.bf16.gmra.mxu3 %v7426_v55 }
 0x4cf   : > { %v7841_v9 = vpop.f32.mrf.mxu0  ;;  %v6464_v45 = vsel %vm5634_vm7, %v6454_v15, %v6463_v41  ;;  %v6864_v54 = vor.u32 %v6862_v62, %v6860_v36 }
 0x4d0   : > { %v7009_v57 = vpop.f32.mrf.mxu2 }
 0x4d1   : > { %v7099_v25 = vadd.f32 %v7009_v57, %v6550_v14  ;;  %v7520_v50 = vpop.f32.mrf.mxu3  ;;  %v5526_v14 = vadd.f32 %v13192_v17, %v12754_v32  ;;  %v6868_v57 = vrot.slane %v6866_v7, 1  ;;  %v6466_v32 = vshrl.u32 %v6303_v13, 16 }
 0x4d2   : > { %v14001_v37 = vadd.f32 %v7836_v35, %v7520_v50  ;;  %v14003_v55 = vpop.f32.mrf.mxu1  ;;  %v6552_v35 = vadd.f32 %v13717_v5, %v13190_v8  ;;  %v6469_v17 = vshll.u32 %v6303_v13, 16 }
 0x4d3   : > { %7885 = vmatmul.bf16.gmra.mxu0 %v7704_v53  ;;  %v14006_v18 = vadd.f32 %v7099_v25, %v13199_v4  ;;  %v5886_v50 = vadd.f32 %v13194_v11, %v5526_v14  ;;  %v7427_v53 = vrot.slane %v13685_v56, 1  ;;  %v6869_v8 = vsel %vm397_vm0, %v6864_v54, %v6868_v57  ;;  %v14855_v14 = vld [vmem:[#allocation8_spill] sm:$0xff] }
 0x4d4   : > { %v14854_v11 = vshll.u32 %v13764_v40, 16  ;;  %v6468_v56 = vrot.slane %v6466_v32, 3  ;;  %v6555_v36 = vadd.f32 %v13741_v63, %v14855_v14 }
 0x4d5   : > { %6628 = vmatmul.bf16.gmra.mxu1 %v6464_v45  ;;  %v7428_v5 = vsel %vm897_vm1, %v7425_v28, %v7427_v53  ;;  %v14856_v45 = vshrl.u32 %v13723_v60, 16 }
 0x4d6   : > { %v7711_v7 = vrot.slane %v14854_v11, 1 }
 0x4d7   : > { %v7843_v47 = vpop.f32.mrf.mxu0  ;;  %v7707_v13 = vor.u32 %v14856_v45, %v7703_v61  ;;  %v14858_v61 = vld [vmem:[#allocation10_spill] sm:$0xff] }
 0x4d8   : > { %v7011_v20 = vpop.f32.mrf.mxu2 }
 0x4d9   : > { %v7100_v4 = vadd.f32 %v7011_v20, %v6552_v35  ;;  %v7522_v25 = vpop.f32.mrf.mxu3  ;;  %v10281_v20 = vld [vmem:[#allocation2 + $0x68] sm:$0xff] }
 0x4da   : > { %v14016_v34 = vadd.f32 %v7838_v16, %v7522_v25  ;;  %v14018_v15 = vpop.f32.mrf.mxu1  ;;  %v6471_v16 = vrot.slane %v6469_v17, 4  ;;  %v14857_v25 = vld [vmem:[#allocation9_spill] sm:$0xff] }
 0x4db   : > { %v14020_v31 = vadd.f32 %v7100_v4, %v5886_v50  ;;  %v7712_v50 = vsel %vm397_vm0, %v7707_v13, %v7711_v7 }
 0x4dc   : > { %v6472_v17 = vor.u32 %v6471_v16, %v6468_v56 }
 0x4dd   : > { %7053 = vmatmul.bf16.gmra.mxu2 %v6869_v8  ;;  %v6874_v8 = vshll.u32 %v10281_v20, 16 }
 0x4de   : > { %7564 = vmatmul.bf16.gmra.mxu3 %v7428_v5  ;;  %v6473_v63 = vsel %vm5634_vm7, %v6463_v41, %v6472_v17  ;;  %v6557_v5 = vadd.f32 %v13758_v10, %v14858_v61  ;;  %v14861_v17 = vshrl.u32 %v13764_v40, 16 }
 0x4df   : > { %v7846_v11 = vpop.f32.mrf.mxu0 }
 0x4e0   : > { %v7014_v35 = vpop.f32.mrf.mxu2 }
 0x4e1   : > { %v7101_v62 = vadd.f32 %v7014_v35, %v6555_v36  ;;  %v7525_v54 = vpop.f32.mrf.mxu3  ;;  %v6870_v36 = vshrl.u32 %v13998_v39, 16  ;;  %v7429_v35 = vrot.slane %v13723_v60, 1  ;;  %v14860_v39 = vld [vmem:[#allocation13_spill] sm:$0xff]  ;;  %v7715_v60 = vor.u32 %v14861_v17, %v7711_v7 }
 0x4e2   : > { %v14031_v28 = vadd.f32 %v7841_v9, %v7525_v54  ;;  %v14033_v4 = vpop.f32.mrf.mxu1  ;;  %v6876_v9 = vrot.slane %v6874_v8, 1  ;;  %v14859_v54 = vshll.u32 %v13802_v2, 16  ;;  %v10282_v8 = vld [vmem:[#allocation2 + $0x70] sm:$0xff] }
 0x4e3   : > { %7890 = vmatmul.bf16.gmra.mxu0 %v7712_v50  ;;  %v14036_v32 = vadd.f32 %v7101_v62, %v14857_v25  ;;  %v6872_v56 = vor.u32 %v6870_v36, %v6868_v57  ;;  %v7430_v10 = vsel %vm897_vm1, %v7427_v53, %v7429_v35  ;;  %v6560_v25 = vadd.f32 %v13782_v48, %v14860_v39  ;;  %v14862_v36 = vld [vmem:[#allocation14_spill] sm:$0xff]  ;;  %v14863_v48 = vld [vmem:[#allocation19_spill] sm:$0xff] }
 0x4e4   : > { %v7719_v50 = vrot.slane %v14859_v54, 1  ;;  %v6878_v54 = vshrl.u32 %v10281_v20, 16 }
 0x4e5   : > { %6633 = vmatmul.bf16.gmra.mxu1 %v6473_v63  ;;  %v6877_v41 = vsel %vm397_vm0, %v6872_v56, %v6876_v9  ;;  %v6882_v56 = vshll.u32 %v10282_v8, 16 }
 0x4e7   : > { %v7848_v61 = vpop.f32.mrf.mxu0  ;;  %v6884_v39 = vrot.slane %v6882_v56, 1  ;;  %v14866_v56 = vld [vmem:[#allocation18_spill] sm:$0xff] }
 0x4e8   : > { %v7016_v14 = vpop.f32.mrf.mxu2 }
 0x4e9   : > { %v14042_v45 = vadd.f32 %v7016_v14, %v6557_v5  ;;  %v7527_v13 = vpop.f32.mrf.mxu3  ;;  %v7720_v5 = vsel %vm397_vm0, %v7715_v60, %v7719_v50 }
 0x4ea   : > { %v14045_v62 = vadd.f32 %v7843_v47, %v7527_v13  ;;  %v14047_v16 = vpop.f32.mrf.mxu1 }
 0x4ed   : > { %7058 = vmatmul.bf16.gmra.mxu2 %v6877_v41  ;;  %v14864_v41 = vld [vmem:[#allocation15_spill] sm:$0xff] }
 0x4ee   : > { %7569 = vmatmul.bf16.gmra.mxu3 %v7430_v10  ;;  %v6562_v7 = vadd.f32 %v13796_v3, %v14864_v41  ;;  %v14865_v3 = vshll.u32 %v13843_v43, 16 }
 0x4f0   : > { %v7019_v47 = vpop.f32.mrf.mxu2  ;;  %v7727_v20 = vrot.slane %v14865_v3, 1 }
 0x4f1   : > { %v7103_v57 = vadd.f32 %v7019_v47, %v6560_v25  ;;  %v7530_v63 = vpop.f32.mrf.mxu3  ;;  %v6880_v47 = vor.u32 %v6878_v54, %v6876_v9  ;;  %v10283_v9 = vld [vmem:[#allocation2 + $0x78] sm:$0xff] }
 0x4f2   : > { %v14058_v14 = vadd.f32 %v7846_v11, %v7530_v63  ;;  %v14060_v53 = vpop.f32.mrf.mxu1  ;;  %v7431_v11 = vrot.slane %v13764_v40, 1  ;;  %v14867_v40 = vshrl.u32 %v13802_v2, 16  ;;  %v6894_v6 = vshrl.u32 %v10283_v9, 16 }
 0x4f3   : > { %7895 = vmatmul.bf16.gmra.mxu0 %v7720_v5  ;;  %v14063_v13 = vadd.f32 %v7103_v57, %v14862_v36  ;;  %v7851_v57 = vpop.f32.mrf.mxu0  ;;  %v6885_v5 = vsel %vm397_vm0, %v6880_v47, %v6884_v39  ;;  %v14868_v47 = vld [vmem:[#allocation20_spill] sm:$0xff] }
 0x4f4   : > { %v7432_v36 = vsel %vm897_vm1, %v7429_v35, %v7431_v11 }
 0x4f5   : > { %8106 = vmatmul.bf16.vlgmr.msra.gmra.mxu1 %v14863_v48  ;;  %v6565_v48 = vadd.f32 %v13820_v51, %v14866_v56  ;;  %v14869_v51 = vld [vmem:[#allocation23_spill] sm:$0xff]  ;;  %v14870_v56 = vld [vmem:[#allocation21_spill] sm:$0xff] }
 0x4f8   : > { %v7021_v10 = vpop.f32.mrf.mxu2 }
 0x4f9   : > { %v14068_v25 = vadd.f32 %v7021_v10, %v6562_v7  ;;  %v7532_v17 = vpop.f32.mrf.mxu3 }
 0x4fa   : > { %v14071_v60 = vadd.f32 %v7848_v61, %v7532_v17  ;;  %v14073_v63 = vpop.f32.mrf.mxu1  ;;  %v7723_v61 = vor.u32 %v14867_v40, %v7719_v50  ;;  %v6567_v50 = vadd.f32 %v13834_v49, %v14870_v56  ;;  %v14871_v49 = vshll.u32 %v13881_v23, 16 }
 0x4fb   : > { %v7853_v3 = vpop.f32.mrf.mxu0 }
 0x4fc   : > { %v7728_v54 = vsel %vm397_vm0, %v7723_v61, %v7727_v20  ;;  %v7433_v61 = vrot.slane %v13802_v2, 1  ;;  %v7735_v56 = vrot.slane %v14871_v49, 1  ;;  %v14873_v2 = vshrl.u32 %v13843_v43, 16  ;;  %v14874_v49 = vld [vmem:[#allocation27_spill] sm:$0xff] }
 0x4fd   : > { %7063 = vmatmul.bf16.gmra.mxu2 %v6885_v5 }
 0x4fe   : > { %7574 = vmatmul.bf16.gmra.mxu3 %v7432_v36  ;;  %v6890_v36 = vshll.u32 %v10283_v9, 16 }
 0x500   : > { %v7024_v41 = vpop.f32.mrf.mxu2 }
 0x501   : > { %v7105_v7 = vadd.f32 %v7024_v41, %v6565_v48  ;;  %v7535_v10 = vpop.f32.mrf.mxu3  ;;  %v6886_v48 = vshrl.u32 %v10282_v8, 16  ;;  %v6892_v41 = vrot.slane %v6890_v36, 1  ;;  %v14872_v8 = vld [vmem:[#allocation26_spill] sm:$0xff] }
 0x502   : > { %v14084_v17 = vadd.f32 %v7851_v57, %v7535_v10  ;;  %v14086_v35 = vpop.f32.mrf.mxu1  ;;  %v6570_v36 = vadd.f32 %v13861_v21, %v14872_v8  ;;  %v14875_v21 = vld [vmem:[#allocation29_spill] sm:$0xff]  ;;  %v14876_v8 = vld [vmem:[#allocation28_spill] sm:$0xff] }
 0x503   : > { %7900 = vmatmul.bf16.gmra.mxu0 %v7728_v54  ;;  %v14089_v5 = vadd.f32 %v7105_v7, %v14868_v47  ;;  %v6888_v54 = vor.u32 %v6886_v48, %v6884_v39  ;;  %v10284_v39 = vld [vmem:[#allocation2 + $0x80] sm:$0xff] }
 0x504   : > { %v6898_v58 = vshll.u32 %v10284_v39, 16  ;;  %v6902_v33 = vshrl.u32 %v10284_v39, 16  ;;  %v14885_v39 = vld [vmem:[#allocation38_spill] sm:$0xff] }
 0x505   : > { %8111 = vmatmul.bf16.gmra.mxu1 %v14869_v51  ;;  %v6893_v47 = vsel %vm397_vm0, %v6888_v54, %v6892_v41  ;;  %v7434_v51 = vsel %vm897_vm1, %v7431_v11, %v7433_v61 }
 0x508   : > { %v7026_v40 = vpop.f32.mrf.mxu2 }
 0x509   : > { %v14094_v46 = vadd.f32 %v7026_v40, %v6567_v50  ;;  %v7537_v57 = vpop.f32.mrf.mxu3  ;;  %v7856_v50 = vpop.f32.mrf.mxu0 }
 0x50a   : > { %v14097_v10 = vadd.f32 %v7853_v3, %v7537_v57  ;;  %v14099_v7 = vpop.f32.mrf.mxu1  ;;  %v7731_v3 = vor.u32 %v14873_v2, %v7727_v20  ;;  %v6572_v20 = vadd.f32 %v13875_v19, %v14876_v8  ;;  %v14877_v19 = vshll.u32 %v13922_v1, 16 }
 0x50c   : > { %v7736_v54 = vsel %vm397_vm0, %v7731_v3, %v7735_v56  ;;  %v7435_v3 = vrot.slane %v13843_v43, 1  ;;  %v7743_v9 = vrot.slane %v14877_v19, 1  ;;  %v14881_v19 = vld [vmem:[#allocation34_spill] sm:$0xff] }
 0x50d   : > { %7068 = vmatmul.bf16.gmra.mxu2 %v6893_v47 }
 0x50e   : > { %7579 = vmatmul.bf16.gmra.mxu3 %v7434_v51 }
 0x510   : > { %v7029_v40 = vpop.f32.mrf.mxu2 }
 0x511   : > { %v7107_v48 = vadd.f32 %v7029_v40, %v6570_v36  ;;  %v7540_v57 = vpop.f32.mrf.mxu3  ;;  %v6900_v36 = vrot.slane %v6898_v58, 1  ;;  %v7858_v40 = vpop.f32.mrf.mxu0  ;;  %v14878_v58 = vld [vmem:[#allocation32_spill] sm:$0xff] }
 0x512   : > { %v14110_v47 = vadd.f32 %v7856_v50, %v7540_v57  ;;  %v14112_v11 = vpop.f32.mrf.mxu1  ;;  %v6575_v8 = vadd.f32 %v13899_v12, %v14878_v58 }
 0x513   : > { %7905 = vmatmul.bf16.gmra.mxu0 %v7736_v54  ;;  %v14115_v51 = vadd.f32 %v7107_v48, %v14874_v49  ;;  %v6896_v54 = vor.u32 %v6894_v6, %v6892_v41 }
 0x515   : > { %8116 = vmatmul.bf16.gmra.mxu1 %v14875_v21  ;;  %v6901_v49 = vsel %vm397_vm0, %v6896_v54, %v6900_v36  ;;  %v7436_v21 = vsel %vm897_vm1, %v7433_v61, %v7435_v3  ;;  %v14880_v54 = vld [vmem:[#allocation33_spill] sm:$0xff] }
 0x518   : > { %v7031_v2 = vpop.f32.mrf.mxu2 }
 0x519   : > { %v14120_v52 = vadd.f32 %v7031_v2, %v6572_v20  ;;  %v7542_v50 = vpop.f32.mrf.mxu3  ;;  %v14879_v20 = vshrl.u32 %v13881_v23, 16 }
 0x51a   : > { %v14123_v57 = vadd.f32 %v7858_v40, %v7542_v50  ;;  %v14125_v48 = vpop.f32.mrf.mxu1  ;;  %v10285_v40 = vld [vmem:[#allocation2 + $0x88] sm:$0xff] }
 0x51b   : > { %v7739_v43 = vor.u32 %v14879_v20, %v7735_v56 }
 0x51d   : > { %7073 = vmatmul.bf16.gmra.mxu2 %v6901_v49  ;;  %v7744_v41 = vsel %vm397_vm0, %v7739_v43, %v7743_v9  ;;  %v6906_v49 = vshll.u32 %v10285_v40, 16  ;;  %v6904_v43 = vor.u32 %v6902_v33, %v6900_v36  ;;  %v10286_v33 = vld [vmem:[#allocation2 + $0x90] sm:$0xff] }
 0x51e   : > { %7584 = vmatmul.bf16.gmra.mxu3 %v7436_v21  ;;  %v14882_v21 = vld [vmem:[#allocation35_spill] sm:$0xff] }
 0x51f   : > { %v6577_v12 = vadd.f32 %v13913_v0, %v14882_v21  ;;  %v6908_v56 = vrot.slane %v6906_v49, 1  ;;  %v14884_v0 = vshll.u32 %v13928_v26, 16  ;;  %v6580_v49 = vadd.f32 %v13938_v30, %v14885_v39 }
 0x520   : > { %v7034_v2 = vpop.f32.mrf.mxu2  ;;  %v6910_v30 = vshrl.u32 %v10285_v40, 16  ;;  %v10287_v40 = vld [vmem:[#allocation2 + $0x98] sm:$0xff] }
 0x521   : > { %v7109_v6 = vadd.f32 %v7034_v2, %v6575_v8  ;;  %v7437_v8 = vrot.slane %v13881_v23, 1  ;;  %v14155_v21 = vrot.slane %v14884_v0, 1  ;;  %v7439_v0 = vrot.slane %v13922_v1, 1 }
 0x522   : > { %v14136_v50 = vpop.f32.mrf.mxu1  ;;  %v6912_v39 = vor.u32 %v6910_v30, %v6908_v56 }
 0x523   : > { %7910 = vmatmul.bf16.gmra.mxu0 %v7744_v41  ;;  %v14139_v61 = vadd.f32 %v7109_v6, %v14880_v54  ;;  %v6909_v41 = vsel %vm397_vm0, %v6904_v43, %v6908_v56  ;;  %v7438_v6 = vsel %vm897_vm1, %v7435_v3, %v7437_v8  ;;  %v14883_v54 = vshrl.u32 %v13922_v1, 16  ;;  %v14886_v1 = vld [vmem:[#allocation42_spill] sm:$0xff] }
 0x524   : > { %v6582_v43 = vadd.f32 %v13964_v44, %v13457_v38  ;;  %v6585_v38 = vadd.f32 %v13980_v59, %v13468_v42  ;;  %v14624_v42 = vrot.slane %v13928_v26, 1  ;;  %v6675_v59 = vld [vmem:[#allocation2 + $0xa0] sm:$0x1] }
 0x525   : > { %8121 = vmatmul.bf16.gmra.mxu1 %v14881_v19  ;;  %v7747_v19 = vor.u32 %v14883_v54, %v7743_v9  ;;  %v6914_v9 = vshll.u32 %v10286_v33, 16 }
 0x528   : > { %v7036_v58 = vpop.f32.mrf.mxu2 }
 0x529   : > { %v14144_v20 = vadd.f32 %v7036_v58, %v6577_v12  ;;  %v7752_v12 = vsel %vm397_vm0, %v7747_v19, %v14155_v21 }
 0x52a   : > { %v14147_v2 = vpop.f32.mrf.mxu1 }
 0x52d   : > { %7078 = vmatmul.bf16.gmra.mxu2 %v6909_v41 }
 0x52e   : > { %7589 = vmatmul.bf16.gmra.mxu3 %v7438_v6  ;;  %v6916_v6 = vrot.slane %v6914_v9, 1  ;;  %v14888_v9 = vld [vmem:[#allocation40_spill] sm:$0xff] }
 0x530   : > { %v7039_v23 = vpop.f32.mrf.mxu2 }
 0x531   : > { %v7111_v36 = vadd.f32 %v7039_v23, %v6580_v49 }
 0x532   : > { %v14161_v58 = vpop.f32.mrf.mxu1 }
 0x533   : > { %7915 = vmatmul.bf16.gmra.mxu0 %v7752_v12  ;;  %v14164_v3 = vadd.f32 %v7111_v36, %v13463_v29  ;;  %v6917_v29 = vsel %vm397_vm0, %v6912_v39, %v6916_v6  ;;  %v6922_v12 = vshll.u32 %v10287_v40, 16 }
 0x535   : > { %8126 = vmatmul.bf16.gmra.mxu1 %v13455_v24  ;;  %v7440_v24 = vsel %vm897_vm1, %v7437_v8, %v7439_v0  ;;  %v6918_v8 = vshrl.u32 %v10286_v33, 16  ;;  %v6924_v30 = vrot.slane %v6922_v12, 1  ;;  %v14890_v33 = vld [vmem:[#allocation41_spill] sm:$0xff] }
 0x537   : > { %v6920_v39 = vor.u32 %v6918_v8, %v6916_v6 }
 0x538   : > { %v7041_v41 = vpop.f32.mrf.mxu2 }
 0x539   : > { %v7112_v54 = vadd.f32 %v7041_v41, %v6582_v43  ;;  %v6587_v43 = vadd.f32 %v13988_v27, %v14888_v9  ;;  %v7442_v27 = vsel %vm897_vm1, %v7439_v0, %v14624_v42 }
 0x53a   : > { %v14170_v19 = vpop.f32.mrf.mxu1 }
 0x53b   : > { %v14173_v49 = vadd.f32 %v7112_v54, %v13487_v22  ;;  %v14887_v22 = vld [vmem:[#allocation39_spill] sm:$0xff] }
 0x53d   : > { %7083 = vmatmul.bf16.gmra.mxu2 %v6917_v29 }
 0x53e   : > { %7594 = vmatmul.bf16.gmra.mxu3 %v7440_v24  ;;  %v14889_v24 = vld [vmem:[#allocation44_spill] sm:$0xff] }
 0x540   : > { %v7044_v44 = vpop.f32.mrf.mxu2 }
 0x541   : > { %v7113_v23 = vadd.f32 %v7044_v44, %v6585_v38  ;;  %v6925_v44 = vsel %vm397_vm0, %v6920_v39, %v6924_v30  ;;  %v14893_v39 = vld [vmem:[#allocation43_spill] sm:$0xff] }
 0x542   : > { %v14179_v36 = vpop.f32.mrf.mxu1 }
 0x543   : > { %v14182_v56 = vadd.f32 %v7113_v23, %v14886_v1  ;;  %v6766_v23 = vunpack.c.l.b16 %v6675_v59  ;;  %v6590_v1 = vadd.f32 %v14003_v55, %v14890_v33  ;;  %v6926_v59 = vshrl.u32 %v10287_v40, 16 }
 0x545   : > { %8131 = vmatmul.bf16.gmra.mxu1 %v14887_v22  ;;  %v6785_v22 = vpack.c.b16 %v6766_v23, %v6766_v23  ;;  %v14894_v23 = vld [vmem:[#allocation50_spill] sm:$0xff] }
 0x547   : > { %v6930_v8 = vshll.u32 %v6785_v22, 16 }
 0x548   : > { %v7046_v41 = vpop.f32.mrf.mxu2 }
 0x549   : > { %v7114_v54 = vadd.f32 %v7046_v41, %v6587_v43  ;;  %v14891_v43 = vld [vmem:[#allocation47_spill] sm:$0xff] }
 0x54a   : > { %v14188_v29 = vpop.f32.mrf.mxu1 }
 0x54b   : > { %v14191_v38 = vadd.f32 %v7114_v54, %v14889_v24  ;;  %v14892_v54 = vld [vmem:[#allocation45_spill] sm:$0xff]  ;;  %v6592_v24 = vadd.f32 %v14018_v15, %v14893_v39 }
 0x54d   : > { %7088 = vmatmul.bf16.gmra.mxu2 %v6925_v44  ;;  %v6928_v44 = vor.u32 %v6926_v59, %v6924_v30  ;;  %v14896_v30 = vld [vmem:[#allocation52_spill] sm:$0xff] }
 0x54e   : > { %7599 = vmatmul.bf16.gmra.mxu3 %v7442_v27  ;;  %v6932_v27 = vrot.slane %v6930_v8, 1  ;;  %v14897_v8 = vld [vmem:[#allocation49_spill] sm:$0xff] }
 0x550   : > { %v7049_v12 = vpop.f32.mrf.mxu2 }
 0x551   : > { %v7115_v6 = vadd.f32 %v7049_v12, %v6590_v1  ;;  %v6933_v1 = vsel %vm397_vm0, %v6928_v44, %v6932_v27  ;;  %v14895_v12 = vld [vmem:[#allocation46_spill] sm:$0xff] }
 0x552   : > { %v14199_v9 = vpop.f32.mrf.mxu1  ;;  %v6595_v40 = vadd.f32 %v14033_v4, %v14895_v12  ;;  %v14901_v4 = vld [vmem:[#allocation51_spill] sm:$0xff] }
 0x553   : > { %v14202_v41 = vadd.f32 %v7115_v6, %v14891_v43  ;;  %v6600_v27 = vadd.f32 %v14060_v53, %v14901_v4  ;;  %v8341_v12 = vld [vmem:[%s11005_s14 + $0x8] sm:$0xe] }
 0x555   : > { %8136 = vmatmul.bf16.gmra.mxu1 %v14892_v54 }
 0x558   : > { %v7051_v0 = vpop.f32.mrf.mxu2 }
 0x559   : > { %v7116_v42 = vadd.f32 %v7051_v0, %v6592_v24  ;;  %v14899_v0 = vld [vmem:[#allocation55_spill] sm:$0xff] }
 0x55a   : > { %v14207_v55 = vpop.f32.mrf.mxu1 }
 0x55b   : > { %v14210_v33 = vadd.f32 %v7116_v42, %v14894_v23  ;;  %v14898_v42 = vld [vmem:[#allocation48_spill] sm:$0xff] }
 0x55c   : > { %v6597_v54 = vadd.f32 %v14047_v16, %v14898_v42  ;;  %v8454_v42 = vunpack.c.l.bf16 %v8341_v12  ;;  %v14906_v12 = vld [vmem:[#allocation60_spill] sm:$0xff] }
 0x55d   : > { %7093 = vmatmul.bf16.gmra.mxu2 %v6933_v1 }
 0x560   : > { %v7054_v22 = vpop.f32.mrf.mxu2 }
 0x561   : > { %v7117_v6 = vadd.f32 %v7054_v22, %v6595_v40  ;;  %v8342_v40 = vld [vmem:[%s11005_s14 + $0xc] sm:$0xf]  ;;  %v14902_v22 = vld [vmem:[#allocation57_spill] sm:$0xff] }
 0x562   : > { %v14215_v15 = vpop.f32.mrf.mxu1 }
 0x563   : > { %v14218_v43 = vadd.f32 %v7117_v6, %v14896_v30 }
 0x565   : > { %8141 = vmatmul.bf16.gmra.mxu1 %v14897_v8  ;;  %v10794_v8 = vld [vmem:[%s11005_s14 + $0x10] sm:$0xff]  }
 0x566   : > { %v10509_v4 = vunpack.c.l.bf16 %v10794_v8 }
 0x568   : > { %v7056_v59 = vpop.f32.mrf.mxu2 }
 0x569   : > { %v7118_v39 = vadd.f32 %v7056_v59, %v6597_v54  ;;  %v8455_v54 = vunpack.c.l.bf16 %v8342_v40 }
 0x56a   : > { %v14223_v24 = vpop.f32.mrf.mxu1 }
 0x56b   : > { %v14226_v44 = vadd.f32 %v7118_v39, %v14899_v0  ;;  %v14904_v39 = vld [vmem:[#allocation54_spill] sm:$0xff]  ;;  %v14905_v0 = vld [vmem:[#allocation53_spill] sm:$0xff] }
 0x56c   : > { %v6602_v53 = vadd.f32 %v14073_v63, %v14905_v0 }
 0x56d   : > { %14900 = vst [vmem:[#allocation8_spill] sm:$0xff] %v14226_v44 }
 0x570   : > { %v7059_v23 = vpop.f32.mrf.mxu2 }
 0x571   : > { %v7119_v1 = vadd.f32 %v7059_v23, %v6600_v27  ;;  %v14244_v27 = vld [vmem:[%s14574_s4] ss:$0 sm:$0xff] }
 0x572   : > { %v8107_v30 = vpop.f32.mrf.mxu1 }
 0x573   : > { %v14233_v6 = vadd.f32 %v7119_v1, %v14902_v22  ;;  %v8197_v16 = vadd.f32 %v8107_v30, %v14001_v37  ;;  %v8529_v1 = vrot.slane %v8454_v42, 3  ;;  %v8530_v37 = vrot.slane %v8455_v54, 3 }
 0x574   : > { %v8532_v30 = vrot.slane %v10509_v4, 3 }
 0x575   : > { %14903 = vst [vmem:[#allocation9_spill] sm:$0xff] %v14233_v6  ;;  %v8269_v59 = vadd.f32 %v8197_v16, %v14006_v18  ;;  %8146 = vmatmul.bf16.gmra.mxu1 %v14904_v39  ;;  %v8531_v39 = vsel %vm2973_vm5, %v8529_v1, %v8530_v37  ;;  %v14907_v6 = vld [vmem:[#allocation56_spill] sm:$0xff] }
 0x576   : > { %v6605_v44 = vadd.f32 %v14086_v35, %v14907_v6  ;;  %v8533_v42 = vsel %vm2973_vm5, %v8530_v37, %v8532_v30  ;;  %v10510_v35 = vunpack.c.h.bf16 %v10794_v8  ;;  %v14910_v6 = vld [vmem:[#allocation4_spill] sm:$0xff]  ;;  %v14911_v37 = vld [vmem:[#allocation11_spill] sm:$0xff] }
 0x577   : > { %v8418_v16 = vadd.f32 %v14244_v27, %v8269_v59  ;;  %v14908_v59 = vld [vmem:[#allocation62_spill] sm:$0xff] }
 0x578   : > { %v7061_v23 = vpop.f32.mrf.mxu2 }
 0x579   : > { %v7120_v22 = vadd.f32 %v7061_v23, %v6602_v53  ;;  %v8638_v54 = vadd.f32 %v8531_v39, %v8418_v16 }
 0x57a   : > { %v8109_v18 = vpop.f32.mrf.mxu1 }
 0x57b   : > { %v14247_v40 = vadd.f32 %v7120_v22, %v14906_v12  ;;  %v8198_v63 = vadd.f32 %v8109_v18, %v14016_v34  ;;  %v8674_v18 = vmax.f32 %v8638_v54, 0.0 }
 0x57d   : > { %v8270_v0 = vadd.f32 %v8198_v63, %v14020_v31  ;;  %v10795_v63 = vld [vmem:[%s11005_s14 + $0x18] sm:$0xff]  }
 0x57f   : > { %v8419_v53 = vadd.f32 %v14244_v27, %v8270_v0  ;;  %v14912_v0 = vld [vmem:[#allocation59_spill] sm:$0xff] }
 0x580   : > { %v7064_v23 = vpop.f32.mrf.mxu2 }
 0x581   : > { %v7121_v4 = vadd.f32 %v7064_v23, %v6605_v44  ;;  %v8639_v22 = vadd.f32 %v8533_v42, %v8419_v53  ;;  %v5531_v44 = vadd.f32 %v14911_v37, %v14910_v6  ;;  %v14913_v42 = vld [vmem:[#allocation58_spill] sm:$0xff]  ;;  %v8534_v23 = vrot.slane %v10510_v35, 3  ;;  %v14916_v37 = vld [vmem:[#allocation61_spill] sm:$0xff] }
 0x582   : > { %v8112_v34 = vpop.f32.mrf.mxu1  ;;  %v6607_v54 = vadd.f32 %v14099_v7, %v14913_v42 }
 0x583   : > { %v14259_v12 = vadd.f32 %v7121_v4, %v14908_v59  ;;  %v8675_v1 = vmax.f32 %v8639_v22, 0.0  ;;  %v8199_v31 = vadd.f32 %v8112_v34, %v14031_v28  ;;  %v10513_v28 = vunpack.c.l.bf16 %v10795_v63  ;;  %v14914_v22 = vld [vmem:[#allocation12_spill] sm:$0xff]  ;;  %v14915_v34 = vld [vmem:[#allocation65_spill] sm:$0xff] }
 0x584   : > { %v5888_v59 = vadd.f32 %v14914_v22, %v5531_v44  ;;  %v8535_v7 = vsel %vm2973_vm5, %v8532_v30, %v8534_v23  ;;  %v6610_v44 = vadd.f32 %v14112_v11, %v14916_v37  ;;  %v10796_v11 = vld [vmem:[%s11005_s14 + $0x20] sm:$0xff]  }
 0x585   : > { %14909 = vst [vmem:[#allocation10_spill] sm:$0xff] %v14259_v12  ;;  %v10578_v16 = vpack.c.bf16 %v8675_v1, %v8674_v18  ;;  %v8271_v39 = vadd.f32 %v8199_v31, %v14036_v32  ;;  %8151 = vmatmul.bf16.gmra.mxu1 %v14912_v0  ;;  %v8536_v6 = vrot.slane %v10513_v28, 3  ;;  %v14283_v31 = vpop.f32.mrf.mxu0 }
 0x586   : > { %v7174_v18 = vadd.f32 %v14042_v45, %v5888_v59  ;;  %v10514_v59 = vunpack.c.h.bf16 %v10795_v63 }
 0x587   : > { %10579 = vst [vmem:[%s14266_s13] sm:$0xff] %v10578_v16   ;;  %v8420_v32 = vadd.f32 %v14244_v27, %v8271_v39  ;;  %v14287_v16 = vpop.f32.mrf.mxu3  ;;  %v8537_v0 = vsel %vm2973_vm5, %v8534_v23, %v8536_v6 }
 0x588   : > { %v7066_v53 = vpop.f32.mrf.mxu2 }
 0x589   : > { %v7122_v4 = vadd.f32 %v7066_v53, %v6607_v54  ;;  %v8640_v42 = vadd.f32 %v8535_v7, %v8420_v32  ;;  %v14920_v7 = vld [vmem:[#allocation64_spill] sm:$0xff] }
 0x58a   : > { %v8114_v12 = vpop.f32.mrf.mxu1 }
 0x58b   : > { %v14277_v8 = vadd.f32 %v7122_v4, %v14915_v34  ;;  %v8200_v1 = vadd.f32 %v8114_v12, %v14045_v62  ;;  %v14917_v12 = vld [vmem:[#allocation67_spill] sm:$0xff]  ;;  %v8676_v53 = vmax.f32 %v8640_v42, 0.0  ;;  %v14918_v34 = vld [vmem:[#allocation5_spill] sm:$0xff] }
 0x58d   : > { %v8272_v35 = vadd.f32 %v8200_v1, %v7174_v18  ;;  %v14919_v18 = vld [vmem:[#allocation16_spill] sm:$0xff] }
 0x58e   : > { %v5536_v23 = vadd.f32 %v14919_v18, %v14918_v34  ;;  %v14924_v18 = vld [vmem:[#allocation66_spill] sm:$0xff] }
 0x58f   : > { %v8421_v45 = vadd.f32 %v14244_v27, %v8272_v35  ;;  %v14921_v35 = vld [vmem:[#allocation63_spill] sm:$0xff] }
 0x590   : > { %v7069_v54 = vpop.f32.mrf.mxu2  ;;  %v6612_v37 = vadd.f32 %v14125_v48, %v14921_v35 }
 0x591   : > { %v7123_v39 = vadd.f32 %v7069_v54, %v6610_v44  ;;  %v8641_v62 = vadd.f32 %v8537_v0, %v8421_v45  ;;  %v10517_v44 = vunpack.c.l.bf16 %v10796_v11  ;;  %v14302_v0 = vpop.f32.mrf.mxu0  ;;  %v14305_v45 = vpop.f32.mrf.mxu3  ;;  %v14922_v54 = vld [vmem:[#allocation17_spill] sm:$0xff] }
 0x592   : > { %v8117_v28 = vpop.f32.mrf.mxu1 }
 0x593   : > { %v14292_v30 = vadd.f32 %v7123_v39, %v14917_v12  ;;  %v8677_v4 = vmax.f32 %v8641_v62, 0.0  ;;  %v8201_v22 = vadd.f32 %v8117_v28, %v14058_v14  ;;  %v8538_v14 = vrot.slane %v10514_v59, 3  ;;  %v14923_v62 = vld [vmem:[#allocation70_spill] sm:$0xff] }
 0x594   : > { %v5890_v39 = vadd.f32 %v14922_v54, %v5536_v23  ;;  %v8540_v28 = vrot.slane %v10517_v44, 3  ;;  %v6615_v59 = vadd.f32 %v14136_v50, %v14924_v18 }
 0x595   : > { %v10583_v32 = vpack.c.bf16 %v8677_v4, %v8676_v53  ;;  %v8273_v1 = vadd.f32 %v8201_v22, %v14063_v13  ;;  %8156 = vmatmul.bf16.gmra.mxu1 %v14920_v7  ;;  %v8539_v22 = vsel %vm2973_vm5, %v8536_v6, %v8538_v14 }
 0x596   : > { %v7176_v53 = vadd.f32 %v14068_v25, %v5890_v39  ;;  %v8541_v23 = vsel %vm2973_vm5, %v8538_v14, %v8540_v28  ;;  %v10797_v14 = vld [vmem:[%s11005_s14 + $0x28] sm:$0xff]   ;;  %v10518_v39 = vunpack.c.h.bf16 %v10796_v11 }
 0x597   : > { %10811 = vst [vmem:[%s14266_s13 + $0x8] sm:$0xff] %v10583_v32   ;;  %v8422_v48 = vadd.f32 %v14244_v27, %v8273_v1 }
 0x598   : > { %v7071_v42 = vpop.f32.mrf.mxu2 }
 0x599   : > { %v7124_v63 = vadd.f32 %v7071_v42, %v6612_v37  ;;  %v8642_v32 = vadd.f32 %v8539_v22, %v8422_v48  ;;  %v14319_v44 = vpop.f32.mrf.mxu0  ;;  %v14321_v1 = vpop.f32.mrf.mxu3  ;;  %v14928_v22 = vld [vmem:[#allocation69_spill] sm:$0xff] }
 0x59a   : > { %v8119_v13 = vpop.f32.mrf.mxu1 }
 0x59b   : > { %v14309_v12 = vadd.f32 %v7124_v63, %v14923_v62  ;;  %v8202_v4 = vadd.f32 %v8119_v13, %v14071_v60  ;;  %v14925_v60 = vld [vmem:[#allocation72_spill] sm:$0xff]  ;;  %v8678_v63 = vmax.f32 %v8642_v32, 0.0  ;;  %v14926_v62 = vld [vmem:[#allocation22_spill] sm:$0xff]  ;;  %v8542_v32 = vrot.slane %v10518_v39, 3 }
 0x59c   : > { %v14927_v13 = vld [vmem:[#allocation24_spill] sm:$0xff] }
 0x59d   : > { %v8274_v34 = vadd.f32 %v8202_v4, %v7176_v53  ;;  %v5541_v53 = vadd.f32 %v14927_v13, %v14926_v62  ;;  %v14932_v62 = vld [vmem:[#allocation71_spill] sm:$0xff] }
 0x59e   : > { %v6620_v13 = vadd.f32 %v14161_v58, %v14932_v62  ;;  %v14934_v58 = vld [vmem:[#allocation6_spill] sm:$0xff] }
 0x59f   : > { %v8423_v7 = vadd.f32 %v14244_v27, %v8274_v34  ;;  %v14929_v34 = vld [vmem:[#allocation68_spill] sm:$0xff] }
 0x5a0   : > { %v7074_v35 = vpop.f32.mrf.mxu2  ;;  %v6617_v18 = vadd.f32 %v14147_v2, %v14929_v34 }
 0x5a1   : > { %v7125_v37 = vadd.f32 %v7074_v35, %v6615_v59  ;;  %v8643_v25 = vadd.f32 %v8541_v23, %v8423_v7  ;;  %v10521_v59 = vunpack.c.l.bf16 %v10797_v14  ;;  %v14930_v35 = vld [vmem:[#allocation25_spill] sm:$0xff] }
 0x5a2   : > { %v8122_v42 = vpop.f32.mrf.mxu1 }
 0x5a3   : > { %v14324_v6 = vadd.f32 %v7125_v37, %v14925_v60  ;;  %v8679_v54 = vmax.f32 %v8643_v25, 0.0  ;;  %v8203_v50 = vadd.f32 %v8122_v42, %v14084_v17  ;;  %v5892_v17 = vadd.f32 %v14930_v35, %v5541_v53  ;;  %v14931_v37 = vld [vmem:[#allocation75_spill] sm:$0xff]  ;;  %v10798_v35 = vld [vmem:[%s11005_s14 + $0x30] sm:$0xff]  }
 0x5a4   : > { %v8544_v60 = vrot.slane %v10521_v59, 3 }
 0x5a5   : > { %v10588_v48 = vpack.c.bf16 %v8679_v54, %v8678_v63  ;;  %v8275_v4 = vadd.f32 %v8203_v50, %v14089_v5  ;;  %8161 = vmatmul.bf16.gmra.mxu1 %v14928_v22  ;;  %v7178_v42 = vadd.f32 %v14094_v46, %v5892_v17  ;;  %v14340_v5 = vpop.f32.mrf.mxu0  ;;  %v14344_v54 = vpop.f32.mrf.mxu3  ;;  %v8543_v50 = vsel %vm2973_vm5, %v8540_v28, %v8542_v32 }
 0x5a6   : > { %v8545_v53 = vsel %vm2973_vm5, %v8542_v32, %v8544_v60  ;;  %v10522_v17 = vunpack.c.h.bf16 %v10797_v14 }
 0x5a7   : > { %10812 = vst [vmem:[%s14266_s13 + $0x10] sm:$0xff] %v10588_v48   ;;  %v8424_v63 = vadd.f32 %v14244_v27, %v8275_v4  ;;  %v14933_v4 = vld [vmem:[#allocation77_spill] sm:$0xff] }
 0x5a8   : > { %v7076_v23 = vpop.f32.mrf.mxu2 }
 0x5a9   : > { %v7126_v7 = vadd.f32 %v7076_v23, %v6617_v18  ;;  %v8644_v48 = vadd.f32 %v8543_v50, %v8424_v63  ;;  %v14937_v50 = vld [vmem:[#allocation73_spill] sm:$0xff] }
 0x5aa   : > { %v8124_v25 = vpop.f32.mrf.mxu1 }
 0x5ab   : > { %v14337_v11 = vadd.f32 %v7126_v7, %v14931_v37  ;;  %v8204_v2 = vadd.f32 %v8124_v25, %v14097_v10  ;;  %v8680_v23 = vmax.f32 %v8644_v48, 0.0  ;;  %v14935_v37 = vld [vmem:[#allocation30_spill] sm:$0xff]  ;;  %v14938_v48 = vld [vmem:[#allocation31_spill] sm:$0xff] }
 0x5ac   : > { %v5546_v32 = vadd.f32 %v14935_v37, %v14934_v58 }
 0x5ad   : > { %v8276_v39 = vadd.f32 %v8204_v2, %v7178_v42  ;;  %v14358_v25 = vpop.f32.mrf.mxu0  ;;  %v14936_v2 = vld [vmem:[#allocation74_spill] sm:$0xff]  ;;  %v14364_v62 = vpop.f32.mrf.mxu3 }
 0x5af   : > { %v8425_v46 = vadd.f32 %v14244_v27, %v8276_v39  ;;  %v6622_v39 = vadd.f32 %v14170_v19, %v14937_v50  ;;  %v14941_v50 = vld [vmem:[#allocation82_spill] sm:$0xff] }
 0x5b0   : > { %v7079_v22 = vpop.f32.mrf.mxu2 }
 0x5b1   : > { %v7127_v34 = vadd.f32 %v7079_v22, %v6620_v13  ;;  %v8645_v18 = vadd.f32 %v8545_v53, %v8425_v46  ;;  %v10525_v13 = vunpack.c.l.bf16 %v10798_v35  ;;  %v8546_v53 = vrot.slane %v10522_v17, 3  ;;  %v14939_v22 = vld [vmem:[#allocation80_spill] sm:$0xff] }
 0x5b2   : > { %v8127_v59 = vpop.f32.mrf.mxu1  ;;  %v5894_v46 = vadd.f32 %v14938_v48, %v5546_v32  ;;  %v10526_v48 = vunpack.c.h.bf16 %v10798_v35  ;;  %v7864_v35 = vadd.f32 %v14302_v0, %v14305_v45 }
 0x5b3   : > { %v14352_v10 = vadd.f32 %v7127_v34, %v14933_v4  ;;  %v8681_v7 = vmax.f32 %v8645_v18, 0.0  ;;  %v8205_v28 = vadd.f32 %v8127_v59, %v14110_v47  ;;  %v8548_v4 = vrot.slane %v10525_v13, 3 }
 0x5b5   : > { %v10593_v42 = vpack.c.bf16 %v8681_v7, %v8680_v23  ;;  %v8277_v63 = vadd.f32 %v8205_v28, %v14115_v51  ;;  %8166 = vmatmul.bf16.gmra.mxu1 %v14936_v2  ;;  %v7180_v51 = vadd.f32 %v14120_v52, %v5894_v46  ;;  %v8547_v23 = vsel %vm2973_vm5, %v8544_v60, %v8546_v53  ;;  %v14940_v28 = vld [vmem:[#allocation76_spill] sm:$0xff]  ;;  %v14378_v37 = vpop.f32.mrf.mxu0  ;;  %v14381_v52 = vpop.f32.mrf.mxu3  ;;  %v14942_v46 = vld [vmem:[#allocation7_spill] sm:$0xff] }
 0x5b6   : > { %v6625_v17 = vadd.f32 %v14179_v36, %v14940_v28  ;;  %v8549_v58 = vsel %vm2973_vm5, %v8546_v53, %v8548_v4  ;;  %v8550_v28 = vrot.slane %v10526_v48, 3 }
 0x5b7   : > { %10813 = vst [vmem:[%s14266_s13 + $0x18] sm:$0xff] %v10593_v42   ;;  %v8426_v59 = vadd.f32 %v14244_v27, %v8277_v63 }
 0x5b8   : > { %v7081_v47 = vpop.f32.mrf.mxu2 }
 0x5b9   : > { %v7128_v14 = vadd.f32 %v7081_v47, %v6622_v39  ;;  %v8646_v32 = vadd.f32 %v8547_v23, %v8426_v59  ;;  %v14944_v59 = vld [vmem:[#allocation79_spill] sm:$0xff] }
 0x5ba   : > { %v8129_v18 = vpop.f32.mrf.mxu1 }
 0x5bb   : > { %v14369_v34 = vadd.f32 %v7128_v14, %v14939_v22  ;;  %v8206_v19 = vadd.f32 %v8129_v18, %v14123_v57  ;;  %v7862_v57 = vadd.f32 %v14283_v31, %v14287_v16  ;;  %v8682_v13 = vmax.f32 %v8646_v32, 0.0  ;;  %v10799_v14 = vld [vmem:[%s11005_s14 + $0x38] sm:$0xff]   ;;  %v14943_v22 = vld [vmem:[#allocation36_spill] sm:$0xff] }
 0x5bc   : > { %v5551_v18 = vadd.f32 %v14943_v22, %v14942_v46  ;;  %v10529_v31 = vunpack.c.l.bf16 %v10799_v14 }
 0x5bd   : > { %v8278_v7 = vadd.f32 %v8206_v19, %v7180_v51  ;;  %v14945_v19 = vld [vmem:[#allocation78_spill] sm:$0xff] }
 0x5be   : > { %v6627_v23 = vadd.f32 %v14188_v29, %v14945_v19 }
 0x5bf   : > { %v8427_v42 = vadd.f32 %v14244_v27, %v8278_v7 }
 0x5c0   : > { %v7084_v2 = vpop.f32.mrf.mxu2 }
 0x5c1   : > { %v7129_v63 = vadd.f32 %v7084_v2, %v6625_v17  ;;  %v8647_v60 = vadd.f32 %v8549_v58, %v8427_v42  ;;  %v14946_v58 = vld [vmem:[#allocation37_spill] sm:$0xff]  ;;  %v14399_v42 = vpop.f32.mrf.mxu0  ;;  %v14401_v2 = vpop.f32.mrf.mxu3 }
 0x5c2   : > { %v8132_v36 = vpop.f32.mrf.mxu1  ;;  %v5896_v32 = vadd.f32 %v14946_v58, %v5551_v18 }
 0x5c3   : > { %v14386_v39 = vadd.f32 %v7129_v63, %v14941_v50  ;;  %v8683_v47 = vmax.f32 %v8647_v60, 0.0  ;;  %v8207_v53 = vadd.f32 %v8132_v36, %v7862_v57  ;;  %v14947_v63 = vld [vmem:[#allocation85_spill] sm:$0xff]  ;;  %v8552_v60 = vrot.slane %v10529_v31, 3 }
 0x5c4   : > { %v7182_v50 = vadd.f32 %v14144_v20, %v5896_v32  ;;  %v7867_v20 = vadd.f32 %v14319_v44, %v14321_v1  ;;  %v14950_v32 = vld [vmem:[#allocation84_spill] sm:$0xff] }
 0x5c5   : > { %v10598_v51 = vpack.c.bf16 %v8683_v47, %v8682_v13  ;;  %8171 = vmatmul.bf16.gmra.mxu1 %v14944_v59  ;;  %v8279_v16 = vadd.f32 %v8207_v53, %v14139_v61  ;;  %v8551_v13 = vsel %vm2973_vm5, %v8548_v4, %v8550_v28  ;;  %v14948_v53 = vld [vmem:[#allocation81_spill] sm:$0xff]  ;;  %v8553_v45 = vsel %vm2973_vm5, %v8550_v28, %v8552_v60  ;;  %v14949_v59 = vld [vmem:[#allocation87_spill] sm:$0xff] }
 0x5c6   : > { %v6630_v0 = vadd.f32 %v14199_v9, %v14948_v53 }
 0x5c7   : > { %10814 = vst [vmem:[%s14266_s13 + $0x20] sm:$0xff] %v10598_v51   ;;  %v8428_v61 = vadd.f32 %v14244_v27, %v8279_v16 }
 0x5c8   : > { %v7086_v7 = vpop.f32.mrf.mxu2 }
 0x5c9   : > { %v7130_v17 = vadd.f32 %v7086_v7, %v6627_v23  ;;  %v8648_v48 = vadd.f32 %v8551_v13, %v8428_v61  ;;  %v14418_v23 = vpop.f32.mrf.mxu0  ;;  %v10800_v7 = vld [vmem:[%s11005_s14 + $0x40] sm:$0xff]   ;;  %v14421_v28 = vpop.f32.mrf.mxu3  ;;  %v14952_v13 = vld [vmem:[#allocation91_spill] sm:$0xff] }
 0x5ca   : > { %v8134_v29 = vpop.f32.mrf.mxu1  ;;  %v10533_v1 = vunpack.c.l.bf16 %v10800_v7 }
 0x5cb   : > { %v14404_v57 = vadd.f32 %v7130_v17, %v14947_v63  ;;  %v8208_v36 = vadd.f32 %v8134_v29, %v7864_v35  ;;  %v8684_v31 = vmax.f32 %v8648_v48, 0.0  ;;  %v10530_v17 = vunpack.c.h.bf16 %v10799_v14  ;;  %v14951_v35 = vld [vmem:[#allocation83_spill] sm:$0xff] }
 0x5cc   : > { %v6632_v44 = vadd.f32 %v14207_v55, %v14951_v35  ;;  %v8556_v53 = vrot.slane %v10533_v1, 3  ;;  %v7279_v48 = vld [vmem:[#allocation2 + $0xa8] sm:$0x1] }
 0x5cd   : > { %v8280_v47 = vadd.f32 %v8208_v36, %v7182_v50  ;;  %v8554_v50 = vrot.slane %v10530_v17, 3  ;;  %v7869_v36 = vadd.f32 %v14340_v5, %v14344_v54  ;;  %v14954_v17 = vld [vmem:[#allocation93_spill] sm:$0xff] }
 0x5cf   : > { %v8429_v46 = vadd.f32 %v14244_v27, %v8280_v47  ;;  %v8555_v55 = vsel %vm2973_vm5, %v8552_v60, %v8554_v50  ;;  %v8557_v54 = vsel %vm2973_vm5, %v8554_v50, %v8556_v53  ;;  %v10534_v50 = vunpack.c.h.bf16 %v10800_v7 }
 0x5d0   : > { %v7089_v22 = vpop.f32.mrf.mxu2 }
 0x5d1   : > { %v7131_v18 = vadd.f32 %v7089_v22, %v6630_v0  ;;  %v8649_v51 = vadd.f32 %v8553_v45, %v8429_v46  ;;  %v7388_v46 = vunpack.c.l.b16 %v7279_v48  ;;  %v14435_v22 = vpop.f32.mrf.mxu0  ;;  %v14440_v5 = vpop.f32.mrf.mxu3  ;;  %v14958_v48 = vshrl.u32 %v13928_v26, 16 }
 0x5d2   : > { %v8137_v4 = vpop.f32.mrf.mxu1  ;;  %v8558_v7 = vrot.slane %v10534_v50, 3 }
 0x5d3   : > { %v14416_v19 = vadd.f32 %v7131_v18, %v14949_v59  ;;  %v8685_v9 = vmax.f32 %v8649_v51, 0.0  ;;  %v8209_v16 = vadd.f32 %v8137_v4, %v7867_v20  ;;  %v14953_v18 = vld [vmem:[#allocation86_spill] sm:$0xff]  ;;  %v7407_v51 = vpack.c.b16 %v7388_v46, %v7388_v46 }
 0x5d4   : > { %v6635_v20 = vadd.f32 %v14215_v15, %v14953_v18 }
 0x5d5   : > { %v10603_v58 = vpack.c.bf16 %v8685_v9, %v8684_v31  ;;  %8176 = vmatmul.bf16.gmra.mxu1 %v14950_v32  ;;  %v8281_v63 = vadd.f32 %v8209_v16, %v14164_v3  ;;  %v7443_v60 = vrot.slane %v7407_v51, 1  ;;  %v7872_v16 = vadd.f32 %v14358_v25, %v14364_v62  ;;  %v14957_v25 = vld [vmem:[#allocation88_spill] sm:$0xff] }
 0x5d6   : > { %v14955_v32 = vrot.slane %v13928_v26, 1  ;;  %v6637_v62 = vadd.f32 %v14223_v24, %v14957_v25  ;;  %v7757_v46 = vshll.u32 %v7407_v51, 16  ;;  %v8559_v51 = vsel %vm2973_vm5, %v8556_v53, %v8558_v7  ;;  %v14960_v25 = vld [vmem:[#allocation92_spill] sm:$0xff] }
 0x5d7   : > { %10815 = vst [vmem:[%s14266_s13 + $0x28] sm:$0xff] %v10603_v58   ;;  %v8430_v0 = vadd.f32 %v14244_v27, %v8281_v63 }
 0x5d8   : > { %v7091_v29 = vpop.f32.mrf.mxu2  ;;  %v7444_v35 = vsel %vm897_vm1, %v14955_v32, %v7443_v60  ;;  %v7759_v24 = vrot.slane %v7757_v46, 1 }
 0x5d9   : > { %v7132_v61 = vadd.f32 %v7091_v29, %v6632_v44  ;;  %v8650_v59 = vadd.f32 %v8555_v55, %v8430_v0  ;;  %v10801_v29 = vld [vmem:[%s11005_s14 + $0x48] sm:$0xff]   ;;  %7604 = vmatmul.bf16.gmra.mxu3 %v7444_v35  ;;  %v7755_v55 = vor.u32 %v14958_v48, %v14155_v21 }
 0x5da   : > { %v8139_v14 = vpop.f32.mrf.mxu1  ;;  %v7926_v21 = vld [vmem:[#allocation2 + $0xa8] sm:$0x3] }
 0x5db   : > { %v14431_v47 = vadd.f32 %v7132_v61, %v14952_v13  ;;  %v8210_v45 = vadd.f32 %v8139_v14, %v7869_v36  ;;  %v8686_v44 = vmax.f32 %v8650_v59, 0.0  ;;  %v14956_v36 = vld [vmem:[#allocation89_spill] sm:$0xff]  ;;  %v10537_v13 = vunpack.c.l.bf16 %v10801_v29  ;;  %v14456_v14 = vpop.f32.mrf.mxu0 }
 0x5dc   : > { %v7760_v26 = vsel %vm397_vm0, %v7755_v55, %v7759_v24 }
 0x5dd   : > { %v8282_v3 = vadd.f32 %v8210_v45, %v14173_v49  ;;  %7920 = vmatmul.bf16.gmra.mxu0 %v7760_v26 }
 0x5df   : > { %v8431_v4 = vadd.f32 %v14244_v27, %v8282_v3  ;;  %v14463_v3 = vpop.f32.mrf.mxu3 }
 0x5e0   : > { %v7094_v31 = vpop.f32.mrf.mxu2 }
 0x5e1   : > { %v7133_v9 = vadd.f32 %v7094_v31, %v6635_v20  ;;  %v8651_v49 = vadd.f32 %v8557_v54, %v8431_v4  ;;  %v7874_v20 = vadd.f32 %v14378_v37, %v14381_v52  ;;  %v14959_v54 = vld [vmem:[#allocation94_spill] sm:$0xff]  ;;  %v8560_v31 = vrot.slane %v10537_v13, 3 }
 0x5e2   : > { %v8142_v15 = vpop.f32.mrf.mxu1  ;;  %v7945_v52 = vunpack.c.l.b16 %v7926_v21 }
 0x5e3   : > { %v14447_v58 = vadd.f32 %v7133_v9, %v14954_v17  ;;  %v8687_v1 = vmax.f32 %v8651_v49, 0.0  ;;  %v8211_v63 = vadd.f32 %v8142_v15, %v7872_v16  ;;  %v8561_v37 = vsel %vm2973_vm5, %v8558_v7, %v8560_v31  ;;  %v7886_v15 = vpop.f32.mrf.mxu0 }
 0x5e4   : > { %v7877_v17 = vadd.f32 %v14399_v42, %v14401_v2 }
 0x5e5   : > { %v10608_v61 = vpack.c.bf16 %v8687_v1, %v8686_v44  ;;  %8181 = vmatmul.bf16.gmra.mxu1 %v14956_v36  ;;  %v8283_v0 = vadd.f32 %v8211_v63, %v14182_v56  ;;  %v7946_v1 = vpack.c.b16 %v7945_v52, %v7945_v52 }
 0x5e7   : > { %10816 = vst [vmem:[%s14266_s13 + $0x30] sm:$0xff] %v10608_v61   ;;  %v8432_v56 = vadd.f32 %v14244_v27, %v8283_v0  ;;  %v7570_v35 = vpop.f32.mrf.mxu3  ;;  %v10802_v61 = vld [vmem:[%s11005_s14 + $0x50] sm:$0xff]   ;;  %v8024_v13 = vshrl.u32 %v7946_v1, 16  ;;  %v8027_v0 = vshll.u32 %v7946_v1, 16 }
 0x5e8   : > { %v7096_v45 = vpop.f32.mrf.mxu2 }
 0x5e9   : > { %v7134_v18 = vadd.f32 %v7096_v45, %v6637_v62  ;;  %v8652_v16 = vadd.f32 %v8559_v51, %v8432_v56  ;;  %v10541_v62 = vunpack.c.l.bf16 %v10802_v61  ;;  %v7879_v45 = vadd.f32 %v14418_v23, %v14421_v28  ;;  %v14961_v51 = vld [vmem:[#allocation90_spill] sm:$0xff] }
 0x5ea   : > { %v8144_v4 = vpop.f32.mrf.mxu1  ;;  %v8026_v46 = vrot.slane %v8024_v13, 1  ;;  %v8029_v7 = vrot.slane %v8027_v0, 2  ;;  %v7882_v28 = vadd.f32 %v14435_v22, %v14440_v5  ;;  %v7884_v22 = vadd.f32 %v14456_v14, %v14463_v3 }
 0x5eb   : > { %v14468_v59 = vadd.f32 %v7134_v18, %v14959_v54  ;;  %v8212_v9 = vadd.f32 %v8144_v4, %v7874_v20  ;;  %v8688_v53 = vmax.f32 %v8652_v16, 0.0  ;;  %v8564_v55 = vrot.slane %v10541_v62, 3  ;;  %v7888_v18 = vpop.f32.mrf.mxu0  ;;  %v10803_v16 = vld [vmem:[%s11005_s14 + $0x58] sm:$0xff]  }
 0x5ec   : > { %v8030_v56 = vor.u32 %v8029_v7, %v8026_v46  ;;  %v10804_v7 = vld [vmem:[%s11005_s14 + $0x60] sm:$0xff]  }
 0x5ed   : > { %v8284_v60 = vadd.f32 %v8212_v9, %v14191_v38  ;;  %v10538_v38 = vunpack.c.h.bf16 %v10801_v29 }
 0x5ef   : > { %v8433_v49 = vadd.f32 %v14244_v27, %v8284_v60  ;;  %v8562_v2 = vrot.slane %v10538_v38, 3  ;;  %v7572_v24 = vpop.f32.mrf.mxu3  ;;  %v8031_v60 = vsel %vm1337_vm2, %v14961_v51, %v8030_v56 }
 0x5f0   : > { %v7889_v56 = vadd.f32 %v7888_v18, %v7572_v24 }
 0x5f1   : > { %v8653_v32 = vadd.f32 %v8561_v37, %v8433_v49  ;;  %v8563_v54 = vsel %vm2973_vm5, %v8560_v31, %v8562_v2 }
 0x5f2   : > { %v8147_v44 = vpop.f32.mrf.mxu1 }
 0x5f3   : > { %v8689_v63 = vmax.f32 %v8653_v32, 0.0  ;;  %v8213_v50 = vadd.f32 %v8147_v44, %v7877_v17  ;;  %v7891_v49 = vpop.f32.mrf.mxu0  ;;  %v10545_v44 = vunpack.c.l.bf16 %v10803_v16 }
 0x5f5   : > { %v10613_v36 = vpack.c.bf16 %v8689_v63, %v8688_v53  ;;  %8186 = vmatmul.bf16.gmra.mxu1 %v14960_v25  ;;  %v8285_v42 = vadd.f32 %v8213_v50, %v14202_v41  ;;  %v8565_v41 = vsel %vm2973_vm5, %v8562_v2, %v8564_v55  ;;  %v8568_v63 = vrot.slane %v10545_v44, 3 }
 0x5f6   : > { %v7887_v2 = vadd.f32 %v7886_v15, %v7570_v35 }
 0x5f7   : > { %10817 = vst [vmem:[%s14266_s13 + $0x38] sm:$0xff] %v10613_v36   ;;  %v8434_v29 = vadd.f32 %v14244_v27, %v8285_v42  ;;  %v7575_v32 = vpop.f32.mrf.mxu3  ;;  %v14962_v36 = vld [vmem:[#allocation8_spill] sm:$0xff] }
 0x5f9   : > { %v8654_v9 = vadd.f32 %v8563_v54, %v8434_v29  ;;  %v10546_v29 = vunpack.c.h.bf16 %v10803_v16  ;;  %v14963_v54 = vld [vmem:[#allocation9_spill] sm:$0xff] }
 0x5fa   : > { %v8149_v48 = vpop.f32.mrf.mxu1 }
 0x5fb   : > { %v8214_v20 = vadd.f32 %v8149_v48, %v7879_v45  ;;  %v8690_v37 = vmax.f32 %v8654_v9, 0.0  ;;  %v7893_v13 = vpop.f32.mrf.mxu0 }
 0x5fd   : > { %v8286_v4 = vadd.f32 %v8214_v20, %v14210_v33  ;;  %v10542_v33 = vunpack.c.h.bf16 %v10802_v61 }
 0x5ff   : > { %v8435_v23 = vadd.f32 %v14244_v27, %v8286_v4  ;;  %v8566_v53 = vrot.slane %v10542_v33, 3  ;;  %v7577_v42 = vpop.f32.mrf.mxu3 }
 0x601   : > { %v8655_v26 = vadd.f32 %v8565_v41, %v8435_v23  ;;  %v8567_v61 = vsel %vm2973_vm5, %v8564_v55, %v8566_v53  ;;  %v8569_v62 = vsel %vm2973_vm5, %v8566_v53, %v8568_v63  ;;  %v10549_v55 = vunpack.c.l.bf16 %v10804_v7 }
 0x602   : > { %v8152_v21 = vpop.f32.mrf.mxu1  ;;  %v8570_v41 = vrot.slane %v10546_v29, 3 }
 0x603   : > { %v8691_v52 = vmax.f32 %v8655_v26, 0.0  ;;  %v8215_v31 = vadd.f32 %v8152_v21, %v7882_v28  ;;  %v7896_v9 = vpop.f32.mrf.mxu0  ;;  %v8572_v26 = vrot.slane %v10549_v55, 3 }
 0x604   : > { %v8571_v21 = vsel %vm2973_vm5, %v8568_v63, %v8570_v41 }
 0x605   : > { %v10618_v17 = vpack.c.bf16 %v8691_v52, %v8690_v37  ;;  %8191 = vmatmul.bf16.gmra.mxu1 %v8031_v60  ;;  %v8287_v1 = vadd.f32 %v8215_v31, %v14218_v43  ;;  %v8573_v60 = vsel %vm2973_vm5, %v8570_v41, %v8572_v26  ;;  %v7892_v31 = vadd.f32 %v7891_v49, %v7575_v32 }
 0x607   : > { %10818 = vst [vmem:[%s14266_s13 + $0x40] sm:$0xff] %v10618_v17   ;;  %v8436_v50 = vadd.f32 %v14244_v27, %v8287_v1  ;;  %v7580_v23 = vpop.f32.mrf.mxu3  ;;  %v10805_v1 = vld [vmem:[%s11005_s14 + $0x68] sm:$0xff]  }
 0x608   : > { %v10553_v63 = vunpack.c.l.bf16 %v10805_v1  ;;  %v10554_v55 = vunpack.c.h.bf16 %v10805_v1  ;;  %v10807_v1 = vld [vmem:[%s11005_s14 + $0x78] sm:$0xff]  }
 0x609   : > { %v8656_v0 = vadd.f32 %v8567_v61, %v8436_v50  ;;  %v7894_v61 = vadd.f32 %v7893_v13, %v7577_v42 }
 0x60a   : > { %v8154_v5 = vpop.f32.mrf.mxu1 }
 0x60b   : > { %v8216_v38 = vadd.f32 %v8154_v5, %v7884_v22  ;;  %v8692_v45 = vmax.f32 %v8656_v0, 0.0  ;;  %v7898_v16 = vpop.f32.mrf.mxu0  ;;  %v10550_v22 = vunpack.c.h.bf16 %v10804_v7 }
 0x60d   : > { %v8288_v25 = vadd.f32 %v8216_v38, %v14962_v36  ;;  %v8574_v38 = vrot.slane %v10550_v22, 3 }
 0x60f   : > { %v8437_v43 = vadd.f32 %v14244_v27, %v8288_v25  ;;  %v7582_v53 = vpop.f32.mrf.mxu3  ;;  %v8576_v25 = vrot.slane %v10553_v63, 3 }
 0x611   : > { %v8657_v14 = vadd.f32 %v8569_v62, %v8437_v43  ;;  %v8575_v62 = vsel %vm2973_vm5, %v8572_v26, %v8574_v38  ;;  %v7899_v26 = vadd.f32 %v7898_v16, %v7582_v53 }
 0x612   : > { %v8157_v3 = vpop.f32.mrf.mxu1 }
 0x613   : > { %v8693_v48 = vmax.f32 %v8657_v14, 0.0  ;;  %v8217_v46 = vadd.f32 %v8157_v3, %v7887_v2  ;;  %v7901_v0 = vpop.f32.mrf.mxu0  ;;  %v8577_v14 = vsel %vm2973_vm5, %v8574_v38, %v8576_v25 }
 0x615   : > { %v10623_v20 = vpack.c.bf16 %v8693_v48, %v8692_v45  ;;  %v8289_v4 = vadd.f32 %v8217_v46, %v14963_v54  ;;  %v7897_v48 = vadd.f32 %v7896_v9, %v7580_v23 }
 0x617   : > { %10819 = vst [vmem:[%s14266_s13 + $0x48] sm:$0xff] %v10623_v20   ;;  %v8438_v15 = vadd.f32 %v14244_v27, %v8289_v4  ;;  %v7585_v2 = vpop.f32.mrf.mxu3  ;;  %v10806_v20 = vld [vmem:[%s11005_s14 + $0x70] sm:$0xff]  }
 0x618   : > { %v10557_v4 = vunpack.c.l.bf16 %v10806_v20  ;;  %v10558_v53 = vunpack.c.h.bf16 %v10806_v20 }
 0x619   : > { %v8658_v37 = vadd.f32 %v8571_v21, %v8438_v15 }
 0x61a   : > { %v8159_v28 = vpop.f32.mrf.mxu1  ;;  %v8582_v63 = vrot.slane %v10558_v53, 3 }
 0x61b   : > { %v8218_v35 = vadd.f32 %v8159_v28, %v7889_v56  ;;  %v8694_v33 = vmax.f32 %v8658_v37, 0.0  ;;  %v7903_v41 = vpop.f32.mrf.mxu0  ;;  %v8578_v28 = vrot.slane %v10554_v55, 3 }
 0x61d   : > { %v8290_v51 = vadd.f32 %v8218_v35, %v14247_v40  ;;  %v14964_v40 = vld [vmem:[#allocation10_spill] sm:$0xff]  ;;  %v8580_v35 = vrot.slane %v10557_v4, 3  ;;  %v8579_v21 = vsel %vm2973_vm5, %v8576_v25, %v8578_v28 }
 0x61f   : > { %v8439_v52 = vadd.f32 %v14244_v27, %v8290_v51  ;;  %v7587_v56 = vpop.f32.mrf.mxu3 }
 0x621   : > { %v8659_v18 = vadd.f32 %v8573_v60, %v8439_v52  ;;  %v8581_v60 = vsel %vm2973_vm5, %v8578_v28, %v8580_v35 }
 0x622   : > { %v8162_v24 = vpop.f32.mrf.mxu1 }
 0x623   : > { %v8695_v17 = vmax.f32 %v8659_v18, 0.0  ;;  %v8219_v44 = vadd.f32 %v8162_v24, %v7892_v31  ;;  %v7906_v31 = vpop.f32.mrf.mxu0 }
 0x625   : > { %v10628_v5 = vpack.c.bf16 %v8695_v17, %v8694_v33  ;;  %v8291_v50 = vadd.f32 %v8219_v44, %v14964_v40  ;;  %v7904_v40 = vadd.f32 %v7903_v41, %v7587_v56 }
 0x627   : > { %10820 = vst [vmem:[%s14266_s13 + $0x50] sm:$0xff] %v10628_v5   ;;  %v8440_v49 = vadd.f32 %v14244_v27, %v8291_v50  ;;  %v7590_v24 = vpop.f32.mrf.mxu3  ;;  %v10561_v5 = vunpack.c.l.bf16 %v10807_v1 }
 0x629   : > { %v8660_v3 = vadd.f32 %v8575_v62, %v8440_v49  ;;  %v8584_v38 = vrot.slane %v10561_v5, 3 }
 0x62a   : > { %v8164_v36 = vpop.f32.mrf.mxu1 }
 0x62b   : > { %v8220_v32 = vadd.f32 %v8164_v36, %v7894_v61  ;;  %v8696_v46 = vmax.f32 %v8660_v3, 0.0  ;;  %v7908_v61 = vpop.f32.mrf.mxu0 }
 0x62d   : > { %v8292_v43 = vadd.f32 %v8220_v32, %v14277_v8  ;;  %v8583_v32 = vsel %vm2973_vm5, %v8580_v35, %v8582_v63 }
 0x62f   : > { %v8441_v45 = vadd.f32 %v14244_v27, %v8292_v43  ;;  %v7592_v49 = vpop.f32.mrf.mxu3 }
 0x630   : > { %v7909_v4 = vadd.f32 %v7908_v61, %v7592_v49 }
 0x631   : > { %v8661_v13 = vadd.f32 %v8577_v14, %v8441_v45 }
 0x632   : > { %v8167_v42 = vpop.f32.mrf.mxu1 }
 0x633   : > { %v8697_v7 = vmax.f32 %v8661_v13, 0.0  ;;  %v8221_v29 = vadd.f32 %v8167_v42, %v7897_v48  ;;  %v10808_v42 = vld [vmem:[%s11005_s14 + $0x80] sm:$0xff]  }
 0x634   : > { %v10565_v55 = vunpack.c.l.bf16 %v10808_v42 }
 0x635   : > { %v10633_v54 = vpack.c.bf16 %v8697_v7, %v8696_v46  ;;  %v8293_v8 = vadd.f32 %v8221_v29, %v14292_v30  ;;  %v7902_v30 = vadd.f32 %v7901_v0, %v7585_v2  ;;  %v8585_v0 = vsel %vm2973_vm5, %v8582_v63, %v8584_v38  ;;  %v7911_v7 = vpop.f32.mrf.mxu0 }
 0x636   : > { %v7907_v2 = vadd.f32 %v7906_v31, %v7590_v24  ;;  %v10562_v46 = vunpack.c.h.bf16 %v10807_v1  ;;  %v10566_v24 = vunpack.c.h.bf16 %v10808_v42 }
 0x637   : > { %10821 = vst [vmem:[%s14266_s13 + $0x58] sm:$0xff] %v10633_v54   ;;  %v8442_v9 = vadd.f32 %v14244_v27, %v8293_v8  ;;  %v7595_v20 = vpop.f32.mrf.mxu3  ;;  %v8588_v8 = vrot.slane %v10565_v55, 3 }
 0x638   : > { %v8586_v54 = vrot.slane %v10562_v46, 3 }
 0x639   : > { %v8662_v37 = vadd.f32 %v8579_v21, %v8442_v9 }
 0x63a   : > { %v8169_v15 = vpop.f32.mrf.mxu1  ;;  %v8589_v35 = vsel %vm2973_vm5, %v8586_v54, %v8588_v8 }
 0x63b   : > { %v8222_v23 = vadd.f32 %v8169_v15, %v7899_v26  ;;  %v8698_v33 = vmax.f32 %v8662_v37, 0.0  ;;  %v8587_v26 = vsel %vm2973_vm5, %v8584_v38, %v8586_v54 }
 0x63d   : > { %v8294_v51 = vadd.f32 %v8222_v23, %v14309_v12  ;;  %v7913_v9 = vpop.f32.mrf.mxu0 }
 0x63f   : > { %v8443_v52 = vadd.f32 %v14244_v27, %v8294_v51  ;;  %v7912_v51 = vadd.f32 %v7911_v7, %v7595_v20 }
 0x641   : > { %v8663_v18 = vadd.f32 %v8581_v60, %v8443_v52 }
 0x642   : > { %v8172_v16 = vpop.f32.mrf.mxu1 }
 0x643   : > { %v8699_v17 = vmax.f32 %v8663_v18, 0.0  ;;  %v8223_v44 = vadd.f32 %v8172_v16, %v7902_v30  ;;  %v10809_v18 = vld [vmem:[%s11005_s14 + $0x88] sm:$0xff]  }
 0x645   : > { %v10638_v22 = vpack.c.bf16 %v8699_v17, %v8698_v33  ;;  %v8295_v12 = vadd.f32 %v8223_v44, %v14324_v6  ;;  %v10569_v33 = vunpack.c.l.bf16 %v10809_v18  ;;  %v8590_v17 = vrot.slane %v10566_v24, 3  ;;  %v7916_v1 = vpop.f32.mrf.mxu0 }
 0x647   : > { %10822 = vst [vmem:[%s14266_s13 + $0x60] sm:$0xff] %v10638_v22   ;;  %v8444_v36 = vadd.f32 %v14244_v27, %v8295_v12  ;;  %v8592_v5 = vrot.slane %v10569_v33, 3 }
 0x649   : > { %v8664_v43 = vadd.f32 %v8583_v32, %v8444_v36  ;;  %v8593_v38 = vsel %vm2973_vm5, %v8590_v17, %v8592_v5 }
 0x64a   : > { %v8174_v50 = vpop.f32.mrf.mxu1 }
 0x64b   : > { %v8224_v25 = vadd.f32 %v8174_v50, %v7904_v40  ;;  %v8700_v45 = vmax.f32 %v8664_v43, 0.0  ;;  %v8591_v40 = vsel %vm2973_vm5, %v8588_v8, %v8590_v17  ;;  %v10810_v43 = vld [vmem:[%s11005_s14 + $0x90] sm:$0xff]  }
 0x64d   : > { %v8296_v62 = vadd.f32 %v8224_v25, %v14337_v11 }
 0x64f   : > { %v8445_v6 = vadd.f32 %v14244_v27, %v8296_v62 }
 0x651   : > { %v8665_v14 = vadd.f32 %v8585_v0, %v8445_v6  ;;  %v7918_v6 = vpop.f32.mrf.mxu0 }
 0x652   : > { %v8177_v3 = vpop.f32.mrf.mxu1 }
 0x653   : > { %v8701_v48 = vmax.f32 %v8665_v14, 0.0  ;;  %v8225_v13 = vadd.f32 %v8177_v3, %v7907_v2  ;;  %v10570_v14 = vunpack.c.h.bf16 %v10809_v18 }
 0x655   : > { %v10643_v29 = vpack.c.bf16 %v8701_v48, %v8700_v45  ;;  %v8297_v11 = vadd.f32 %v8225_v13, %v14352_v10  ;;  %v7597_v10 = vpop.f32.mrf.mxu3  ;;  %v10573_v45 = vunpack.c.l.bf16 %v10810_v43  ;;  %v8594_v48 = vrot.slane %v10570_v14, 3 }
 0x656   : > { %v7914_v44 = vadd.f32 %v7913_v9, %v7597_v10  ;;  %v8377_v9 = vld [vmem:[%s11005_s14 + $0x98] sm:$0x3] }
 0x657   : > { %10823 = vst [vmem:[%s14266_s13 + $0x68] sm:$0xff] %v10643_v29   ;;  %v8446_v56 = vadd.f32 %v14244_v27, %v8297_v11  ;;  %v8596_v46 = vrot.slane %v10573_v45, 3  ;;  %v8595_v20 = vsel %vm2973_vm5, %v8592_v5, %v8594_v48 }
 0x659   : > { %v8666_v23 = vadd.f32 %v8587_v26, %v8446_v56 }
 0x65a   : > { %v8179_v41 = vpop.f32.mrf.mxu1  ;;  %v7921_v11 = vpop.f32.mrf.mxu0 }
 0x65b   : > { %v8226_v28 = vadd.f32 %v8179_v41, %v7909_v4  ;;  %v8702_v52 = vmax.f32 %v8666_v23, 0.0  ;;  %v10574_v23 = vunpack.c.h.bf16 %v10810_v43 }
 0x65d   : > { %v8298_v15 = vadd.f32 %v8226_v28, %v14369_v34  ;;  %v7600_v53 = vpop.f32.mrf.mxu3 }
 0x65e   : > { %v7917_v36 = vadd.f32 %v7916_v1, %v7600_v53 }
 0x65f   : > { %v8447_v21 = vadd.f32 %v14244_v27, %v8298_v15 }
 0x661   : > { %v8667_v60 = vadd.f32 %v8589_v35, %v8447_v21 }
 0x662   : > { %v8182_v37 = vpop.f32.mrf.mxu1 }
 0x663   : > { %v8703_v30 = vmax.f32 %v8667_v60, 0.0  ;;  %v8227_v31 = vadd.f32 %v8182_v37, %v7912_v51  ;;  %v7923_v51 = vpop.f32.mrf.mxu0  ;;  %v8490_v60 = vunpack.c.l.bf16 %v8377_v9  ;;  %v8598_v37 = vrot.slane %v10574_v23, 3 }
 0x665   : > { %v10648_v16 = vpack.c.bf16 %v8703_v30, %v8702_v52  ;;  %v8299_v34 = vadd.f32 %v8227_v31, %v14386_v39  ;;  %v7602_v2 = vpop.f32.mrf.mxu3  ;;  %v8600_v31 = vrot.slane %v8490_v60, 3 }
 0x666   : > { %v7919_v13 = vadd.f32 %v7918_v6, %v7602_v2 }
 0x667   : > { %10824 = vst [vmem:[%s14266_s13 + $0x70] sm:$0xff] %v10648_v16   ;;  %v8448_v12 = vadd.f32 %v14244_v27, %v8299_v34  ;;  %v8599_v16 = vsel %vm2973_vm5, %v8596_v46, %v8598_v37  ;;  %v8601_v34 = vsel %vm2973_vm5, %v8598_v37, %v8600_v31 }
 0x669   : > { %v8668_v61 = vadd.f32 %v8591_v40, %v8448_v12 }
 0x66a   : > { %v8184_v22 = vpop.f32.mrf.mxu1 }
 0x66b   : > { %v8228_v63 = vadd.f32 %v8184_v22, %v7914_v44  ;;  %v8704_v32 = vmax.f32 %v8668_v61, 0.0 }
 0x66d   : > { %v8300_v50 = vadd.f32 %v8228_v63, %v14404_v57  ;;  %v7605_v55 = vpop.f32.mrf.mxu3 }
 0x66e   : > { %v7922_v41 = vadd.f32 %v7921_v11, %v7605_v55 }
 0x66f   : > { %v8449_v39 = vadd.f32 %v14244_v27, %v8300_v50  ;;  %v10921_v27 = vld [vmem:[%s14574_s4] ss:$0 sm:$0xff] }
 0x671   : > { %v8669_v25 = vadd.f32 %v8593_v38, %v8449_v39 }
 0x672   : > { %v8187_v49 = vpop.f32.mrf.mxu1 }
 0x673   : > { %v8705_v62 = vmax.f32 %v8669_v25, 0.0  ;;  %v8229_v0 = vadd.f32 %v8187_v49, %v7917_v36 }
 0x675   : > { %v10653_v3 = vpack.c.bf16 %v8705_v62, %v8704_v32  ;;  %v8301_v57 = vadd.f32 %v8229_v0, %v14416_v19  ;;  %v8597_v19 = vsel %vm2973_vm5, %v8594_v48, %v8596_v46  ;;  %v7607_v10 = vpop.f32.mrf.mxu3 }
 0x676   : > { %v7924_v52 = vadd.f32 %v7923_v51, %v7607_v10 }
 0x677   : > { %10825 = vst [vmem:[%s14266_s13 + $0x78] sm:$0xff] %v10653_v3   ;;  %v8450_v7 = vadd.f32 %v10921_v27, %v8301_v57 }
 0x679   : > { %v8670_v4 = vadd.f32 %v8595_v20, %v8450_v7 }
 0x67a   : > { %v8189_v42 = vpop.f32.mrf.mxu1 }
 0x67b   : > { %v8230_v29 = vadd.f32 %v8189_v42, %v7919_v13  ;;  %v8706_v26 = vmax.f32 %v8670_v4, 0.0 }
 0x67d   : > { %v8302_v54 = vadd.f32 %v8230_v29, %v14431_v47 }
 0x67f   : > { %v8451_v8 = vadd.f32 %v10921_v27, %v8302_v54 }
 0x681   : > { %v8671_v56 = vadd.f32 %v8597_v19, %v8451_v8 }
 0x682   : > { %v8192_v28 = vpop.f32.mrf.mxu1 }
 0x683   : > { %v8707_v15 = vmax.f32 %v8671_v56, 0.0  ;;  %v8231_v35 = vadd.f32 %v8192_v28, %v7922_v41 }
 0x685   : > { %v10658_v21 = vpack.c.bf16 %v8707_v15, %v8706_v26  ;;  %v8303_v47 = vadd.f32 %v8231_v35, %v14447_v58 }
 0x687   : > { %10826 = vst [vmem:[%s14266_s13 + $0x80] sm:$0xff] %v10658_v21   ;;  %v8452_v18 = vadd.f32 %v10921_v27, %v8303_v47 }
 0x689   : > { %v8672_v17 = vadd.f32 %v8599_v16, %v8452_v18 }
 0x68a   : > { %v8194_v30 = vpop.f32.mrf.mxu1 }
 0x68b   : > { %v8232_v24 = vadd.f32 %v8194_v30, %v7924_v52  ;;  %v8708_v53 = vmax.f32 %v8672_v17, 0.0 }
 0x68d   : > { %v8304_v33 = vadd.f32 %v8232_v24, %v14468_v59 }
 0x68f   : > { %v8453_v44 = vadd.f32 %v10921_v27, %v8304_v33 }
 0x691   : > { %v8673_v1 = vadd.f32 %v8601_v34, %v8453_v44 }
 0x693   : > { %v8709_v22 = vmax.f32 %v8673_v1, 0.0 }
 0x695   : > { %v10663_v5 = vpack.c.bf16 %v8709_v22, %v8708_v53 }
 0x697   : > { %10827 = vst [vmem:[%s14266_s13 + $0x88] sm:$0xff] %v10663_v5  }
 0x698 PF: > { %s15_s18 = sadd.s32 1, %s10934_s18  }
 0x699   : > { %p12_p4 = scmp.ge.s32.totalorder %s15_s18, 4  }
 0x69b   :  { %14 = sbr.rel (!%p12_p4) target bundleno = 1 (0x1), region = 86 }

</bundles_post_ra>
